<compile_context>
chip_gen: v5e
topology: v5e:2x2
jax: 0.10.0
libtpu: 0.0.40
codegen_flags: <defaults>
</compile_context>

<pallas_src>
import functools

import jax
import jax.numpy as jnp
import numpy as np
from jax.experimental import pallas as pl
from jax.experimental.pallas import tpu as pltpu


# ------------------------- small synthetic NNUE config -----------------------
N_BUCKETS = 2                       # shrunk from 16 for a small synthetic run
N_INPUTS = N_BUCKETS * 12 * 64      # 1536
N_HIDDEN0 = 128
N_HIDDEN1 = 32
N_HIDDEN2 = 32
OUTPUT_SCALE = 300.0
WDL_SCALE = 200.0
N_INPUTS_FACT = N_INPUTS            # FEATURE_FACTORIZE=False

BATCH = 512                         # >= 2 grid steps per TensorCore on v7x
TILE_B = 128


# --------------------------------- kernel ------------------------------------
def nnue_kernel(feat_ref, side_ref,
                ftw_hi_ref, ftw_lo_ref, ftb_ref,
                l1w_ref, l1b_ref,
                l2w_ref, l2b_ref,
                l3w_ref, l3b_ref,
                out_ref):
    _, tb, f = feat_ref.shape
    h0 = ftw_hi_ref.shape[1]

    # ---- feature transformer: ONE stacked bf16 MXU matmul (hi/lo weights) ----
    # [2, tb, F] -> [2*tb, F] is a free reshape (merges leading dims only; the
    # lane dim F is untouched and tb % 8 == 0 so no (8,128) tile is crossed).
    x = feat_ref[...].reshape(2 * tb, f)                   # bf16, no upcast
    h = (jnp.dot(x, ftw_hi_ref[...], preferred_element_type=jnp.float32)
         + jnp.dot(x, ftw_lo_ref[...], preferred_element_type=jnp.float32)
         + ftb_ref[...])                                   # [2*tb, H0] f32
    w = h[:tb]                                             # white perspective
    b = h[tb:]                                             # black perspective

    # ---- side-to-move perspective flip via selects (no concats) -------------
    stm = side_ref[...] > 0.5                              # [tb, 1] bool
    first = jnp.where(stm, w, b)                           # side-to-move half
    second = jnp.where(stm, b, w)                          # opponent half

    o0a = jnp.clip(first, 0.0, 1.0)
    o0b = jnp.clip(second, 0.0, 1.0)

    # ---- l1 as two half matmuls over the (uncopied) accumulator halves ------
    o1 = (jnp.dot(o0a, l1w_ref[:h0, :], preferred_element_type=jnp.float32)
          + jnp.dot(o0b, l1w_ref[h0:, :], preferred_element_type=jnp.float32)
          + l1b_ref[...])
    o1 = jnp.clip(o1, 0.0, 1.0)                            # [tb, H1]

    o2 = (jnp.dot(o1, l2w_ref[...], preferred_element_type=jnp.float32)
          + l2b_ref[...])
    o2 = jnp.clip(o2, 0.0, 1.0)                            # [tb, H2]

    # ---- l3 (N=1): VPU multiply + XLU lane reduction (no MXU tail op) -------
    # OUTPUT_SCALE / WDL_SCALE are folded into l3 weights/bias by the wrapper.
    o3 = jnp.sum(o2 * l3w_ref[...], axis=-1, keepdims=True) + l3b_ref[...]
    out_ref[...] = jax.nn.sigmoid(o3)                      # [tb, 1]


# -------------------------------- wrapper -------------------------------------
@functools.partial(jax.jit, static_argnames=("tb",))
def nnue_forward(white_features, black_features, side,
                 ft_w, ft_b, l1_w, l1_b, l2_w, l2_b, l3_w, l3_b, *, tb=TILE_B):
    B, F = white_features.shape
    H0 = ft_w.shape[1]
    H1 = l1_w.shape[1]
    H2 = l2_w.shape[1]
    assert B % tb == 0

    # Pre-stack white/black along a leading axis -> single bf16 input stream.
    # (In production the data loader should hand us this array directly.)
    feats = jnp.stack([white_features, black_features], axis=0
                      ).astype(jnp.bfloat16)               # [2, B, F], 0/1 exact

    side_f = side.astype(jnp.float32).reshape(B, 1)

    # Split ft_w into a bf16 hi/lo pair so the FT matmul runs on the bf16 MXU
    # path while keeping ~16 mantissa bits of weight precision.
    ftw_hi = ft_w.astype(jnp.bfloat16)
    ftw_lo = (ft_w - ftw_hi.astype(jnp.float32)).astype(jnp.bfloat16)

    # Fold the output scaling into the final layer (o3 * OS / WDL == o2@(W*k)+b*k).
    k = jnp.float32(OUTPUT_SCALE / WDL_SCALE)
    l3w_row = (l3_w * k).T                                  # [1, H2]
    l3b_s = l3_b * k                                        # [1, 1]

    def batch_map(i):
        return (i, 0)

    def feat_map(i):
        return (0, i, 0)

    def fixed_map(i):
        return (0, 0)

    grid = (B // tb,)

    out = pl.pallas_call(
        nnue_kernel,
        out_shape=jax.ShapeDtypeStruct((B, 1), jnp.float32),
        grid_spec=pltpu.PrefetchScalarGridSpec(
            num_scalar_prefetch=0,
            grid=grid,
            in_specs=[
                pl.BlockSpec((2, tb, F), feat_map),        # stacked features (bf16)
                pl.BlockSpec((tb, 1), batch_map),          # side mask
                pl.BlockSpec((F, H0), fixed_map),          # ft.weight^T hi (bf16)
                pl.BlockSpec((F, H0), fixed_map),          # ft.weight^T lo (bf16)
                pl.BlockSpec((1, H0), fixed_map),          # ft.bias (f32)
                pl.BlockSpec((2 * H0, H1), fixed_map),     # l1.weight^T
                pl.BlockSpec((1, H1), fixed_map),          # l1.bias
                pl.BlockSpec((H1, H2), fixed_map),         # l2.weight^T
                pl.BlockSpec((1, H2), fixed_map),          # l2.bias
                pl.BlockSpec((1, H2), fixed_map),          # l3.weight row (pre-scaled)
                pl.BlockSpec((1, 1), fixed_map),           # l3.bias (pre-scaled)
            ],
            out_specs=pl.BlockSpec((tb, 1), batch_map),
        ),
        compiler_params=pltpu.CompilerParams(
            dimension_semantics=("parallel",),
            vmem_limit_bytes=32 * 1024 * 1024),
    )(feats, side_f,
      ftw_hi, ftw_lo, ft_b, l1_w, l1_b, l2_w, l2_b, l3w_row, l3b_s)
    return out


# ------------------------ deterministic parameter init -------------------------
def init_params(key):
    k_ft, k_l1, k_l2, k_l3 = jax.random.split(key, 4)

    # ft: normal(std = sqrt(2 / (fan_in + H0))), fan_in = 22 (no factorization)
    ft_std = np.sqrt(2.0 / (22 + N_HIDDEN0))
    ft_w = (ft_std * jax.random.normal(k_ft, (N_INPUTS_FACT, N_HIDDEN0))
            ).astype(jnp.float32)
    ft_b = jnp.zeros((1, N_HIDDEN0), jnp.float32)

    # xavier_normal_: std = sqrt(2 / (fan_in + fan_out))
    def xavier(k, fan_in, fan_out):
        std = np.sqrt(2.0 / (fan_in + fan_out))
        return (std * jax.random.normal(k, (fan_in, fan_out))).astype(jnp.float32)

    l1_w = xavier(k_l1, 2 * N_HIDDEN0, N_HIDDEN1)
    l1_b = jnp.zeros((1, N_HIDDEN1), jnp.float32)
    l2_w = xavier(k_l2, N_HIDDEN1, N_HIDDEN2)
    l2_b = jnp.zeros((1, N_HIDDEN2), jnp.float32)
    l3_w = xavier(k_l3, N_HIDDEN2, 1)
    l3_b = jnp.zeros((1, 1), jnp.float32)
    return ft_w, ft_b, l1_w, l1_b, l2_w, l2_b, l3_w, l3_b


# ------------------------------- reference ------------------------------------
def nnue_ref(wf, bf, side, ft_w, ft_b, l1_w, l1_b, l2_w, l2_b, l3_w, l3_b):
    wf = wf.astype(jnp.float32)
    bf = bf.astype(jnp.float32)
    side_f = side.astype(jnp.float32).reshape(-1, 1)
    w = wf @ ft_w + ft_b
    b = bf @ ft_w + ft_b
    acc = (jnp.concatenate([w, b], 1) * side_f
           + jnp.concatenate([b, w], 1) * (1 - side_f))
    o0 = jnp.clip(acc, 0.0, 1.0)
    o1 = jnp.clip(o0 @ l1_w + l1_b, 0.0, 1.0)
    o2 = jnp.clip(o1 @ l2_w + l2_b, 0.0, 1.0)
    o3 = (o2 @ l3_w + l3_b) * OUTPUT_SCALE
    return jax.nn.sigmoid(o3 / WDL_SCALE)


if __name__ == "__main__":
    key = jax.random.PRNGKey(0)
    k_params, k_wf, k_bf, k_side = jax.random.split(key, 4)

    params = init_params(k_params)

    # synthetic sparse-ish 0/1 feature vectors (like one-hot piece features),
    # stored as bf16 (0/1 are exact) to halve HBM feature traffic.
    wf = jax.random.bernoulli(k_wf, p=0.02, shape=(BATCH, N_INPUTS_FACT)
                              ).astype(jnp.bfloat16)
    bf = jax.random.bernoulli(k_bf, p=0.02, shape=(BATCH, N_INPUTS_FACT)
                              ).astype(jnp.bfloat16)
    side = jax.random.bernoulli(k_side, p=0.5, shape=(BATCH,))

    out = nnue_forward(wf, bf, side, *params)
    out = jax.block_until_ready(out)

    ref = nnue_ref(wf, bf, side, *params)
    # Tolerance covers the bf16 hi/lo FT-weight split (per-weight residual
    # <= ~2^-16 relative, summed over ~30 active features); any structural bug
    # would produce errors orders of magnitude larger.
    np.testing.assert_allclose(np.asarray(out), np.asarray(ref),
                               rtol=5e-5, atol=5e-5)
    print("KERNEL_OK")
</pallas_src>

<mosaic_0001>
module attributes {stable_mosaic.version = 11 : i64} {
  func.func @nnue_kernel(%arg0: i32, %arg1: memref<2x128x1536xbf16, #tpu.memory_space<vmem>>, %arg2: memref<128x1xf32, #tpu.memory_space<vmem>>, %arg3: memref<1536x128xbf16, #tpu.memory_space<vmem>>, %arg4: memref<1536x128xbf16, #tpu.memory_space<vmem>>, %arg5: memref<1x128xf32, #tpu.memory_space<vmem>>, %arg6: memref<256x32xf32, #tpu.memory_space<vmem>>, %arg7: memref<1x32xf32, #tpu.memory_space<vmem>>, %arg8: memref<32x32xf32, #tpu.memory_space<vmem>>, %arg9: memref<1x32xf32, #tpu.memory_space<vmem>>, %arg10: memref<1x32xf32, #tpu.memory_space<vmem>>, %arg11: memref<1x1xf32, #tpu.memory_space<vmem>>, %arg12: memref<128x1xf32, #tpu.memory_space<vmem>>) attributes {dimension_semantics = [#tpu.dimension_semantics<parallel>], iteration_bounds = array<i64: 4>, scalar_prefetch = 0 : i64, scratch_operands = 0 : i64, tpu.core_type = #tpu.core_type<tc>, window_params = [{transform_indices = @transform_0, window_bounds = array<i64: 2, 128, 1536>}, {transform_indices = @transform_1, window_bounds = array<i64: 128, 1>}, {pipeline_mode = #tpu.pipeline_mode<synchronous>, transform_indices = @transform_2, window_bounds = array<i64: 1536, 128>}, {pipeline_mode = #tpu.pipeline_mode<synchronous>, transform_indices = @transform_3, window_bounds = array<i64: 1536, 128>}, {pipeline_mode = #tpu.pipeline_mode<synchronous>, transform_indices = @transform_4, window_bounds = array<i64: 1, 128>}, {pipeline_mode = #tpu.pipeline_mode<synchronous>, transform_indices = @transform_5, window_bounds = array<i64: 256, 32>}, {pipeline_mode = #tpu.pipeline_mode<synchronous>, transform_indices = @transform_6, window_bounds = array<i64: 1, 32>}, {pipeline_mode = #tpu.pipeline_mode<synchronous>, transform_indices = @transform_7, window_bounds = array<i64: 32, 32>}, {pipeline_mode = #tpu.pipeline_mode<synchronous>, transform_indices = @transform_8, window_bounds = array<i64: 1, 32>}, {pipeline_mode = #tpu.pipeline_mode<synchronous>, transform_indices = @transform_9, window_bounds = array<i64: 1, 32>}, {pipeline_mode = #tpu.pipeline_mode<synchronous>, transform_indices = @transform_10, window_bounds = array<i64: 1, 1>}, {transform_indices = @transform_11, window_bounds = array<i64: 128, 1>}]} {
    %c0 = arith.constant 0 : index
    %c0_0 = arith.constant 0 : index
    %c0_1 = arith.constant 0 : index
    %0 = vector.load %arg1[%c0, %c0_0, %c0_1] : memref<2x128x1536xbf16, #tpu.memory_space<vmem>>, vector<2x128x1536xbf16>
    %1 = vector.shape_cast %0 : vector<2x128x1536xbf16> to vector<256x1536xbf16>
    %c0_2 = arith.constant 0 : index
    %c0_3 = arith.constant 0 : index
    %2 = vector.load %arg3[%c0_2, %c0_3] : memref<1536x128xbf16, #tpu.memory_space<vmem>>, vector<1536x128xbf16>
    %cst = arith.constant dense<0.000000e+00> : vector<256x128xf32>
    %3 = tpu.matmul %1, %2, %cst {dimension_numbers = #tpu.dot_dimension_numbers<[1], [0], [0], [1], [0, 0, 1, 1], [], []>} : vector<256x1536xbf16>, vector<1536x128xbf16>, vector<256x128xf32> -> vector<256x128xf32>
    %c0_4 = arith.constant 0 : index
    %c0_5 = arith.constant 0 : index
    %4 = vector.load %arg4[%c0_4, %c0_5] : memref<1536x128xbf16, #tpu.memory_space<vmem>>, vector<1536x128xbf16>
    %cst_6 = arith.constant dense<0.000000e+00> : vector<256x128xf32>
    %5 = tpu.matmul %1, %4, %cst_6 {dimension_numbers = #tpu.dot_dimension_numbers<[1], [0], [0], [1], [0, 0, 1, 1], [], []>} : vector<256x1536xbf16>, vector<1536x128xbf16>, vector<256x128xf32> -> vector<256x128xf32>
    %6 = arith.addf %3, %5 : vector<256x128xf32>
    %c0_7 = arith.constant 0 : index
    %c0_8 = arith.constant 0 : index
    %7 = vector.load %arg5[%c0_7, %c0_8] : memref<1x128xf32, #tpu.memory_space<vmem>>, vector<1x128xf32>
    %8 = vector.broadcast %7 : vector<1x128xf32> to vector<256x128xf32>
    %9 = arith.addf %6, %8 : vector<256x128xf32>
    %10 = vector.extract_strided_slice %9 {offsets = [0, 0], sizes = [128, 128], strides = [1, 1]} : vector<256x128xf32> to vector<128x128xf32>
    %11 = vector.extract_strided_slice %9 {offsets = [128, 0], sizes = [128, 128], strides = [1, 1]} : vector<256x128xf32> to vector<128x128xf32>
    %c0_9 = arith.constant 0 : index
    %c0_10 = arith.constant 0 : index
    %12 = vector.load %arg2[%c0_9, %c0_10] : memref<128x1xf32, #tpu.memory_space<vmem>>, vector<128x1xf32>
    %cst_11 = arith.constant 5.000000e-01 : f32
    %13 = vector.broadcast %cst_11 : f32 to vector<128x1xf32>
    %14 = arith.cmpf ogt, %12, %13 : vector<128x1xf32>
    %15 = vector.shape_cast %14 : vector<128x1xi1> to vector<128x1xi1>
    %16 = vector.broadcast %15 : vector<128x1xi1> to vector<128x128xi1>
    %17 = arith.select %16, %10, %11 : vector<128x128xi1>, vector<128x128xf32>
    %18 = vector.shape_cast %14 : vector<128x1xi1> to vector<128x1xi1>
    %19 = vector.broadcast %18 : vector<128x1xi1> to vector<128x128xi1>
    %20 = arith.select %19, %11, %10 : vector<128x128xi1>, vector<128x128xf32>
    %cst_12 = arith.constant 0.000000e+00 : f32
    %cst_13 = arith.constant 1.000000e+00 : f32
    %21 = vector.broadcast %cst_12 : f32 to vector<128x128xf32>
    %22 = arith.maximumf %21, %17 : vector<128x128xf32>
    %23 = vector.broadcast %cst_13 : f32 to vector<128x128xf32>
    %24 = arith.minimumf %23, %22 : vector<128x128xf32>
    %cst_14 = arith.constant 0.000000e+00 : f32
    %cst_15 = arith.constant 1.000000e+00 : f32
    %25 = vector.broadcast %cst_14 : f32 to vector<128x128xf32>
    %26 = arith.maximumf %25, %20 : vector<128x128xf32>
    %27 = vector.broadcast %cst_15 : f32 to vector<128x128xf32>
    %28 = arith.minimumf %27, %26 : vector<128x128xf32>
    %c0_16 = arith.constant 0 : index
    %c0_17 = arith.constant 0 : index
    %29 = vector.load %arg6[%c0_16, %c0_17] : memref<256x32xf32, #tpu.memory_space<vmem>>, vector<128x32xf32>
    %cst_18 = arith.constant dense<0.000000e+00> : vector<128x32xf32>
    %30 = tpu.matmul %24, %29, %cst_18 {dimension_numbers = #tpu.dot_dimension_numbers<[1], [0], [0], [1], [0, 0, 1, 1], [], []>} : vector<128x128xf32>, vector<128x32xf32>, vector<128x32xf32> -> vector<128x32xf32>
    %c128 = arith.constant 128 : index
    %c0_19 = arith.constant 0 : index
    %31 = vector.load %arg6[%c128, %c0_19] : memref<256x32xf32, #tpu.memory_space<vmem>>, vector<128x32xf32>
    %cst_20 = arith.constant dense<0.000000e+00> : vector<128x32xf32>
    %32 = tpu.matmul %28, %31, %cst_20 {dimension_numbers = #tpu.dot_dimension_numbers<[1], [0], [0], [1], [0, 0, 1, 1], [], []>} : vector<128x128xf32>, vector<128x32xf32>, vector<128x32xf32> -> vector<128x32xf32>
    %33 = arith.addf %30, %32 : vector<128x32xf32>
    %c0_21 = arith.constant 0 : index
    %c0_22 = arith.constant 0 : index
    %34 = vector.load %arg7[%c0_21, %c0_22] : memref<1x32xf32, #tpu.memory_space<vmem>>, vector<1x32xf32>
    %35 = vector.broadcast %34 : vector<1x32xf32> to vector<128x32xf32>
    %36 = arith.addf %33, %35 : vector<128x32xf32>
    %cst_23 = arith.constant 0.000000e+00 : f32
    %cst_24 = arith.constant 1.000000e+00 : f32
    %37 = vector.broadcast %cst_23 : f32 to vector<128x32xf32>
    %38 = arith.maximumf %37, %36 : vector<128x32xf32>
    %39 = vector.broadcast %cst_24 : f32 to vector<128x32xf32>
    %40 = arith.minimumf %39, %38 : vector<128x32xf32>
    %c0_25 = arith.constant 0 : index
    %c0_26 = arith.constant 0 : index
    %41 = vector.load %arg8[%c0_25, %c0_26] : memref<32x32xf32, #tpu.memory_space<vmem>>, vector<32x32xf32>
    %cst_27 = arith.constant dense<0.000000e+00> : vector<128x32xf32>
    %42 = tpu.matmul %40, %41, %cst_27 {dimension_numbers = #tpu.dot_dimension_numbers<[1], [0], [0], [1], [0, 0, 1, 1], [], []>} : vector<128x32xf32>, vector<32x32xf32>, vector<128x32xf32> -> vector<128x32xf32>
    %c0_28 = arith.constant 0 : index
    %c0_29 = arith.constant 0 : index
    %43 = vector.load %arg9[%c0_28, %c0_29] : memref<1x32xf32, #tpu.memory_space<vmem>>, vector<1x32xf32>
    %44 = vector.broadcast %43 : vector<1x32xf32> to vector<128x32xf32>
    %45 = arith.addf %42, %44 : vector<128x32xf32>
    %cst_30 = arith.constant 0.000000e+00 : f32
    %cst_31 = arith.constant 1.000000e+00 : f32
    %46 = vector.broadcast %cst_30 : f32 to vector<128x32xf32>
    %47 = arith.maximumf %46, %45 : vector<128x32xf32>
    %48 = vector.broadcast %cst_31 : f32 to vector<128x32xf32>
    %49 = arith.minimumf %48, %47 : vector<128x32xf32>
    %c0_32 = arith.constant 0 : index
    %c0_33 = arith.constant 0 : index
    %50 = vector.load %arg10[%c0_32, %c0_33] : memref<1x32xf32, #tpu.memory_space<vmem>>, vector<1x32xf32>
    %51 = vector.broadcast %50 : vector<1x32xf32> to vector<128x32xf32>
    %52 = arith.mulf %49, %51 : vector<128x32xf32>
    %cst_34 = arith.constant dense<0.000000e+00> : vector<128xf32>
    %53 = vector.multi_reduction <add>, %52, %cst_34 [1] : vector<128x32xf32> to vector<128xf32>
    %54 = vector.shape_cast %53 : vector<128xf32> to vector<128x1xf32>
    %c0_35 = arith.constant 0 : index
    %c0_36 = arith.constant 0 : index
    %55 = vector.load %arg11[%c0_35, %c0_36] : memref<1x1xf32, #tpu.memory_space<vmem>>, vector<1x1xf32>
    %56 = vector.broadcast %55 : vector<1x1xf32> to vector<128x1xf32>
    %57 = arith.addf %54, %56 : vector<128x1xf32>
    %58 = arith.negf %57 : vector<128x1xf32>
    %59 = math.exp %58 : vector<128x1xf32>
    %cst_37 = arith.constant 1.000000e+00 : f32
    %60 = vector.broadcast %cst_37 : f32 to vector<128x1xf32>
    %61 = arith.addf %60, %59 : vector<128x1xf32>
    %62 = arith.divf %60, %61 : vector<128x1xf32>
    %c0_38 = arith.constant 0 : index
    %c0_39 = arith.constant 0 : index
    %63 = vector.load %arg12[%c0_38, %c0_39] : memref<128x1xf32, #tpu.memory_space<vmem>>, vector<128x1xf32>
    tpu.vector_store %arg12[%c0_38, %c0_39], %62 {strides = array<i32>} : memref<128x1xf32, #tpu.memory_space<vmem>>, vector<128x1xf32>,
    return
  }
  func.func @transform_0(%arg0: i32) -> (i32, i32, i32) {
    %c0_i32 = arith.constant 0 : i32
    %c0_i32_0 = arith.constant 0 : i32
    %c0_i32_1 = arith.constant 0 : i32
    return %c0_i32, %arg0, %c0_i32_0 : i32, i32, i32
  }
  func.func @transform_1(%arg0: i32) -> (i32, i32) {
    %c0_i32 = arith.constant 0 : i32
    %c0_i32_0 = arith.constant 0 : i32
    return %arg0, %c0_i32 : i32, i32
  }
  func.func @transform_2(%arg0: i32) -> (i32, i32) {
    %c0_i32 = arith.constant 0 : i32
    %c0_i32_0 = arith.constant 0 : i32
    %c0_i32_1 = arith.constant 0 : i32
    return %c0_i32, %c0_i32_0 : i32, i32
  }
  func.func @transform_3(%arg0: i32) -> (i32, i32) {
    %c0_i32 = arith.constant 0 : i32
    %c0_i32_0 = arith.constant 0 : i32
    %c0_i32_1 = arith.constant 0 : i32
    return %c0_i32, %c0_i32_0 : i32, i32
  }
  func.func @transform_4(%arg0: i32) -> (i32, i32) {
    %c0_i32 = arith.constant 0 : i32
    %c0_i32_0 = arith.constant 0 : i32
    %c0_i32_1 = arith.constant 0 : i32
    return %c0_i32, %c0_i32_0 : i32, i32
  }
  func.func @transform_5(%arg0: i32) -> (i32, i32) {
    %c0_i32 = arith.constant 0 : i32
    %c0_i32_0 = arith.constant 0 : i32
    %c0_i32_1 = arith.constant 0 : i32
    return %c0_i32, %c0_i32_0 : i32, i32
  }
  func.func @transform_6(%arg0: i32) -> (i32, i32) {
    %c0_i32 = arith.constant 0 : i32
    %c0_i32_0 = arith.constant 0 : i32
    %c0_i32_1 = arith.constant 0 : i32
    return %c0_i32, %c0_i32_0 : i32, i32
  }
  func.func @transform_7(%arg0: i32) -> (i32, i32) {
    %c0_i32 = arith.constant 0 : i32
    %c0_i32_0 = arith.constant 0 : i32
    %c0_i32_1 = arith.constant 0 : i32
    return %c0_i32, %c0_i32_0 : i32, i32
  }
  func.func @transform_8(%arg0: i32) -> (i32, i32) {
    %c0_i32 = arith.constant 0 : i32
    %c0_i32_0 = arith.constant 0 : i32
    %c0_i32_1 = arith.constant 0 : i32
    return %c0_i32, %c0_i32_0 : i32, i32
  }
  func.func @transform_9(%arg0: i32) -> (i32, i32) {
    %c0_i32 = arith.constant 0 : i32
    %c0_i32_0 = arith.constant 0 : i32
    %c0_i32_1 = arith.constant 0 : i32
    return %c0_i32, %c0_i32_0 : i32, i32
  }
  func.func @transform_10(%arg0: i32) -> (i32, i32) {
    %c0_i32 = arith.constant 0 : i32
    %c0_i32_0 = arith.constant 0 : i32
    %c0_i32_1 = arith.constant 0 : i32
    return %c0_i32, %c0_i32_0 : i32, i32
  }
  func.func @transform_11(%arg0: i32) -> (i32, i32) {
    %c0_i32 = arith.constant 0 : i32
    %c0_i32_0 = arith.constant 0 : i32
    return %arg0, %c0_i32 : i32, i32
  }
}

</mosaic_0001>

<bundles_post_ra>
// kernel: nnue_forward.1
= control target key start
LH: loop header
LB: loop body
LE: loop exit
PB: predicated region body
PF: predicated region fallthrough
CT: control target
= control target key end

     0   :  { %s12528_s0 = inlined_call_operand.vmem [shape: bf16[2,512,1536], index: 0, kind: input, shape index: {}]   ;;  %s12529_s1 = inlined_call_operand.vmem [shape: f32[512,1], index: 1, kind: input, shape index: {}]   ;;  %s12530_s2 = inlined_call_operand.vmem [shape: bf16[1536,128], index: 2, kind: input, shape index: {}]   ;;  %s12531_s3 = inlined_call_operand.vmem [shape: bf16[1536,128], index: 3, kind: input, shape index: {}]   ;;  %s12532_s4 = inlined_call_operand.vmem [shape: f32[1,128], index: 4, kind: input, shape index: {}]   ;;  %s12533_s5 = inlined_call_operand.vmem [shape: f32[256,32], index: 5, kind: input, shape index: {}]   ;;  %s12534_s6 = inlined_call_operand.vmem [shape: f32[1,32], index: 6, kind: input, shape index: {}]   ;;  %s12535_s7 = inlined_call_operand.vmem [shape: f32[32,32], index: 7, kind: input, shape index: {}]   ;;  %s12536_s8 = inlined_call_operand.vmem [shape: f32[1,32], index: 8, kind: input, shape index: {}]   ;;  %s12537_s9 = inlined_call_operand.vmem [shape: f32[1,32], index: 9, kind: input, shape index: {}]   ;;  %s12538_s10 = inlined_call_operand.<no memory space> [shape: f32[1,1], index: 10, kind: input, shape index: {}]   ;;  %s12539_s11 = inlined_call_operand.vmem [shape: f32[512,1], index: 11, kind: output, shape index: {}]  }
   0x1   :  { %v16_v0 = vstv %s12538_s10 }
   0x2   :  { %17 = vst [vmem:[#allocation2] sm:$0x1] %v16_v0 }
   0x3   :  { %s8913_s19 = smov 0   ;;  %s8915_s20 = smov 0  }
   0x4   :  { %s8917_s21 = smov 0  }
   0x5 LB: > { %s6735_s10 = sadd.s32 4294967295, %s8847_s21   ;;  %s8930_s22 = sadd.s32 1, %s8847_s21   ;;  %s8847_s21 = sphi %s8917_s21, %s13048_s21   ;;  %s8843_s20 = sphi %s8915_s20, %s13047_s20   ;;  %s8839_s19 = sphi %s8913_s19, %s13046_s19  }
   0x6   : > { %s27_s23 = ssub.s32 %s8847_s21, %s8930_s22  ;;  %s30_s24 = sadd.s32 1, %s8843_s20 }
   0x7   : > { %p28_p0 = scmp.eq.s32.totalorder %s27_s23, 0  ;;  %p37_p1 = scmp.ne.s32.totalorder %s8843_s20, %s8839_s19 }
   0x8   : > { %p38_p2 = scmp.eq.s32.totalorder %s8847_s21, 0  ;;  %p6738_p4 = scmp.ge.s32.totalorder %s8847_s21, 4 }
   0x9   : > { %s8939_s25 = scalar_select %p28_p0, %s8843_s20, %s30_s24  }
   0xa   : > { %p39_p3 = por %p38_p2, %p37_p1  ;;  %331 = sbr.rel (%p6738_p4) target bundleno = 212 (0xd4), region = 52 }
   0xf   : > { %334 = sbr.rel (!%p39_p3) target bundleno = 212 (0xd4), region = 56  ;;  %s336_s26 = sand.u32 (%p39_p3), 1, %s8843_s20  }
  0x10   : > { %s8726_s27 = smul.u32 (%p39_p3), 768, %s8847_s21 }
  0x11   : > { %s8725_s28 = smul.u32 (%p39_p3), 1536, %s336_s26 }
  0x12   : > { %s8947_s12 = scalar_lea.vmem (%p39_p3), %s12528_s0, %s8726_s27 }
  0x13   : > { %v355_v1 = vld [vmem:[%s8947_s12] sm:$0xff] (%p39_p3)  ;;  %v357_v2 = vld [vmem:[%s8947_s12 + $0x8] sm:$0xff] (%p39_p3)  ;;  %v359_v3 = vld [vmem:[%s8947_s12 + $0x10] sm:$0xff] (%p39_p3)  ;;  %s8952_s13 = scalar_lea.vmem (%p39_p3), [#allocation3], %s8725_s28 }
  0x14   : > { %356 = vst [vmem:[%s8952_s13] sm:$0xff] %v355_v1  ;;  %v361_v4 = vld [vmem:[%s8947_s12 + $0x18] sm:$0xff]  ;;  %v363_v5 = vld [vmem:[%s8947_s12 + $0x20] sm:$0xff]  ;;  %v365_v6 = vld [vmem:[%s8947_s12 + $0x28] sm:$0xff] }
  0x15   : > { %358 = vst [vmem:[%s8952_s13 + $0x8] sm:$0xff] %v357_v2  ;;  %v367_v7 = vld [vmem:[%s8947_s12 + $0x30] sm:$0xff]  ;;  %v369_v8 = vld [vmem:[%s8947_s12 + $0x38] sm:$0xff]  ;;  %v371_v9 = vld [vmem:[%s8947_s12 + $0x40] sm:$0xff] }
  0x16   : > { %360 = vst [vmem:[%s8952_s13 + $0x10] sm:$0xff] %v359_v3  ;;  %v373_v10 = vld [vmem:[%s8947_s12 + $0x48] sm:$0xff]  ;;  %v375_v11 = vld [vmem:[%s8947_s12 + $0x50] sm:$0xff]  ;;  %v377_v12 = vld [vmem:[%s8947_s12 + $0x58] sm:$0xff] }
  0x17   : > { %362 = vst [vmem:[%s8952_s13 + $0x18] sm:$0xff] %v361_v4  ;;  %v379_v13 = vld [vmem:[%s8947_s12 + $0x60] sm:$0xff]  ;;  %v381_v14 = vld [vmem:[%s8947_s12 + $0x68] sm:$0xff]  ;;  %v383_v15 = vld [vmem:[%s8947_s12 + $0x70] sm:$0xff] }
  0x18   : > { %364 = vst [vmem:[%s8952_s13 + $0x20] sm:$0xff] %v363_v5  ;;  %v385_v16 = vld [vmem:[%s8947_s12 + $0x78] sm:$0xff]  ;;  %v387_v17 = vld [vmem:[%s8947_s12 + $0x80] sm:$0xff]  ;;  %v389_v18 = vld [vmem:[%s8947_s12 + $0x88] sm:$0xff] }
  0x19   : > { %366 = vst [vmem:[%s8952_s13 + $0x28] sm:$0xff] %v365_v6  ;;  %v391_v19 = vld [vmem:[%s8947_s12 + $0x90] sm:$0xff]  ;;  %v393_v20 = vld [vmem:[%s8947_s12 + $0x98] sm:$0xff]  ;;  %v395_v21 = vld [vmem:[%s8947_s12 + $0xa0] sm:$0xff] }
  0x1a   : > { %368 = vst [vmem:[%s8952_s13 + $0x30] sm:$0xff] %v367_v7  ;;  %v397_v22 = vld [vmem:[%s8947_s12 + $0xa8] sm:$0xff]  ;;  %v399_v23 = vld [vmem:[%s8947_s12 + $0xb0] sm:$0xff]  ;;  %v401_v24 = vld [vmem:[%s8947_s12 + $0xb8] sm:$0xff] }
  0x1b   : > { %370 = vst [vmem:[%s8952_s13 + $0x38] sm:$0xff] %v369_v8  ;;  %v403_v25 = vld [vmem:[%s8947_s12 + $0xc0] sm:$0xff]  ;;  %v405_v26 = vld [vmem:[%s8947_s12 + $0xc8] sm:$0xff]  ;;  %v407_v27 = vld [vmem:[%s8947_s12 + $0xd0] sm:$0xff] }
  0x1c   : > { %372 = vst [vmem:[%s8952_s13 + $0x40] sm:$0xff] %v371_v9  ;;  %v409_v28 = vld [vmem:[%s8947_s12 + $0xd8] sm:$0xff]  ;;  %v411_v29 = vld [vmem:[%s8947_s12 + $0xe0] sm:$0xff]  ;;  %v413_v30 = vld [vmem:[%s8947_s12 + $0xe8] sm:$0xff] }
  0x1d   : > { %374 = vst [vmem:[%s8952_s13 + $0x48] sm:$0xff] %v373_v10  ;;  %v415_v31 = vld [vmem:[%s8947_s12 + $0xf0] sm:$0xff]  ;;  %v417_v32 = vld [vmem:[%s8947_s12 + $0xf8] sm:$0xff]  ;;  %v419_v33 = vld [vmem:[%s8947_s12 + $0x100] sm:$0xff] }
  0x1e   : > { %376 = vst [vmem:[%s8952_s13 + $0x50] sm:$0xff] %v375_v11  ;;  %v421_v34 = vld [vmem:[%s8947_s12 + $0x108] sm:$0xff]  ;;  %v423_v35 = vld [vmem:[%s8947_s12 + $0x110] sm:$0xff]  ;;  %v425_v36 = vld [vmem:[%s8947_s12 + $0x118] sm:$0xff] }
  0x1f   : > { %378 = vst [vmem:[%s8952_s13 + $0x58] sm:$0xff] %v377_v12  ;;  %v427_v37 = vld [vmem:[%s8947_s12 + $0x120] sm:$0xff]  ;;  %v429_v38 = vld [vmem:[%s8947_s12 + $0x128] sm:$0xff]  ;;  %v431_v39 = vld [vmem:[%s8947_s12 + $0x130] sm:$0xff] }
  0x20   : > { %380 = vst [vmem:[%s8952_s13 + $0x60] sm:$0xff] %v379_v13  ;;  %v433_v40 = vld [vmem:[%s8947_s12 + $0x138] sm:$0xff]  ;;  %v435_v41 = vld [vmem:[%s8947_s12 + $0x140] sm:$0xff]  ;;  %v437_v42 = vld [vmem:[%s8947_s12 + $0x148] sm:$0xff] }
  0x21   : > { %382 = vst [vmem:[%s8952_s13 + $0x68] sm:$0xff] %v381_v14  ;;  %v439_v43 = vld [vmem:[%s8947_s12 + $0x150] sm:$0xff]  ;;  %v441_v44 = vld [vmem:[%s8947_s12 + $0x158] sm:$0xff]  ;;  %v443_v45 = vld [vmem:[%s8947_s12 + $0x160] sm:$0xff] }
  0x22   : > { %384 = vst [vmem:[%s8952_s13 + $0x70] sm:$0xff] %v383_v15  ;;  %v445_v46 = vld [vmem:[%s8947_s12 + $0x168] sm:$0xff]  ;;  %v447_v47 = vld [vmem:[%s8947_s12 + $0x170] sm:$0xff]  ;;  %v449_v48 = vld [vmem:[%s8947_s12 + $0x178] sm:$0xff] }
  0x23   : > { %386 = vst [vmem:[%s8952_s13 + $0x78] sm:$0xff] %v385_v16  ;;  %v451_v49 = vld [vmem:[%s8947_s12 + $0x180] sm:$0xff]  ;;  %v453_v50 = vld [vmem:[%s8947_s12 + $0x188] sm:$0xff]  ;;  %v455_v51 = vld [vmem:[%s8947_s12 + $0x190] sm:$0xff] }
  0x24   : > { %388 = vst [vmem:[%s8952_s13 + $0x80] sm:$0xff] %v387_v17  ;;  %v457_v52 = vld [vmem:[%s8947_s12 + $0x198] sm:$0xff]  ;;  %v459_v53 = vld [vmem:[%s8947_s12 + $0x1a0] sm:$0xff]  ;;  %v461_v54 = vld [vmem:[%s8947_s12 + $0x1a8] sm:$0xff] }
  0x25   : > { %390 = vst [vmem:[%s8952_s13 + $0x88] sm:$0xff] %v389_v18  ;;  %v463_v55 = vld [vmem:[%s8947_s12 + $0x1b0] sm:$0xff]  ;;  %v465_v56 = vld [vmem:[%s8947_s12 + $0x1b8] sm:$0xff]  ;;  %v467_v57 = vld [vmem:[%s8947_s12 + $0x1c0] sm:$0xff] }
  0x26   : > { %392 = vst [vmem:[%s8952_s13 + $0x90] sm:$0xff] %v391_v19  ;;  %v469_v58 = vld [vmem:[%s8947_s12 + $0x1c8] sm:$0xff]  ;;  %v471_v59 = vld [vmem:[%s8947_s12 + $0x1d0] sm:$0xff]  ;;  %v473_v60 = vld [vmem:[%s8947_s12 + $0x1d8] sm:$0xff] }
  0x27   : > { %394 = vst [vmem:[%s8952_s13 + $0x98] sm:$0xff] %v393_v20  ;;  %v475_v61 = vld [vmem:[%s8947_s12 + $0x1e0] sm:$0xff]  ;;  %v477_v62 = vld [vmem:[%s8947_s12 + $0x1e8] sm:$0xff]  ;;  %v479_v63 = vld [vmem:[%s8947_s12 + $0x1f0] sm:$0xff] }
  0x28   : > { %396 = vst [vmem:[%s8952_s13 + $0xa0] sm:$0xff] %v395_v21  ;;  %v481_v0 = vld [vmem:[%s8947_s12 + $0x1f8] sm:$0xff]  ;;  %v483_v1 = vld [vmem:[%s8947_s12 + $0x200] sm:$0xff]  ;;  %v485_v2 = vld [vmem:[%s8947_s12 + $0x208] sm:$0xff] }
  0x29   : > { %398 = vst [vmem:[%s8952_s13 + $0xa8] sm:$0xff] %v397_v22  ;;  %v487_v3 = vld [vmem:[%s8947_s12 + $0x210] sm:$0xff]  ;;  %v489_v4 = vld [vmem:[%s8947_s12 + $0x218] sm:$0xff]  ;;  %v491_v5 = vld [vmem:[%s8947_s12 + $0x220] sm:$0xff] }
  0x2a   : > { %400 = vst [vmem:[%s8952_s13 + $0xb0] sm:$0xff] %v399_v23  ;;  %v493_v6 = vld [vmem:[%s8947_s12 + $0x228] sm:$0xff]  ;;  %v495_v7 = vld [vmem:[%s8947_s12 + $0x230] sm:$0xff]  ;;  %v497_v8 = vld [vmem:[%s8947_s12 + $0x238] sm:$0xff] }
  0x2b   : > { %402 = vst [vmem:[%s8952_s13 + $0xb8] sm:$0xff] %v401_v24  ;;  %v499_v9 = vld [vmem:[%s8947_s12 + $0x240] sm:$0xff]  ;;  %v501_v10 = vld [vmem:[%s8947_s12 + $0x248] sm:$0xff]  ;;  %v503_v11 = vld [vmem:[%s8947_s12 + $0x250] sm:$0xff] }
  0x2c   : > { %404 = vst [vmem:[%s8952_s13 + $0xc0] sm:$0xff] %v403_v25  ;;  %v505_v12 = vld [vmem:[%s8947_s12 + $0x258] sm:$0xff]  ;;  %v507_v13 = vld [vmem:[%s8947_s12 + $0x260] sm:$0xff]  ;;  %v509_v14 = vld [vmem:[%s8947_s12 + $0x268] sm:$0xff] }
  0x2d   : > { %406 = vst [vmem:[%s8952_s13 + $0xc8] sm:$0xff] %v405_v26  ;;  %v511_v15 = vld [vmem:[%s8947_s12 + $0x270] sm:$0xff]  ;;  %v513_v16 = vld [vmem:[%s8947_s12 + $0x278] sm:$0xff]  ;;  %v515_v17 = vld [vmem:[%s8947_s12 + $0x280] sm:$0xff] }
  0x2e   : > { %408 = vst [vmem:[%s8952_s13 + $0xd0] sm:$0xff] %v407_v27  ;;  %v517_v18 = vld [vmem:[%s8947_s12 + $0x288] sm:$0xff]  ;;  %v519_v19 = vld [vmem:[%s8947_s12 + $0x290] sm:$0xff]  ;;  %v521_v20 = vld [vmem:[%s8947_s12 + $0x298] sm:$0xff] }
  0x2f   : > { %410 = vst [vmem:[%s8952_s13 + $0xd8] sm:$0xff] %v409_v28  ;;  %v523_v21 = vld [vmem:[%s8947_s12 + $0x2a0] sm:$0xff]  ;;  %v525_v22 = vld [vmem:[%s8947_s12 + $0x2a8] sm:$0xff]  ;;  %v527_v23 = vld [vmem:[%s8947_s12 + $0x2b0] sm:$0xff] }
  0x30   : > { %412 = vst [vmem:[%s8952_s13 + $0xe0] sm:$0xff] %v411_v29  ;;  %v529_v24 = vld [vmem:[%s8947_s12 + $0x2b8] sm:$0xff]  ;;  %v531_v25 = vld [vmem:[%s8947_s12 + $0x2c0] sm:$0xff]  ;;  %v533_v26 = vld [vmem:[%s8947_s12 + $0x2c8] sm:$0xff] }
  0x31   : > { %414 = vst [vmem:[%s8952_s13 + $0xe8] sm:$0xff] %v413_v30  ;;  %v535_v27 = vld [vmem:[%s8947_s12 + $0x2d0] sm:$0xff]  ;;  %v537_v28 = vld [vmem:[%s8947_s12 + $0x2d8] sm:$0xff]  ;;  %v539_v29 = vld [vmem:[%s8947_s12 + $0x2e0] sm:$0xff] }
  0x32   : > { %416 = vst [vmem:[%s8952_s13 + $0xf0] sm:$0xff] %v415_v31  ;;  %v541_v30 = vld [vmem:[%s8947_s12 + $0x2e8] sm:$0xff]  ;;  %v543_v31 = vld [vmem:[%s8947_s12 + $0x2f0] sm:$0xff] }
  0x33   : > { %418 = vst [vmem:[%s8952_s13 + $0xf8] sm:$0xff] %v417_v32  ;;  %v545_v32 = vld [vmem:[%s8947_s12 + $0x2f8] sm:$0xff] }
  0x34   : > { %420 = vst [vmem:[%s8952_s13 + $0x100] sm:$0xff] %v419_v33  ;;  %v547_v33 = vld [vmem:[%s8947_s12 + $0xc00] sm:$0xff] }
  0x35   : > { %422 = vst [vmem:[%s8952_s13 + $0x108] sm:$0xff] %v421_v34  ;;  %v549_v34 = vld [vmem:[%s8947_s12 + $0xc08] sm:$0xff] }
  0x36   : > { %424 = vst [vmem:[%s8952_s13 + $0x110] sm:$0xff] %v423_v35  ;;  %v551_v35 = vld [vmem:[%s8947_s12 + $0xc10] sm:$0xff] }
  0x37   : > { %426 = vst [vmem:[%s8952_s13 + $0x118] sm:$0xff] %v425_v36  ;;  %v553_v36 = vld [vmem:[%s8947_s12 + $0xc18] sm:$0xff] }
  0x38   : > { %428 = vst [vmem:[%s8952_s13 + $0x120] sm:$0xff] %v427_v37  ;;  %v555_v37 = vld [vmem:[%s8947_s12 + $0xc20] sm:$0xff] }
  0x39   : > { %430 = vst [vmem:[%s8952_s13 + $0x128] sm:$0xff] %v429_v38  ;;  %v557_v38 = vld [vmem:[%s8947_s12 + $0xc28] sm:$0xff] }
  0x3a   : > { %432 = vst [vmem:[%s8952_s13 + $0x130] sm:$0xff] %v431_v39  ;;  %v559_v39 = vld [vmem:[%s8947_s12 + $0xc30] sm:$0xff] }
  0x3b   : > { %434 = vst [vmem:[%s8952_s13 + $0x138] sm:$0xff] %v433_v40  ;;  %v561_v40 = vld [vmem:[%s8947_s12 + $0xc38] sm:$0xff] }
  0x3c   : > { %436 = vst [vmem:[%s8952_s13 + $0x140] sm:$0xff] %v435_v41  ;;  %v563_v41 = vld [vmem:[%s8947_s12 + $0xc40] sm:$0xff] }
  0x3d   : > { %438 = vst [vmem:[%s8952_s13 + $0x148] sm:$0xff] %v437_v42  ;;  %v565_v42 = vld [vmem:[%s8947_s12 + $0xc48] sm:$0xff] }
  0x3e   : > { %440 = vst [vmem:[%s8952_s13 + $0x150] sm:$0xff] %v439_v43  ;;  %v567_v43 = vld [vmem:[%s8947_s12 + $0xc50] sm:$0xff] }
  0x3f   : > { %442 = vst [vmem:[%s8952_s13 + $0x158] sm:$0xff] %v441_v44  ;;  %v569_v44 = vld [vmem:[%s8947_s12 + $0xc58] sm:$0xff] }
  0x40   : > { %444 = vst [vmem:[%s8952_s13 + $0x160] sm:$0xff] %v443_v45  ;;  %v571_v45 = vld [vmem:[%s8947_s12 + $0xc60] sm:$0xff] }
  0x41   : > { %446 = vst [vmem:[%s8952_s13 + $0x168] sm:$0xff] %v445_v46  ;;  %v573_v46 = vld [vmem:[%s8947_s12 + $0xc68] sm:$0xff] }
  0x42   : > { %448 = vst [vmem:[%s8952_s13 + $0x170] sm:$0xff] %v447_v47  ;;  %v575_v47 = vld [vmem:[%s8947_s12 + $0xc70] sm:$0xff] }
  0x43   : > { %450 = vst [vmem:[%s8952_s13 + $0x178] sm:$0xff] %v449_v48  ;;  %v577_v48 = vld [vmem:[%s8947_s12 + $0xc78] sm:$0xff] }
  0x44   : > { %452 = vst [vmem:[%s8952_s13 + $0x180] sm:$0xff] %v451_v49  ;;  %v579_v49 = vld [vmem:[%s8947_s12 + $0xc80] sm:$0xff] }
  0x45   : > { %454 = vst [vmem:[%s8952_s13 + $0x188] sm:$0xff] %v453_v50  ;;  %v581_v50 = vld [vmem:[%s8947_s12 + $0xc88] sm:$0xff] }
  0x46   : > { %456 = vst [vmem:[%s8952_s13 + $0x190] sm:$0xff] %v455_v51  ;;  %v583_v51 = vld [vmem:[%s8947_s12 + $0xc90] sm:$0xff] }
  0x47   : > { %458 = vst [vmem:[%s8952_s13 + $0x198] sm:$0xff] %v457_v52  ;;  %v585_v52 = vld [vmem:[%s8947_s12 + $0xc98] sm:$0xff] }
  0x48   : > { %460 = vst [vmem:[%s8952_s13 + $0x1a0] sm:$0xff] %v459_v53  ;;  %v587_v53 = vld [vmem:[%s8947_s12 + $0xca0] sm:$0xff] }
  0x49   : > { %462 = vst [vmem:[%s8952_s13 + $0x1a8] sm:$0xff] %v461_v54  ;;  %v589_v54 = vld [vmem:[%s8947_s12 + $0xca8] sm:$0xff] }
  0x4a   : > { %464 = vst [vmem:[%s8952_s13 + $0x1b0] sm:$0xff] %v463_v55  ;;  %v591_v55 = vld [vmem:[%s8947_s12 + $0xcb0] sm:$0xff] }
  0x4b   : > { %466 = vst [vmem:[%s8952_s13 + $0x1b8] sm:$0xff] %v465_v56  ;;  %v593_v56 = vld [vmem:[%s8947_s12 + $0xcb8] sm:$0xff] }
  0x4c   : > { %468 = vst [vmem:[%s8952_s13 + $0x1c0] sm:$0xff] %v467_v57  ;;  %v595_v57 = vld [vmem:[%s8947_s12 + $0xcc0] sm:$0xff] }
  0x4d   : > { %470 = vst [vmem:[%s8952_s13 + $0x1c8] sm:$0xff] %v469_v58  ;;  %v597_v58 = vld [vmem:[%s8947_s12 + $0xcc8] sm:$0xff] }
  0x4e   : > { %472 = vst [vmem:[%s8952_s13 + $0x1d0] sm:$0xff] %v471_v59  ;;  %v599_v59 = vld [vmem:[%s8947_s12 + $0xcd0] sm:$0xff] }
  0x4f   : > { %474 = vst [vmem:[%s8952_s13 + $0x1d8] sm:$0xff] %v473_v60  ;;  %v601_v60 = vld [vmem:[%s8947_s12 + $0xcd8] sm:$0xff] }
  0x50   : > { %476 = vst [vmem:[%s8952_s13 + $0x1e0] sm:$0xff] %v475_v61  ;;  %v603_v61 = vld [vmem:[%s8947_s12 + $0xce0] sm:$0xff] }
  0x51   : > { %478 = vst [vmem:[%s8952_s13 + $0x1e8] sm:$0xff] %v477_v62  ;;  %v605_v62 = vld [vmem:[%s8947_s12 + $0xce8] sm:$0xff] }
  0x52   : > { %480 = vst [vmem:[%s8952_s13 + $0x1f0] sm:$0xff] %v479_v63  ;;  %v607_v63 = vld [vmem:[%s8947_s12 + $0xcf0] sm:$0xff] }
  0x53   : > { %482 = vst [vmem:[%s8952_s13 + $0x1f8] sm:$0xff] %v481_v0  ;;  %v609_v0 = vld [vmem:[%s8947_s12 + $0xcf8] sm:$0xff] }
  0x54   : > { %484 = vst [vmem:[%s8952_s13 + $0x200] sm:$0xff] %v483_v1  ;;  %v611_v1 = vld [vmem:[%s8947_s12 + $0xd00] sm:$0xff] }
  0x55   : > { %486 = vst [vmem:[%s8952_s13 + $0x208] sm:$0xff] %v485_v2  ;;  %v613_v2 = vld [vmem:[%s8947_s12 + $0xd08] sm:$0xff] }
  0x56   : > { %488 = vst [vmem:[%s8952_s13 + $0x210] sm:$0xff] %v487_v3  ;;  %v615_v3 = vld [vmem:[%s8947_s12 + $0xd10] sm:$0xff] }
  0x57   : > { %490 = vst [vmem:[%s8952_s13 + $0x218] sm:$0xff] %v489_v4  ;;  %v617_v4 = vld [vmem:[%s8947_s12 + $0xd18] sm:$0xff] }
  0x58   : > { %492 = vst [vmem:[%s8952_s13 + $0x220] sm:$0xff] %v491_v5  ;;  %v619_v5 = vld [vmem:[%s8947_s12 + $0xd20] sm:$0xff] }
  0x59   : > { %494 = vst [vmem:[%s8952_s13 + $0x228] sm:$0xff] %v493_v6  ;;  %v621_v6 = vld [vmem:[%s8947_s12 + $0xd28] sm:$0xff] }
  0x5a   : > { %496 = vst [vmem:[%s8952_s13 + $0x230] sm:$0xff] %v495_v7  ;;  %v623_v7 = vld [vmem:[%s8947_s12 + $0xd30] sm:$0xff] }
  0x5b   : > { %498 = vst [vmem:[%s8952_s13 + $0x238] sm:$0xff] %v497_v8  ;;  %v625_v8 = vld [vmem:[%s8947_s12 + $0xd38] sm:$0xff] }
  0x5c   : > { %500 = vst [vmem:[%s8952_s13 + $0x240] sm:$0xff] %v499_v9  ;;  %v627_v9 = vld [vmem:[%s8947_s12 + $0xd40] sm:$0xff] }
  0x5d   : > { %502 = vst [vmem:[%s8952_s13 + $0x248] sm:$0xff] %v501_v10  ;;  %v629_v10 = vld [vmem:[%s8947_s12 + $0xd48] sm:$0xff] }
  0x5e   : > { %504 = vst [vmem:[%s8952_s13 + $0x250] sm:$0xff] %v503_v11  ;;  %v631_v11 = vld [vmem:[%s8947_s12 + $0xd50] sm:$0xff] }
  0x5f   : > { %506 = vst [vmem:[%s8952_s13 + $0x258] sm:$0xff] %v505_v12  ;;  %v633_v12 = vld [vmem:[%s8947_s12 + $0xd58] sm:$0xff] }
  0x60   : > { %508 = vst [vmem:[%s8952_s13 + $0x260] sm:$0xff] %v507_v13  ;;  %v635_v13 = vld [vmem:[%s8947_s12 + $0xd60] sm:$0xff] }
  0x61   : > { %510 = vst [vmem:[%s8952_s13 + $0x268] sm:$0xff] %v509_v14  ;;  %v637_v14 = vld [vmem:[%s8947_s12 + $0xd68] sm:$0xff] }
  0x62   : > { %512 = vst [vmem:[%s8952_s13 + $0x270] sm:$0xff] %v511_v15  ;;  %v639_v15 = vld [vmem:[%s8947_s12 + $0xd70] sm:$0xff] }
  0x63   : > { %514 = vst [vmem:[%s8952_s13 + $0x278] sm:$0xff] %v513_v16  ;;  %v641_v16 = vld [vmem:[%s8947_s12 + $0xd78] sm:$0xff] }
  0x64   : > { %516 = vst [vmem:[%s8952_s13 + $0x280] sm:$0xff] %v515_v17  ;;  %v643_v17 = vld [vmem:[%s8947_s12 + $0xd80] sm:$0xff] }
  0x65   : > { %518 = vst [vmem:[%s8952_s13 + $0x288] sm:$0xff] %v517_v18  ;;  %v645_v18 = vld [vmem:[%s8947_s12 + $0xd88] sm:$0xff] }
  0x66   : > { %520 = vst [vmem:[%s8952_s13 + $0x290] sm:$0xff] %v519_v19  ;;  %v647_v19 = vld [vmem:[%s8947_s12 + $0xd90] sm:$0xff] }
  0x67   : > { %522 = vst [vmem:[%s8952_s13 + $0x298] sm:$0xff] %v521_v20  ;;  %v649_v20 = vld [vmem:[%s8947_s12 + $0xd98] sm:$0xff] }
  0x68   : > { %524 = vst [vmem:[%s8952_s13 + $0x2a0] sm:$0xff] %v523_v21  ;;  %v651_v21 = vld [vmem:[%s8947_s12 + $0xda0] sm:$0xff] }
  0x69   : > { %526 = vst [vmem:[%s8952_s13 + $0x2a8] sm:$0xff] %v525_v22  ;;  %v653_v22 = vld [vmem:[%s8947_s12 + $0xda8] sm:$0xff] }
  0x6a   : > { %528 = vst [vmem:[%s8952_s13 + $0x2b0] sm:$0xff] %v527_v23  ;;  %v655_v23 = vld [vmem:[%s8947_s12 + $0xdb0] sm:$0xff] }
  0x6b   : > { %530 = vst [vmem:[%s8952_s13 + $0x2b8] sm:$0xff] %v529_v24  ;;  %v657_v24 = vld [vmem:[%s8947_s12 + $0xdb8] sm:$0xff] }
  0x6c   : > { %532 = vst [vmem:[%s8952_s13 + $0x2c0] sm:$0xff] %v531_v25  ;;  %v659_v25 = vld [vmem:[%s8947_s12 + $0xdc0] sm:$0xff] }
  0x6d   : > { %534 = vst [vmem:[%s8952_s13 + $0x2c8] sm:$0xff] %v533_v26  ;;  %v661_v26 = vld [vmem:[%s8947_s12 + $0xdc8] sm:$0xff] }
  0x6e   : > { %536 = vst [vmem:[%s8952_s13 + $0x2d0] sm:$0xff] %v535_v27  ;;  %v663_v27 = vld [vmem:[%s8947_s12 + $0xdd0] sm:$0xff] }
  0x6f   : > { %538 = vst [vmem:[%s8952_s13 + $0x2d8] sm:$0xff] %v537_v28  ;;  %v665_v28 = vld [vmem:[%s8947_s12 + $0xdd8] sm:$0xff] }
  0x70   : > { %540 = vst [vmem:[%s8952_s13 + $0x2e0] sm:$0xff] %v539_v29  ;;  %v667_v29 = vld [vmem:[%s8947_s12 + $0xde0] sm:$0xff] }
  0x71   : > { %542 = vst [vmem:[%s8952_s13 + $0x2e8] sm:$0xff] %v541_v30  ;;  %v669_v30 = vld [vmem:[%s8947_s12 + $0xde8] sm:$0xff] }
  0x72   : > { %544 = vst [vmem:[%s8952_s13 + $0x2f0] sm:$0xff] %v543_v31  ;;  %v671_v31 = vld [vmem:[%s8947_s12 + $0xdf0] sm:$0xff] }
  0x73   : > { %546 = vst [vmem:[%s8952_s13 + $0x2f8] sm:$0xff] %v545_v32  ;;  %v673_v32 = vld [vmem:[%s8947_s12 + $0xdf8] sm:$0xff] }
  0x74   : > { %548 = vst [vmem:[%s8952_s13 + $0x300] sm:$0xff] %v547_v33  ;;  %v675_v33 = vld [vmem:[%s8947_s12 + $0xe00] sm:$0xff] }
  0x75   : > { %550 = vst [vmem:[%s8952_s13 + $0x308] sm:$0xff] %v549_v34  ;;  %v677_v34 = vld [vmem:[%s8947_s12 + $0xe08] sm:$0xff] }
  0x76   : > { %552 = vst [vmem:[%s8952_s13 + $0x310] sm:$0xff] %v551_v35  ;;  %v679_v35 = vld [vmem:[%s8947_s12 + $0xe10] sm:$0xff] }
  0x77   : > { %554 = vst [vmem:[%s8952_s13 + $0x318] sm:$0xff] %v553_v36  ;;  %v681_v36 = vld [vmem:[%s8947_s12 + $0xe18] sm:$0xff] }
  0x78   : > { %556 = vst [vmem:[%s8952_s13 + $0x320] sm:$0xff] %v555_v37  ;;  %v683_v37 = vld [vmem:[%s8947_s12 + $0xe20] sm:$0xff] }
  0x79   : > { %558 = vst [vmem:[%s8952_s13 + $0x328] sm:$0xff] %v557_v38  ;;  %v685_v38 = vld [vmem:[%s8947_s12 + $0xe28] sm:$0xff] }
  0x7a   : > { %560 = vst [vmem:[%s8952_s13 + $0x330] sm:$0xff] %v559_v39  ;;  %v687_v39 = vld [vmem:[%s8947_s12 + $0xe30] sm:$0xff] }
  0x7b   : > { %562 = vst [vmem:[%s8952_s13 + $0x338] sm:$0xff] %v561_v40  ;;  %v689_v40 = vld [vmem:[%s8947_s12 + $0xe38] sm:$0xff] }
  0x7c   : > { %564 = vst [vmem:[%s8952_s13 + $0x340] sm:$0xff] %v563_v41  ;;  %v691_v41 = vld [vmem:[%s8947_s12 + $0xe40] sm:$0xff] }
  0x7d   : > { %566 = vst [vmem:[%s8952_s13 + $0x348] sm:$0xff] %v565_v42  ;;  %v693_v42 = vld [vmem:[%s8947_s12 + $0xe48] sm:$0xff] }
  0x7e   : > { %568 = vst [vmem:[%s8952_s13 + $0x350] sm:$0xff] %v567_v43  ;;  %v695_v43 = vld [vmem:[%s8947_s12 + $0xe50] sm:$0xff] }
  0x7f   : > { %570 = vst [vmem:[%s8952_s13 + $0x358] sm:$0xff] %v569_v44  ;;  %v697_v44 = vld [vmem:[%s8947_s12 + $0xe58] sm:$0xff] }
  0x80   : > { %572 = vst [vmem:[%s8952_s13 + $0x360] sm:$0xff] %v571_v45  ;;  %v699_v45 = vld [vmem:[%s8947_s12 + $0xe60] sm:$0xff] }
  0x81   : > { %574 = vst [vmem:[%s8952_s13 + $0x368] sm:$0xff] %v573_v46  ;;  %v701_v46 = vld [vmem:[%s8947_s12 + $0xe68] sm:$0xff] }
  0x82   : > { %576 = vst [vmem:[%s8952_s13 + $0x370] sm:$0xff] %v575_v47  ;;  %v703_v47 = vld [vmem:[%s8947_s12 + $0xe70] sm:$0xff] }
  0x83   : > { %578 = vst [vmem:[%s8952_s13 + $0x378] sm:$0xff] %v577_v48  ;;  %v705_v48 = vld [vmem:[%s8947_s12 + $0xe78] sm:$0xff] }
  0x84   : > { %580 = vst [vmem:[%s8952_s13 + $0x380] sm:$0xff] %v579_v49  ;;  %v707_v49 = vld [vmem:[%s8947_s12 + $0xe80] sm:$0xff] }
  0x85   : > { %582 = vst [vmem:[%s8952_s13 + $0x388] sm:$0xff] %v581_v50  ;;  %v709_v50 = vld [vmem:[%s8947_s12 + $0xe88] sm:$0xff] }
  0x86   : > { %584 = vst [vmem:[%s8952_s13 + $0x390] sm:$0xff] %v583_v51  ;;  %v711_v51 = vld [vmem:[%s8947_s12 + $0xe90] sm:$0xff] }
  0x87   : > { %586 = vst [vmem:[%s8952_s13 + $0x398] sm:$0xff] %v585_v52  ;;  %v713_v52 = vld [vmem:[%s8947_s12 + $0xe98] sm:$0xff] }
  0x88   : > { %588 = vst [vmem:[%s8952_s13 + $0x3a0] sm:$0xff] %v587_v53  ;;  %v715_v53 = vld [vmem:[%s8947_s12 + $0xea0] sm:$0xff] }
  0x89   : > { %590 = vst [vmem:[%s8952_s13 + $0x3a8] sm:$0xff] %v589_v54  ;;  %v717_v54 = vld [vmem:[%s8947_s12 + $0xea8] sm:$0xff] }
  0x8a   : > { %592 = vst [vmem:[%s8952_s13 + $0x3b0] sm:$0xff] %v591_v55  ;;  %v719_v55 = vld [vmem:[%s8947_s12 + $0xeb0] sm:$0xff] }
  0x8b   : > { %594 = vst [vmem:[%s8952_s13 + $0x3b8] sm:$0xff] %v593_v56  ;;  %v721_v56 = vld [vmem:[%s8947_s12 + $0xeb8] sm:$0xff] }
  0x8c   : > { %596 = vst [vmem:[%s8952_s13 + $0x3c0] sm:$0xff] %v595_v57  ;;  %v723_v57 = vld [vmem:[%s8947_s12 + $0xec0] sm:$0xff] }
  0x8d   : > { %598 = vst [vmem:[%s8952_s13 + $0x3c8] sm:$0xff] %v597_v58  ;;  %v725_v58 = vld [vmem:[%s8947_s12 + $0xec8] sm:$0xff] }
  0x8e   : > { %600 = vst [vmem:[%s8952_s13 + $0x3d0] sm:$0xff] %v599_v59  ;;  %v727_v59 = vld [vmem:[%s8947_s12 + $0xed0] sm:$0xff] }
  0x8f   : > { %602 = vst [vmem:[%s8952_s13 + $0x3d8] sm:$0xff] %v601_v60  ;;  %v729_v60 = vld [vmem:[%s8947_s12 + $0xed8] sm:$0xff] }
  0x90   : > { %604 = vst [vmem:[%s8952_s13 + $0x3e0] sm:$0xff] %v603_v61  ;;  %v731_v61 = vld [vmem:[%s8947_s12 + $0xee0] sm:$0xff] }
  0x91   : > { %606 = vst [vmem:[%s8952_s13 + $0x3e8] sm:$0xff] %v605_v62  ;;  %v733_v62 = vld [vmem:[%s8947_s12 + $0xee8] sm:$0xff] }
  0x92   : > { %608 = vst [vmem:[%s8952_s13 + $0x3f0] sm:$0xff] %v607_v63  ;;  %v735_v63 = vld [vmem:[%s8947_s12 + $0xef0] sm:$0xff] }
  0x93   : > { %610 = vst [vmem:[%s8952_s13 + $0x3f8] sm:$0xff] %v609_v0  ;;  %v737_v0 = vld [vmem:[%s8947_s12 + $0xef8] sm:$0xff] }
  0x94   : > { %612 = vst [vmem:[%s8952_s13 + $0x400] sm:$0xff] %v611_v1 }
  0x95   : > { %614 = vst [vmem:[%s8952_s13 + $0x408] sm:$0xff] %v613_v2 }
  0x96   : > { %616 = vst [vmem:[%s8952_s13 + $0x410] sm:$0xff] %v615_v3 }
  0x97   : > { %618 = vst [vmem:[%s8952_s13 + $0x418] sm:$0xff] %v617_v4 }
  0x98   : > { %620 = vst [vmem:[%s8952_s13 + $0x420] sm:$0xff] %v619_v5 }
  0x99   : > { %622 = vst [vmem:[%s8952_s13 + $0x428] sm:$0xff] %v621_v6 }
  0x9a   : > { %624 = vst [vmem:[%s8952_s13 + $0x430] sm:$0xff] %v623_v7 }
  0x9b   : > { %626 = vst [vmem:[%s8952_s13 + $0x438] sm:$0xff] %v625_v8 }
  0x9c   : > { %628 = vst [vmem:[%s8952_s13 + $0x440] sm:$0xff] %v627_v9 }
  0x9d   : > { %630 = vst [vmem:[%s8952_s13 + $0x448] sm:$0xff] %v629_v10 }
  0x9e   : > { %632 = vst [vmem:[%s8952_s13 + $0x450] sm:$0xff] %v631_v11 }
  0x9f   : > { %634 = vst [vmem:[%s8952_s13 + $0x458] sm:$0xff] %v633_v12 }
  0xa0   : > { %636 = vst [vmem:[%s8952_s13 + $0x460] sm:$0xff] %v635_v13 }
  0xa1   : > { %638 = vst [vmem:[%s8952_s13 + $0x468] sm:$0xff] %v637_v14 }
  0xa2   : > { %640 = vst [vmem:[%s8952_s13 + $0x470] sm:$0xff] %v639_v15 }
  0xa3   : > { %642 = vst [vmem:[%s8952_s13 + $0x478] sm:$0xff] %v641_v16 }
  0xa4   : > { %644 = vst [vmem:[%s8952_s13 + $0x480] sm:$0xff] %v643_v17 }
  0xa5   : > { %646 = vst [vmem:[%s8952_s13 + $0x488] sm:$0xff] %v645_v18 }
  0xa6   : > { %648 = vst [vmem:[%s8952_s13 + $0x490] sm:$0xff] %v647_v19 }
  0xa7   : > { %650 = vst [vmem:[%s8952_s13 + $0x498] sm:$0xff] %v649_v20 }
  0xa8   : > { %652 = vst [vmem:[%s8952_s13 + $0x4a0] sm:$0xff] %v651_v21 }
  0xa9   : > { %654 = vst [vmem:[%s8952_s13 + $0x4a8] sm:$0xff] %v653_v22 }
  0xaa   : > { %656 = vst [vmem:[%s8952_s13 + $0x4b0] sm:$0xff] %v655_v23 }
  0xab   : > { %658 = vst [vmem:[%s8952_s13 + $0x4b8] sm:$0xff] %v657_v24 }
  0xac   : > { %660 = vst [vmem:[%s8952_s13 + $0x4c0] sm:$0xff] %v659_v25 }
  0xad   : > { %662 = vst [vmem:[%s8952_s13 + $0x4c8] sm:$0xff] %v661_v26 }
  0xae   : > { %664 = vst [vmem:[%s8952_s13 + $0x4d0] sm:$0xff] %v663_v27 }
  0xaf   : > { %666 = vst [vmem:[%s8952_s13 + $0x4d8] sm:$0xff] %v665_v28 }
  0xb0   : > { %668 = vst [vmem:[%s8952_s13 + $0x4e0] sm:$0xff] %v667_v29 }
  0xb1   : > { %670 = vst [vmem:[%s8952_s13 + $0x4e8] sm:$0xff] %v669_v30 }
  0xb2   : > { %672 = vst [vmem:[%s8952_s13 + $0x4f0] sm:$0xff] %v671_v31 }
  0xb3   : > { %674 = vst [vmem:[%s8952_s13 + $0x4f8] sm:$0xff] %v673_v32 }
  0xb4   : > { %676 = vst [vmem:[%s8952_s13 + $0x500] sm:$0xff] %v675_v33 }
  0xb5   : > { %678 = vst [vmem:[%s8952_s13 + $0x508] sm:$0xff] %v677_v34 }
  0xb6   : > { %680 = vst [vmem:[%s8952_s13 + $0x510] sm:$0xff] %v679_v35 }
  0xb7   : > { %682 = vst [vmem:[%s8952_s13 + $0x518] sm:$0xff] %v681_v36 }
  0xb8   : > { %684 = vst [vmem:[%s8952_s13 + $0x520] sm:$0xff] %v683_v37 }
  0xb9   : > { %686 = vst [vmem:[%s8952_s13 + $0x528] sm:$0xff] %v685_v38 }
  0xba   : > { %688 = vst [vmem:[%s8952_s13 + $0x530] sm:$0xff] %v687_v39 }
  0xbb   : > { %690 = vst [vmem:[%s8952_s13 + $0x538] sm:$0xff] %v689_v40 }
  0xbc   : > { %692 = vst [vmem:[%s8952_s13 + $0x540] sm:$0xff] %v691_v41 }
  0xbd   : > { %694 = vst [vmem:[%s8952_s13 + $0x548] sm:$0xff] %v693_v42 }
  0xbe   : > { %696 = vst [vmem:[%s8952_s13 + $0x550] sm:$0xff] %v695_v43 }
  0xbf   : > { %698 = vst [vmem:[%s8952_s13 + $0x558] sm:$0xff] %v697_v44 }
  0xc0   : > { %700 = vst [vmem:[%s8952_s13 + $0x560] sm:$0xff] %v699_v45 }
  0xc1   : > { %702 = vst [vmem:[%s8952_s13 + $0x568] sm:$0xff] %v701_v46 }
  0xc2   : > { %704 = vst [vmem:[%s8952_s13 + $0x570] sm:$0xff] %v703_v47 }
  0xc3   : > { %706 = vst [vmem:[%s8952_s13 + $0x578] sm:$0xff] %v705_v48 }
  0xc4   : > { %708 = vst [vmem:[%s8952_s13 + $0x580] sm:$0xff] %v707_v49 }
  0xc5   : > { %710 = vst [vmem:[%s8952_s13 + $0x588] sm:$0xff] %v709_v50 }
  0xc6   : > { %712 = vst [vmem:[%s8952_s13 + $0x590] sm:$0xff] %v711_v51 }
  0xc7   : > { %714 = vst [vmem:[%s8952_s13 + $0x598] sm:$0xff] %v713_v52 }
  0xc8   : > { %716 = vst [vmem:[%s8952_s13 + $0x5a0] sm:$0xff] %v715_v53 }
  0xc9   : > { %718 = vst [vmem:[%s8952_s13 + $0x5a8] sm:$0xff] %v717_v54 }
  0xca   : > { %720 = vst [vmem:[%s8952_s13 + $0x5b0] sm:$0xff] %v719_v55 }
  0xcb   : > { %722 = vst [vmem:[%s8952_s13 + $0x5b8] sm:$0xff] %v721_v56 }
  0xcc   : > { %724 = vst [vmem:[%s8952_s13 + $0x5c0] sm:$0xff] %v723_v57 }
  0xcd   : > { %726 = vst [vmem:[%s8952_s13 + $0x5c8] sm:$0xff] %v725_v58 }
  0xce   : > { %728 = vst [vmem:[%s8952_s13 + $0x5d0] sm:$0xff] %v727_v59 }
  0xcf   : > { %730 = vst [vmem:[%s8952_s13 + $0x5d8] sm:$0xff] %v729_v60 }
  0xd0   : > { %732 = vst [vmem:[%s8952_s13 + $0x5e0] sm:$0xff] %v731_v61 }
  0xd1   : > { %734 = vst [vmem:[%s8952_s13 + $0x5e8] sm:$0xff] %v733_v62 }
  0xd2   : > { %736 = vst [vmem:[%s8952_s13 + $0x5f0] sm:$0xff] %v735_v63 }
  0xd3   : > { %738 = vst [vmem:[%s8952_s13 + $0x5f8] sm:$0xff] %v737_v0 }
  0xd4 PF: > { %p6742_p5 = scmp.ge.s32.totalorder %s8847_s21, 1  ;;  %p752_p6 = scmp.lt.s32.totalorder %s8847_s21, 5 }
  0xd6   : > { %p753_p7 = pnand %p6742_p5, %p752_p6 }
  0xd8   : > { %756 = sbr.rel (%p753_p7) target bundleno = 2440 (0x988), region = 83 }
  0xdd   : > { %v8612_v1 = vld [vmem:[%s12531_s3 + $0x38] sm:$0xff]  ;;  %v8611_v4 = vld [vmem:[%s12531_s3 + $0x30] sm:$0xff]  ;;  %v8610_v7 = vld [vmem:[%s12531_s3 + $0x28] sm:$0xff]  ;;  %s759_s16 = sand.u32 1, %s8839_s19   ;;  %s6743_s17 = sshll.u32 %s6735_s10, 4 }
  0xde   : > { %v9343_v2 = vld [vmem:[%s12531_s3 + $0xb8] sm:$0xff]  ;;  %2928 = vmatpush.bf16.msra.mxu0 %v8612_v1  ;;  %8701 = vmatpush.bf16.msra.mxu3 %v8612_v1  ;;  %v9358_v5 = vld [vmem:[%s12531_s3 + $0xb0] sm:$0xff]  ;;  %v9373_v8 = vld [vmem:[%s12531_s3 + $0xa8] sm:$0xff]  ;;  %s8727_s23 = smul.u32 1536, %s759_s16  ;;  %p805_p8 = scmp.lt.s32.totalorder %s6743_s17, 63 }
  0xdf   : > { %v9348_v3 = vld [vmem:[%s12531_s3 + $0x78] sm:$0xff]  ;;  %3106 = vmatpush.bf16.msra.mxu2 %v9343_v2  ;;  %v9363_v6 = vld [vmem:[%s12531_s3 + $0x70] sm:$0xff]  ;;  %v8618_v9 = vld [vmem:[%s12531_s3 + $0x68] sm:$0xff] }
  0xe0   : > { %3017 = vmatpush.bf16.msra.mxu1 %v9348_v3  ;;  %v8609_v10 = vld [vmem:[%s12531_s3 + $0x20] sm:$0xff]  ;;  %v8608_v13 = vld [vmem:[%s12531_s3 + $0x18] sm:$0xff]  ;;  %v8607_v16 = vld [vmem:[%s12531_s3 + $0x10] sm:$0xff]  ;;  %s9441_s27 = scalar_lea.vmem [#allocation3], %s8727_s23  ;;  %s13050_s17 = smov (!%p805_p8, %s6743_s17), 63 }
  0xe1   : > { %v9384_v11 = vld [vmem:[%s12531_s3 + $0xa0] sm:$0xff]  ;;  %v9400_v14 = vld [vmem:[%s12531_s3 + $0x98] sm:$0xff]  ;;  %v9413_v17 = vld [vmem:[%s12531_s3 + $0x90] sm:$0xff]  ;;  %s6744_s21 = sshll.u32 %s13050_s17, 3 }
  0xe2   : > { %2929 = vmatpush.bf16.msra.mxu0 %v8611_v4  ;;  %8702 = vmatpush.bf16.msra.mxu3 %v8611_v4  ;;  %v9389_v12 = vld [vmem:[%s12531_s3 + $0x60] sm:$0xff]  ;;  %v8616_v15 = vld [vmem:[%s12531_s3 + $0x58] sm:$0xff]  ;;  %v8615_v18 = vld [vmem:[%s12531_s3 + $0x50] sm:$0xff]  ;;  %s12093_s19 = scalar_lea.vmem %s12529_s1, %s6744_s21  ;;  %s12472_s29 = scalar_lea.vmem %s12539_s11, %s6744_s21 }
  0xe3   : > { %3107 = vmatpush.bf16.msra.mxu2 %v9358_v5  ;;  %v8606_v19 = vld [vmem:[%s12531_s3 + $0x8] sm:$0xff]  ;;  %v8605_v22 = vld [vmem:[%s12531_s3] sm:$0xff]  ;;  %v8323_v26 = vld [vmem:[%s9441_s27 + $0x2c] sm:$0xf0] }
  0xe4   : > { %3018 = vmatpush.bf16.msra.mxu1 %v9363_v6  ;;  %v9425_v20 = vld [vmem:[%s12531_s3 + $0x88] sm:$0xff]  ;;  %v9436_v23 = vld [vmem:[%s12531_s3 + $0x80] sm:$0xff]  ;;  %v8491_v28 = vld [vmem:[%s9441_s27 + $0x56c] sm:$0xf0] }
  0xe5   : > { %v8614_v21 = vld [vmem:[%s12531_s3 + $0x48] sm:$0xff]  ;;  %v8613_v24 = vld [vmem:[%s12531_s3 + $0x40] sm:$0xff]  ;;  %v8324_v30 = vld [vmem:[%s9441_s27 + $0x34] sm:$0xf0] }
  0xe6   : > { %2930 = vmatpush.bf16.msra.mxu0 %v8610_v7  ;;  %8703 = vmatpush.bf16.msra.mxu3 %v8610_v7  ;;  %v6749_v25 = vld [vmem:[%s9441_s27] sm:$0xf]  ;;  %v6757_v29 = vld [vmem:[%s9441_s27 + $0x8] sm:$0xf]  ;;  %v8317_v31 = vld [vmem:[%s9441_s27 + $0x4] sm:$0xf] }
  0xe7   : > { %3108 = vmatpush.bf16.msra.mxu2 %v9373_v8  ;;  %v7421_v27 = vld [vmem:[%s9441_s27 + $0x540] sm:$0xf]  ;;  %v6751_v32 = vld [vmem:[%s9441_s27 + $0x30] sm:$0xf0]  ;;  %v9452_v33 = vor.u32 %v8323_v26, %v6749_v25  ;;  %v9456_v35 = vor.u32 %v8324_v30, %v6757_v29  ;;  %v8335_v38 = vld [vmem:[%s9441_s27 + $0x8c] sm:$0xf0] }
  0xe8   : > { %3019 = vmatpush.bf16.msra.mxu1 %v8618_v9  ;;  %v9454_v34 = vor.u32 %v8491_v28, %v7421_v27  ;;  %v9458_v36 = vor.u32 %v8317_v31, %v6751_v32  ;;  %v6797_v37 = vld [vmem:[%s9441_s27 + $0x60] sm:$0xf]  ;;  %v8503_v40 = vld [vmem:[%s9441_s27 + $0x5cc] sm:$0xf0]  ;;  %v6805_v41 = vld [vmem:[%s9441_s27 + $0x68] sm:$0xf] }
  0xe9   : > { %v7469_v39 = vld [vmem:[%s9441_s27 + $0x5a0] sm:$0xf]  ;;  %v8336_v42 = vld [vmem:[%s9441_s27 + $0x94] sm:$0xf0]  ;;  %v8329_v43 = vld [vmem:[%s9441_s27 + $0x64] sm:$0xf]  ;;  %v9476_v45 = vor.u32 %v8335_v38, %v6797_v37 }
  0xea   : > { %2931 = vmatpush.bf16.msra.mxu0 %v8609_v10  ;;  %8704 = vmatpush.bf16.msra.mxu3 %v8609_v10  ;;  %12708 = vst [vmem:[#allocation4_spill] sm:$0xff] %v9454_v34  ;;  %v6799_v44 = vld [vmem:[%s9441_s27 + $0x90] sm:$0xf0]  ;;  %v9478_v46 = vor.u32 %v8503_v40, %v7469_v39  ;;  %v9480_v47 = vor.u32 %v8336_v42, %v6805_v41  ;;  %v6845_v49 = vld [vmem:[%s9441_s27 + $0xc0] sm:$0xf] }
  0xeb   : > { %3109 = vmatpush.bf16.msra.mxu2 %v9384_v11  ;;  %v9482_v48 = vor.u32 %v8329_v43, %v6799_v44  ;;  %v8347_v50 = vld [vmem:[%s9441_s27 + $0xec] sm:$0xf0]  ;;  %v8485_v51 = vld [vmem:[%s9441_s27 + $0x544] sm:$0xf]  ;;  %v7423_v52 = vld [vmem:[%s9441_s27 + $0x570] sm:$0xf0] }
  0xec   : > { %3020 = vmatpush.bf16.msra.mxu1 %v9389_v12  ;;  %12709 = vst [vmem:[#allocation5_spill] sm:$0xff] %v9478_v46  ;;  %v6853_v53 = vld [vmem:[%s9441_s27 + $0xc8] sm:$0xf]  ;;  %v8348_v54 = vld [vmem:[%s9441_s27 + $0xf4] sm:$0xf0]  ;;  %v9496_v57 = vor.u32 %v8347_v50, %v6845_v49  ;;  %v9498_v58 = vor.u32 %v8485_v51, %v7423_v52  ;;  %v8631_v38 = vld [vmem:[%s12531_s3 + $0xd0] sm:$0xff] }
  0xed   : > { %v8341_v55 = vld [vmem:[%s9441_s27 + $0xc4] sm:$0xf]  ;;  %v6847_v56 = vld [vmem:[%s9441_s27 + $0xf0] sm:$0xf0]  ;;  %v9501_v59 = vor.u32 %v8348_v54, %v6853_v53  ;;  %v6893_v61 = vld [vmem:[%s9441_s27 + $0x120] sm:$0xf] }
  0xee   : > { %2932 = vmatpush.bf16.msra.mxu0 %v8608_v13  ;;  %8705 = vmatpush.bf16.msra.mxu3 %v8608_v13  ;;  %12710 = vst [vmem:[#allocation6_spill] sm:$0xff] %v9498_v58  ;;  %v9503_v60 = vor.u32 %v8341_v55, %v6847_v56  ;;  %v8359_v62 = vld [vmem:[%s9441_s27 + $0x14c] sm:$0xf0]  ;;  %v8497_v63 = vld [vmem:[%s9441_s27 + $0x5a4] sm:$0xf]  ;;  %v8632_v25 = vld [vmem:[%s12531_s3 + $0xd8] sm:$0xff] }
  0xef   : > { %3110 = vmatpush.bf16.msra.mxu2 %v9400_v14  ;;  %v7471_v0 = vld [vmem:[%s9441_s27 + $0x5d0] sm:$0xf0]  ;;  %v6901_v1 = vld [vmem:[%s9441_s27 + $0x128] sm:$0xf]  ;;  %v6941_v10 = vld [vmem:[%s9441_s27 + $0x180] sm:$0xf] }
  0xf0   : > { %3021 = vmatpush.bf16.msra.mxu1 %v8616_v15  ;;  %v6895_v4 = vld [vmem:[%s9441_s27 + $0x150] sm:$0xf0]  ;;  %v7429_v13 = vld [vmem:[%s9441_s27 + $0x548] sm:$0xf]  ;;  %v6989_v26 = vld [vmem:[%s9441_s27 + $0x1e0] sm:$0xf] }
  0xf1   : > { %v8383_v27 = vld [vmem:[%s9441_s27 + $0x20c] sm:$0xf0]  ;;  %v6997_v28 = vld [vmem:[%s9441_s27 + $0x1e8] sm:$0xf]  ;;  %v8504_v30 = vld [vmem:[%s9441_s27 + $0x5d4] sm:$0xf0] }
  0xf2   : > { %2933 = vmatpush.bf16.msra.mxu0 %v8607_v16  ;;  %8706 = vmatpush.bf16.msra.mxu3 %v8607_v16  ;;  %v8365_v16 = vld [vmem:[%s9441_s27 + $0x184] sm:$0xf]  ;;  %v7477_v29 = vld [vmem:[%s9441_s27 + $0x5a8] sm:$0xf]  ;;  %v8384_v31 = vld [vmem:[%s9441_s27 + $0x214] sm:$0xf0]  ;;  %v9582_v39 = vor.u32 %v8383_v27, %v6989_v26 }
  0xf3   : > { %3111 = vmatpush.bf16.msra.mxu2 %v9413_v17  ;;  %v8377_v32 = vld [vmem:[%s9441_s27 + $0x1e4] sm:$0xf]  ;;  %v6991_v37 = vld [vmem:[%s9441_s27 + $0x210] sm:$0xf0]  ;;  %v9584_v40 = vor.u32 %v8504_v30, %v7477_v29  ;;  %v9586_v41 = vor.u32 %v8384_v31, %v6997_v28  ;;  %v7037_v50 = vld [vmem:[%s9441_s27 + $0x240] sm:$0xf] }
  0xf4   : > { %3022 = vmatpush.bf16.msra.mxu1 %v8615_v18  ;;  %12716 = vst [vmem:[#allocation12_spill] sm:$0xff] %v9582_v39  ;;  %v9588_v42 = vor.u32 %v8377_v32, %v6991_v37  ;;  %v8630_v43 = vld [vmem:[%s12531_s3 + $0xc8] sm:$0xff]  ;;  %v8629_v44 = vld [vmem:[%s12531_s3 + $0xc0] sm:$0xff]  ;;  %v8668_v49 = vld [vmem:[%s12531_s3 + $0x1f8] sm:$0xff] }
  0xf5   : > { %12717 = vst [vmem:[#allocation13_spill] sm:$0xff] %v9584_v40  ;;  %v8395_v51 = vld [vmem:[%s9441_s27 + $0x26c] sm:$0xf0]  ;;  %v7045_v52 = vld [vmem:[%s9441_s27 + $0x248] sm:$0xf] }
  0xf6   : > { %2934 = vmatpush.bf16.msra.mxu0 %v8606_v19  ;;  %8707 = vmatpush.bf16.msra.mxu3 %v8606_v19  ;;  %12718 = vst [vmem:[#allocation14_spill] sm:$0xff] %v9586_v41  ;;  %v8318_v53 = vld [vmem:[%s9441_s27 + $0xc] sm:$0xf]  ;;  %v6759_v54 = vld [vmem:[%s9441_s27 + $0x38] sm:$0xf0] }
  0xf7   : > { %3112 = vmatpush.bf16.msra.mxu2 %v9425_v20  ;;  %12719 = vst [vmem:[#allocation15_spill] sm:$0xff] %v9588_v42  ;;  %v8396_v55 = vld [vmem:[%s9441_s27 + $0x274] sm:$0xf0]  ;;  %v8389_v56 = vld [vmem:[%s9441_s27 + $0x244] sm:$0xf]  ;;  %v8659_v26 = vld [vmem:[%s12531_s3 + $0x1b0] sm:$0xff] }
  0xf8   : > { %3023 = vmatpush.bf16.msra.mxu1 %v8614_v21  ;;  %v7133_v27 = vld [vmem:[%s9441_s27 + $0x300] sm:$0xf]  ;;  %v8419_v28 = vld [vmem:[%s9441_s27 + $0x32c] sm:$0xf0]  ;;  %v7141_v29 = vld [vmem:[%s9441_s27 + $0x308] sm:$0xf] }
  0xf9   : > { %v8342_v30 = vld [vmem:[%s9441_s27 + $0xcc] sm:$0xf]  ;;  %v6855_v31 = vld [vmem:[%s9441_s27 + $0xf8] sm:$0xf0]  ;;  %v8420_v32 = vld [vmem:[%s9441_s27 + $0x334] sm:$0xf0] }
  0xfa   : > { %2935 = vmatpush.bf16.msra.mxu0 %v8605_v22  ;;  %8708 = vmatpush.bf16.msra.mxu3 %v8605_v22  ;;  %v8413_v37 = vld [vmem:[%s9441_s27 + $0x304] sm:$0xf] }
  0xfb   : > { %3113 = vmatpush.bf16.msra.mxu2 %v9436_v23 }
  0xfc   : > { %3024 = vmatpush.bf16.msra.mxu1 %v8613_v24 }
  0xfd   : > { %2936 = vmatmul.bf16.vlgmr.msra.gmra.mxu0 %v9452_v33  ;;  %3006 = vmatmul.bf16.vlgmr.msra.gmra.mxu3 %v9454_v34 }
  0xfe   : > { %8709 = vmatpush.bf16.msrb.mxu3 %v9348_v3  ;;  %3114 = vmatmul.bf16.vlgmr.msra.gmra.mxu2 %v9456_v35  ;;  %v8353_v3 = vld [vmem:[%s9441_s27 + $0x124] sm:$0xf] }
  0xff   : > { %3025 = vmatmul.bf16.vlgmr.msra.gmra.mxu1 %v9458_v36 }
 0x102   : > { %8710 = vmatpush.bf16.msrb.mxu3 %v9363_v6  ;;  %v9520_v6 = vor.u32 %v8359_v62, %v6893_v61  ;;  %v7039_v61 = vld [vmem:[%s9441_s27 + $0x270] sm:$0xf0]  ;;  %v9611_v62 = vor.u32 %v8395_v51, %v7037_v50  ;;  %v9670_v50 = vor.u32 %v8420_v32, %v7141_v29 }
 0x104   : > { %12720 = vst [vmem:[#allocation16_spill] sm:$0xff] %v9611_v62 }
 0x105   : > { %12730 = vst [vmem:[#allocation26_spill] sm:$0xff] %v9670_v50 }
 0x106   : > { %8711 = vmatpush.bf16.msrb.mxu3 %v8618_v9  ;;  %v8636_v9 = vld [vmem:[%s12531_s3 + $0xf8] sm:$0xff] }
 0x10a   : > { %8712 = vmatpush.bf16.msrb.mxu3 %v9389_v12  ;;  %v6949_v12 = vld [vmem:[%s9441_s27 + $0x188] sm:$0xf] }
 0x10d   : > { %2941 = vmatmul.bf16.gmra.mxu0 %v9476_v45  ;;  %3011 = vmatmul.bf16.gmra.mxu3 %v9478_v46  ;;  %v8456_v46 = vld [vmem:[%s9441_s27 + $0x454] sm:$0xf0] }
 0x10e   : > { %8713 = vmatpush.bf16.msrb.mxu3 %v8616_v15  ;;  %3119 = vmatmul.bf16.gmra.mxu2 %v9480_v47  ;;  %v8372_v15 = vld [vmem:[%s9441_s27 + $0x1b4] sm:$0xf0] }
 0x10f   : > { %3030 = vmatmul.bf16.gmra.mxu1 %v9482_v48 }
 0x112   : > { %8714 = vmatpush.bf16.msrb.mxu3 %v8615_v18  ;;  %v6943_v18 = vld [vmem:[%s9441_s27 + $0x1b0] sm:$0xf0] }
 0x113   : > { %v9556_v22 = vor.u32 %v8365_v16, %v6943_v18  ;;  %v8401_v16 = vld [vmem:[%s9441_s27 + $0x2a4] sm:$0xf]  ;;  %v7087_v18 = vld [vmem:[%s9441_s27 + $0x2d0] sm:$0xf0] }
 0x115   : > { %12715 = vst [vmem:[#allocation11_spill] sm:$0xff] %v9556_v22 }
 0x116   : > { %8715 = vmatpush.bf16.msrb.mxu3 %v8614_v21  ;;  %v9554_v21 = vor.u32 %v8372_v15, %v6949_v12  ;;  %v7093_v12 = vld [vmem:[%s9441_s27 + $0x2a8] sm:$0xf]  ;;  %v8408_v15 = vld [vmem:[%s9441_s27 + $0x2d4] sm:$0xf0] }
 0x118   : > { %12714 = vst [vmem:[#allocation10_spill] sm:$0xff] %v9554_v21 }
 0x11a   : > { %8716 = vmatpush.bf16.msrb.mxu3 %v8613_v24  ;;  %v8633_v24 = vld [vmem:[%s12531_s3 + $0xe0] sm:$0xff] }
 0x11d   : > { %2946 = vmatmul.bf16.gmra.mxu0 %v9496_v57  ;;  %3095 = vmatmul.bf16.vlgmr.msrb.gmra.mxu3 %v9498_v58  ;;  %v8449_v58 = vld [vmem:[%s9441_s27 + $0x424] sm:$0xf] }
 0x11e   : > { %8717 = vmatpush.bf16.msra.mxu3 %v9343_v2  ;;  %3124 = vmatmul.bf16.gmra.mxu2 %v9501_v59  ;;  %v8360_v2 = vld [vmem:[%s9441_s27 + $0x154] sm:$0xf0] }
 0x11f   : > { %3035 = vmatmul.bf16.gmra.mxu1 %v9503_v60  ;;  %v9524_v7 = vor.u32 %v8360_v2, %v6901_v1  ;;  %v9617_v1 = vor.u32 %v8389_v56, %v7039_v61  ;;  %v8660_v2 = vld [vmem:[%s12531_s3 + $0x1b8] sm:$0xff]  ;;  %v8666_v56 = vld [vmem:[%s12531_s3 + $0x1e8] sm:$0xff] }
 0x120   : > { %3462 = vmatpush.bf16.msrb.mxu2 %v8660_v2 }
 0x121   : > { %12723 = vst [vmem:[#allocation19_spill] sm:$0xff] %v9617_v1 }
 0x122   : > { %8718 = vmatpush.bf16.msra.mxu3 %v9358_v5  ;;  %v9522_v5 = vor.u32 %v8497_v63, %v7471_v0  ;;  %v9613_v63 = vor.u32 %v8318_v53, %v6759_v54  ;;  %v9615_v0 = vor.u32 %v8396_v55, %v7045_v52  ;;  %v8643_v52 = vld [vmem:[%s12531_s3 + $0x130] sm:$0xff] }
 0x123   : > { %v8651_v53 = vld [vmem:[%s12531_s3 + $0x170] sm:$0xff] }
 0x124   : > { %12711 = vst [vmem:[#allocation7_spill] sm:$0xff] %v9522_v5  ;;  %3463 = vmatpush.bf16.msrb.mxu2 %v8659_v26  ;;  %v7183_v26 = vld [vmem:[%s9441_s27 + $0x390] sm:$0xf0] }
 0x125   : > { %12721 = vst [vmem:[#allocation17_spill] sm:$0xff] %v9613_v63 }
 0x126   : > { %8719 = vmatpush.bf16.msra.mxu3 %v9373_v8  ;;  %v9526_v8 = vor.u32 %v8353_v3, %v6895_v4  ;;  %12722 = vst [vmem:[#allocation18_spill] sm:$0xff] %v9615_v0  ;;  %v8644_v3 = vld [vmem:[%s12531_s3 + $0x138] sm:$0xff]  ;;  %v8667_v4 = vld [vmem:[%s12531_s3 + $0x1f0] sm:$0xff] }
 0x127   : > { %3284 = vmatpush.bf16.msrb.mxu0 %v8644_v3 }
 0x12a   : > { %8720 = vmatpush.bf16.msra.mxu3 %v9384_v11  ;;  %v8371_v11 = vld [vmem:[%s9441_s27 + $0x1ac] sm:$0xf0] }
 0x12b   : > { %v9550_v19 = vor.u32 %v8371_v11, %v6941_v10  ;;  %v7085_v10 = vld [vmem:[%s9441_s27 + $0x2a0] sm:$0xf]  ;;  %v8407_v11 = vld [vmem:[%s9441_s27 + $0x2cc] sm:$0xf0]  ;;  %3285 = vmatpush.bf16.msrb.mxu0 %v8643_v52 }
 0x12d   : > { %2951 = vmatmul.bf16.gmra.mxu0 %v9520_v6  ;;  %3100 = vmatmul.bf16.gmra.mxu3 %v9522_v5  ;;  %12712 = vst [vmem:[#allocation8_spill] sm:$0xff] %v9550_v19 }
 0x12e   : > { %8721 = vmatpush.bf16.msra.mxu3 %v9400_v14  ;;  %3129 = vmatmul.bf16.gmra.mxu2 %v9524_v7  ;;  %v8492_v14 = vld [vmem:[%s9441_s27 + $0x574] sm:$0xf0] }
 0x12f   : > { %3040 = vmatmul.bf16.gmra.mxu1 %v9526_v8 }
 0x132   : > { %8722 = vmatpush.bf16.msra.mxu3 %v9413_v17  ;;  %v8635_v17 = vld [vmem:[%s12531_s3 + $0xf0] sm:$0xff] }
 0x136   : > { %8723 = vmatpush.bf16.msra.mxu3 %v9425_v20  ;;  %v9552_v20 = vor.u32 %v8492_v14, %v7429_v13  ;;  %v8330_v13 = vld [vmem:[%s9441_s27 + $0x6c] sm:$0xf]  ;;  %v6807_v14 = vld [vmem:[%s9441_s27 + $0x98] sm:$0xf0] }
 0x138   : > { %12713 = vst [vmem:[#allocation9_spill] sm:$0xff] %v9552_v20 }
 0x13a   : > { %8724 = vmatpush.bf16.msra.mxu3 %v9436_v23  ;;  %v8634_v23 = vld [vmem:[%s12531_s3 + $0xe8] sm:$0xff] }
 0x13d   : > { %2956 = vmatmul.bf16.gmra.mxu0 %v9550_v19  ;;  %3184 = vmatmul.bf16.vlgmr.msra.gmra.mxu3 %v9552_v20  ;;  %v7279_v20 = vld [vmem:[%s9441_s27 + $0x450] sm:$0xf0] }
 0x13e   : > { %3195 = vmatpush.bf16.msrb.mxu3 %v8636_v9  ;;  %3134 = vmatmul.bf16.gmra.mxu2 %v9554_v21  ;;  %v8652_v9 = vld [vmem:[%s12531_s3 + $0x178] sm:$0xff]  ;;  %v8691_v19 = vld [vmem:[%s12531_s3 + $0x2b0] sm:$0xff] }
 0x13f   : > { %3045 = vmatmul.bf16.gmra.mxu1 %v9556_v22 }
 0x140   : > { %3373 = vmatpush.bf16.msrb.mxu1 %v8652_v9 }
 0x142   : > { %3196 = vmatpush.bf16.msrb.mxu3 %v8635_v17  ;;  %v9643_v17 = vor.u32 %v8407_v11, %v7085_v10  ;;  %v7181_v11 = vld [vmem:[%s9441_s27 + $0x360] sm:$0xf] }
 0x144   : > { %12724 = vst [vmem:[#allocation20_spill] sm:$0xff] %v9643_v17  ;;  %3374 = vmatpush.bf16.msrb.mxu1 %v8651_v53 }
 0x146   : > { %3197 = vmatpush.bf16.msrb.mxu3 %v8634_v23  ;;  %v9645_v23 = vor.u32 %v8330_v13, %v6807_v14  ;;  %v7189_v13 = vld [vmem:[%s9441_s27 + $0x368] sm:$0xf]  ;;  %v8354_v14 = vld [vmem:[%s9441_s27 + $0x12c] sm:$0xf] }
 0x148   : > { %12725 = vst [vmem:[#allocation21_spill] sm:$0xff] %v9645_v23 }
 0x14a   : > { %3198 = vmatpush.bf16.msrb.mxu3 %v8633_v24  ;;  %v9647_v24 = vor.u32 %v8408_v15, %v7093_v12  ;;  %v8431_v12 = vld [vmem:[%s9441_s27 + $0x38c] sm:$0xf0]  ;;  %v6903_v15 = vld [vmem:[%s9441_s27 + $0x158] sm:$0xf0] }
 0x14b   : > { %v9701_v29 = vor.u32 %v8431_v12, %v7181_v11  ;;  %v8650_v11 = vld [vmem:[%s12531_s3 + $0x168] sm:$0xff]  ;;  %v7229_v12 = vld [vmem:[%s9441_s27 + $0x3c0] sm:$0xf] }
 0x14c   : > { %12726 = vst [vmem:[#allocation22_spill] sm:$0xff] %v9647_v24  ;;  %3375 = vmatpush.bf16.msrb.mxu1 %v8650_v11 }
 0x14d   : > { %2961 = vmatmul.bf16.gmra.mxu0 %v9582_v39  ;;  %3189 = vmatmul.bf16.gmra.mxu3 %v9584_v40  ;;  %12732 = vst [vmem:[#allocation28_spill] sm:$0xff] %v9701_v29  ;;  %v6999_v40 = vld [vmem:[%s9441_s27 + $0x218] sm:$0xf0] }
 0x14e   : > { %3199 = vmatpush.bf16.msrb.mxu3 %v8632_v25  ;;  %3139 = vmatmul.bf16.gmra.mxu2 %v9586_v41  ;;  %v9649_v25 = vor.u32 %v8401_v16, %v7087_v18  ;;  %v8432_v16 = vld [vmem:[%s9441_s27 + $0x394] sm:$0xf0]  ;;  %v8425_v18 = vld [vmem:[%s9441_s27 + $0x364] sm:$0xf] }
 0x14f   : > { %3050 = vmatmul.bf16.gmra.mxu1 %v9588_v42  ;;  %v8692_v42 = vld [vmem:[%s12531_s3 + $0x2b8] sm:$0xff] }
 0x150   : > { %12727 = vst [vmem:[#allocation23_spill] sm:$0xff] %v9649_v25 }
 0x152   : > { %3200 = vmatpush.bf16.msrb.mxu3 %v8631_v38  ;;  %v7135_v38 = vld [vmem:[%s9441_s27 + $0x330] sm:$0xf0] }
 0x153   : > { %v9672_v51 = vor.u32 %v8413_v37, %v7135_v38  ;;  %v9707_v37 = vor.u32 %v8432_v16, %v7189_v13  ;;  %v9709_v38 = vor.u32 %v8425_v18, %v7183_v26  ;;  %v8443_v13 = vld [vmem:[%s9441_s27 + $0x3ec] sm:$0xf0]  ;;  %v6951_v16 = vld [vmem:[%s9441_s27 + $0x1b8] sm:$0xf0]  ;;  %v8444_v18 = vld [vmem:[%s9441_s27 + $0x3f4] sm:$0xf0] }
 0x154   : > { %v8437_v26 = vld [vmem:[%s9441_s27 + $0x3c4] sm:$0xf] }
 0x155   : > { %12731 = vst [vmem:[#allocation27_spill] sm:$0xff] %v9672_v51 }
 0x156   : > { %3201 = vmatpush.bf16.msrb.mxu3 %v8630_v43  ;;  %v9666_v43 = vor.u32 %v8419_v28, %v7133_v27  ;;  %12734 = vst [vmem:[#allocation30_spill] sm:$0xff] %v9707_v37 }
 0x157   : > { %12735 = vst [vmem:[#allocation31_spill] sm:$0xff] %v9709_v38 }
 0x158   : > { %12728 = vst [vmem:[#allocation24_spill] sm:$0xff] %v9666_v43 }
 0x15a   : > { %3202 = vmatpush.bf16.msrb.mxu3 %v8629_v44  ;;  %v9668_v44 = vor.u32 %v8342_v30, %v6855_v31  ;;  %v9703_v30 = vor.u32 %v8354_v14, %v6903_v15  ;;  %v7237_v14 = vld [vmem:[%s9441_s27 + $0x3c8] sm:$0xf]  ;;  %v8366_v15 = vld [vmem:[%s9441_s27 + $0x18c] sm:$0xf] }
 0x15c   : > { %12729 = vst [vmem:[#allocation25_spill] sm:$0xff] %v9668_v44 }
 0x15d   : > { %2966 = vmatmul.bf16.gmra.mxu0 %v9611_v62  ;;  %3203 = vmatmul.bf16.vlgmr.msrb.gmra.mxu3 %v9613_v63  ;;  %12733 = vst [vmem:[#allocation29_spill] sm:$0xff] %v9703_v30 }
 0x15e   : > { %3551 = vmatpush.bf16.msra.mxu3 %v8668_v49  ;;  %3144 = vmatmul.bf16.gmra.mxu2 %v9615_v0 }
 0x15f   : > { %3055 = vmatmul.bf16.gmra.mxu1 %v9617_v1 }
 0x162   : > { %3552 = vmatpush.bf16.msra.mxu3 %v8667_v4 }
 0x166   : > { %3553 = vmatpush.bf16.msra.mxu3 %v8666_v56 }
 0x16d   : > { %2971 = vmatmul.bf16.gmra.mxu0 %v9643_v17  ;;  %3208 = vmatmul.bf16.gmra.mxu3 %v9645_v23 }
 0x16e   : > { %3149 = vmatmul.bf16.gmra.mxu2 %v9647_v24 }
 0x16f   : > { %3060 = vmatmul.bf16.gmra.mxu1 %v9649_v25 }
 0x17a   : > { %v2937_v49 = vpop.f32.mrf.mxu0 }
 0x17c   : > { %v3026_v54 = vpop.f32.mrf.mxu1 }
 0x17d   : > { %v3027_v55 = vadd.f32 %v3026_v54, %v2937_v49  ;;  %2976 = vmatmul.bf16.gmra.mxu0 %v9666_v43  ;;  %3213 = vmatmul.bf16.gmra.mxu3 %v9668_v44 }
 0x17e   : > { %3154 = vmatmul.bf16.gmra.mxu2 %v9670_v50 }
 0x17f   : > { %3065 = vmatmul.bf16.gmra.mxu1 %v9672_v51 }
 0x180   : > { %v9687_v61 = vpop.f32.mrf.mxu3 }
 0x181   : > { %v3115_v2 = vpop.f32.mrf.mxu2 }
 0x182   : > { %v9689_v3 = vadd.f32 %v3115_v2, %v3027_v55  ;;  %v2939_v4 = vpop.f32.mrf.mxu0  ;;  %v8658_v2 = vld [vmem:[%s12531_s3 + $0x1a8] sm:$0xff] }
 0x183   : > { %3464 = vmatpush.bf16.msrb.mxu2 %v8658_v2 }
 0x184   : > { %v3028_v9 = vpop.f32.mrf.mxu1 }
 0x185   : > { %v3029_v10 = vadd.f32 %v3028_v9, %v2939_v4 }
 0x188   : > { %v9699_v27 = vpop.f32.mrf.mxu3 }
 0x189   : > { %v3117_v28 = vpop.f32.mrf.mxu2 }
 0x18a   : > { %v9705_v31 = vadd.f32 %v3117_v28, %v3029_v10  ;;  %v2942_v32 = vpop.f32.mrf.mxu0  ;;  %v8642_v10 = vld [vmem:[%s12531_s3 + $0x128] sm:$0xff]  ;;  %v7231_v28 = vld [vmem:[%s9441_s27 + $0x3f0] sm:$0xf0] }
 0x18b   : > { %3286 = vmatpush.bf16.msrb.mxu0 %v8642_v10  ;;  %v9746_v5 = vor.u32 %v8437_v26, %v7231_v28  ;;  %v7277_v28 = vld [vmem:[%s9441_s27 + $0x420] sm:$0xf] }
 0x18c   : > { %v3031_v49 = vpop.f32.mrf.mxu1 }
 0x18d   : > { %v3032_v52 = vadd.f32 %v3031_v49, %v2942_v32  ;;  %2981 = vmatmul.bf16.gmra.mxu0 %v9701_v29  ;;  %3218 = vmatmul.bf16.gmra.mxu3 %v9703_v30  ;;  %12739 = vst [vmem:[#allocation35_spill] sm:$0xff] %v9746_v5 }
 0x18e   : > { %3159 = vmatmul.bf16.gmra.mxu2 %v9707_v37 }
 0x18f   : > { %3070 = vmatmul.bf16.gmra.mxu1 %v9709_v38 }
 0x190   : > { %v9715_v53 = vpop.f32.mrf.mxu3 }
 0x191   : > { %v3120_v54 = vpop.f32.mrf.mxu2 }
 0x192   : > { %v9717_v55 = vadd.f32 %v3120_v54, %v3032_v52  ;;  %v2944_v56 = vpop.f32.mrf.mxu0  ;;  %v9738_v52 = vor.u32 %v8443_v13, %v7229_v12  ;;  %v9740_v54 = vor.u32 %v8366_v15, %v6951_v16 }
 0x194   : > { %v3033_v4 = vpop.f32.mrf.mxu1  ;;  %12736 = vst [vmem:[#allocation32_spill] sm:$0xff] %v9738_v52 }
 0x195   : > { %v3034_v9 = vadd.f32 %v3033_v4, %v2944_v56  ;;  %12737 = vst [vmem:[#allocation33_spill] sm:$0xff] %v9740_v54  ;;  %v9744_v4 = vor.u32 %v8444_v18, %v7237_v14 }
 0x197   : > { %12738 = vst [vmem:[#allocation34_spill] sm:$0xff] %v9744_v4 }
 0x198   : > { %v9736_v32 = vpop.f32.mrf.mxu3 }
 0x199   : > { %v3122_v49 = vpop.f32.mrf.mxu2 }
 0x19a   : > { %v9742_v56 = vadd.f32 %v3122_v49, %v3034_v9  ;;  %v2947_v2 = vpop.f32.mrf.mxu0  ;;  %v8665_v9 = vld [vmem:[%s12531_s3 + $0x1e0] sm:$0xff]  ;;  %v8455_v49 = vld [vmem:[%s9441_s27 + $0x44c] sm:$0xf0] }
 0x19b   : > { %3554 = vmatpush.bf16.msra.mxu3 %v8665_v9 }
 0x19c   : > { %v3036_v10 = vpop.f32.mrf.mxu1 }
 0x19d   : > { %v3037_v11 = vadd.f32 %v3036_v10, %v2947_v2  ;;  %2986 = vmatmul.bf16.gmra.mxu0 %v9738_v52  ;;  %3223 = vmatmul.bf16.gmra.mxu3 %v9740_v54  ;;  %v7285_v2 = vld [vmem:[%s9441_s27 + $0x428] sm:$0xf]  ;;  %v8378_v10 = vld [vmem:[%s9441_s27 + $0x1ec] sm:$0xf] }
 0x19e   : > { %3164 = vmatmul.bf16.gmra.mxu2 %v9744_v4  ;;  %v9783_v30 = vor.u32 %v8456_v46, %v7285_v2  ;;  %v8656_v46 = vld [vmem:[%s12531_s3 + $0x198] sm:$0xff]  ;;  %v8639_v2 = vld [vmem:[%s12531_s3 + $0x110] sm:$0xff]  ;;  %v8637_v4 = vld [vmem:[%s12531_s3 + $0x100] sm:$0xff] }
 0x19f   : > { %3075 = vmatmul.bf16.gmra.mxu1 %v9746_v5 }
 0x1a0   : > { %v3096_v12 = vpop.f32.mrf.mxu3  ;;  %12742 = vst [vmem:[#allocation38_spill] sm:$0xff] %v9783_v30 }
 0x1a1   : > { %v9756_v13 = vadd.f32 %v3096_v12, %v9687_v61  ;;  %v3125_v14 = vpop.f32.mrf.mxu2  ;;  %v9771_v12 = vor.u32 %v8455_v49, %v7277_v28 }
 0x1a2   : > { %v9758_v15 = vadd.f32 %v3125_v14, %v3037_v11  ;;  %v2949_v16 = vpop.f32.mrf.mxu0  ;;  %v9773_v11 = vor.u32 %v8378_v10, %v6999_v40  ;;  %v8641_v14 = vld [vmem:[%s12531_s3 + $0x120] sm:$0xff]  ;;  %v8655_v10 = vld [vmem:[%s12531_s3 + $0x190] sm:$0xff] }
 0x1a3   : > { %12740 = vst [vmem:[#allocation36_spill] sm:$0xff] %v9771_v12  ;;  %3287 = vmatpush.bf16.msrb.mxu0 %v8641_v14  ;;  %v8649_v40 = vld [vmem:[%s12531_s3 + $0x160] sm:$0xff] }
 0x1a4   : > { %v3038_v18 = vpop.f32.mrf.mxu1  ;;  %12741 = vst [vmem:[#allocation37_spill] sm:$0xff] %v9773_v11  ;;  %3376 = vmatpush.bf16.msrb.mxu1 %v8649_v40  ;;  %v8638_v40 = vld [vmem:[%s12531_s3 + $0x108] sm:$0xff] }
 0x1a5   : > { %v3039_v26 = vadd.f32 %v3038_v18, %v2949_v16  ;;  %v8657_v16 = vld [vmem:[%s12531_s3 + $0x1a0] sm:$0xff] }
 0x1a6   : > { %3465 = vmatpush.bf16.msrb.mxu2 %v8657_v16  ;;  %v8647_v16 = vld [vmem:[%s12531_s3 + $0x150] sm:$0xff] }
 0x1a8   : > { %v3098_v34 = vpop.f32.mrf.mxu3 }
 0x1a9   : > { %v9769_v9 = vadd.f32 %v3098_v34, %v9699_v27  ;;  %v3127_v61 = vpop.f32.mrf.mxu2  ;;  %v9785_v34 = vor.u32 %v8449_v58, %v7279_v20  ;;  %v8648_v58 = vld [vmem:[%s12531_s3 + $0x158] sm:$0xff] }
 0x1aa   : > { %v9781_v18 = vadd.f32 %v3127_v61, %v3039_v26  ;;  %v2952_v54 = vpop.f32.mrf.mxu0  ;;  %v8640_v26 = vld [vmem:[%s12531_s3 + $0x118] sm:$0xff]  ;;  %3466 = vmatpush.bf16.msrb.mxu2 %v8656_v46  ;;  %3377 = vmatpush.bf16.msrb.mxu1 %v8648_v58  ;;  %v8467_v46 = vld [vmem:[%s9441_s27 + $0x4ac] sm:$0xf0]  ;;  %v8390_v58 = vld [vmem:[%s9441_s27 + $0x24c] sm:$0xf] }
 0x1ab   : > { %12743 = vst [vmem:[#allocation39_spill] sm:$0xff] %v9785_v34  ;;  %3288 = vmatpush.bf16.msrb.mxu0 %v8640_v26  ;;  %v7325_v26 = vld [vmem:[%s9441_s27 + $0x480] sm:$0xf] }
 0x1ac   : > { %v3041_v27 = vpop.f32.mrf.mxu1 }
 0x1ad   : > { %v3042_v28 = vadd.f32 %v3041_v27, %v2952_v54  ;;  %2991 = vmatmul.bf16.gmra.mxu0 %v9771_v12  ;;  %3228 = vmatmul.bf16.gmra.mxu3 %v9773_v11  ;;  %v8461_v11 = vld [vmem:[%s9441_s27 + $0x484] sm:$0xf]  ;;  %v9837_v12 = vor.u32 %v8467_v46, %v7325_v26 }
 0x1ae   : > { %3169 = vmatmul.bf16.gmra.mxu2 %v9783_v30  ;;  %3378 = vmatpush.bf16.msrb.mxu1 %v8647_v16  ;;  %v8653_v16 = vld [vmem:[%s12531_s3 + $0x180] sm:$0xff] }
 0x1af   : > { %3080 = vmatmul.bf16.gmra.mxu1 %v9785_v34  ;;  %3289 = vmatpush.bf16.msrb.mxu0 %v8639_v2  ;;  %v7047_v2 = vld [vmem:[%s9441_s27 + $0x278] sm:$0xf0]  ;;  %v7327_v34 = vld [vmem:[%s9441_s27 + $0x4b0] sm:$0xf0]  ;;  %12744 = vst [vmem:[#allocation40_spill] sm:$0xff] %v9837_v12 }
 0x1b0   : > { %v3101_v20 = vpop.f32.mrf.mxu3  ;;  %3467 = vmatpush.bf16.msrb.mxu2 %v8655_v10  ;;  %v8646_v10 = vld [vmem:[%s12531_s3 + $0x148] sm:$0xff]  ;;  %v9839_v5 = vor.u32 %v8390_v58, %v7047_v2  ;;  %v8645_v26 = vld [vmem:[%s12531_s3 + $0x140] sm:$0xff]  ;;  %v8479_v2 = vld [vmem:[%s9441_s27 + $0x50c] sm:$0xf0] }
 0x1b1   : > { %v9804_v54 = vadd.f32 %v3101_v20, %v9715_v53  ;;  %v3130_v49 = vpop.f32.mrf.mxu2  ;;  %v7333_v20 = vld [vmem:[%s9441_s27 + $0x488] sm:$0xf]  ;;  %v7373_v58 = vld [vmem:[%s9441_s27 + $0x4e0] sm:$0xf] }
 0x1b2   : > { %v9812_v61 = vadd.f32 %v3130_v49, %v3042_v28  ;;  %v2954_v14 = vpop.f32.mrf.mxu0  ;;  %v8654_v28 = vld [vmem:[%s12531_s3 + $0x188] sm:$0xff]  ;;  %v8468_v49 = vld [vmem:[%s9441_s27 + $0x4b4] sm:$0xf0]  ;;  %12745 = vst [vmem:[#allocation41_spill] sm:$0xff] %v9839_v5  ;;  %3379 = vmatpush.bf16.msrb.mxu1 %v8646_v10 }
 0x1b3   : > { %3290 = vmatpush.bf16.msrb.mxu0 %v8638_v40  ;;  %v7381_v10 = vld [vmem:[%s9441_s27 + $0x4e8] sm:$0xf] }
 0x1b4   : > { %v3043_v53 = vpop.f32.mrf.mxu1  ;;  %3468 = vmatpush.bf16.msrb.mxu2 %v8654_v28  ;;  %v9849_v28 = vor.u32 %v8468_v49, %v7333_v20 }
 0x1b5   : > { %v3044_v27 = vadd.f32 %v3043_v53, %v2954_v14 }
 0x1b6   : > { %12746 = vst [vmem:[#allocation42_spill] sm:$0xff] %v9849_v28  ;;  %3380 = vmatpush.bf16.msrb.mxu1 %v8645_v26  ;;  %v7375_v26 = vld [vmem:[%s9441_s27 + $0x510] sm:$0xf0] }
 0x1b7   : > { %3291 = vmatpush.bf16.msrb.mxu0 %v8637_v4 }
 0x1b8   : > { %v3103_v14 = vpop.f32.mrf.mxu3  ;;  %3469 = vmatpush.bf16.msrb.mxu2 %v8653_v16  ;;  %v8402_v16 = vld [vmem:[%s9441_s27 + $0x2ac] sm:$0xf] }
 0x1b9   : > { %v9835_v53 = vadd.f32 %v3103_v14, %v9736_v32  ;;  %v3132_v30 = vpop.f32.mrf.mxu2  ;;  %v9851_v32 = vor.u32 %v8461_v11, %v7327_v34 }
 0x1ba   : > { %v9847_v40 = vadd.f32 %v3132_v30, %v3044_v27  ;;  %v2957_v44 = vpop.f32.mrf.mxu0  ;;  %v8664_v30 = vld [vmem:[%s12531_s3 + $0x1d8] sm:$0xff] }
 0x1bb   : > { %12747 = vst [vmem:[#allocation43_spill] sm:$0xff] %v9851_v32  ;;  %3555 = vmatpush.bf16.msra.mxu3 %v8664_v30 }
 0x1bc   : > { %v3046_v14 = vpop.f32.mrf.mxu1  ;;  %3818 = vmatpush.bf16.msra.mxu2 %v8692_v42  ;;  %v8409_v42 = vld [vmem:[%s9441_s27 + $0x2dc] sm:$0xf0] }
 0x1bd   : > { %v3047_v46 = vadd.f32 %v3046_v14, %v2957_v44  ;;  %2996 = vmatmul.bf16.gmra.mxu0 %v9837_v12  ;;  %3233 = vmatmul.bf16.gmra.mxu3 %v9839_v5  ;;  %v7095_v14 = vld [vmem:[%s9441_s27 + $0x2d8] sm:$0xf0]  ;;  %v8480_v5 = vld [vmem:[%s9441_s27 + $0x514] sm:$0xf0] }
 0x1be   : > { %3174 = vmatmul.bf16.gmra.mxu2 %v9849_v28 }
 0x1bf   : > { %3085 = vmatmul.bf16.gmra.mxu1 %v9851_v32  ;;  %v8473_v32 = vld [vmem:[%s9441_s27 + $0x4e4] sm:$0xf] }
 0x1c0   : > { %v3185_v44 = vpop.f32.mrf.mxu3  ;;  %3819 = vmatpush.bf16.msra.mxu2 %v8691_v19  ;;  %v7197_v19 = vld [vmem:[%s9441_s27 + $0x370] sm:$0xf] }
 0x1c1   : > { %v3135_v4 = vpop.f32.mrf.mxu2  ;;  %v9864_v11 = vadd.f32 %v3185_v44, %v9756_v13  ;;  %v9879_v13 = vor.u32 %v8479_v2, %v7373_v58  ;;  %v8414_v58 = vld [vmem:[%s9441_s27 + $0x30c] sm:$0xf]  ;;  %v7143_v2 = vld [vmem:[%s9441_s27 + $0x338] sm:$0xf0] }
 0x1c2   : > { %v9866_v34 = vadd.f32 %v3135_v4, %v3047_v46  ;;  %v2959_v27 = vpop.f32.mrf.mxu0  ;;  %v9881_v46 = vor.u32 %v8402_v16, %v7095_v14  ;;  %v8325_v16 = vld [vmem:[%s9441_s27 + $0x3c] sm:$0xf0]  ;;  %v6773_v14 = vld [vmem:[%s9441_s27 + $0x18] sm:$0xf] }
 0x1c3   : > { %12748 = vst [vmem:[#allocation44_spill] sm:$0xff] %v9879_v13 }
 0x1c4   : > { %v3048_v20 = vpop.f32.mrf.mxu1  ;;  %12749 = vst [vmem:[#allocation45_spill] sm:$0xff] %v9881_v46 }
 0x1c5   : > { %v3049_v49 = vadd.f32 %v3048_v20, %v2959_v27  ;;  %v9885_v27 = vor.u32 %v8480_v5, %v7381_v10  ;;  %v9887_v20 = vor.u32 %v8473_v32, %v7375_v26  ;;  %v6765_v10 = vld [vmem:[%s9441_s27 + $0x10] sm:$0xf]  ;;  %v8326_v26 = vld [vmem:[%s9441_s27 + $0x44] sm:$0xf0] }
 0x1c7   : > { %12750 = vst [vmem:[#allocation46_spill] sm:$0xff] %v9885_v27 }
 0x1c8   : > { %v3187_v28 = vpop.f32.mrf.mxu3  ;;  %12751 = vst [vmem:[#allocation47_spill] sm:$0xff] %v9887_v20 }
 0x1c9   : > { %v3137_v12 = vpop.f32.mrf.mxu2  ;;  %v9877_v30 = vadd.f32 %v3187_v28, %v9769_v9 }
 0x1ca   : > { %v9883_v44 = vadd.f32 %v3137_v12, %v3049_v49  ;;  %v2962_v4 = vpop.f32.mrf.mxu0 }
 0x1cc   : > { %v3051_v52 = vpop.f32.mrf.mxu1 }
 0x1cd   : > { %v3052_v38 = vadd.f32 %v3051_v52, %v2962_v4  ;;  %3001 = vmatmul.bf16.gmra.mxu0 %v9879_v13  ;;  %3238 = vmatmul.bf16.gmra.mxu3 %v9881_v46  ;;  %v8319_v4 = vld [vmem:[%s9441_s27 + $0x14] sm:$0xf]  ;;  %v6767_v46 = vld [vmem:[%s9441_s27 + $0x40] sm:$0xf0] }
 0x1ce   : > { %3179 = vmatmul.bf16.gmra.mxu2 %v9885_v27 }
 0x1cf   : > { %3090 = vmatmul.bf16.gmra.mxu1 %v9887_v20 }
 0x1d0   : > { %v3190_v5 = vpop.f32.mrf.mxu3 }
 0x1d1   : > { %v3140_v9 = vpop.f32.mrf.mxu2  ;;  %v9894_v12 = vadd.f32 %v3190_v5, %v9804_v54  ;;  %v9909_v54 = vor.u32 %v8414_v58, %v7143_v2 }
 0x1d2   : > { %v9896_v28 = vadd.f32 %v3140_v9, %v3052_v38  ;;  %v2964_v52 = vpop.f32.mrf.mxu0  ;;  %v9911_v38 = vor.u32 %v8325_v16, %v6765_v10  ;;  %v8426_v10 = vld [vmem:[%s9441_s27 + $0x36c] sm:$0xf]  ;;  %v7191_v16 = vld [vmem:[%s9441_s27 + $0x398] sm:$0xf0] }
 0x1d3   : > { %12752 = vst [vmem:[#allocation48_spill] sm:$0xff] %v9909_v54 }
 0x1d4   : > { %v3053_v32 = vpop.f32.mrf.mxu1  ;;  %12753 = vst [vmem:[#allocation49_spill] sm:$0xff] %v9911_v38 }
 0x1d5   : > { %v3054_v49 = vadd.f32 %v3053_v32, %v2964_v52  ;;  %v9915_v52 = vor.u32 %v8326_v26, %v6773_v14  ;;  %v9917_v32 = vor.u32 %v8319_v4, %v6767_v46  ;;  %v6813_v14 = vld [vmem:[%s9441_s27 + $0x70] sm:$0xf]  ;;  %v8337_v26 = vld [vmem:[%s9441_s27 + $0x9c] sm:$0xf0]  ;;  %v6821_v4 = vld [vmem:[%s9441_s27 + $0x78] sm:$0xf] }
 0x1d7   : > { %12754 = vst [vmem:[#allocation50_spill] sm:$0xff] %v9915_v52 }
 0x1d8   : > { %v3192_v27 = vpop.f32.mrf.mxu3  ;;  %12755 = vst [vmem:[#allocation51_spill] sm:$0xff] %v9917_v32 }
 0x1d9   : > { %v3142_v20 = vpop.f32.mrf.mxu2  ;;  %v9907_v13 = vadd.f32 %v3192_v27, %v9835_v53  ;;  %v8663_v53 = vld [vmem:[%s12531_s3 + $0x1d0] sm:$0xff] }
 0x1da   : > { %v9913_v5 = vadd.f32 %v3142_v20, %v3054_v49  ;;  %v2967_v9 = vpop.f32.mrf.mxu0  ;;  %3556 = vmatpush.bf16.msra.mxu3 %v8663_v53 }
 0x1dc   : > { %v3056_v37 = vpop.f32.mrf.mxu1 }
 0x1dd   : > { %v3057_v23 = vadd.f32 %v3056_v37, %v2967_v9  ;;  %3243 = vmatmul.bf16.gmra.mxu3 %v9909_v54  ;;  %3292 = vmatmul.bf16.vlgmr.msrb.gmra.mxu0 %v9911_v38  ;;  %v8338_v9 = vld [vmem:[%s9441_s27 + $0xa4] sm:$0xf0] }
 0x1de   : > { %3470 = vmatmul.bf16.vlgmr.msrb.gmra.mxu2 %v9915_v52  ;;  %v6815_v52 = vld [vmem:[%s9441_s27 + $0xa0] sm:$0xf0] }
 0x1df   : > { %3381 = vmatmul.bf16.vlgmr.msrb.gmra.mxu1 %v9917_v32  ;;  %v8331_v32 = vld [vmem:[%s9441_s27 + $0x74] sm:$0xf] }
 0x1e0   : > { %v3204_v46 = vpop.f32.mrf.mxu3 }
 0x1e1   : > { %v3145_v37 = vpop.f32.mrf.mxu2  ;;  %v9927_v27 = vadd.f32 %v3204_v46, %v9689_v3  ;;  %v9942_v3 = vor.u32 %v8426_v10, %v7191_v16  ;;  %v8438_v10 = vld [vmem:[%s9441_s27 + $0x3cc] sm:$0xf]  ;;  %v7239_v16 = vld [vmem:[%s9441_s27 + $0x3f8] sm:$0xf0] }
 0x1e2   : > { %v9929_v20 = vadd.f32 %v3145_v37, %v3057_v23  ;;  %v2969_v49 = vpop.f32.mrf.mxu0  ;;  %v9944_v23 = vor.u32 %v8337_v26, %v6813_v14  ;;  %v6861_v14 = vld [vmem:[%s9441_s27 + $0xd0] sm:$0xf]  ;;  %v8349_v26 = vld [vmem:[%s9441_s27 + $0xfc] sm:$0xf0] }
 0x1e3   : > { %12756 = vst [vmem:[#allocation52_spill] sm:$0xff] %v9942_v3 }
 0x1e4   : > { %v3058_v58 = vpop.f32.mrf.mxu1  ;;  %12757 = vst [vmem:[#allocation53_spill] sm:$0xff] %v9944_v23 }
 0x1e5   : > { %v3059_v2 = vadd.f32 %v3058_v58, %v2969_v49  ;;  %v9948_v49 = vor.u32 %v8338_v9, %v6821_v4  ;;  %v9950_v58 = vor.u32 %v8331_v32, %v6815_v52  ;;  %v6869_v4 = vld [vmem:[%s9441_s27 + $0xd8] sm:$0xf]  ;;  %v8350_v9 = vld [vmem:[%s9441_s27 + $0x104] sm:$0xf0] }
 0x1e7   : > { %12758 = vst [vmem:[#allocation54_spill] sm:$0xff] %v9948_v49 }
 0x1e8   : > { %v3206_v38 = vpop.f32.mrf.mxu3  ;;  %12759 = vst [vmem:[#allocation55_spill] sm:$0xff] %v9950_v58 }
 0x1e9   : > { %v3147_v54 = vpop.f32.mrf.mxu2  ;;  %v9940_v53 = vadd.f32 %v3206_v38, %v9705_v31 }
 0x1ea   : > { %v9946_v46 = vadd.f32 %v3147_v54, %v3059_v2  ;;  %v2972_v37 = vpop.f32.mrf.mxu0 }
 0x1ec   : > { %v3061_v29 = vpop.f32.mrf.mxu1 }
 0x1ed   : > { %v3062_v51 = vadd.f32 %v3061_v29, %v2972_v37  ;;  %3248 = vmatmul.bf16.gmra.mxu3 %v9942_v3  ;;  %3297 = vmatmul.bf16.gmra.mxu0 %v9944_v23  ;;  %v8343_v37 = vld [vmem:[%s9441_s27 + $0xd4] sm:$0xf] }
 0x1ee   : > { %3475 = vmatmul.bf16.gmra.mxu2 %v9948_v49  ;;  %v6863_v49 = vld [vmem:[%s9441_s27 + $0x100] sm:$0xf0] }
 0x1ef   : > { %3386 = vmatmul.bf16.gmra.mxu1 %v9950_v58 }
 0x1f0   : > { %v3209_v31 = vpop.f32.mrf.mxu3 }
 0x1f1   : > { %v3150_v54 = vpop.f32.mrf.mxu2  ;;  %v9957_v38 = vadd.f32 %v3209_v31, %v9717_v55  ;;  %v9972_v55 = vor.u32 %v8438_v10, %v7239_v16 }
 0x1f2   : > { %v9959_v52 = vadd.f32 %v3150_v54, %v3062_v51  ;;  %v2974_v29 = vpop.f32.mrf.mxu0  ;;  %v9974_v51 = vor.u32 %v8349_v26, %v6861_v14  ;;  %v8450_v14 = vld [vmem:[%s9441_s27 + $0x42c] sm:$0xf]  ;;  %v7287_v26 = vld [vmem:[%s9441_s27 + $0x458] sm:$0xf0] }
 0x1f3   : > { %12760 = vst [vmem:[#allocation56_spill] sm:$0xff] %v9972_v55 }
 0x1f4   : > { %v3063_v32 = vpop.f32.mrf.mxu1  ;;  %12761 = vst [vmem:[#allocation57_spill] sm:$0xff] %v9974_v51 }
 0x1f5   : > { %v3064_v2 = vadd.f32 %v3063_v32, %v2974_v29  ;;  %v9978_v29 = vor.u32 %v8350_v9, %v6869_v4  ;;  %v9980_v32 = vor.u32 %v8343_v37, %v6863_v49  ;;  %v6909_v4 = vld [vmem:[%s9441_s27 + $0x130] sm:$0xf]  ;;  %v8361_v9 = vld [vmem:[%s9441_s27 + $0x15c] sm:$0xf0]  ;;  %v6917_v37 = vld [vmem:[%s9441_s27 + $0x138] sm:$0xf] }
 0x1f7   : > { %12762 = vst [vmem:[#allocation58_spill] sm:$0xff] %v9978_v29 }
 0x1f8   : > { %v3211_v23 = vpop.f32.mrf.mxu3  ;;  %12763 = vst [vmem:[#allocation59_spill] sm:$0xff] %v9980_v32 }
 0x1f9   : > { %v3152_v58 = vpop.f32.mrf.mxu2  ;;  %v9970_v3 = vadd.f32 %v3211_v23, %v9742_v56  ;;  %v8662_v56 = vld [vmem:[%s12531_s3 + $0x1c8] sm:$0xff] }
 0x1fa   : > { %v9976_v31 = vadd.f32 %v3152_v58, %v3064_v2  ;;  %v2977_v54 = vpop.f32.mrf.mxu0  ;;  %3557 = vmatpush.bf16.msra.mxu3 %v8662_v56 }
 0x1fc   : > { %v3066_v50 = vpop.f32.mrf.mxu1 }
 0x1fd   : > { %v3067_v63 = vadd.f32 %v3066_v50, %v2977_v54  ;;  %3253 = vmatmul.bf16.gmra.mxu3 %v9972_v55  ;;  %3302 = vmatmul.bf16.gmra.mxu0 %v9974_v51  ;;  %v8362_v54 = vld [vmem:[%s9441_s27 + $0x164] sm:$0xf0] }
 0x1fe   : > { %3480 = vmatmul.bf16.gmra.mxu2 %v9978_v29  ;;  %v6911_v29 = vld [vmem:[%s9441_s27 + $0x160] sm:$0xf0] }
 0x1ff   : > { %3391 = vmatmul.bf16.gmra.mxu1 %v9980_v32  ;;  %v8355_v32 = vld [vmem:[%s9441_s27 + $0x134] sm:$0xf] }
 0x200   : > { %v3214_v23 = vpop.f32.mrf.mxu3 }
 0x201   : > { %v3155_v50 = vpop.f32.mrf.mxu2  ;;  %v9990_v49 = vadd.f32 %v3214_v23, %v9758_v15  ;;  %v10005_v15 = vor.u32 %v8450_v14, %v7287_v26  ;;  %v8462_v14 = vld [vmem:[%s9441_s27 + $0x48c] sm:$0xf]  ;;  %v7335_v26 = vld [vmem:[%s9441_s27 + $0x4b8] sm:$0xf0] }
 0x202   : > { %v9992_v58 = vadd.f32 %v3155_v50, %v3067_v63  ;;  %v2979_v2 = vpop.f32.mrf.mxu0  ;;  %v10007_v63 = vor.u32 %v8361_v9, %v6909_v4  ;;  %v6957_v4 = vld [vmem:[%s9441_s27 + $0x190] sm:$0xf]  ;;  %v8373_v9 = vld [vmem:[%s9441_s27 + $0x1bc] sm:$0xf0] }
 0x203   : > { %12764 = vst [vmem:[#allocation60_spill] sm:$0xff] %v10005_v15 }
 0x204   : > { %v3068_v10 = vpop.f32.mrf.mxu1  ;;  %12765 = vst [vmem:[#allocation61_spill] sm:$0xff] %v10007_v63 }
 0x205   : > { %v3069_v16 = vadd.f32 %v3068_v10, %v2979_v2  ;;  %v10011_v2 = vor.u32 %v8362_v54, %v6917_v37  ;;  %v10013_v10 = vor.u32 %v8355_v32, %v6911_v29  ;;  %v6965_v37 = vld [vmem:[%s9441_s27 + $0x198] sm:$0xf]  ;;  %v8374_v54 = vld [vmem:[%s9441_s27 + $0x1c4] sm:$0xf0] }
 0x207   : > { %12766 = vst [vmem:[#allocation62_spill] sm:$0xff] %v10011_v2 }
 0x208   : > { %v3216_v51 = vpop.f32.mrf.mxu3  ;;  %12767 = vst [vmem:[#allocation63_spill] sm:$0xff] %v10013_v10 }
 0x209   : > { %v3157_v55 = vpop.f32.mrf.mxu2  ;;  %v10003_v56 = vadd.f32 %v3216_v51, %v9781_v18 }
 0x20a   : > { %v10009_v23 = vadd.f32 %v3157_v55, %v3069_v16  ;;  %v2982_v50 = vpop.f32.mrf.mxu0 }
 0x20c   : > { %v3071_v43 = vpop.f32.mrf.mxu1 }
 0x20d   : > { %v3072_v25 = vadd.f32 %v3071_v43, %v2982_v50  ;;  %3258 = vmatmul.bf16.gmra.mxu3 %v10005_v15  ;;  %3307 = vmatmul.bf16.gmra.mxu0 %v10007_v63  ;;  %v8367_v50 = vld [vmem:[%s9441_s27 + $0x194] sm:$0xf] }
 0x20e   : > { %3485 = vmatmul.bf16.gmra.mxu2 %v10011_v2  ;;  %v6959_v2 = vld [vmem:[%s9441_s27 + $0x1c0] sm:$0xf0] }
 0x20f   : > { %3396 = vmatmul.bf16.gmra.mxu1 %v10013_v10 }
 0x210   : > { %v3219_v18 = vpop.f32.mrf.mxu3 }
 0x211   : > { %v3160_v55 = vpop.f32.mrf.mxu2  ;;  %v10020_v51 = vadd.f32 %v3219_v18, %v9812_v61  ;;  %v10035_v61 = vor.u32 %v8462_v14, %v7335_v26 }
 0x212   : > { %v10022_v29 = vadd.f32 %v3160_v55, %v3072_v25  ;;  %v2984_v43 = vpop.f32.mrf.mxu0  ;;  %v10037_v25 = vor.u32 %v8373_v9, %v6957_v4  ;;  %v8474_v4 = vld [vmem:[%s9441_s27 + $0x4ec] sm:$0xf]  ;;  %v7383_v9 = vld [vmem:[%s9441_s27 + $0x518] sm:$0xf0] }
 0x213   : > { %12768 = vst [vmem:[#allocation64_spill] sm:$0xff] %v10035_v61 }
 0x214   : > { %v3073_v32 = vpop.f32.mrf.mxu1  ;;  %12769 = vst [vmem:[#allocation65_spill] sm:$0xff] %v10037_v25 }
 0x215   : > { %v3074_v16 = vadd.f32 %v3073_v32, %v2984_v43  ;;  %v10041_v43 = vor.u32 %v8374_v54, %v6965_v37  ;;  %v10043_v32 = vor.u32 %v8367_v50, %v6959_v2  ;;  %v7005_v37 = vld [vmem:[%s9441_s27 + $0x1f0] sm:$0xf]  ;;  %v8385_v54 = vld [vmem:[%s9441_s27 + $0x21c] sm:$0xf0]  ;;  %v7013_v50 = vld [vmem:[%s9441_s27 + $0x1f8] sm:$0xf] }
 0x217   : > { %12770 = vst [vmem:[#allocation66_spill] sm:$0xff] %v10041_v43 }
 0x218   : > { %v3221_v63 = vpop.f32.mrf.mxu3  ;;  %12771 = vst [vmem:[#allocation67_spill] sm:$0xff] %v10043_v32 }
 0x219   : > { %v3162_v10 = vpop.f32.mrf.mxu2  ;;  %v10033_v15 = vadd.f32 %v3221_v63, %v9847_v40  ;;  %v8661_v40 = vld [vmem:[%s12531_s3 + $0x1c0] sm:$0xff] }
 0x21a   : > { %v10039_v18 = vadd.f32 %v3162_v10, %v3074_v16  ;;  %v2987_v55 = vpop.f32.mrf.mxu0  ;;  %3558 = vmatpush.bf16.msra.mxu3 %v8661_v40 }
 0x21c   : > { %v3076_v24 = vpop.f32.mrf.mxu1 }
 0x21d   : > { %v3077_v17 = vadd.f32 %v3076_v24, %v2987_v55  ;;  %3263 = vmatmul.bf16.gmra.mxu3 %v10035_v61  ;;  %3312 = vmatmul.bf16.gmra.mxu0 %v10037_v25  ;;  %v8386_v55 = vld [vmem:[%s9441_s27 + $0x224] sm:$0xf0] }
 0x21e   : > { %3490 = vmatmul.bf16.gmra.mxu2 %v10041_v43  ;;  %v7007_v43 = vld [vmem:[%s9441_s27 + $0x220] sm:$0xf0] }
 0x21f   : > { %3401 = vmatmul.bf16.gmra.mxu1 %v10043_v32  ;;  %v8379_v32 = vld [vmem:[%s9441_s27 + $0x1f4] sm:$0xf] }
 0x220   : > { %v3224_v63 = vpop.f32.mrf.mxu3 }
 0x221   : > { %v3165_v24 = vpop.f32.mrf.mxu2  ;;  %v10053_v2 = vadd.f32 %v3224_v63, %v9866_v34  ;;  %v10068_v34 = vor.u32 %v8474_v4, %v7383_v9  ;;  %v8486_v4 = vld [vmem:[%s9441_s27 + $0x54c] sm:$0xf]  ;;  %v7431_v9 = vld [vmem:[%s9441_s27 + $0x578] sm:$0xf0] }
 0x222   : > { %v10055_v10 = vadd.f32 %v3165_v24, %v3077_v17  ;;  %v2989_v16 = vpop.f32.mrf.mxu0  ;;  %v10070_v17 = vor.u32 %v8385_v54, %v7005_v37  ;;  %v7053_v37 = vld [vmem:[%s9441_s27 + $0x250] sm:$0xf]  ;;  %v8397_v54 = vld [vmem:[%s9441_s27 + $0x27c] sm:$0xf0] }
 0x223   : > { %12772 = vst [vmem:[#allocation68_spill] sm:$0xff] %v10068_v34 }
 0x224   : > { %v3078_v14 = vpop.f32.mrf.mxu1  ;;  %12773 = vst [vmem:[#allocation69_spill] sm:$0xff] %v10070_v17 }
 0x225   : > { %v3079_v26 = vadd.f32 %v3078_v14, %v2989_v16  ;;  %v10074_v16 = vor.u32 %v8386_v55, %v7013_v50  ;;  %v10076_v14 = vor.u32 %v8379_v32, %v7007_v43  ;;  %v7061_v50 = vld [vmem:[%s9441_s27 + $0x258] sm:$0xf]  ;;  %v8398_v55 = vld [vmem:[%s9441_s27 + $0x284] sm:$0xf0] }
 0x227   : > { %12774 = vst [vmem:[#allocation70_spill] sm:$0xff] %v10074_v16 }
 0x228   : > { %v3226_v25 = vpop.f32.mrf.mxu3  ;;  %12775 = vst [vmem:[#allocation71_spill] sm:$0xff] %v10076_v14 }
 0x229   : > { %v3167_v61 = vpop.f32.mrf.mxu2  ;;  %v10066_v40 = vadd.f32 %v3226_v25, %v9883_v44 }
 0x22a   : > { %v10072_v63 = vadd.f32 %v3167_v61, %v3079_v26  ;;  %v2992_v24 = vpop.f32.mrf.mxu0 }
 0x22c   : > { %v3081_v1 = vpop.f32.mrf.mxu1 }
 0x22d   : > { %v3082_v0 = vadd.f32 %v3081_v1, %v2992_v24  ;;  %3268 = vmatmul.bf16.gmra.mxu3 %v10068_v34  ;;  %3317 = vmatmul.bf16.gmra.mxu0 %v10070_v17  ;;  %v8391_v24 = vld [vmem:[%s9441_s27 + $0x254] sm:$0xf] }
 0x22e   : > { %3495 = vmatmul.bf16.gmra.mxu2 %v10074_v16  ;;  %v7055_v16 = vld [vmem:[%s9441_s27 + $0x280] sm:$0xf0] }
 0x22f   : > { %3406 = vmatmul.bf16.gmra.mxu1 %v10076_v14 }
 0x230   : > { %v3229_v44 = vpop.f32.mrf.mxu3 }
 0x231   : > { %v3170_v61 = vpop.f32.mrf.mxu2  ;;  %v10083_v25 = vadd.f32 %v3229_v44, %v9896_v28  ;;  %v10098_v28 = vor.u32 %v8486_v4, %v7431_v9 }
 0x232   : > { %v10085_v43 = vadd.f32 %v3170_v61, %v3082_v0  ;;  %v2994_v1 = vpop.f32.mrf.mxu0  ;;  %v10100_v0 = vor.u32 %v8397_v54, %v7053_v37 }
 0x233   : > { %12776 = vst [vmem:[#allocation72_spill] sm:$0xff] %v10098_v28 }
 0x234   : > { %v3083_v32 = vpop.f32.mrf.mxu1  ;;  %12777 = vst [vmem:[#allocation73_spill] sm:$0xff] %v10100_v0 }
 0x235   : > { %v3084_v26 = vadd.f32 %v3083_v32, %v2994_v1  ;;  %v10104_v1 = vor.u32 %v8398_v55, %v7061_v50  ;;  %v10106_v32 = vor.u32 %v8391_v24, %v7055_v16  ;;  %v8498_v50 = vld [vmem:[%s9441_s27 + $0x5ac] sm:$0xf]  ;;  %v7479_v55 = vld [vmem:[%s9441_s27 + $0x5d8] sm:$0xf0]  ;;  %v7101_v24 = vld [vmem:[%s9441_s27 + $0x2b0] sm:$0xf] }
 0x237   : > { %12778 = vst [vmem:[#allocation74_spill] sm:$0xff] %v10104_v1 }
 0x238   : > { %v3231_v17 = vpop.f32.mrf.mxu3  ;;  %12779 = vst [vmem:[#allocation75_spill] sm:$0xff] %v10106_v32 }
 0x239   : > { %v3172_v14 = vpop.f32.mrf.mxu2  ;;  %v10096_v34 = vadd.f32 %v3231_v17, %v9913_v5  ;;  %v8676_v5 = vld [vmem:[%s12531_s3 + $0x238] sm:$0xff] }
 0x23a   : > { %v10102_v44 = vadd.f32 %v3172_v14, %v3084_v26  ;;  %v2997_v61 = vpop.f32.mrf.mxu0  ;;  %v8700_v17 = vld [vmem:[%s12531_s3 + $0x2f8] sm:$0xff]  ;;  %3640 = vmatpush.bf16.msra.mxu0 %v8676_v5  ;;  %v7103_v5 = vld [vmem:[%s9441_s27 + $0x2e0] sm:$0xf0] }
 0x23b   : > { %3907 = vmatpush.bf16.msrb.mxu3 %v8700_v17 }
 0x23c   : > { %v3086_v62 = vpop.f32.mrf.mxu1 }
 0x23d   : > { %v3087_v41 = vadd.f32 %v3086_v62, %v2997_v61  ;;  %3273 = vmatmul.bf16.gmra.mxu3 %v10098_v28  ;;  %3322 = vmatmul.bf16.gmra.mxu0 %v10100_v0  ;;  %v8684_v62 = vld [vmem:[%s12531_s3 + $0x278] sm:$0xff] }
 0x23e   : > { %3500 = vmatmul.bf16.gmra.mxu2 %v10104_v1  ;;  %3729 = vmatpush.bf16.msra.mxu1 %v8684_v62  ;;  %v7109_v61 = vld [vmem:[%s9441_s27 + $0x2b8] sm:$0xf]  ;;  %v8403_v1 = vld [vmem:[%s9441_s27 + $0x2b4] sm:$0xf] }
 0x23f   : > { %3411 = vmatmul.bf16.gmra.mxu1 %v10106_v32  ;;  %v8410_v32 = vld [vmem:[%s9441_s27 + $0x2e4] sm:$0xf0] }
 0x240   : > { %v3234_v16 = vpop.f32.mrf.mxu3 }
 0x241   : > { %v3175_v14 = vpop.f32.mrf.mxu2  ;;  %v10125_v26 = vadd.f32 %v3234_v16, %v9929_v20  ;;  %v10140_v20 = vor.u32 %v8498_v50, %v7479_v55 }
 0x242   : > { %v10127_v4 = vadd.f32 %v3175_v14, %v3087_v41  ;;  %v2999_v9 = vpop.f32.mrf.mxu0  ;;  %v10142_v41 = vor.u32 %v8409_v42, %v7101_v24  ;;  %v10146_v14 = vor.u32 %v8410_v32, %v7109_v61  ;;  %v7149_v24 = vld [vmem:[%s9441_s27 + $0x310] sm:$0xf]  ;;  %v8421_v42 = vld [vmem:[%s9441_s27 + $0x33c] sm:$0xf0]  ;;  %v7157_v61 = vld [vmem:[%s9441_s27 + $0x318] sm:$0xf] }
 0x243   : > { %12780 = vst [vmem:[#allocation76_spill] sm:$0xff] %v10140_v20 }
 0x244   : > { %v3088_v37 = vpop.f32.mrf.mxu1  ;;  %12781 = vst [vmem:[#allocation77_spill] sm:$0xff] %v10142_v41 }
 0x245   : > { %v3089_v54 = vadd.f32 %v3088_v37, %v2999_v9  ;;  %12782 = vst [vmem:[#allocation78_spill] sm:$0xff] %v10146_v14  ;;  %v10148_v9 = vor.u32 %v8403_v1, %v7103_v5  ;;  %v8320_v5 = vld [vmem:[%s9441_s27 + $0x1c] sm:$0xf] }
 0x247   : > { %12783 = vst [vmem:[#allocation79_spill] sm:$0xff] %v10148_v9 }
 0x248   : > { %v3236_v0 = vpop.f32.mrf.mxu3 }
 0x249   : > { %v3177_v17 = vpop.f32.mrf.mxu2  ;;  %v10138_v28 = vadd.f32 %v3236_v0, %v9946_v46 }
 0x24a   : > { %v10144_v62 = vadd.f32 %v3177_v17, %v3089_v54  ;;  %v3002_v16 = vpop.f32.mrf.mxu0  ;;  %v6775_v17 = vld [vmem:[%s9441_s27 + $0x48] sm:$0xf0] }
 0x24c   : > { %v3091_v37 = vpop.f32.mrf.mxu1 }
 0x24d   : > { %v3092_v39 = vadd.f32 %v3091_v37, %v3002_v16  ;;  %3278 = vmatmul.bf16.gmra.mxu3 %v10140_v20  ;;  %3327 = vmatmul.bf16.gmra.mxu0 %v10142_v41  ;;  %v8422_v16 = vld [vmem:[%s9441_s27 + $0x344] sm:$0xf0]  ;;  %v8415_v37 = vld [vmem:[%s9441_s27 + $0x314] sm:$0xf] }
 0x24e   : > { %3505 = vmatmul.bf16.gmra.mxu2 %v10146_v14  ;;  %v7151_v14 = vld [vmem:[%s9441_s27 + $0x340] sm:$0xf0] }
 0x24f   : > { %3416 = vmatmul.bf16.gmra.mxu1 %v10148_v9 }
 0x250   : > { %v3239_v46 = vpop.f32.mrf.mxu3 }
 0x251   : > { %v3180_v0 = vpop.f32.mrf.mxu2  ;;  %v10155_v1 = vadd.f32 %v3239_v46, %v9959_v52  ;;  %v10170_v52 = vor.u32 %v8421_v42, %v7149_v24 }
 0x252   : > { %v10157_v32 = vadd.f32 %v3180_v0, %v3092_v39  ;;  %v3004_v54 = vpop.f32.mrf.mxu0  ;;  %v10172_v39 = vor.u32 %v8320_v5, %v6775_v17  ;;  %v8433_v17 = vld [vmem:[%s9441_s27 + $0x39c] sm:$0xf0] }
 0x253   : > { %12784 = vst [vmem:[#allocation80_spill] sm:$0xff] %v10170_v52 }
 0x254   : > { %v3093_v50 = vpop.f32.mrf.mxu1  ;;  %12785 = vst [vmem:[#allocation81_spill] sm:$0xff] %v10172_v39 }
 0x255   : > { %v3094_v55 = vadd.f32 %v3093_v50, %v3004_v54  ;;  %v10176_v54 = vor.u32 %v8422_v16, %v7157_v61  ;;  %v10178_v50 = vor.u32 %v8415_v37, %v7151_v14  ;;  %v7205_v16 = vld [vmem:[%s9441_s27 + $0x378] sm:$0xf]  ;;  %v8332_v37 = vld [vmem:[%s9441_s27 + $0x7c] sm:$0xf] }
 0x257   : > { %12786 = vst [vmem:[#allocation82_spill] sm:$0xff] %v10176_v54 }
 0x258   : > { %v3241_v41 = vpop.f32.mrf.mxu3  ;;  %12787 = vst [vmem:[#allocation83_spill] sm:$0xff] %v10178_v50 }
 0x259   : > { %v3182_v9 = vpop.f32.mrf.mxu2  ;;  %v10168_v20 = vadd.f32 %v3241_v41, %v9976_v31  ;;  %v8675_v41 = vld [vmem:[%s12531_s3 + $0x230] sm:$0xff] }
 0x25a   : > { %v10174_v46 = vadd.f32 %v3182_v9, %v3094_v55  ;;  %v3293_v0 = vpop.f32.mrf.mxu0  ;;  %3641 = vmatpush.bf16.msra.mxu0 %v8675_v41  ;;  %v8434_v41 = vld [vmem:[%s9441_s27 + $0x3a4] sm:$0xf0] }
 0x25b   : > { %v3294_v22 = vadd.f32 %v3293_v0, %v9927_v27  ;;  %v8699_v27 = vld [vmem:[%s12531_s3 + $0x2f0] sm:$0xff] }
 0x25c   : > { %v3382_v21 = vpop.f32.mrf.mxu1  ;;  %3908 = vmatpush.bf16.msrb.mxu3 %v8699_v27  ;;  %v6823_v0 = vld [vmem:[%s9441_s27 + $0xa8] sm:$0xf0]  ;;  %v8427_v27 = vld [vmem:[%s9441_s27 + $0x374] sm:$0xf] }
 0x25d   : > { %v3383_v31 = vadd.f32 %v3382_v21, %v3294_v22  ;;  %3332 = vmatmul.bf16.gmra.mxu0 %v10170_v52  ;;  %3559 = vmatmul.bf16.vlgmr.msra.gmra.mxu3 %v10172_v39  ;;  %v8683_v21 = vld [vmem:[%s12531_s3 + $0x270] sm:$0xff] }
 0x25e   : > { %3510 = vmatmul.bf16.gmra.mxu2 %v10176_v54  ;;  %3730 = vmatpush.bf16.msra.mxu1 %v8683_v21 }
 0x25f   : > { %3421 = vmatmul.bf16.gmra.mxu1 %v10178_v50  ;;  %v7199_v50 = vld [vmem:[%s9441_s27 + $0x3a0] sm:$0xf0] }
 0x260   : > { %v3244_v22 = vpop.f32.mrf.mxu3 }
 0x261   : > { %v10198_v14 = vadd.f32 %v3244_v22, %v9992_v58  ;;  %v3471_v9 = vpop.f32.mrf.mxu2  ;;  %v10216_v22 = vor.u32 %v8332_v37, %v6823_v0  ;;  %v7245_v37 = vld [vmem:[%s9441_s27 + $0x3d0] sm:$0xf]  ;;  %v8445_v0 = vld [vmem:[%s9441_s27 + $0x3fc] sm:$0xf0] }
 0x262   : > { %v10200_v55 = vadd.f32 %v3471_v9, %v3383_v31  ;;  %v3295_v24 = vpop.f32.mrf.mxu0  ;;  %v10214_v31 = vor.u32 %v8433_v17, %v7197_v19 }
 0x263   : > { %v3296_v42 = vadd.f32 %v3295_v24, %v9940_v53  ;;  %12789 = vst [vmem:[#allocation85_spill] sm:$0xff] %v10216_v22  ;;  %v10220_v24 = vor.u32 %v8434_v41, %v7205_v16  ;;  %v7253_v41 = vld [vmem:[%s9441_s27 + $0x3d8] sm:$0xf] }
 0x264   : > { %v3384_v61 = vpop.f32.mrf.mxu1  ;;  %12788 = vst [vmem:[#allocation84_spill] sm:$0xff] %v10214_v31 }
 0x265   : > { %v3385_v5 = vadd.f32 %v3384_v61, %v3296_v42  ;;  %12790 = vst [vmem:[#allocation86_spill] sm:$0xff] %v10220_v24  ;;  %v10222_v42 = vor.u32 %v8427_v27, %v7199_v50  ;;  %v8344_v27 = vld [vmem:[%s9441_s27 + $0xdc] sm:$0xf] }
 0x267   : > { %12791 = vst [vmem:[#allocation87_spill] sm:$0xff] %v10222_v42 }
 0x268   : > { %v3246_v54 = vpop.f32.mrf.mxu3 }
 0x269   : > { %v10212_v58 = vadd.f32 %v3246_v54, %v10009_v23  ;;  %v3473_v21 = vpop.f32.mrf.mxu2 }
 0x26a   : > { %v10218_v53 = vadd.f32 %v3473_v21, %v3385_v5  ;;  %v3298_v9 = vpop.f32.mrf.mxu0  ;;  %v6871_v21 = vld [vmem:[%s9441_s27 + $0x108] sm:$0xf0] }
 0x26b   : > { %v3299_v61 = vadd.f32 %v3298_v9, %v9957_v38  ;;  %v8446_v9 = vld [vmem:[%s9441_s27 + $0x404] sm:$0xf0] }
 0x26c   : > { %v3387_v39 = vpop.f32.mrf.mxu1 }
 0x26d   : > { %v3388_v23 = vadd.f32 %v3387_v39, %v3299_v61  ;;  %3337 = vmatmul.bf16.gmra.mxu0 %v10214_v31  ;;  %3564 = vmatmul.bf16.gmra.mxu3 %v10216_v22  ;;  %v8439_v61 = vld [vmem:[%s9441_s27 + $0x3d4] sm:$0xf] }
 0x26e   : > { %3515 = vmatmul.bf16.gmra.mxu2 %v10220_v24 }
 0x26f   : > { %3426 = vmatmul.bf16.gmra.mxu1 %v10222_v42  ;;  %v7247_v42 = vld [vmem:[%s9441_s27 + $0x400] sm:$0xf0] }
 0x270   : > { %v3249_v54 = vpop.f32.mrf.mxu3 }
 0x271   : > { %v10230_v38 = vadd.f32 %v3249_v54, %v10022_v29  ;;  %v3476_v50 = vpop.f32.mrf.mxu2 }
 0x272   : > { %v10232_v5 = vadd.f32 %v3476_v50, %v3388_v23  ;;  %v3300_v39 = vpop.f32.mrf.mxu0  ;;  %v10246_v23 = vor.u32 %v8445_v0, %v7245_v37  ;;  %v10248_v50 = vor.u32 %v8344_v27, %v6871_v21 }
 0x273   : > { %v3301_v19 = vadd.f32 %v3300_v39, %v9970_v3 }
 0x274   : > { %v3389_v17 = vpop.f32.mrf.mxu1  ;;  %12792 = vst [vmem:[#allocation88_spill] sm:$0xff] %v10246_v23 }
 0x275   : > { %v3390_v16 = vadd.f32 %v3389_v17, %v3301_v19  ;;  %12793 = vst [vmem:[#allocation89_spill] sm:$0xff] %v10248_v50  ;;  %v10252_v19 = vor.u32 %v8446_v9, %v7253_v41  ;;  %v10254_v17 = vor.u32 %v8439_v61, %v7247_v42  ;;  %v8674_v42 = vld [vmem:[%s12531_s3 + $0x228] sm:$0xff]  ;;  %v7293_v61 = vld [vmem:[%s9441_s27 + $0x430] sm:$0xf] }
 0x276   : > { %3642 = vmatpush.bf16.msra.mxu0 %v8674_v42  ;;  %v6919_v42 = vld [vmem:[%s9441_s27 + $0x168] sm:$0xf0] }
 0x277   : > { %12794 = vst [vmem:[#allocation90_spill] sm:$0xff] %v10252_v19 }
 0x278   : > { %v3251_v24 = vpop.f32.mrf.mxu3  ;;  %12795 = vst [vmem:[#allocation91_spill] sm:$0xff] %v10254_v17 }
 0x279   : > { %v10244_v29 = vadd.f32 %v3251_v24, %v10039_v18  ;;  %v3478_v54 = vpop.f32.mrf.mxu2  ;;  %v8690_v18 = vld [vmem:[%s12531_s3 + $0x2a8] sm:$0xff] }
 0x27a   : > { %v10250_v3 = vadd.f32 %v3478_v54, %v3390_v16  ;;  %v3303_v39 = vpop.f32.mrf.mxu0  ;;  %3820 = vmatpush.bf16.msra.mxu2 %v8690_v18  ;;  %v8457_v54 = vld [vmem:[%s9441_s27 + $0x45c] sm:$0xf0]  ;;  %v8356_v18 = vld [vmem:[%s9441_s27 + $0x13c] sm:$0xf] }
 0x27b   : > { %v3304_v22 = vadd.f32 %v3303_v39, %v9990_v49  ;;  %v8698_v49 = vld [vmem:[%s12531_s3 + $0x2e8] sm:$0xff]  ;;  %v7301_v39 = vld [vmem:[%s9441_s27 + $0x438] sm:$0xf] }
 0x27c   : > { %v3392_v31 = vpop.f32.mrf.mxu1  ;;  %3909 = vmatpush.bf16.msrb.mxu3 %v8698_v49  ;;  %v8451_v49 = vld [vmem:[%s9441_s27 + $0x434] sm:$0xf] }
 0x27d   : > { %v3393_v24 = vadd.f32 %v3392_v31, %v3304_v22  ;;  %3342 = vmatmul.bf16.gmra.mxu0 %v10246_v23  ;;  %3569 = vmatmul.bf16.gmra.mxu3 %v10248_v50  ;;  %v8682_v31 = vld [vmem:[%s12531_s3 + $0x268] sm:$0xff] }
 0x27e   : > { %3520 = vmatmul.bf16.gmra.mxu2 %v10252_v19  ;;  %3731 = vmatpush.bf16.msra.mxu1 %v8682_v31  ;;  %v7295_v19 = vld [vmem:[%s9441_s27 + $0x460] sm:$0xf0] }
 0x27f   : > { %3431 = vmatmul.bf16.gmra.mxu1 %v10254_v17  ;;  %v8458_v17 = vld [vmem:[%s9441_s27 + $0x464] sm:$0xf0] }
 0x280   : > { %v3254_v22 = vpop.f32.mrf.mxu3 }
 0x281   : > { %v10274_v16 = vadd.f32 %v3254_v22, %v10055_v10  ;;  %v3481_v37 = vpop.f32.mrf.mxu2  ;;  %v10292_v22 = vor.u32 %v8356_v18, %v6919_v42  ;;  %v8469_v18 = vld [vmem:[%s9441_s27 + $0x4bc] sm:$0xf0]  ;;  %v7349_v42 = vld [vmem:[%s9441_s27 + $0x498] sm:$0xf] }
 0x282   : > { %v10276_v0 = vadd.f32 %v3481_v37, %v3393_v24  ;;  %v3305_v41 = vpop.f32.mrf.mxu0  ;;  %v10290_v24 = vor.u32 %v8457_v54, %v7293_v61 }
 0x283   : > { %v3306_v27 = vadd.f32 %v3305_v41, %v10003_v56  ;;  %12797 = vst [vmem:[#allocation93_spill] sm:$0xff] %v10292_v22  ;;  %v10296_v41 = vor.u32 %v8458_v17, %v7301_v39  ;;  %v7341_v39 = vld [vmem:[%s9441_s27 + $0x490] sm:$0xf] }
 0x284   : > { %v3394_v21 = vpop.f32.mrf.mxu1  ;;  %12796 = vst [vmem:[#allocation92_spill] sm:$0xff] %v10290_v24 }
 0x285   : > { %v3395_v9 = vadd.f32 %v3394_v21, %v3306_v27  ;;  %12798 = vst [vmem:[#allocation94_spill] sm:$0xff] %v10296_v41  ;;  %v10298_v27 = vor.u32 %v8451_v49, %v7295_v19  ;;  %v8368_v49 = vld [vmem:[%s9441_s27 + $0x19c] sm:$0xf] }
 0x287   : > { %12799 = vst [vmem:[#allocation95_spill] sm:$0xff] %v10298_v27 }
 0x288   : > { %v3256_v50 = vpop.f32.mrf.mxu3 }
 0x289   : > { %v10288_v10 = vadd.f32 %v3256_v50, %v10072_v63  ;;  %v3483_v31 = vpop.f32.mrf.mxu2 }
 0x28a   : > { %v10294_v56 = vadd.f32 %v3483_v31, %v3395_v9  ;;  %v3308_v37 = vpop.f32.mrf.mxu0  ;;  %v6967_v31 = vld [vmem:[%s9441_s27 + $0x1c8] sm:$0xf0] }
 0x28b   : > { %v3309_v21 = vadd.f32 %v3308_v37, %v10020_v51  ;;  %v8470_v37 = vld [vmem:[%s9441_s27 + $0x4c4] sm:$0xf0] }
 0x28c   : > { %v3397_v23 = vpop.f32.mrf.mxu1 }
 0x28d   : > { %v3398_v63 = vadd.f32 %v3397_v23, %v3309_v21  ;;  %3347 = vmatmul.bf16.gmra.mxu0 %v10290_v24  ;;  %3574 = vmatmul.bf16.gmra.mxu3 %v10292_v22  ;;  %v8463_v21 = vld [vmem:[%s9441_s27 + $0x494] sm:$0xf] }
 0x28e   : > { %3525 = vmatmul.bf16.gmra.mxu2 %v10296_v41 }
 0x28f   : > { %3436 = vmatmul.bf16.gmra.mxu1 %v10298_v27  ;;  %v7343_v27 = vld [vmem:[%s9441_s27 + $0x4c0] sm:$0xf0] }
 0x290   : > { %v3259_v50 = vpop.f32.mrf.mxu3 }
 0x291   : > { %v10306_v51 = vadd.f32 %v3259_v50, %v10085_v43  ;;  %v3486_v19 = vpop.f32.mrf.mxu2 }
 0x292   : > { %v10308_v17 = vadd.f32 %v3486_v19, %v3398_v63  ;;  %v3310_v23 = vpop.f32.mrf.mxu0  ;;  %v10322_v63 = vor.u32 %v8469_v18, %v7341_v39  ;;  %v10324_v19 = vor.u32 %v8368_v49, %v6967_v31 }
 0x293   : > { %v3311_v9 = vadd.f32 %v3310_v23, %v10033_v15 }
 0x294   : > { %v3399_v61 = vpop.f32.mrf.mxu1  ;;  %12800 = vst [vmem:[#allocation96_spill] sm:$0xff] %v10322_v63 }
 0x295   : > { %v3400_v54 = vadd.f32 %v3399_v61, %v3311_v9  ;;  %12801 = vst [vmem:[#allocation97_spill] sm:$0xff] %v10324_v19  ;;  %v10328_v9 = vor.u32 %v8470_v37, %v7349_v42  ;;  %v10330_v61 = vor.u32 %v8463_v21, %v7343_v27  ;;  %v8673_v27 = vld [vmem:[%s12531_s3 + $0x220] sm:$0xff]  ;;  %v7389_v21 = vld [vmem:[%s9441_s27 + $0x4f0] sm:$0xf] }
 0x296   : > { %3643 = vmatpush.bf16.msra.mxu0 %v8673_v27  ;;  %v7015_v27 = vld [vmem:[%s9441_s27 + $0x228] sm:$0xf0] }
 0x297   : > { %12802 = vst [vmem:[#allocation98_spill] sm:$0xff] %v10328_v9 }
 0x298   : > { %v3261_v41 = vpop.f32.mrf.mxu3  ;;  %12803 = vst [vmem:[#allocation99_spill] sm:$0xff] %v10330_v61 }
 0x299   : > { %v10320_v43 = vadd.f32 %v3261_v41, %v10102_v44  ;;  %v3488_v50 = vpop.f32.mrf.mxu2  ;;  %v8689_v44 = vld [vmem:[%s12531_s3 + $0x2a0] sm:$0xff] }
 0x29a   : > { %v10326_v15 = vadd.f32 %v3488_v50, %v3400_v54  ;;  %v3313_v23 = vpop.f32.mrf.mxu0  ;;  %3821 = vmatpush.bf16.msra.mxu2 %v8689_v44  ;;  %v8481_v50 = vld [vmem:[%s9441_s27 + $0x51c] sm:$0xf0]  ;;  %v8380_v44 = vld [vmem:[%s9441_s27 + $0x1fc] sm:$0xf] }
 0x29b   : > { %v3314_v22 = vadd.f32 %v3313_v23, %v10053_v2  ;;  %v8697_v2 = vld [vmem:[%s12531_s3 + $0x2e0] sm:$0xff]  ;;  %v7397_v23 = vld [vmem:[%s9441_s27 + $0x4f8] sm:$0xf] }
 0x29c   : > { %v3402_v24 = vpop.f32.mrf.mxu1  ;;  %3910 = vmatpush.bf16.msrb.mxu3 %v8697_v2  ;;  %v8475_v2 = vld [vmem:[%s9441_s27 + $0x4f4] sm:$0xf] }
 0x29d   : > { %v3403_v41 = vadd.f32 %v3402_v24, %v3314_v22  ;;  %3352 = vmatmul.bf16.gmra.mxu0 %v10322_v63  ;;  %3579 = vmatmul.bf16.gmra.mxu3 %v10324_v19  ;;  %v8681_v24 = vld [vmem:[%s12531_s3 + $0x260] sm:$0xff] }
 0x29e   : > { %3530 = vmatmul.bf16.gmra.mxu2 %v10328_v9  ;;  %3732 = vmatpush.bf16.msra.mxu1 %v8681_v24  ;;  %v7391_v9 = vld [vmem:[%s9441_s27 + $0x520] sm:$0xf0] }
 0x29f   : > { %3441 = vmatmul.bf16.gmra.mxu1 %v10330_v61  ;;  %v8482_v61 = vld [vmem:[%s9441_s27 + $0x524] sm:$0xf0] }
 0x2a0   : > { %v3264_v22 = vpop.f32.mrf.mxu3 }
 0x2a1   : > { %v10350_v54 = vadd.f32 %v3264_v22, %v10127_v4  ;;  %v3491_v39 = vpop.f32.mrf.mxu2  ;;  %v10368_v22 = vor.u32 %v8380_v44, %v7015_v27  ;;  %v8679_v27 = vld [vmem:[%s12531_s3 + $0x250] sm:$0xff] }
 0x2a2   : > { %v10352_v18 = vadd.f32 %v3491_v39, %v3403_v41  ;;  %v3315_v42 = vpop.f32.mrf.mxu0  ;;  %v10366_v41 = vor.u32 %v8481_v50, %v7389_v21  ;;  %v8687_v21 = vld [vmem:[%s12531_s3 + $0x290] sm:$0xff] }
 0x2a3   : > { %v3316_v49 = vadd.f32 %v3315_v42, %v10066_v40  ;;  %12805 = vst [vmem:[#allocation101_spill] sm:$0xff] %v10368_v22  ;;  %v10372_v42 = vor.u32 %v8482_v61, %v7397_v23 }
 0x2a4   : > { %v3404_v31 = vpop.f32.mrf.mxu1  ;;  %12804 = vst [vmem:[#allocation100_spill] sm:$0xff] %v10366_v41 }
 0x2a5   : > { %v3405_v37 = vadd.f32 %v3404_v31, %v3316_v49  ;;  %12806 = vst [vmem:[#allocation102_spill] sm:$0xff] %v10372_v42  ;;  %v10374_v49 = vor.u32 %v8475_v2, %v7391_v9  ;;  %v7437_v2 = vld [vmem:[%s9441_s27 + $0x550] sm:$0xf] }
 0x2a7   : > { %12807 = vst [vmem:[#allocation103_spill] sm:$0xff] %v10374_v49 }
 0x2a8   : > { %v3266_v19 = vpop.f32.mrf.mxu3 }
 0x2a9   : > { %v10364_v4 = vadd.f32 %v3266_v19, %v10144_v62  ;;  %v3493_v24 = vpop.f32.mrf.mxu2  ;;  %v8672_v62 = vld [vmem:[%s12531_s3 + $0x218] sm:$0xff] }
 0x2aa   : > { %v10370_v40 = vadd.f32 %v3493_v24, %v3405_v37  ;;  %v3318_v39 = vpop.f32.mrf.mxu0  ;;  %v8688_v19 = vld [vmem:[%s12531_s3 + $0x298] sm:$0xff]  ;;  %3644 = vmatpush.bf16.msra.mxu0 %v8672_v62  ;;  %v8671_v37 = vld [vmem:[%s12531_s3 + $0x210] sm:$0xff]  ;;  %v8493_v24 = vld [vmem:[%s9441_s27 + $0x57c] sm:$0xf0] }
 0x2ab   : > { %v3319_v31 = vadd.f32 %v3318_v39, %v10083_v25  ;;  %3822 = vmatpush.bf16.msra.mxu2 %v8688_v19  ;;  %v8680_v25 = vld [vmem:[%s12531_s3 + $0x258] sm:$0xff]  ;;  %v8494_v62 = vld [vmem:[%s9441_s27 + $0x584] sm:$0xf0] }
 0x2ac   : > { %v3407_v63 = vpop.f32.mrf.mxu1  ;;  %3733 = vmatpush.bf16.msra.mxu1 %v8680_v25  ;;  %v8392_v19 = vld [vmem:[%s9441_s27 + $0x25c] sm:$0xf]  ;;  %v7063_v25 = vld [vmem:[%s9441_s27 + $0x288] sm:$0xf0] }
 0x2ad   : > { %v3408_v52 = vadd.f32 %v3407_v63, %v3319_v31  ;;  %3357 = vmatmul.bf16.gmra.mxu0 %v10366_v41  ;;  %3584 = vmatmul.bf16.gmra.mxu3 %v10368_v22  ;;  %v7445_v31 = vld [vmem:[%s9441_s27 + $0x558] sm:$0xf] }
 0x2ae   : > { %3535 = vmatmul.bf16.gmra.mxu2 %v10372_v42  ;;  %3645 = vmatpush.bf16.msra.mxu0 %v8671_v37  ;;  %v8678_v37 = vld [vmem:[%s12531_s3 + $0x248] sm:$0xff]  ;;  %v10437_v22 = vor.u32 %v8494_v62, %v7445_v31 }
 0x2af   : > { %3446 = vmatmul.bf16.gmra.mxu1 %v10374_v49  ;;  %3823 = vmatpush.bf16.msra.mxu2 %v8687_v21  ;;  %v8669_v49 = vld [vmem:[%s12531_s3 + $0x200] sm:$0xff] }
 0x2b0   : > { %v3269_v63 = vpop.f32.mrf.mxu3  ;;  %3734 = vmatpush.bf16.msra.mxu1 %v8679_v27  ;;  %v10427_v27 = vor.u32 %v8392_v19, %v7063_v25  ;;  %12810 = vst [vmem:[#allocation106_spill] sm:$0xff] %v10437_v22  ;;  %v8677_v19 = vld [vmem:[%s12531_s3 + $0x240] sm:$0xff] }
 0x2b1   : > { %v10391_v9 = vadd.f32 %v3269_v63, %v10157_v32  ;;  %v3496_v61 = vpop.f32.mrf.mxu2  ;;  %v8487_v63 = vld [vmem:[%s9441_s27 + $0x554] sm:$0xf] }
 0x2b2   : > { %v10399_v50 = vadd.f32 %v3496_v61, %v3408_v52  ;;  %v3320_v23 = vpop.f32.mrf.mxu0  ;;  %v8670_v52 = vld [vmem:[%s12531_s3 + $0x208] sm:$0xff]  ;;  %12809 = vst [vmem:[#allocation105_spill] sm:$0xff] %v10427_v27 }
 0x2b3   : > { %v3321_v32 = vadd.f32 %v3320_v23, %v10096_v34  ;;  %v8686_v34 = vld [vmem:[%s12531_s3 + $0x288] sm:$0xff]  ;;  %3646 = vmatpush.bf16.msra.mxu0 %v8670_v52  ;;  %v8685_v52 = vld [vmem:[%s12531_s3 + $0x280] sm:$0xff] }
 0x2b4   : > { %v3409_v44 = vpop.f32.mrf.mxu1  ;;  %v7439_v61 = vld [vmem:[%s9441_s27 + $0x580] sm:$0xf0]  ;;  %3824 = vmatpush.bf16.msra.mxu2 %v8686_v34  ;;  %3735 = vmatpush.bf16.msra.mxu1 %v8678_v37 }
 0x2b5   : > { %v3410_v39 = vadd.f32 %v3409_v44, %v3321_v32  ;;  %v10425_v44 = vor.u32 %v8493_v24, %v7437_v2 }
 0x2b7   : > { %12808 = vst [vmem:[#allocation104_spill] sm:$0xff] %v10425_v44  ;;  %3647 = vmatpush.bf16.msra.mxu0 %v8669_v49 }
 0x2b8   : > { %v3271_v21 = vpop.f32.mrf.mxu3  ;;  %3825 = vmatpush.bf16.msra.mxu2 %v8685_v52  ;;  %3736 = vmatpush.bf16.msra.mxu1 %v8677_v19  ;;  %v7493_v52 = vld [vmem:[%s9441_s27 + $0x5b8] sm:$0xf]  ;;  %v8506_v19 = vld [vmem:[%s9441_s27 + $0x5e4] sm:$0xf0] }
 0x2b9   : > { %v10423_v23 = vadd.f32 %v3271_v21, %v10174_v46  ;;  %v3498_v32 = vpop.f32.mrf.mxu2  ;;  %v10439_v46 = vor.u32 %v8487_v63, %v7439_v61  ;;  %v7485_v21 = vld [vmem:[%s9441_s27 + $0x5b0] sm:$0xf] }
 0x2ba   : > { %v10435_v34 = vadd.f32 %v3498_v32, %v3410_v39  ;;  %v3323_v42 = vpop.f32.mrf.mxu0  ;;  %v8505_v32 = vld [vmem:[%s9441_s27 + $0x5dc] sm:$0xf0] }
 0x2bb   : > { %12811 = vst [vmem:[#allocation107_spill] sm:$0xff] %v10439_v46  ;;  %v3324_v2 = vadd.f32 %v3323_v42, %v10125_v26  ;;  %v8696_v26 = vld [vmem:[%s12531_s3 + $0x2d8] sm:$0xff] }
 0x2bc   : > { %v3412_v24 = vpop.f32.mrf.mxu1  ;;  %3911 = vmatpush.bf16.msrb.mxu3 %v8696_v26 }
 0x2bd   : > { %v3413_v25 = vadd.f32 %v3412_v24, %v3324_v2  ;;  %3362 = vmatmul.bf16.gmra.mxu0 %v10425_v44  ;;  %3589 = vmatmul.bf16.gmra.mxu3 %v10427_v27  ;;  %v8404_v2 = vld [vmem:[%s9441_s27 + $0x2bc] sm:$0xf]  ;;  %v7111_v24 = vld [vmem:[%s9441_s27 + $0x2e8] sm:$0xf0] }
 0x2be   : > { %3540 = vmatmul.bf16.gmra.mxu2 %v10437_v22  ;;  %v7487_v22 = vld [vmem:[%s9441_s27 + $0x5e0] sm:$0xf0] }
 0x2bf   : > { %3451 = vmatmul.bf16.gmra.mxu1 %v10439_v46  ;;  %v8499_v46 = vld [vmem:[%s9441_s27 + $0x5b4] sm:$0xf] }
 0x2c0   : > { %v3274_v42 = vpop.f32.mrf.mxu3 }
 0x2c1   : > { %v10453_v49 = vadd.f32 %v3274_v42, %v9864_v11  ;;  %v3501_v39 = vpop.f32.mrf.mxu2 }
 0x2c2   : > { %v10455_v31 = vadd.f32 %v3501_v39, %v3413_v25  ;;  %v3325_v62 = vpop.f32.mrf.mxu0  ;;  %v10469_v25 = vor.u32 %v8505_v32, %v7485_v21  ;;  %v10471_v39 = vor.u32 %v8404_v2, %v7111_v24  ;;  %v7159_v2 = vld [vmem:[%s9441_s27 + $0x348] sm:$0xf0]  ;;  %v6781_v24 = vld [vmem:[%s9441_s27 + $0x20] sm:$0xf] }
 0x2c3   : > { %v3326_v63 = vadd.f32 %v3325_v62, %v10138_v28 }
 0x2c4   : > { %v3414_v61 = vpop.f32.mrf.mxu1  ;;  %12812 = vst [vmem:[#allocation108_spill] sm:$0xff] %v10469_v25 }
 0x2c5   : > { %v3415_v37 = vadd.f32 %v3414_v61, %v3326_v63  ;;  %12813 = vst [vmem:[#allocation109_spill] sm:$0xff] %v10471_v39  ;;  %v10475_v63 = vor.u32 %v8506_v19, %v7493_v52  ;;  %v10477_v61 = vor.u32 %v8499_v46, %v7487_v22  ;;  %v8416_v52 = vld [vmem:[%s9441_s27 + $0x31c] sm:$0xf]  ;;  %v8327_v19 = vld [vmem:[%s9441_s27 + $0x4c] sm:$0xf0] }
 0x2c7   : > { %12814 = vst [vmem:[#allocation110_spill] sm:$0xff] %v10475_v63 }
 0x2c8   : > { %v3276_v26 = vpop.f32.mrf.mxu3  ;;  %12815 = vst [vmem:[#allocation111_spill] sm:$0xff] %v10477_v61 }
 0x2c9   : > { %v10467_v11 = vadd.f32 %v3276_v26, %v9877_v30  ;;  %v3503_v42 = vpop.f32.mrf.mxu2  ;;  %v6789_v26 = vld [vmem:[%s9441_s27 + $0x28] sm:$0xf] }
 0x2ca   : > { %v10473_v28 = vadd.f32 %v3503_v42, %v3415_v37  ;;  %v3328_v62 = vpop.f32.mrf.mxu0  ;;  %v8328_v42 = vld [vmem:[%s9441_s27 + $0x54] sm:$0xf0] }
 0x2cb   : > { %v3329_v27 = vadd.f32 %v3328_v62, %v10155_v1  ;;  %v8321_v62 = vld [vmem:[%s9441_s27 + $0x24] sm:$0xf] }
 0x2cc   : > { %v3417_v44 = vpop.f32.mrf.mxu1 }
 0x2cd   : > { %v3418_v30 = vadd.f32 %v3417_v44, %v3329_v27  ;;  %3367 = vmatmul.bf16.gmra.mxu0 %v10469_v25  ;;  %3594 = vmatmul.bf16.gmra.mxu3 %v10471_v39 }
 0x2ce   : > { %3545 = vmatmul.bf16.gmra.mxu2 %v10475_v63 }
 0x2cf   : > { %3456 = vmatmul.bf16.gmra.mxu1 %v10477_v61  ;;  %v6783_v61 = vld [vmem:[%s9441_s27 + $0x50] sm:$0xf0] }
 0x2d0   : > { %v3279_v22 = vpop.f32.mrf.mxu3 }
 0x2d1   : > { %v10485_v1 = vadd.f32 %v3279_v22, %v9894_v12  ;;  %v3506_v46 = vpop.f32.mrf.mxu2 }
 0x2d2   : > { %v10487_v37 = vadd.f32 %v3506_v46, %v3418_v30  ;;  %v3330_v44 = vpop.f32.mrf.mxu0  ;;  %v10501_v30 = vor.u32 %v8416_v52, %v7159_v2  ;;  %v10503_v46 = vor.u32 %v8327_v19, %v6781_v24  ;;  %v8428_v24 = vld [vmem:[%s9441_s27 + $0x37c] sm:$0xf]  ;;  %v7207_v19 = vld [vmem:[%s9441_s27 + $0x3a8] sm:$0xf0] }
 0x2d3   : > { %v3331_v27 = vadd.f32 %v3330_v44, %v10168_v20 }
 0x2d4   : > { %v3419_v21 = vpop.f32.mrf.mxu1  ;;  %12816 = vst [vmem:[#allocation112_spill] sm:$0xff] %v10501_v30 }
 0x2d5   : > { %v3420_v32 = vadd.f32 %v3419_v21, %v3331_v27  ;;  %12817 = vst [vmem:[#allocation113_spill] sm:$0xff] %v10503_v46  ;;  %v10507_v27 = vor.u32 %v8328_v42, %v6789_v26  ;;  %v10509_v21 = vor.u32 %v8321_v62, %v6783_v61  ;;  %v6829_v26 = vld [vmem:[%s9441_s27 + $0x80] sm:$0xf]  ;;  %v8339_v42 = vld [vmem:[%s9441_s27 + $0xac] sm:$0xf0] }
 0x2d6   : > { %v6837_v62 = vld [vmem:[%s9441_s27 + $0x88] sm:$0xf] }
 0x2d7   : > { %12818 = vst [vmem:[#allocation114_spill] sm:$0xff] %v10507_v27 }
 0x2d8   : > { %v3281_v63 = vpop.f32.mrf.mxu3  ;;  %12819 = vst [vmem:[#allocation115_spill] sm:$0xff] %v10509_v21 }
 0x2d9   : > { %v10499_v12 = vadd.f32 %v3281_v63, %v9907_v13  ;;  %v3508_v22 = vpop.f32.mrf.mxu2  ;;  %v8695_v13 = vld [vmem:[%s12531_s3 + $0x2d0] sm:$0xff] }
 0x2da   : > { %v10505_v20 = vadd.f32 %v3508_v22, %v3420_v32  ;;  %v3333_v44 = vpop.f32.mrf.mxu0  ;;  %3912 = vmatpush.bf16.msrb.mxu3 %v8695_v13  ;;  %v8340_v22 = vld [vmem:[%s9441_s27 + $0xb4] sm:$0xf0] }
 0x2db   : > { %v3334_v39 = vadd.f32 %v3333_v44, %v10198_v14  ;;  %v8333_v44 = vld [vmem:[%s9441_s27 + $0x84] sm:$0xf] }
 0x2dc   : > { %v3422_v25 = vpop.f32.mrf.mxu1 }
 0x2dd   : > { %v3423_v41 = vadd.f32 %v3422_v25, %v3334_v39  ;;  %3599 = vmatmul.bf16.gmra.mxu3 %v10501_v30  ;;  %3648 = vmatmul.bf16.vlgmr.msra.gmra.mxu0 %v10503_v46 }
 0x2de   : > { %3826 = vmatmul.bf16.vlgmr.msra.gmra.mxu2 %v10507_v27 }
 0x2df   : > { %3737 = vmatmul.bf16.vlgmr.msra.gmra.mxu1 %v10509_v21  ;;  %v6831_v21 = vld [vmem:[%s9441_s27 + $0xb0] sm:$0xf0] }
 0x2e0   : > { %v3560_v14 = vpop.f32.mrf.mxu3 }
 0x2e1   : > { %v3511_v25 = vpop.f32.mrf.mxu2  ;;  %v10520_v39 = vadd.f32 %v3560_v14, %v10200_v55  ;;  %v10538_v14 = vor.u32 %v8339_v42, %v6829_v26  ;;  %v8440_v26 = vld [vmem:[%s9441_s27 + $0x3dc] sm:$0xf]  ;;  %v7255_v42 = vld [vmem:[%s9441_s27 + $0x408] sm:$0xf0] }
 0x2e2   : > { %v10522_v63 = vadd.f32 %v3511_v25, %v3423_v41  ;;  %v3335_v61 = vpop.f32.mrf.mxu0  ;;  %v10536_v41 = vor.u32 %v8428_v24, %v7207_v19 }
 0x2e3   : > { %v3336_v32 = vadd.f32 %v3335_v61, %v10212_v58  ;;  %12821 = vst [vmem:[#allocation117_spill] sm:$0xff] %v10538_v14  ;;  %v10542_v61 = vor.u32 %v8340_v22, %v6837_v62  ;;  %v6877_v62 = vld [vmem:[%s9441_s27 + $0xe0] sm:$0xf]  ;;  %v8351_v22 = vld [vmem:[%s9441_s27 + $0x10c] sm:$0xf0] }
 0x2e4   : > { %v3424_v52 = vpop.f32.mrf.mxu1  ;;  %12820 = vst [vmem:[#allocation116_spill] sm:$0xff] %v10536_v41 }
 0x2e5   : > { %v3425_v2 = vadd.f32 %v3424_v52, %v3336_v32  ;;  %12822 = vst [vmem:[#allocation118_spill] sm:$0xff] %v10542_v61  ;;  %v10544_v32 = vor.u32 %v8333_v44, %v6831_v21  ;;  %v6885_v44 = vld [vmem:[%s9441_s27 + $0xe8] sm:$0xf] }
 0x2e7   : > { %12823 = vst [vmem:[#allocation119_spill] sm:$0xff] %v10544_v32 }
 0x2e8   : > { %v3562_v13 = vpop.f32.mrf.mxu3 }
 0x2e9   : > { %v3513_v27 = vpop.f32.mrf.mxu2  ;;  %v10534_v55 = vadd.f32 %v3562_v13, %v10218_v53  ;;  %v8352_v13 = vld [vmem:[%s9441_s27 + $0x114] sm:$0xf0] }
 0x2ea   : > { %v10540_v58 = vadd.f32 %v3513_v27, %v3425_v2  ;;  %v3338_v25 = vpop.f32.mrf.mxu0 }
 0x2eb   : > { %v3339_v52 = vadd.f32 %v3338_v25, %v10230_v38  ;;  %v8345_v25 = vld [vmem:[%s9441_s27 + $0xe4] sm:$0xf] }
 0x2ec   : > { %v3427_v46 = vpop.f32.mrf.mxu1 }
 0x2ed   : > { %v3428_v30 = vadd.f32 %v3427_v46, %v3339_v52  ;;  %3604 = vmatmul.bf16.gmra.mxu3 %v10536_v41  ;;  %3653 = vmatmul.bf16.gmra.mxu0 %v10538_v14  ;;  %v6879_v52 = vld [vmem:[%s9441_s27 + $0x110] sm:$0xf0] }
 0x2ee   : > { %3831 = vmatmul.bf16.gmra.mxu2 %v10542_v61 }
 0x2ef   : > { %3742 = vmatmul.bf16.gmra.mxu1 %v10544_v32 }
 0x2f0   : > { %v3565_v53 = vpop.f32.mrf.mxu3 }
 0x2f1   : > { %v3516_v27 = vpop.f32.mrf.mxu2  ;;  %v10552_v38 = vadd.f32 %v3565_v53, %v10232_v5  ;;  %v10570_v53 = vor.u32 %v8351_v22, %v6877_v62  ;;  %v8452_v22 = vld [vmem:[%s9441_s27 + $0x43c] sm:$0xf] }
 0x2f2   : > { %v10554_v21 = vadd.f32 %v3516_v27, %v3428_v30  ;;  %v3340_v46 = vpop.f32.mrf.mxu0  ;;  %v10568_v30 = vor.u32 %v8440_v26, %v7255_v42 }
 0x2f3   : > { %v3341_v2 = vadd.f32 %v3340_v46, %v10244_v29  ;;  %12825 = vst [vmem:[#allocation121_spill] sm:$0xff] %v10570_v53  ;;  %v10574_v46 = vor.u32 %v8352_v13, %v6885_v44  ;;  %v7303_v44 = vld [vmem:[%s9441_s27 + $0x468] sm:$0xf0]  ;;  %v6925_v13 = vld [vmem:[%s9441_s27 + $0x140] sm:$0xf] }
 0x2f4   : > { %v3429_v24 = vpop.f32.mrf.mxu1  ;;  %12824 = vst [vmem:[#allocation120_spill] sm:$0xff] %v10568_v30 }
 0x2f5   : > { %v3430_v19 = vadd.f32 %v3429_v24, %v3341_v2  ;;  %12826 = vst [vmem:[#allocation122_spill] sm:$0xff] %v10574_v46  ;;  %v10576_v2 = vor.u32 %v8345_v25, %v6879_v52  ;;  %v8363_v25 = vld [vmem:[%s9441_s27 + $0x16c] sm:$0xf0]  ;;  %v6933_v52 = vld [vmem:[%s9441_s27 + $0x148] sm:$0xf] }
 0x2f7   : > { %12827 = vst [vmem:[#allocation123_spill] sm:$0xff] %v10576_v2 }
 0x2f8   : > { %v3567_v32 = vpop.f32.mrf.mxu3 }
 0x2f9   : > { %v3518_v61 = vpop.f32.mrf.mxu2  ;;  %v10566_v5 = vadd.f32 %v3567_v32, %v10250_v3  ;;  %v8694_v3 = vld [vmem:[%s12531_s3 + $0x2c8] sm:$0xff] }
 0x2fa   : > { %v10572_v29 = vadd.f32 %v3518_v61, %v3430_v19  ;;  %v3343_v27 = vpop.f32.mrf.mxu0  ;;  %3913 = vmatpush.bf16.msrb.mxu3 %v8694_v3 }
 0x2fb   : > { %v3344_v24 = vadd.f32 %v3343_v27, %v10274_v16  ;;  %v8364_v27 = vld [vmem:[%s9441_s27 + $0x174] sm:$0xf0] }
 0x2fc   : > { %v3432_v14 = vpop.f32.mrf.mxu1 }
 0x2fd   : > { %v3433_v41 = vadd.f32 %v3432_v14, %v3344_v24  ;;  %3609 = vmatmul.bf16.gmra.mxu3 %v10568_v30  ;;  %3658 = vmatmul.bf16.gmra.mxu0 %v10570_v53  ;;  %v8357_v24 = vld [vmem:[%s9441_s27 + $0x144] sm:$0xf] }
 0x2fe   : > { %3836 = vmatmul.bf16.gmra.mxu2 %v10574_v46 }
 0x2ff   : > { %3747 = vmatmul.bf16.gmra.mxu1 %v10576_v2  ;;  %v6927_v2 = vld [vmem:[%s9441_s27 + $0x170] sm:$0xf0] }
 0x300   : > { %v3570_v16 = vpop.f32.mrf.mxu3 }
 0x301   : > { %v3521_v14 = vpop.f32.mrf.mxu2  ;;  %v10587_v61 = vadd.f32 %v3570_v16, %v10276_v0  ;;  %v10605_v16 = vor.u32 %v8363_v25, %v6925_v13  ;;  %v8464_v13 = vld [vmem:[%s9441_s27 + $0x49c] sm:$0xf]  ;;  %v7351_v25 = vld [vmem:[%s9441_s27 + $0x4c8] sm:$0xf0] }
 0x302   : > { %v10589_v32 = vadd.f32 %v3521_v14, %v3433_v41  ;;  %v3345_v19 = vpop.f32.mrf.mxu0  ;;  %v10603_v41 = vor.u32 %v8452_v22, %v7303_v44 }
 0x303   : > { %v3346_v26 = vadd.f32 %v3345_v19, %v10288_v10  ;;  %12829 = vst [vmem:[#allocation125_spill] sm:$0xff] %v10605_v16  ;;  %v10609_v19 = vor.u32 %v8364_v27, %v6933_v52  ;;  %v6973_v52 = vld [vmem:[%s9441_s27 + $0x1a0] sm:$0xf]  ;;  %v8375_v27 = vld [vmem:[%s9441_s27 + $0x1cc] sm:$0xf0] }
 0x304   : > { %v3434_v42 = vpop.f32.mrf.mxu1  ;;  %12828 = vst [vmem:[#allocation124_spill] sm:$0xff] %v10603_v41 }
 0x305   : > { %v3435_v62 = vadd.f32 %v3434_v42, %v3346_v26  ;;  %12830 = vst [vmem:[#allocation126_spill] sm:$0xff] %v10609_v19  ;;  %v10611_v26 = vor.u32 %v8357_v24, %v6927_v2  ;;  %v6981_v24 = vld [vmem:[%s9441_s27 + $0x1a8] sm:$0xf] }
 0x307   : > { %12831 = vst [vmem:[#allocation127_spill] sm:$0xff] %v10611_v26 }
 0x308   : > { %v3572_v3 = vpop.f32.mrf.mxu3 }
 0x309   : > { %v3523_v46 = vpop.f32.mrf.mxu2  ;;  %v10601_v0 = vadd.f32 %v3572_v3, %v10294_v56  ;;  %v8376_v3 = vld [vmem:[%s9441_s27 + $0x1d4] sm:$0xf0] }
 0x30a   : > { %v10607_v10 = vadd.f32 %v3523_v46, %v3435_v62  ;;  %v3348_v14 = vpop.f32.mrf.mxu0 }
 0x30b   : > { %v3349_v42 = vadd.f32 %v3348_v14, %v10306_v51  ;;  %v8369_v14 = vld [vmem:[%s9441_s27 + $0x1a4] sm:$0xf] }
 0x30c   : > { %v3437_v53 = vpop.f32.mrf.mxu1 }
 0x30d   : > { %v3438_v30 = vadd.f32 %v3437_v53, %v3349_v42  ;;  %3614 = vmatmul.bf16.gmra.mxu3 %v10603_v41  ;;  %3663 = vmatmul.bf16.gmra.mxu0 %v10605_v16  ;;  %v6975_v42 = vld [vmem:[%s9441_s27 + $0x1d0] sm:$0xf0] }
 0x30e   : > { %3841 = vmatmul.bf16.gmra.mxu2 %v10609_v19 }
 0x30f   : > { %3752 = vmatmul.bf16.gmra.mxu1 %v10611_v26 }
 0x310   : > { %v3575_v56 = vpop.f32.mrf.mxu3 }
 0x311   : > { %v3526_v46 = vpop.f32.mrf.mxu2  ;;  %v10619_v51 = vadd.f32 %v3575_v56, %v10308_v17  ;;  %v10637_v56 = vor.u32 %v8375_v27, %v6973_v52  ;;  %v8476_v27 = vld [vmem:[%s9441_s27 + $0x4fc] sm:$0xf] }
 0x312   : > { %v10621_v2 = vadd.f32 %v3526_v46, %v3438_v30  ;;  %v3350_v53 = vpop.f32.mrf.mxu0  ;;  %v10635_v30 = vor.u32 %v8464_v13, %v7351_v25 }
 0x313   : > { %v3351_v62 = vadd.f32 %v3350_v53, %v10320_v43  ;;  %12833 = vst [vmem:[#allocation129_spill] sm:$0xff] %v10637_v56  ;;  %v10641_v53 = vor.u32 %v8376_v3, %v6981_v24  ;;  %v7399_v24 = vld [vmem:[%s9441_s27 + $0x528] sm:$0xf0]  ;;  %v7021_v3 = vld [vmem:[%s9441_s27 + $0x200] sm:$0xf] }
 0x314   : > { %v3439_v22 = vpop.f32.mrf.mxu1  ;;  %12832 = vst [vmem:[#allocation128_spill] sm:$0xff] %v10635_v30 }
 0x315   : > { %v3440_v44 = vadd.f32 %v3439_v22, %v3351_v62  ;;  %12834 = vst [vmem:[#allocation130_spill] sm:$0xff] %v10641_v53  ;;  %v10643_v62 = vor.u32 %v8369_v14, %v6975_v42  ;;  %v8387_v14 = vld [vmem:[%s9441_s27 + $0x22c] sm:$0xf0]  ;;  %v7029_v42 = vld [vmem:[%s9441_s27 + $0x208] sm:$0xf] }
 0x317   : > { %12835 = vst [vmem:[#allocation131_spill] sm:$0xff] %v10643_v62 }
 0x318   : > { %v3577_v26 = vpop.f32.mrf.mxu3 }
 0x319   : > { %v3528_v19 = vpop.f32.mrf.mxu2  ;;  %v10633_v17 = vadd.f32 %v3577_v26, %v10326_v15  ;;  %v8693_v15 = vld [vmem:[%s12531_s3 + $0x2c0] sm:$0xff] }
 0x31a   : > { %v10639_v43 = vadd.f32 %v3528_v19, %v3440_v44  ;;  %v3353_v46 = vpop.f32.mrf.mxu0  ;;  %3914 = vmatpush.bf16.msrb.mxu3 %v8693_v15 }
 0x31b   : > { %v3354_v22 = vadd.f32 %v3353_v46, %v10350_v54  ;;  %v8388_v46 = vld [vmem:[%s9441_s27 + $0x234] sm:$0xf0] }
 0x31c   : > { %v3442_v16 = vpop.f32.mrf.mxu1 }
 0x31d   : > { %v3443_v41 = vadd.f32 %v3442_v16, %v3354_v22  ;;  %3619 = vmatmul.bf16.gmra.mxu3 %v10635_v30  ;;  %3668 = vmatmul.bf16.gmra.mxu0 %v10637_v56  ;;  %v8381_v22 = vld [vmem:[%s9441_s27 + $0x204] sm:$0xf] }
 0x31e   : > { %3846 = vmatmul.bf16.gmra.mxu2 %v10641_v53 }
 0x31f   : > { %3757 = vmatmul.bf16.gmra.mxu1 %v10643_v62  ;;  %v7023_v62 = vld [vmem:[%s9441_s27 + $0x230] sm:$0xf0] }
 0x320   : > { %v3580_v54 = vpop.f32.mrf.mxu3 }
 0x321   : > { %v3531_v16 = vpop.f32.mrf.mxu2  ;;  %v10654_v19 = vadd.f32 %v3580_v54, %v10352_v18  ;;  %v10672_v54 = vor.u32 %v8387_v14, %v7021_v3  ;;  %v8488_v3 = vld [vmem:[%s9441_s27 + $0x55c] sm:$0xf]  ;;  %v7447_v14 = vld [vmem:[%s9441_s27 + $0x588] sm:$0xf0] }
 0x322   : > { %v10656_v26 = vadd.f32 %v3531_v16, %v3443_v41  ;;  %v3355_v44 = vpop.f32.mrf.mxu0  ;;  %v10670_v41 = vor.u32 %v8476_v27, %v7399_v24 }
 0x323   : > { %v3356_v13 = vadd.f32 %v3355_v44, %v10364_v4  ;;  %12837 = vst [vmem:[#allocation133_spill] sm:$0xff] %v10672_v54  ;;  %v10676_v44 = vor.u32 %v8388_v46, %v7029_v42  ;;  %v7069_v42 = vld [vmem:[%s9441_s27 + $0x260] sm:$0xf]  ;;  %v8399_v46 = vld [vmem:[%s9441_s27 + $0x28c] sm:$0xf0] }
 0x324   : > { %v3444_v25 = vpop.f32.mrf.mxu1  ;;  %12836 = vst [vmem:[#allocation132_spill] sm:$0xff] %v10670_v41 }
 0x325   : > { %v3445_v52 = vadd.f32 %v3444_v25, %v3356_v13  ;;  %12838 = vst [vmem:[#allocation134_spill] sm:$0xff] %v10676_v44  ;;  %v10678_v13 = vor.u32 %v8381_v22, %v7023_v62  ;;  %v7077_v22 = vld [vmem:[%s9441_s27 + $0x268] sm:$0xf] }
 0x327   : > { %12839 = vst [vmem:[#allocation135_spill] sm:$0xff] %v10678_v13 }
 0x328   : > { %v3582_v15 = vpop.f32.mrf.mxu3 }
 0x329   : > { %v3533_v53 = vpop.f32.mrf.mxu2  ;;  %v10668_v18 = vadd.f32 %v3582_v15, %v10370_v40  ;;  %v8400_v15 = vld [vmem:[%s9441_s27 + $0x294] sm:$0xf0] }
 0x32a   : > { %v10674_v4 = vadd.f32 %v3533_v53, %v3445_v52  ;;  %v3358_v16 = vpop.f32.mrf.mxu0 }
 0x32b   : > { %v3359_v25 = vadd.f32 %v3358_v16, %v10391_v9  ;;  %v8393_v16 = vld [vmem:[%s9441_s27 + $0x264] sm:$0xf] }
 0x32c   : > { %v3447_v56 = vpop.f32.mrf.mxu1 }
 0x32d   : > { %v3448_v30 = vadd.f32 %v3447_v56, %v3359_v25  ;;  %3624 = vmatmul.bf16.gmra.mxu3 %v10670_v41  ;;  %3673 = vmatmul.bf16.gmra.mxu0 %v10672_v54  ;;  %v7071_v25 = vld [vmem:[%s9441_s27 + $0x290] sm:$0xf0] }
 0x32e   : > { %3851 = vmatmul.bf16.gmra.mxu2 %v10676_v44  ;;  %v8532_v41 = vld [vmem:[%s12530_s2 + $0xb8] sm:$0xff] }
 0x32f   : > { %3762 = vmatmul.bf16.gmra.mxu1 %v10678_v13  ;;  %4750 = vmatpush.bf16.msrb.mxu2 %v8532_v41  ;;  %v8500_v41 = vld [vmem:[%s9441_s27 + $0x5bc] sm:$0xf] }
 0x330   : > { %v3585_v40 = vpop.f32.mrf.mxu3 }
 0x331   : > { %v3536_v53 = vpop.f32.mrf.mxu2  ;;  %v10686_v9 = vadd.f32 %v3585_v40, %v10399_v50  ;;  %v10704_v40 = vor.u32 %v8399_v46, %v7069_v42 }
 0x332   : > { %v10688_v62 = vadd.f32 %v3536_v53, %v3448_v30  ;;  %v3360_v56 = vpop.f32.mrf.mxu0  ;;  %v10702_v30 = vor.u32 %v8488_v3, %v7447_v14 }
 0x333   : > { %v3361_v52 = vadd.f32 %v3360_v56, %v10423_v23  ;;  %12841 = vst [vmem:[#allocation137_spill] sm:$0xff] %v10704_v40  ;;  %v10708_v56 = vor.u32 %v8400_v15, %v7077_v22 }
 0x334   : > { %v3449_v27 = vpop.f32.mrf.mxu1  ;;  %12840 = vst [vmem:[#allocation136_spill] sm:$0xff] %v10702_v30 }
 0x335   : > { %v3450_v24 = vadd.f32 %v3449_v27, %v3361_v52  ;;  %12842 = vst [vmem:[#allocation138_spill] sm:$0xff] %v10708_v56  ;;  %v10710_v52 = vor.u32 %v8393_v16, %v7071_v25  ;;  %v7495_v16 = vld [vmem:[%s9441_s27 + $0x5e8] sm:$0xf0]  ;;  %v7117_v25 = vld [vmem:[%s9441_s27 + $0x2c0] sm:$0xf] }
 0x337   : > { %12843 = vst [vmem:[#allocation139_spill] sm:$0xff] %v10710_v52 }
 0x338   : > { %v3587_v13 = vpop.f32.mrf.mxu3 }
 0x339   : > { %v3538_v44 = vpop.f32.mrf.mxu2  ;;  %v10700_v50 = vadd.f32 %v3587_v13, %v10435_v34 }
 0x33a   : > { %v10706_v23 = vadd.f32 %v3538_v44, %v3450_v24  ;;  %v3363_v53 = vpop.f32.mrf.mxu0  ;;  %v8516_v44 = vld [vmem:[%s12530_s2 + $0x38] sm:$0xff] }
 0x33b   : > { %v3364_v27 = vadd.f32 %v3363_v53, %v10453_v49  ;;  %v8540_v49 = vld [vmem:[%s12530_s2 + $0xf8] sm:$0xff]  ;;  %4572 = vmatpush.bf16.msrb.mxu0 %v8516_v44  ;;  %v8411_v53 = vld [vmem:[%s9441_s27 + $0x2ec] sm:$0xf0] }
 0x33c   : > { %v3452_v54 = vpop.f32.mrf.mxu1  ;;  %4839 = vmatpush.bf16.msra.mxu3 %v8540_v49  ;;  %v8412_v44 = vld [vmem:[%s9441_s27 + $0x2f4] sm:$0xf0]  ;;  %v8405_v49 = vld [vmem:[%s9441_s27 + $0x2c4] sm:$0xf] }
 0x33d   : > { %v3453_v34 = vadd.f32 %v3452_v54, %v3364_v27  ;;  %3629 = vmatmul.bf16.gmra.mxu3 %v10702_v30  ;;  %3678 = vmatmul.bf16.gmra.mxu0 %v10704_v40  ;;  %v8524_v54 = vld [vmem:[%s12530_s2 + $0x78] sm:$0xff]  ;;  %v7125_v27 = vld [vmem:[%s9441_s27 + $0x2c8] sm:$0xf] }
 0x33e   : > { %3856 = vmatmul.bf16.gmra.mxu2 %v10708_v56  ;;  %4661 = vmatpush.bf16.msrb.mxu1 %v8524_v54  ;;  %v10748_v54 = vor.u32 %v8411_v53, %v7117_v25  ;;  %v7165_v25 = vld [vmem:[%s9441_s27 + $0x320] sm:$0xf]  ;;  %v8423_v53 = vld [vmem:[%s9441_s27 + $0x34c] sm:$0xf0] }
 0x33f   : > { %3767 = vmatmul.bf16.gmra.mxu1 %v10710_v52  ;;  %v7119_v52 = vld [vmem:[%s9441_s27 + $0x2f0] sm:$0xf0] }
 0x340   : > { %v3590_v13 = vpop.f32.mrf.mxu3  ;;  %12845 = vst [vmem:[#allocation141_spill] sm:$0xff] %v10748_v54 }
 0x341   : > { %v3541_v24 = vpop.f32.mrf.mxu2  ;;  %v10730_v3 = vadd.f32 %v3590_v13, %v10455_v31 }
 0x342   : > { %v10732_v14 = vadd.f32 %v3541_v24, %v3453_v34  ;;  %v3365_v42 = vpop.f32.mrf.mxu0  ;;  %v10746_v34 = vor.u32 %v8500_v41, %v7495_v16  ;;  %v10752_v24 = vor.u32 %v8412_v44, %v7125_v27  ;;  %v7173_v27 = vld [vmem:[%s9441_s27 + $0x328] sm:$0xf]  ;;  %v8322_v44 = vld [vmem:[%s9441_s27 + $0x2c] sm:$0xf] }
 0x343   : > { %v3366_v46 = vadd.f32 %v3365_v42, %v10467_v11  ;;  %v10754_v42 = vor.u32 %v8405_v49, %v7119_v52  ;;  %v6791_v49 = vld [vmem:[%s9441_s27 + $0x58] sm:$0xf0] }
 0x344   : > { %v3454_v22 = vpop.f32.mrf.mxu1  ;;  %12844 = vst [vmem:[#allocation140_spill] sm:$0xff] %v10746_v34 }
 0x345   : > { %v3455_v15 = vadd.f32 %v3454_v22, %v3366_v46  ;;  %12846 = vst [vmem:[#allocation142_spill] sm:$0xff] %v10752_v24 }
 0x346   : > { %12847 = vst [vmem:[#allocation143_spill] sm:$0xff] %v10754_v42 }
 0x348   : > { %v3592_v56 = vpop.f32.mrf.mxu3 }
 0x349   : > { %v3543_v40 = vpop.f32.mrf.mxu2  ;;  %v10744_v31 = vadd.f32 %v3592_v56, %v10473_v28 }
 0x34a   : > { %v10750_v11 = vadd.f32 %v3543_v40, %v3455_v15  ;;  %v3368_v13 = vpop.f32.mrf.mxu0 }
 0x34b   : > { %v3369_v46 = vadd.f32 %v3368_v13, %v10485_v1  ;;  %v8424_v13 = vld [vmem:[%s9441_s27 + $0x354] sm:$0xf0] }
 0x34c   : > { %v3457_v22 = vpop.f32.mrf.mxu1 }
 0x34d   : > { %v3458_v30 = vadd.f32 %v3457_v22, %v3369_v46  ;;  %3634 = vmatmul.bf16.gmra.mxu3 %v10746_v34  ;;  %3683 = vmatmul.bf16.gmra.mxu0 %v10748_v54  ;;  %v8417_v46 = vld [vmem:[%s9441_s27 + $0x324] sm:$0xf]  ;;  %v7167_v22 = vld [vmem:[%s9441_s27 + $0x350] sm:$0xf0] }
 0x34e   : > { %3861 = vmatmul.bf16.gmra.mxu2 %v10752_v24  ;;  %v8531_v34 = vld [vmem:[%s12530_s2 + $0xb0] sm:$0xff] }
 0x34f   : > { %3772 = vmatmul.bf16.gmra.mxu1 %v10754_v42  ;;  %4751 = vmatpush.bf16.msrb.mxu2 %v8531_v34  ;;  %v7213_v34 = vld [vmem:[%s9441_s27 + $0x380] sm:$0xf] }
 0x350   : > { %v3595_v28 = vpop.f32.mrf.mxu3 }
 0x351   : > { %v3546_v40 = vpop.f32.mrf.mxu2  ;;  %v10762_v1 = vadd.f32 %v3595_v28, %v10487_v37  ;;  %v10780_v28 = vor.u32 %v8322_v44, %v6791_v49 }
 0x352   : > { %v10764_v56 = vadd.f32 %v3546_v40, %v3458_v30  ;;  %v3370_v52 = vpop.f32.mrf.mxu0  ;;  %v10778_v30 = vor.u32 %v8423_v53, %v7165_v25 }
 0x353   : > { %v3371_v15 = vadd.f32 %v3370_v52, %v10499_v12  ;;  %12849 = vst [vmem:[#allocation145_spill] sm:$0xff] %v10780_v28  ;;  %v10784_v52 = vor.u32 %v8424_v13, %v7173_v27 }
 0x354   : > { %v3459_v41 = vpop.f32.mrf.mxu1  ;;  %12848 = vst [vmem:[#allocation144_spill] sm:$0xff] %v10778_v30 }
 0x355   : > { %v3460_v16 = vadd.f32 %v3459_v41, %v3371_v15  ;;  %12850 = vst [vmem:[#allocation146_spill] sm:$0xff] %v10784_v52  ;;  %v10786_v15 = vor.u32 %v8417_v46, %v7167_v22  ;;  %v8435_v46 = vld [vmem:[%s9441_s27 + $0x3ac] sm:$0xf0]  ;;  %v7221_v22 = vld [vmem:[%s9441_s27 + $0x388] sm:$0xf] }
 0x357   : > { %12851 = vst [vmem:[#allocation147_spill] sm:$0xff] %v10786_v15 }
 0x358   : > { %v3597_v42 = vpop.f32.mrf.mxu3 }
 0x359   : > { %v3548_v24 = vpop.f32.mrf.mxu2  ;;  %v10776_v37 = vadd.f32 %v3597_v42, %v10505_v20 }
 0x35a   : > { %v10782_v12 = vadd.f32 %v3548_v24, %v3460_v16  ;;  %v3649_v40 = vpop.f32.mrf.mxu0  ;;  %v8515_v24 = vld [vmem:[%s12530_s2 + $0x30] sm:$0xff] }
 0x35b   : > { %v3650_v41 = vadd.f32 %v3649_v40, %v10520_v39  ;;  %v8539_v39 = vld [vmem:[%s12530_s2 + $0xf0] sm:$0xff]  ;;  %4573 = vmatpush.bf16.msrb.mxu0 %v8515_v24  ;;  %v8436_v24 = vld [vmem:[%s9441_s27 + $0x3b4] sm:$0xf0] }
 0x35c   : > { %v3738_v54 = vpop.f32.mrf.mxu1  ;;  %4840 = vmatpush.bf16.msra.mxu3 %v8539_v39  ;;  %v8334_v40 = vld [vmem:[%s9441_s27 + $0x8c] sm:$0xf]  ;;  %v8429_v39 = vld [vmem:[%s9441_s27 + $0x384] sm:$0xf] }
 0x35d   : > { %v3739_v20 = vadd.f32 %v3738_v54, %v3650_v41  ;;  %3688 = vmatmul.bf16.gmra.mxu0 %v10778_v30  ;;  %3915 = vmatmul.bf16.vlgmr.msrb.gmra.mxu3 %v10780_v28  ;;  %v8523_v54 = vld [vmem:[%s12530_s2 + $0x70] sm:$0xff]  ;;  %v6839_v41 = vld [vmem:[%s9441_s27 + $0xb8] sm:$0xf0] }
 0x35e   : > { %3866 = vmatmul.bf16.gmra.mxu2 %v10784_v52  ;;  %4662 = vmatpush.bf16.msrb.mxu1 %v8523_v54 }
 0x35f   : > { %3777 = vmatmul.bf16.gmra.mxu1 %v10786_v15  ;;  %v7215_v15 = vld [vmem:[%s9441_s27 + $0x3b0] sm:$0xf0] }
 0x360   : > { %v3600_v42 = vpop.f32.mrf.mxu3 }
 0x361   : > { %v10806_v16 = vadd.f32 %v3600_v42, %v10522_v63  ;;  %v3827_v25 = vpop.f32.mrf.mxu2  ;;  %v10824_v42 = vor.u32 %v8334_v40, %v6839_v41  ;;  %v7261_v40 = vld [vmem:[%s9441_s27 + $0x3e0] sm:$0xf]  ;;  %v8447_v41 = vld [vmem:[%s9441_s27 + $0x40c] sm:$0xf0] }
 0x362   : > { %v10808_v53 = vadd.f32 %v3827_v25, %v3739_v20  ;;  %v3651_v27 = vpop.f32.mrf.mxu0  ;;  %v10822_v20 = vor.u32 %v8435_v46, %v7213_v34 }
 0x363   : > { %v3652_v44 = vadd.f32 %v3651_v27, %v10534_v55  ;;  %12853 = vst [vmem:[#allocation149_spill] sm:$0xff] %v10824_v42  ;;  %v10828_v27 = vor.u32 %v8436_v24, %v7221_v22  ;;  %v7269_v24 = vld [vmem:[%s9441_s27 + $0x3e8] sm:$0xf] }
 0x364   : > { %v3740_v49 = vpop.f32.mrf.mxu1  ;;  %12852 = vst [vmem:[#allocation148_spill] sm:$0xff] %v10822_v20 }
 0x365   : > { %v3741_v13 = vadd.f32 %v3740_v49, %v3652_v44  ;;  %12854 = vst [vmem:[#allocation150_spill] sm:$0xff] %v10828_v27  ;;  %v10830_v44 = vor.u32 %v8429_v39, %v7215_v15  ;;  %v8346_v39 = vld [vmem:[%s9441_s27 + $0xec] sm:$0xf] }
 0x367   : > { %12855 = vst [vmem:[#allocation151_spill] sm:$0xff] %v10830_v44 }
 0x368   : > { %v3602_v52 = vpop.f32.mrf.mxu3 }
 0x369   : > { %v10820_v63 = vadd.f32 %v3602_v52, %v10540_v58  ;;  %v3829_v54 = vpop.f32.mrf.mxu2 }
 0x36a   : > { %v10826_v55 = vadd.f32 %v3829_v54, %v3741_v13  ;;  %v3654_v25 = vpop.f32.mrf.mxu0  ;;  %v6887_v54 = vld [vmem:[%s9441_s27 + $0x118] sm:$0xf0] }
 0x36b   : > { %v3655_v49 = vadd.f32 %v3654_v25, %v10552_v38  ;;  %v8448_v25 = vld [vmem:[%s9441_s27 + $0x414] sm:$0xf0] }
 0x36c   : > { %v3743_v28 = vpop.f32.mrf.mxu1 }
 0x36d   : > { %v3744_v58 = vadd.f32 %v3743_v28, %v3655_v49  ;;  %3693 = vmatmul.bf16.gmra.mxu0 %v10822_v20  ;;  %3920 = vmatmul.bf16.gmra.mxu3 %v10824_v42  ;;  %v8441_v49 = vld [vmem:[%s9441_s27 + $0x3e4] sm:$0xf] }
 0x36e   : > { %3871 = vmatmul.bf16.gmra.mxu2 %v10828_v27 }
 0x36f   : > { %3782 = vmatmul.bf16.gmra.mxu1 %v10830_v44  ;;  %v7263_v44 = vld [vmem:[%s9441_s27 + $0x410] sm:$0xf0] }
 0x370   : > { %v3605_v52 = vpop.f32.mrf.mxu3 }
 0x371   : > { %v10838_v38 = vadd.f32 %v3605_v52, %v10554_v21  ;;  %v3832_v15 = vpop.f32.mrf.mxu2 }
 0x372   : > { %v10840_v13 = vadd.f32 %v3832_v15, %v3744_v58  ;;  %v3656_v28 = vpop.f32.mrf.mxu0  ;;  %v10854_v58 = vor.u32 %v8447_v41, %v7261_v40  ;;  %v10856_v15 = vor.u32 %v8346_v39, %v6887_v54 }
 0x373   : > { %v3657_v34 = vadd.f32 %v3656_v28, %v10566_v5 }
 0x374   : > { %v3745_v46 = vpop.f32.mrf.mxu1  ;;  %12856 = vst [vmem:[#allocation152_spill] sm:$0xff] %v10854_v58 }
 0x375   : > { %v3746_v22 = vadd.f32 %v3745_v46, %v3657_v34  ;;  %12857 = vst [vmem:[#allocation153_spill] sm:$0xff] %v10856_v15  ;;  %v10860_v34 = vor.u32 %v8448_v25, %v7269_v24  ;;  %v10862_v46 = vor.u32 %v8441_v49, %v7263_v44  ;;  %v8514_v44 = vld [vmem:[%s12530_s2 + $0x28] sm:$0xff]  ;;  %v7309_v49 = vld [vmem:[%s9441_s27 + $0x440] sm:$0xf] }
 0x376   : > { %4574 = vmatpush.bf16.msrb.mxu0 %v8514_v44  ;;  %v6935_v44 = vld [vmem:[%s9441_s27 + $0x178] sm:$0xf0] }
 0x377   : > { %12858 = vst [vmem:[#allocation154_spill] sm:$0xff] %v10860_v34 }
 0x378   : > { %v3607_v27 = vpop.f32.mrf.mxu3  ;;  %12859 = vst [vmem:[#allocation155_spill] sm:$0xff] %v10862_v46 }
 0x379   : > { %v10852_v21 = vadd.f32 %v3607_v27, %v10572_v29  ;;  %v3834_v52 = vpop.f32.mrf.mxu2  ;;  %v8530_v29 = vld [vmem:[%s12530_s2 + $0xa8] sm:$0xff] }
 0x37a   : > { %v10858_v5 = vadd.f32 %v3834_v52, %v3746_v22  ;;  %v3659_v28 = vpop.f32.mrf.mxu0  ;;  %4752 = vmatpush.bf16.msrb.mxu2 %v8530_v29  ;;  %v8459_v52 = vld [vmem:[%s9441_s27 + $0x46c] sm:$0xf0]  ;;  %v8358_v29 = vld [vmem:[%s9441_s27 + $0x14c] sm:$0xf] }
 0x37b   : > { %v3660_v42 = vadd.f32 %v3659_v28, %v10587_v61  ;;  %v8538_v61 = vld [vmem:[%s12530_s2 + $0xe8] sm:$0xff] }
 0x37c   : > { %v3748_v20 = vpop.f32.mrf.mxu1  ;;  %4841 = vmatpush.bf16.msra.mxu3 %v8538_v61  ;;  %v7317_v28 = vld [vmem:[%s9441_s27 + $0x448] sm:$0xf]  ;;  %v8453_v61 = vld [vmem:[%s9441_s27 + $0x444] sm:$0xf] }
 0x37d   : > { %v3749_v27 = vadd.f32 %v3748_v20, %v3660_v42  ;;  %3698 = vmatmul.bf16.gmra.mxu0 %v10854_v58  ;;  %3925 = vmatmul.bf16.gmra.mxu3 %v10856_v15  ;;  %v8522_v20 = vld [vmem:[%s12530_s2 + $0x68] sm:$0xff] }
 0x37e   : > { %3876 = vmatmul.bf16.gmra.mxu2 %v10860_v34  ;;  %4663 = vmatpush.bf16.msrb.mxu1 %v8522_v20  ;;  %v7311_v34 = vld [vmem:[%s9441_s27 + $0x470] sm:$0xf0] }
 0x37f   : > { %3787 = vmatmul.bf16.gmra.mxu1 %v10862_v46  ;;  %v8460_v46 = vld [vmem:[%s9441_s27 + $0x474] sm:$0xf0] }
 0x380   : > { %v3610_v42 = vpop.f32.mrf.mxu3 }
 0x381   : > { %v10882_v22 = vadd.f32 %v3610_v42, %v10589_v32  ;;  %v3837_v40 = vpop.f32.mrf.mxu2  ;;  %v10900_v42 = vor.u32 %v8358_v29, %v6935_v44  ;;  %v8471_v29 = vld [vmem:[%s9441_s27 + $0x4cc] sm:$0xf0]  ;;  %v7365_v44 = vld [vmem:[%s9441_s27 + $0x4a8] sm:$0xf] }
 0x382   : > { %v10884_v41 = vadd.f32 %v3837_v40, %v3749_v27  ;;  %v3661_v24 = vpop.f32.mrf.mxu0  ;;  %v10898_v27 = vor.u32 %v8459_v52, %v7309_v49 }
 0x383   : > { %v3662_v39 = vadd.f32 %v3661_v24, %v10601_v0  ;;  %12861 = vst [vmem:[#allocation157_spill] sm:$0xff] %v10900_v42  ;;  %v10904_v24 = vor.u32 %v8460_v46, %v7317_v28  ;;  %v7357_v28 = vld [vmem:[%s9441_s27 + $0x4a0] sm:$0xf] }
 0x384   : > { %v3750_v54 = vpop.f32.mrf.mxu1  ;;  %12860 = vst [vmem:[#allocation156_spill] sm:$0xff] %v10898_v27 }
 0x385   : > { %v3751_v25 = vadd.f32 %v3750_v54, %v3662_v39  ;;  %12862 = vst [vmem:[#allocation158_spill] sm:$0xff] %v10904_v24  ;;  %v10906_v39 = vor.u32 %v8453_v61, %v7311_v34  ;;  %v8370_v61 = vld [vmem:[%s9441_s27 + $0x1ac] sm:$0xf] }
 0x387   : > { %12863 = vst [vmem:[#allocation159_spill] sm:$0xff] %v10906_v39 }
 0x388   : > { %v3612_v15 = vpop.f32.mrf.mxu3 }
 0x389   : > { %v10896_v32 = vadd.f32 %v3612_v15, %v10607_v10  ;;  %v3839_v20 = vpop.f32.mrf.mxu2 }
 0x38a   : > { %v10902_v0 = vadd.f32 %v3839_v20, %v3751_v25  ;;  %v3664_v40 = vpop.f32.mrf.mxu0  ;;  %v6983_v20 = vld [vmem:[%s9441_s27 + $0x1d8] sm:$0xf0] }
 0x38b   : > { %v3665_v54 = vadd.f32 %v3664_v40, %v10619_v51  ;;  %v8472_v40 = vld [vmem:[%s9441_s27 + $0x4d4] sm:$0xf0] }
 0x38c   : > { %v3753_v58 = vpop.f32.mrf.mxu1 }
 0x38d   : > { %v3754_v10 = vadd.f32 %v3753_v58, %v3665_v54  ;;  %3703 = vmatmul.bf16.gmra.mxu0 %v10898_v27  ;;  %3930 = vmatmul.bf16.gmra.mxu3 %v10900_v42  ;;  %v8465_v54 = vld [vmem:[%s9441_s27 + $0x4a4] sm:$0xf] }
 0x38e   : > { %3881 = vmatmul.bf16.gmra.mxu2 %v10904_v24 }
 0x38f   : > { %3792 = vmatmul.bf16.gmra.mxu1 %v10906_v39  ;;  %v7359_v39 = vld [vmem:[%s9441_s27 + $0x4d0] sm:$0xf0] }
 0x390   : > { %v3615_v15 = vpop.f32.mrf.mxu3 }
 0x391   : > { %v10914_v51 = vadd.f32 %v3615_v15, %v10621_v2  ;;  %v3842_v34 = vpop.f32.mrf.mxu2 }
 0x392   : > { %v10916_v46 = vadd.f32 %v3842_v34, %v3754_v10  ;;  %v3666_v58 = vpop.f32.mrf.mxu0  ;;  %v10930_v10 = vor.u32 %v8471_v29, %v7357_v28  ;;  %v10932_v34 = vor.u32 %v8370_v61, %v6983_v20 }
 0x393   : > { %v3667_v25 = vadd.f32 %v3666_v58, %v10633_v17 }
 0x394   : > { %v3755_v49 = vpop.f32.mrf.mxu1  ;;  %12864 = vst [vmem:[#allocation160_spill] sm:$0xff] %v10930_v10 }
 0x395   : > { %v3756_v52 = vadd.f32 %v3755_v49, %v3667_v25  ;;  %12865 = vst [vmem:[#allocation161_spill] sm:$0xff] %v10932_v34  ;;  %v10936_v25 = vor.u32 %v8472_v40, %v7365_v44  ;;  %v10938_v49 = vor.u32 %v8465_v54, %v7359_v39  ;;  %v8513_v39 = vld [vmem:[%s12530_s2 + $0x20] sm:$0xff] }
 0x396   : > { %4575 = vmatpush.bf16.msrb.mxu0 %v8513_v39  ;;  %v7405_v54 = vld [vmem:[%s9441_s27 + $0x500] sm:$0xf]  ;;  %v7031_v39 = vld [vmem:[%s9441_s27 + $0x238] sm:$0xf0] }
 0x397   : > { %12866 = vst [vmem:[#allocation162_spill] sm:$0xff] %v10936_v25 }
 0x398   : > { %v3617_v24 = vpop.f32.mrf.mxu3  ;;  %12867 = vst [vmem:[#allocation163_spill] sm:$0xff] %v10938_v49 }
 0x399   : > { %v10928_v2 = vadd.f32 %v3617_v24, %v10639_v43  ;;  %v3844_v15 = vpop.f32.mrf.mxu2  ;;  %v8529_v43 = vld [vmem:[%s12530_s2 + $0xa0] sm:$0xff] }
 0x39a   : > { %v10934_v17 = vadd.f32 %v3844_v15, %v3756_v52  ;;  %v3669_v58 = vpop.f32.mrf.mxu0  ;;  %4753 = vmatpush.bf16.msrb.mxu2 %v8529_v43  ;;  %v8483_v15 = vld [vmem:[%s9441_s27 + $0x52c] sm:$0xf0]  ;;  %v8382_v43 = vld [vmem:[%s9441_s27 + $0x20c] sm:$0xf] }
 0x39b   : > { %v3670_v42 = vadd.f32 %v3669_v58, %v10654_v19  ;;  %v8537_v19 = vld [vmem:[%s12530_s2 + $0xe0] sm:$0xff]  ;;  %v7413_v58 = vld [vmem:[%s9441_s27 + $0x508] sm:$0xf] }
 0x39c   : > { %v3758_v27 = vpop.f32.mrf.mxu1  ;;  %4842 = vmatpush.bf16.msra.mxu3 %v8537_v19  ;;  %v8477_v19 = vld [vmem:[%s9441_s27 + $0x504] sm:$0xf] }
 0x39d   : > { %v3759_v24 = vadd.f32 %v3758_v27, %v3670_v42  ;;  %3708 = vmatmul.bf16.gmra.mxu0 %v10930_v10  ;;  %3935 = vmatmul.bf16.gmra.mxu3 %v10932_v34  ;;  %v8521_v27 = vld [vmem:[%s12530_s2 + $0x60] sm:$0xff] }
 0x39e   : > { %3886 = vmatmul.bf16.gmra.mxu2 %v10936_v25  ;;  %4664 = vmatpush.bf16.msrb.mxu1 %v8521_v27  ;;  %v7407_v25 = vld [vmem:[%s9441_s27 + $0x530] sm:$0xf0] }
 0x39f   : > { %3797 = vmatmul.bf16.gmra.mxu1 %v10938_v49  ;;  %v8484_v49 = vld [vmem:[%s9441_s27 + $0x534] sm:$0xf0] }
 0x3a0   : > { %v3620_v42 = vpop.f32.mrf.mxu3 }
 0x3a1   : > { %v10958_v52 = vadd.f32 %v3620_v42, %v10656_v26  ;;  %v3847_v28 = vpop.f32.mrf.mxu2  ;;  %v10976_v42 = vor.u32 %v8382_v43, %v7031_v39  ;;  %v8519_v39 = vld [vmem:[%s12530_s2 + $0x50] sm:$0xff] }
 0x3a2   : > { %v10960_v29 = vadd.f32 %v3847_v28, %v3759_v24  ;;  %v3671_v44 = vpop.f32.mrf.mxu0  ;;  %v10974_v24 = vor.u32 %v8483_v15, %v7405_v54  ;;  %v8527_v54 = vld [vmem:[%s12530_s2 + $0x90] sm:$0xff] }
 0x3a3   : > { %v3672_v61 = vadd.f32 %v3671_v44, %v10668_v18  ;;  %12869 = vst [vmem:[#allocation165_spill] sm:$0xff] %v10976_v42  ;;  %v10980_v44 = vor.u32 %v8484_v49, %v7413_v58 }
 0x3a4   : > { %v3760_v20 = vpop.f32.mrf.mxu1  ;;  %12868 = vst [vmem:[#allocation164_spill] sm:$0xff] %v10974_v24 }
 0x3a5   : > { %v3761_v40 = vadd.f32 %v3760_v20, %v3672_v61  ;;  %12870 = vst [vmem:[#allocation166_spill] sm:$0xff] %v10980_v44  ;;  %v10982_v61 = vor.u32 %v8477_v19, %v7407_v25  ;;  %v7453_v19 = vld [vmem:[%s9441_s27 + $0x560] sm:$0xf] }
 0x3a7   : > { %12871 = vst [vmem:[#allocation167_spill] sm:$0xff] %v10982_v61 }
 0x3a8   : > { %v3622_v34 = vpop.f32.mrf.mxu3 }
 0x3a9   : > { %v10972_v26 = vadd.f32 %v3622_v34, %v10674_v4  ;;  %v3849_v27 = vpop.f32.mrf.mxu2  ;;  %v8512_v4 = vld [vmem:[%s12530_s2 + $0x18] sm:$0xff] }
 0x3aa   : > { %v10978_v18 = vadd.f32 %v3849_v27, %v3761_v40  ;;  %v3674_v28 = vpop.f32.mrf.mxu0  ;;  %v8528_v34 = vld [vmem:[%s12530_s2 + $0x98] sm:$0xff]  ;;  %4576 = vmatpush.bf16.msrb.mxu0 %v8512_v4  ;;  %v8511_v40 = vld [vmem:[%s12530_s2 + $0x10] sm:$0xff] }
 0x3ab   : > { %v3675_v20 = vadd.f32 %v3674_v28, %v10686_v9  ;;  %4754 = vmatpush.bf16.msrb.mxu2 %v8528_v34  ;;  %v8520_v9 = vld [vmem:[%s12530_s2 + $0x58] sm:$0xff]  ;;  %v8495_v27 = vld [vmem:[%s9441_s27 + $0x58c] sm:$0xf0]  ;;  %v8394_v34 = vld [vmem:[%s9441_s27 + $0x26c] sm:$0xf] }
 0x3ac   : > { %v3763_v10 = vpop.f32.mrf.mxu1  ;;  %4665 = vmatpush.bf16.msrb.mxu1 %v8520_v9  ;;  %v8496_v4 = vld [vmem:[%s9441_s27 + $0x594] sm:$0xf0]  ;;  %v7079_v9 = vld [vmem:[%s9441_s27 + $0x298] sm:$0xf0] }
 0x3ad   : > { %v3764_v30 = vadd.f32 %v3763_v10, %v3675_v20  ;;  %3713 = vmatmul.bf16.gmra.mxu0 %v10974_v24  ;;  %3940 = vmatmul.bf16.gmra.mxu3 %v10976_v42  ;;  %v7461_v20 = vld [vmem:[%s9441_s27 + $0x568] sm:$0xf] }
 0x3ae   : > { %3891 = vmatmul.bf16.gmra.mxu2 %v10980_v44  ;;  %4577 = vmatpush.bf16.msrb.mxu0 %v8511_v40  ;;  %v8518_v40 = vld [vmem:[%s12530_s2 + $0x48] sm:$0xff]  ;;  %v11045_v42 = vor.u32 %v8496_v4, %v7461_v20 }
 0x3af   : > { %3802 = vmatmul.bf16.gmra.mxu1 %v10982_v61  ;;  %4755 = vmatpush.bf16.msrb.mxu2 %v8527_v54  ;;  %v8509_v61 = vld [vmem:[%s12530_s2] sm:$0xff] }
 0x3b0   : > { %v3625_v10 = vpop.f32.mrf.mxu3  ;;  %4666 = vmatpush.bf16.msrb.mxu1 %v8519_v39  ;;  %v11035_v39 = vor.u32 %v8394_v34, %v7079_v9  ;;  %12874 = vst [vmem:[#allocation170_spill] sm:$0xff] %v11045_v42  ;;  %v8517_v34 = vld [vmem:[%s12530_s2 + $0x40] sm:$0xff] }
 0x3b1   : > { %v10999_v25 = vadd.f32 %v3625_v10, %v10688_v62  ;;  %v3852_v49 = vpop.f32.mrf.mxu2  ;;  %v8489_v10 = vld [vmem:[%s9441_s27 + $0x564] sm:$0xf] }
 0x3b2   : > { %v11007_v15 = vadd.f32 %v3852_v49, %v3764_v30  ;;  %v3676_v58 = vpop.f32.mrf.mxu0  ;;  %v8510_v30 = vld [vmem:[%s12530_s2 + $0x8] sm:$0xff]  ;;  %v7455_v49 = vld [vmem:[%s9441_s27 + $0x590] sm:$0xf0]  ;;  %12873 = vst [vmem:[#allocation169_spill] sm:$0xff] %v11035_v39 }
 0x3b3   : > { %v3677_v62 = vadd.f32 %v3676_v58, %v10700_v50  ;;  %v8526_v50 = vld [vmem:[%s12530_s2 + $0x88] sm:$0xff]  ;;  %4578 = vmatpush.bf16.msrb.mxu0 %v8510_v30  ;;  %v8525_v30 = vld [vmem:[%s12530_s2 + $0x80] sm:$0xff] }
 0x3b4   : > { %v3765_v43 = vpop.f32.mrf.mxu1  ;;  %4756 = vmatpush.bf16.msrb.mxu2 %v8526_v50  ;;  %4667 = vmatpush.bf16.msrb.mxu1 %v8518_v40 }
 0x3b5   : > { %v3766_v28 = vadd.f32 %v3765_v43, %v3677_v62  ;;  %v11033_v43 = vor.u32 %v8495_v27, %v7453_v19 }
 0x3b7   : > { %12872 = vst [vmem:[#allocation168_spill] sm:$0xff] %v11033_v43  ;;  %4579 = vmatpush.bf16.msrb.mxu0 %v8509_v61 }
 0x3b8   : > { %v3627_v54 = vpop.f32.mrf.mxu3  ;;  %4757 = vmatpush.bf16.msrb.mxu2 %v8525_v30  ;;  %4668 = vmatpush.bf16.msrb.mxu1 %v8517_v34  ;;  %v7509_v30 = vld [vmem:[%s9441_s27 + $0x5c8] sm:$0xf]  ;;  %v8508_v34 = vld [vmem:[%s9441_s27 + $0x5f4] sm:$0xf0] }
 0x3b9   : > { %v11031_v58 = vadd.f32 %v3627_v54, %v10706_v23  ;;  %v3854_v62 = vpop.f32.mrf.mxu2  ;;  %v11047_v23 = vor.u32 %v8489_v10, %v7455_v49  ;;  %v7501_v54 = vld [vmem:[%s9441_s27 + $0x5c0] sm:$0xf] }
 0x3ba   : > { %v11043_v50 = vadd.f32 %v3854_v62, %v3766_v28  ;;  %v3679_v44 = vpop.f32.mrf.mxu0  ;;  %v8507_v62 = vld [vmem:[%s9441_s27 + $0x5ec] sm:$0xf0] }
 0x3bb   : > { %12875 = vst [vmem:[#allocation171_spill] sm:$0xff] %v11047_v23  ;;  %v3680_v19 = vadd.f32 %v3679_v44, %v10730_v3  ;;  %v8536_v3 = vld [vmem:[%s12530_s2 + $0xd8] sm:$0xff] }
 0x3bc   : > { %v3768_v27 = vpop.f32.mrf.mxu1  ;;  %4843 = vmatpush.bf16.msra.mxu3 %v8536_v3 }
 0x3bd   : > { %v3769_v9 = vadd.f32 %v3768_v27, %v3680_v19  ;;  %3718 = vmatmul.bf16.gmra.mxu0 %v11033_v43  ;;  %3945 = vmatmul.bf16.gmra.mxu3 %v11035_v39  ;;  %v8406_v19 = vld [vmem:[%s9441_s27 + $0x2cc] sm:$0xf]  ;;  %v7127_v27 = vld [vmem:[%s9441_s27 + $0x2f8] sm:$0xf0] }
 0x3be   : > { %3896 = vmatmul.bf16.gmra.mxu2 %v11045_v42  ;;  %v7503_v42 = vld [vmem:[%s9441_s27 + $0x5f0] sm:$0xf0] }
 0x3bf   : > { %3807 = vmatmul.bf16.gmra.mxu1 %v11047_v23  ;;  %v8501_v23 = vld [vmem:[%s9441_s27 + $0x5c4] sm:$0xf] }
 0x3c0   : > { %v3630_v44 = vpop.f32.mrf.mxu3 }
 0x3c1   : > { %v11061_v61 = vadd.f32 %v3630_v44, %v10732_v14  ;;  %v3857_v28 = vpop.f32.mrf.mxu2 }
 0x3c2   : > { %v11063_v20 = vadd.f32 %v3857_v28, %v3769_v9  ;;  %v3681_v4 = vpop.f32.mrf.mxu0  ;;  %v11077_v9 = vor.u32 %v8507_v62, %v7501_v54  ;;  %v11079_v28 = vor.u32 %v8406_v19, %v7127_v27 }
 0x3c3   : > { %v3682_v10 = vadd.f32 %v3681_v4, %v10744_v31 }
 0x3c4   : > { %v3770_v49 = vpop.f32.mrf.mxu1 }
 0x3c5   : > { %v3771_v40 = vadd.f32 %v3770_v49, %v3682_v10  ;;  %v11083_v10 = vor.u32 %v8508_v34, %v7509_v30  ;;  %v11085_v49 = vor.u32 %v8501_v23, %v7503_v42  ;;  %v7175_v30 = vld [vmem:[%s9441_s27 + $0x358] sm:$0xf0] }
 0x3c8   : > { %v3632_v3 = vpop.f32.mrf.mxu3 }
 0x3c9   : > { %v11075_v14 = vadd.f32 %v3632_v3, %v10750_v11  ;;  %v3859_v44 = vpop.f32.mrf.mxu2 }
 0x3ca   : > { %v11081_v31 = vadd.f32 %v3859_v44, %v3771_v40  ;;  %v3684_v4 = vpop.f32.mrf.mxu0 }
 0x3cb   : > { %v3685_v39 = vadd.f32 %v3684_v4, %v10762_v1 }
 0x3cc   : > { %v3773_v43 = vpop.f32.mrf.mxu1 }
 0x3cd   : > { %v3774_v24 = vadd.f32 %v3773_v43, %v3685_v39  ;;  %3723 = vmatmul.bf16.gmra.mxu0 %v11077_v9  ;;  %3950 = vmatmul.bf16.gmra.mxu3 %v11079_v28  ;;  %v8418_v39 = vld [vmem:[%s9441_s27 + $0x32c] sm:$0xf] }
 0x3ce   : > { %3901 = vmatmul.bf16.gmra.mxu2 %v11083_v10  ;;  %v11103_v3 = vor.u32 %v8418_v39, %v7175_v30  ;;  %v7223_v39 = vld [vmem:[%s9441_s27 + $0x3b8] sm:$0xf0] }
 0x3cf   : > { %3812 = vmatmul.bf16.gmra.mxu1 %v11085_v49 }
 0x3d0   : > { %v3635_v11 = vpop.f32.mrf.mxu3 }
 0x3d1   : > { %v11093_v40 = vadd.f32 %v3635_v11, %v10764_v56  ;;  %v3862_v42 = vpop.f32.mrf.mxu2 }
 0x3d2   : > { %v11095_v23 = vadd.f32 %v3862_v42, %v3774_v24  ;;  %v3686_v54 = vpop.f32.mrf.mxu0 }
 0x3d3   : > { %v3687_v1 = vadd.f32 %v3686_v54, %v10776_v37  ;;  %v8535_v37 = vld [vmem:[%s12530_s2 + $0xd0] sm:$0xff] }
 0x3d4   : > { %v3775_v62 = vpop.f32.mrf.mxu1  ;;  %4844 = vmatpush.bf16.msra.mxu3 %v8535_v37 }
 0x3d5   : > { %v3776_v43 = vadd.f32 %v3775_v62, %v3687_v1 }
 0x3d8   : > { %v3637_v19 = vpop.f32.mrf.mxu3 }
 0x3d9   : > { %v11101_v27 = vadd.f32 %v3637_v19, %v10782_v12  ;;  %v3864_v34 = vpop.f32.mrf.mxu2 }
 0x3da   : > { %v11105_v44 = vadd.f32 %v3864_v34, %v3776_v43  ;;  %v3689_v56 = vpop.f32.mrf.mxu0 }
 0x3db   : > { %v3690_v24 = vadd.f32 %v3689_v56, %v10806_v16 }
 0x3dc   : > { %v3778_v4 = vpop.f32.mrf.mxu1 }
 0x3dd   : > { %v3779_v11 = vadd.f32 %v3778_v4, %v3690_v24  ;;  %3955 = vmatmul.bf16.gmra.mxu3 %v11103_v3  ;;  %4580 = vmatmul.bf16.vlgmr.msrb.gmra.mxu0 %v9452_v33 }
 0x3de   : > { %4758 = vmatmul.bf16.vlgmr.msrb.gmra.mxu2 %v9456_v35  ;;  %v8430_v35 = vld [vmem:[%s9441_s27 + $0x38c] sm:$0xf] }
 0x3df   : > { %4669 = vmatmul.bf16.vlgmr.msrb.gmra.mxu1 %v9458_v36  ;;  %v11126_v34 = vor.u32 %v8430_v35, %v7223_v39 }
 0x3e0   : > { %v3916_v12 = vpop.f32.mrf.mxu3 }
 0x3e1   : > { %v3867_v42 = vpop.f32.mrf.mxu2  ;;  %v11116_v16 = vadd.f32 %v3916_v12, %v10808_v53 }
 0x3e2   : > { %v11118_v54 = vadd.f32 %v3867_v42, %v3779_v11  ;;  %v3691_v1 = vpop.f32.mrf.mxu0 }
 0x3e3   : > { %v3692_v62 = vadd.f32 %v3691_v1, %v10820_v63 }
 0x3e4   : > { %v3780_v33 = vpop.f32.mrf.mxu1 }
 0x3e5   : > { %v3781_v43 = vadd.f32 %v3780_v33, %v3692_v62  ;;  %v8442_v33 = vld [vmem:[%s9441_s27 + $0x3ec] sm:$0xf] }
 0x3e8   : > { %v3918_v36 = vpop.f32.mrf.mxu3 }
 0x3e9   : > { %v3869_v30 = vpop.f32.mrf.mxu2  ;;  %v11124_v19 = vadd.f32 %v3918_v36, %v10826_v55 }
 0x3ea   : > { %v11128_v56 = vadd.f32 %v3869_v30, %v3781_v43  ;;  %v3694_v53 = vpop.f32.mrf.mxu0  ;;  %v7271_v43 = vld [vmem:[%s9441_s27 + $0x418] sm:$0xf0] }
 0x3eb   : > { %v3695_v24 = vadd.f32 %v3694_v53, %v10838_v38 }
 0x3ec   : > { %v3783_v4 = vpop.f32.mrf.mxu1 }
 0x3ed   : > { %v3784_v63 = vadd.f32 %v3783_v4, %v3695_v24  ;;  %3960 = vmatmul.bf16.gmra.mxu3 %v11126_v34  ;;  %4585 = vmatmul.bf16.gmra.mxu0 %v9476_v45 }
 0x3ee   : > { %4763 = vmatmul.bf16.gmra.mxu2 %v9480_v47 }
 0x3ef   : > { %4674 = vmatmul.bf16.gmra.mxu1 %v9482_v48  ;;  %v11146_v48 = vor.u32 %v8442_v33, %v7271_v43 }
 0x3f0   : > { %v3921_v55 = vpop.f32.mrf.mxu3 }
 0x3f1   : > { %v3872_v11 = vpop.f32.mrf.mxu2  ;;  %v11136_v37 = vadd.f32 %v3921_v55, %v10840_v13 }
 0x3f2   : > { %v11138_v12 = vadd.f32 %v3872_v11, %v3784_v63  ;;  %v3696_v42 = vpop.f32.mrf.mxu0 }
 0x3f3   : > { %v3697_v38 = vadd.f32 %v3696_v42, %v10852_v21  ;;  %v8534_v21 = vld [vmem:[%s12530_s2 + $0xc8] sm:$0xff]  ;;  %v7319_v42 = vld [vmem:[%s9441_s27 + $0x478] sm:$0xf0] }
 0x3f4   : > { %v3785_v1 = vpop.f32.mrf.mxu1  ;;  %4845 = vmatpush.bf16.msra.mxu3 %v8534_v21 }
 0x3f5   : > { %v3786_v62 = vadd.f32 %v3785_v1, %v3697_v38 }
 0x3f8   : > { %v3923_v35 = vpop.f32.mrf.mxu3 }
 0x3f9   : > { %v3874_v45 = vpop.f32.mrf.mxu2  ;;  %v11144_v47 = vadd.f32 %v3923_v35, %v10858_v5 }
 0x3fa   : > { %v11148_v39 = vadd.f32 %v3874_v45, %v3786_v62  ;;  %v3699_v13 = vpop.f32.mrf.mxu0 }
 0x3fb   : > { %v3700_v36 = vadd.f32 %v3699_v13, %v10882_v22 }
 0x3fc   : > { %v3788_v30 = vpop.f32.mrf.mxu1 }
 0x3fd   : > { %v3789_v53 = vadd.f32 %v3788_v30, %v3700_v36  ;;  %3965 = vmatmul.bf16.gmra.mxu3 %v11146_v48  ;;  %4590 = vmatmul.bf16.gmra.mxu0 %v9496_v57 }
 0x3fe   : > { %4768 = vmatmul.bf16.gmra.mxu2 %v9501_v59  ;;  %v8454_v59 = vld [vmem:[%s9441_s27 + $0x44c] sm:$0xf] }
 0x3ff   : > { %4679 = vmatmul.bf16.gmra.mxu1 %v9503_v60  ;;  %v11169_v62 = vor.u32 %v8454_v59, %v7319_v42  ;;  %v12877_v42 = vld [vmem:[#allocation10_spill] sm:$0xff] }
 0x400   : > { %v3926_v5 = vpop.f32.mrf.mxu3 }
 0x401   : > { %v3877_v24 = vpop.f32.mrf.mxu2  ;;  %v11159_v22 = vadd.f32 %v3926_v5, %v10884_v41  ;;  %v8466_v5 = vld [vmem:[%s9441_s27 + $0x4ac] sm:$0xf] }
 0x402   : > { %v11161_v4 = vadd.f32 %v3877_v24, %v3789_v53  ;;  %v3701_v63 = vpop.f32.mrf.mxu0  ;;  %v7367_v24 = vld [vmem:[%s9441_s27 + $0x4d8] sm:$0xf0] }
 0x403   : > { %v3702_v55 = vadd.f32 %v3701_v63, %v10896_v32 }
 0x404   : > { %v3790_v57 = vpop.f32.mrf.mxu1 }
 0x405   : > { %v3791_v11 = vadd.f32 %v3790_v57, %v3702_v55 }
 0x408   : > { %v3928_v60 = vpop.f32.mrf.mxu3 }
 0x409   : > { %v3879_v38 = vpop.f32.mrf.mxu2  ;;  %v11167_v1 = vadd.f32 %v3928_v60, %v10902_v0  ;;  %v12878_v60 = vld [vmem:[#allocation11_spill] sm:$0xff] }
 0x40a   : > { %v11171_v33 = vadd.f32 %v3879_v38, %v3791_v11  ;;  %v3704_v41 = vpop.f32.mrf.mxu0 }
 0x40b   : > { %v3705_v43 = vadd.f32 %v3704_v41, %v10914_v51 }
 0x40c   : > { %v3793_v35 = vpop.f32.mrf.mxu1 }
 0x40d   : > { %v3794_v32 = vadd.f32 %v3793_v35, %v3705_v43  ;;  %3970 = vmatmul.bf16.gmra.mxu3 %v11169_v62  ;;  %4595 = vmatmul.bf16.gmra.mxu0 %v9520_v6 }
 0x40e   : > { %4773 = vmatmul.bf16.gmra.mxu2 %v9524_v7 }
 0x40f   : > { %4684 = vmatmul.bf16.gmra.mxu1 %v9526_v8  ;;  %v11189_v8 = vor.u32 %v8466_v5, %v7367_v24 }
 0x410   : > { %v3931_v0 = vpop.f32.mrf.mxu3 }
 0x411   : > { %v3882_v45 = vpop.f32.mrf.mxu2  ;;  %v11179_v13 = vadd.f32 %v3931_v0, %v10916_v46 }
 0x412   : > { %v11181_v36 = vadd.f32 %v3882_v45, %v3794_v32  ;;  %v3706_v30 = vpop.f32.mrf.mxu0 }
 0x413   : > { %v3707_v51 = vadd.f32 %v3706_v30, %v10928_v2  ;;  %v12876_v2 = vld [vmem:[#allocation8_spill] sm:$0xff]  ;;  %v8478_v30 = vld [vmem:[%s9441_s27 + $0x50c] sm:$0xf] }
 0x414   : > { %v3795_v53 = vpop.f32.mrf.mxu1 }
 0x415   : > { %v3796_v21 = vadd.f32 %v3795_v53, %v3707_v51  ;;  %v7415_v51 = vld [vmem:[%s9441_s27 + $0x538] sm:$0xf0] }
 0x416   : > { %v11212_v24 = vor.u32 %v8478_v30, %v7415_v51 }
 0x418   : > { %v3933_v63 = vpop.f32.mrf.mxu3 }
 0x419   : > { %v3884_v6 = vpop.f32.mrf.mxu2  ;;  %v11187_v7 = vadd.f32 %v3933_v63, %v10934_v17  ;;  %v8533_v17 = vld [vmem:[%s12530_s2 + $0xc0] sm:$0xff] }
 0x41a   : > { %v11191_v55 = vadd.f32 %v3884_v6, %v3796_v21  ;;  %v3709_v46 = vpop.f32.mrf.mxu0  ;;  %4846 = vmatpush.bf16.msra.mxu3 %v8533_v17 }
 0x41b   : > { %v3710_v57 = vadd.f32 %v3709_v46, %v10958_v52 }
 0x41c   : > { %v3798_v11 = vpop.f32.mrf.mxu1 }
 0x41d   : > { %v3799_v59 = vadd.f32 %v3798_v11, %v3710_v57  ;;  %3975 = vmatmul.bf16.gmra.mxu3 %v11189_v8  ;;  %4600 = vmatmul.bf16.gmra.mxu0 %v12876_v2  ;;  %v12879_v57 = vld [vmem:[#allocation12_spill] sm:$0xff]  ;;  %v12880_v11 = vld [vmem:[#allocation14_spill] sm:$0xff] }
 0x41e   : > { %4778 = vmatmul.bf16.gmra.mxu2 %v12877_v42 }
 0x41f   : > { %4689 = vmatmul.bf16.gmra.mxu1 %v12878_v60 }
 0x420   : > { %v3936_v38 = vpop.f32.mrf.mxu3 }
 0x421   : > { %v3887_v41 = vpop.f32.mrf.mxu2  ;;  %v11202_v52 = vadd.f32 %v3936_v38, %v10960_v29 }
 0x422   : > { %v11204_v43 = vadd.f32 %v3887_v41, %v3799_v59  ;;  %v3711_v35 = vpop.f32.mrf.mxu0  ;;  %v12881_v59 = vld [vmem:[#allocation15_spill] sm:$0xff] }
 0x423   : > { %v3712_v32 = vadd.f32 %v3711_v35, %v10972_v26  ;;  %v8490_v35 = vld [vmem:[%s9441_s27 + $0x56c] sm:$0xf] }
 0x424   : > { %v3800_v0 = vpop.f32.mrf.mxu1 }
 0x425   : > { %v3801_v45 = vadd.f32 %v3800_v0, %v3712_v32  ;;  %v7463_v32 = vld [vmem:[%s9441_s27 + $0x598] sm:$0xf0] }
 0x426   : > { %v11232_v51 = vor.u32 %v8490_v35, %v7463_v32  ;;  %v8502_v32 = vld [vmem:[%s9441_s27 + $0x5cc] sm:$0xf] }
 0x428   : > { %v3938_v53 = vpop.f32.mrf.mxu3 }
 0x429   : > { %v3889_v21 = vpop.f32.mrf.mxu2  ;;  %v11210_v5 = vadd.f32 %v3938_v53, %v10978_v18 }
 0x42a   : > { %v11214_v63 = vadd.f32 %v3889_v21, %v3801_v45  ;;  %v3714_v29 = vpop.f32.mrf.mxu0 }
 0x42b   : > { %v3715_v6 = vadd.f32 %v3714_v29, %v10999_v25 }
 0x42c   : > { %v3803_v46 = vpop.f32.mrf.mxu1 }
 0x42d   : > { %v3804_v26 = vadd.f32 %v3803_v46, %v3715_v6  ;;  %3980 = vmatmul.bf16.gmra.mxu3 %v11212_v24  ;;  %4605 = vmatmul.bf16.gmra.mxu0 %v12879_v57  ;;  %v12882_v46 = vld [vmem:[#allocation16_spill] sm:$0xff]  ;;  %v8548_v57 = vld [vmem:[%s12530_s2 + $0x138] sm:$0xff] }
 0x42e   : > { %4783 = vmatmul.bf16.gmra.mxu2 %v12880_v11  ;;  %v8556_v11 = vld [vmem:[%s12530_s2 + $0x178] sm:$0xff]  ;;  %4928 = vmatpush.bf16.msra.mxu0 %v8548_v57 }
 0x42f   : > { %4694 = vmatmul.bf16.gmra.mxu1 %v12881_v59  ;;  %v12887_v57 = vld [vmem:[#allocation23_spill] sm:$0xff] }
 0x430   : > { %v3941_v18 = vpop.f32.mrf.mxu3  ;;  %5017 = vmatpush.bf16.msra.mxu1 %v8556_v11 }
 0x431   : > { %v3892_v2 = vpop.f32.mrf.mxu2  ;;  %v11222_v42 = vadd.f32 %v3941_v18, %v11007_v15 }
 0x432   : > { %v11224_v60 = vadd.f32 %v3892_v2, %v3804_v26  ;;  %v3716_v17 = vpop.f32.mrf.mxu0  ;;  %v12883_v26 = vld [vmem:[#allocation18_spill] sm:$0xff] }
 0x433   : > { %v3717_v25 = vadd.f32 %v3716_v17, %v11031_v58  ;;  %v8564_v58 = vld [vmem:[%s12530_s2 + $0x1b8] sm:$0xff] }
 0x434   : > { %v3805_v38 = vpop.f32.mrf.mxu1  ;;  %5106 = vmatpush.bf16.msra.mxu2 %v8564_v58 }
 0x435   : > { %v3806_v41 = vadd.f32 %v3805_v38, %v3717_v25 }
 0x438   : > { %v3943_v0 = vpop.f32.mrf.mxu3 }
 0x439   : > { %v3894_v45 = vpop.f32.mrf.mxu2  ;;  %v11230_v30 = vadd.f32 %v3943_v0, %v11043_v50  ;;  %v12884_v50 = vld [vmem:[#allocation19_spill] sm:$0xff] }
 0x43a   : > { %v11234_v53 = vadd.f32 %v3894_v45, %v3806_v41  ;;  %v3719_v15 = vpop.f32.mrf.mxu0  ;;  %v7511_v0 = vld [vmem:[%s9441_s27 + $0x5f8] sm:$0xf0] }
 0x43b   : > { %v3720_v21 = vadd.f32 %v3719_v15, %v11061_v61  ;;  %v8572_v61 = vld [vmem:[%s12530_s2 + $0x1f8] sm:$0xff] }
 0x43c   : > { %v3808_v29 = vpop.f32.mrf.mxu1  ;;  %5195 = vmatpush.bf16.msrb.mxu3 %v8572_v61 }
 0x43d   : > { %v3809_v6 = vadd.f32 %v3808_v29, %v3720_v21  ;;  %3985 = vmatmul.bf16.gmra.mxu3 %v11232_v51  ;;  %4610 = vmatmul.bf16.gmra.mxu0 %v12882_v46  ;;  %v11264_v29 = vor.u32 %v8502_v32, %v7511_v0 }
 0x43e   : > { %4788 = vmatmul.bf16.gmra.mxu2 %v12883_v26 }
 0x43f   : > { %4699 = vmatmul.bf16.gmra.mxu1 %v12884_v50  ;;  %v12886_v50 = vld [vmem:[#allocation22_spill] sm:$0xff] }
 0x440   : > { %v3946_v59 = vpop.f32.mrf.mxu3 }
 0x441   : > { %v3897_v18 = vpop.f32.mrf.mxu2  ;;  %v11254_v2 = vadd.f32 %v3946_v59, %v11063_v20 }
 0x442   : > { %v11256_v17 = vadd.f32 %v3897_v18, %v3809_v6  ;;  %v3721_v25 = vpop.f32.mrf.mxu0 }
 0x443   : > { %v3722_v38 = vadd.f32 %v3721_v25, %v11075_v14  ;;  %v12885_v14 = vld [vmem:[#allocation20_spill] sm:$0xff] }
 0x444   : > { %v3810_v41 = vpop.f32.mrf.mxu1 }
 0x445   : > { %v3811_v35 = vadd.f32 %v3810_v41, %v3722_v38 }
 0x448   : > { %v3948_v45 = vpop.f32.mrf.mxu3 }
 0x449   : > { %v3899_v15 = vpop.f32.mrf.mxu2  ;;  %v11262_v21 = vadd.f32 %v3948_v45, %v11081_v31 }
 0x44a   : > { %v11266_v58 = vadd.f32 %v3899_v15, %v3811_v35  ;;  %v3724_v20 = vpop.f32.mrf.mxu0 }
 0x44b   : > { %v3725_v6 = vadd.f32 %v3724_v20, %v11093_v40 }
 0x44c   : > { %v3813_v46 = vpop.f32.mrf.mxu1 }
 0x44d   : > { %v3814_v26 = vadd.f32 %v3813_v46, %v3725_v6  ;;  %3990 = vmatmul.bf16.gmra.mxu3 %v11264_v29  ;;  %4615 = vmatmul.bf16.gmra.mxu0 %v12885_v14  ;;  %v12888_v46 = vld [vmem:[#allocation24_spill] sm:$0xff]  ;;  %v12891_v14 = vld [vmem:[#allocation27_spill] sm:$0xff] }
 0x44e   : > { %4793 = vmatmul.bf16.gmra.mxu2 %v12886_v50  ;;  %v8555_v50 = vld [vmem:[%s12530_s2 + $0x170] sm:$0xff] }
 0x44f   : > { %4704 = vmatmul.bf16.gmra.mxu1 %v12887_v57 }
 0x450   : > { %v3951_v61 = vpop.f32.mrf.mxu3  ;;  %5018 = vmatpush.bf16.msra.mxu1 %v8555_v50 }
 0x451   : > { %v3902_v31 = vpop.f32.mrf.mxu2  ;;  %v11274_v11 = vadd.f32 %v3951_v61, %v11095_v23  ;;  %v8563_v23 = vld [vmem:[%s12530_s2 + $0x1b0] sm:$0xff] }
 0x452   : > { %v11276_v59 = vadd.f32 %v3902_v31, %v3814_v26  ;;  %v3726_v18 = vpop.f32.mrf.mxu0  ;;  %v12890_v26 = vld [vmem:[#allocation26_spill] sm:$0xff]  ;;  %5107 = vmatpush.bf16.msra.mxu2 %v8563_v23 }
 0x453   : > { %v3727_v40 = vadd.f32 %v3726_v18, %v11101_v27  ;;  %v12889_v27 = vld [vmem:[#allocation17_spill] sm:$0xff] }
 0x454   : > { %v3815_v25 = vpop.f32.mrf.mxu1 }
 0x455   : > { %v3816_v38 = vadd.f32 %v3815_v25, %v3727_v40 }
 0x458   : > { %v3953_v41 = vpop.f32.mrf.mxu3 }
 0x459   : > { %v3904_v35 = vpop.f32.mrf.mxu2  ;;  %v11280_v32 = vadd.f32 %v3953_v41, %v11105_v44  ;;  %v8547_v44 = vld [vmem:[%s12530_s2 + $0x130] sm:$0xff] }
 0x45a   : > { %v11282_v0 = vadd.f32 %v3904_v35, %v3816_v38  ;;  %v4581_v45 = vpop.f32.mrf.mxu0  ;;  %4929 = vmatpush.bf16.msra.mxu0 %v8547_v44 }
 0x45b   : > { %v4582_v15 = vadd.f32 %v4581_v45, %v11116_v16  ;;  %v8571_v16 = vld [vmem:[%s12530_s2 + $0x1f0] sm:$0xff] }
 0x45c   : > { %v4670_v20 = vpop.f32.mrf.mxu1  ;;  %5196 = vmatpush.bf16.msrb.mxu3 %v8571_v16 }
 0x45d   : > { %v4671_v6 = vadd.f32 %v4670_v20, %v4582_v15  ;;  %4620 = vmatmul.bf16.gmra.mxu0 %v12888_v46  ;;  %4847 = vmatmul.bf16.vlgmr.msra.gmra.mxu3 %v12889_v27 }
 0x45e   : > { %4798 = vmatmul.bf16.gmra.mxu2 %v12890_v26  ;;  %v12892_v26 = vld [vmem:[#allocation28_spill] sm:$0xff] }
 0x45f   : > { %4709 = vmatmul.bf16.gmra.mxu1 %v12891_v14  ;;  %v12894_v14 = vld [vmem:[#allocation30_spill] sm:$0xff] }
 0x460   : > { %v3956_v57 = vpop.f32.mrf.mxu3 }
 0x461   : > { %v11302_v61 = vadd.f32 %v3956_v57, %v11118_v54  ;;  %v4759_v31 = vpop.f32.mrf.mxu2 }
 0x462   : > { %v11304_v18 = vadd.f32 %v4759_v31, %v4671_v6  ;;  %v4583_v40 = vpop.f32.mrf.mxu0  ;;  %v12893_v6 = vld [vmem:[#allocation21_spill] sm:$0xff] }
 0x463   : > { %v4584_v25 = vadd.f32 %v4583_v40, %v11124_v19  ;;  %v12895_v19 = vld [vmem:[#allocation31_spill] sm:$0xff] }
 0x464   : > { %v4672_v38 = vpop.f32.mrf.mxu1 }
 0x465   : > { %v4673_v41 = vadd.f32 %v4672_v38, %v4584_v25 }
 0x468   : > { %v3958_v35 = vpop.f32.mrf.mxu3 }
 0x469   : > { %v11308_v45 = vadd.f32 %v3958_v35, %v11128_v56  ;;  %v4761_v15 = vpop.f32.mrf.mxu2 }
 0x46a   : > { %v11310_v20 = vadd.f32 %v4761_v15, %v4673_v41  ;;  %v4586_v23 = vpop.f32.mrf.mxu0 }
 0x46b   : > { %v4587_v54 = vadd.f32 %v4586_v23, %v11136_v37 }
 0x46c   : > { %v4675_v46 = vpop.f32.mrf.mxu1 }
 0x46d   : > { %v4676_v27 = vadd.f32 %v4675_v46, %v4587_v54  ;;  %4625 = vmatmul.bf16.gmra.mxu0 %v12892_v26  ;;  %4852 = vmatmul.bf16.gmra.mxu3 %v12893_v6  ;;  %v8562_v54 = vld [vmem:[%s12530_s2 + $0x1a8] sm:$0xff]  ;;  %v12898_v26 = vld [vmem:[#allocation34_spill] sm:$0xff] }
 0x46e   : > { %4803 = vmatmul.bf16.gmra.mxu2 %v12894_v14  ;;  %v8546_v6 = vld [vmem:[%s12530_s2 + $0x128] sm:$0xff] }
 0x46f   : > { %4714 = vmatmul.bf16.gmra.mxu1 %v12895_v19  ;;  %v8554_v14 = vld [vmem:[%s12530_s2 + $0x168] sm:$0xff]  ;;  %5108 = vmatpush.bf16.msra.mxu2 %v8562_v54 }
 0x470   : > { %v3961_v44 = vpop.f32.mrf.mxu3  ;;  %4930 = vmatpush.bf16.msra.mxu0 %v8546_v6  ;;  %5019 = vmatpush.bf16.msra.mxu1 %v8554_v14 }
 0x471   : > { %v11318_v56 = vadd.f32 %v3961_v44, %v11138_v12  ;;  %v4764_v16 = vpop.f32.mrf.mxu2 }
 0x472   : > { %v11320_v50 = vadd.f32 %v4764_v16, %v4676_v27  ;;  %v4588_v57 = vpop.f32.mrf.mxu0  ;;  %v12896_v27 = vld [vmem:[#allocation32_spill] sm:$0xff] }
 0x473   : > { %v4589_v37 = vadd.f32 %v4588_v57, %v11144_v47  ;;  %v12897_v47 = vld [vmem:[#allocation25_spill] sm:$0xff] }
 0x474   : > { %v4677_v31 = vpop.f32.mrf.mxu1 }
 0x475   : > { %v4678_v40 = vadd.f32 %v4677_v31, %v4589_v37 }
 0x478   : > { %v3963_v25 = vpop.f32.mrf.mxu3 }
 0x479   : > { %v11324_v38 = vadd.f32 %v3963_v25, %v11148_v39  ;;  %v4766_v41 = vpop.f32.mrf.mxu2  ;;  %v12899_v39 = vld [vmem:[#allocation35_spill] sm:$0xff] }
 0x47a   : > { %v11326_v35 = vadd.f32 %v4766_v41, %v4678_v40  ;;  %v4591_v15 = vpop.f32.mrf.mxu0 }
 0x47b   : > { %v4592_v23 = vadd.f32 %v4591_v15, %v11159_v22  ;;  %v8570_v22 = vld [vmem:[%s12530_s2 + $0x1e8] sm:$0xff] }
 0x47c   : > { %v4680_v12 = vpop.f32.mrf.mxu1  ;;  %5197 = vmatpush.bf16.msrb.mxu3 %v8570_v22 }
 0x47d   : > { %v4681_v46 = vadd.f32 %v4680_v12, %v4592_v23  ;;  %4630 = vmatmul.bf16.gmra.mxu0 %v12896_v27  ;;  %4857 = vmatmul.bf16.gmra.mxu3 %v12897_v47 }
 0x47e   : > { %4808 = vmatmul.bf16.gmra.mxu2 %v12898_v26  ;;  %v12900_v26 = vld [vmem:[#allocation36_spill] sm:$0xff] }
 0x47f   : > { %4719 = vmatmul.bf16.gmra.mxu1 %v12899_v39  ;;  %v12902_v39 = vld [vmem:[#allocation38_spill] sm:$0xff] }
 0x480   : > { %v3966_v19 = vpop.f32.mrf.mxu3 }
 0x481   : > { %v11346_v44 = vadd.f32 %v3966_v19, %v11161_v4  ;;  %v4769_v16 = vpop.f32.mrf.mxu2 }
 0x482   : > { %v11348_v57 = vadd.f32 %v4769_v16, %v4681_v46  ;;  %v4593_v37 = vpop.f32.mrf.mxu0  ;;  %v12901_v46 = vld [vmem:[#allocation29_spill] sm:$0xff] }
 0x483   : > { %v4594_v31 = vadd.f32 %v4593_v37, %v11167_v1  ;;  %v12903_v1 = vld [vmem:[#allocation39_spill] sm:$0xff] }
 0x484   : > { %v4682_v40 = vpop.f32.mrf.mxu1 }
 0x485   : > { %v4683_v25 = vadd.f32 %v4682_v40, %v4594_v31 }
 0x488   : > { %v3968_v41 = vpop.f32.mrf.mxu3 }
 0x489   : > { %v11352_v15 = vadd.f32 %v3968_v41, %v11171_v33  ;;  %v4771_v23 = vpop.f32.mrf.mxu2 }
 0x48a   : > { %v11354_v12 = vadd.f32 %v4771_v23, %v4683_v25  ;;  %v4596_v54 = vpop.f32.mrf.mxu0 }
 0x48b   : > { %v4597_v4 = vadd.f32 %v4596_v54, %v11179_v13 }
 0x48c   : > { %v4685_v27 = vpop.f32.mrf.mxu1 }
 0x48d   : > { %v4686_v47 = vadd.f32 %v4685_v27, %v4597_v4  ;;  %4635 = vmatmul.bf16.gmra.mxu0 %v12900_v26  ;;  %4862 = vmatmul.bf16.gmra.mxu3 %v12901_v46  ;;  %v8561_v4 = vld [vmem:[%s12530_s2 + $0x1a0] sm:$0xff]  ;;  %v12906_v26 = vld [vmem:[#allocation42_spill] sm:$0xff] }
 0x48e   : > { %4813 = vmatmul.bf16.gmra.mxu2 %v12902_v39  ;;  %v8545_v46 = vld [vmem:[%s12530_s2 + $0x120] sm:$0xff] }
 0x48f   : > { %4724 = vmatmul.bf16.gmra.mxu1 %v12903_v1  ;;  %v8553_v39 = vld [vmem:[%s12530_s2 + $0x160] sm:$0xff]  ;;  %5109 = vmatpush.bf16.msra.mxu2 %v8561_v4 }
 0x490   : > { %v3971_v6 = vpop.f32.mrf.mxu3  ;;  %4931 = vmatpush.bf16.msra.mxu0 %v8545_v46  ;;  %5020 = vmatpush.bf16.msra.mxu1 %v8553_v39  ;;  %v12911_v46 = vld [vmem:[#allocation47_spill] sm:$0xff] }
 0x491   : > { %v11362_v33 = vadd.f32 %v3971_v6, %v11181_v36  ;;  %v4774_v22 = vpop.f32.mrf.mxu2 }
 0x492   : > { %v11364_v14 = vadd.f32 %v4774_v22, %v4686_v47  ;;  %v4598_v19 = vpop.f32.mrf.mxu0  ;;  %v12904_v47 = vld [vmem:[#allocation40_spill] sm:$0xff] }
 0x493   : > { %v4599_v13 = vadd.f32 %v4598_v19, %v11187_v7  ;;  %v12905_v7 = vld [vmem:[#allocation33_spill] sm:$0xff] }
 0x494   : > { %v4687_v16 = vpop.f32.mrf.mxu1 }
 0x495   : > { %v4688_v37 = vadd.f32 %v4687_v16, %v4599_v13 }
 0x498   : > { %v3973_v31 = vpop.f32.mrf.mxu3 }
 0x499   : > { %v11368_v40 = vadd.f32 %v3973_v31, %v11191_v55  ;;  %v4776_v25 = vpop.f32.mrf.mxu2  ;;  %v12907_v55 = vld [vmem:[#allocation43_spill] sm:$0xff] }
 0x49a   : > { %v11370_v41 = vadd.f32 %v4776_v25, %v4688_v37  ;;  %v4601_v23 = vpop.f32.mrf.mxu0 }
 0x49b   : > { %v4602_v54 = vadd.f32 %v4601_v23, %v11202_v52  ;;  %v8569_v52 = vld [vmem:[%s12530_s2 + $0x1e0] sm:$0xff] }
 0x49c   : > { %v4690_v36 = vpop.f32.mrf.mxu1  ;;  %5198 = vmatpush.bf16.msrb.mxu3 %v8569_v52 }
 0x49d   : > { %v4691_v27 = vadd.f32 %v4690_v36, %v4602_v54  ;;  %4640 = vmatmul.bf16.gmra.mxu0 %v12904_v47  ;;  %4867 = vmatmul.bf16.gmra.mxu3 %v12905_v7 }
 0x49e   : > { %4818 = vmatmul.bf16.gmra.mxu2 %v12906_v26  ;;  %v12908_v26 = vld [vmem:[#allocation44_spill] sm:$0xff] }
 0x49f   : > { %4729 = vmatmul.bf16.gmra.mxu1 %v12907_v55  ;;  %v12910_v55 = vld [vmem:[#allocation46_spill] sm:$0xff] }
 0x4a0   : > { %v3976_v1 = vpop.f32.mrf.mxu3 }
 0x4a1   : > { %v11390_v6 = vadd.f32 %v3976_v1, %v11204_v43  ;;  %v4779_v22 = vpop.f32.mrf.mxu2 }
 0x4a2   : > { %v11392_v19 = vadd.f32 %v4779_v22, %v4691_v27  ;;  %v4603_v13 = vpop.f32.mrf.mxu0  ;;  %v12909_v27 = vld [vmem:[#allocation37_spill] sm:$0xff] }
 0x4a3   : > { %v4604_v16 = vadd.f32 %v4603_v13, %v11210_v5  ;;  %v8544_v5 = vld [vmem:[%s12530_s2 + $0x118] sm:$0xff]  ;;  %v8543_v22 = vld [vmem:[%s12530_s2 + $0x110] sm:$0xff] }
 0x4a4   : > { %v4692_v37 = vpop.f32.mrf.mxu1  ;;  %4932 = vmatpush.bf16.msra.mxu0 %v8544_v5  ;;  %v8559_v13 = vld [vmem:[%s12530_s2 + $0x190] sm:$0xff]  ;;  %v8557_v5 = vld [vmem:[%s12530_s2 + $0x180] sm:$0xff] }
 0x4a5   : > { %v4693_v31 = vadd.f32 %v4692_v37, %v4604_v16 }
 0x4a8   : > { %v3978_v25 = vpop.f32.mrf.mxu3  ;;  %4933 = vmatpush.bf16.msra.mxu0 %v8543_v22  ;;  %v12913_v22 = vld [vmem:[#allocation41_spill] sm:$0xff] }
 0x4a9   : > { %v11396_v23 = vadd.f32 %v3978_v25, %v11214_v63  ;;  %v4781_v54 = vpop.f32.mrf.mxu2  ;;  %v8560_v63 = vld [vmem:[%s12530_s2 + $0x198] sm:$0xff] }
 0x4aa   : > { %v11398_v36 = vadd.f32 %v4781_v54, %v4693_v31  ;;  %v4606_v4 = vpop.f32.mrf.mxu0  ;;  %5110 = vmatpush.bf16.msra.mxu2 %v8560_v63 }
 0x4ab   : > { %v4607_v43 = vadd.f32 %v4606_v4, %v11222_v42  ;;  %v8552_v42 = vld [vmem:[%s12530_s2 + $0x158] sm:$0xff]  ;;  %v8542_v4 = vld [vmem:[%s12530_s2 + $0x108] sm:$0xff] }
 0x4ac   : > { %v4695_v47 = vpop.f32.mrf.mxu1  ;;  %5021 = vmatpush.bf16.msra.mxu1 %v8552_v42  ;;  %4934 = vmatpush.bf16.msra.mxu0 %v8542_v4 }
 0x4ad   : > { %v4696_v7 = vadd.f32 %v4695_v47, %v4607_v43  ;;  %4645 = vmatmul.bf16.gmra.mxu0 %v12908_v26  ;;  %4872 = vmatmul.bf16.gmra.mxu3 %v12909_v27  ;;  %v8558_v43 = vld [vmem:[%s12530_s2 + $0x188] sm:$0xff]  ;;  %v8541_v27 = vld [vmem:[%s12530_s2 + $0x100] sm:$0xff] }
 0x4ae   : > { %4823 = vmatmul.bf16.gmra.mxu2 %v12910_v55 }
 0x4af   : > { %4734 = vmatmul.bf16.gmra.mxu1 %v12911_v46  ;;  %5111 = vmatpush.bf16.msra.mxu2 %v8559_v13  ;;  %v12914_v13 = vld [vmem:[#allocation9_spill] sm:$0xff] }
 0x4b0   : > { %v3981_v52 = vpop.f32.mrf.mxu3  ;;  %4935 = vmatpush.bf16.msra.mxu0 %v8541_v27 }
 0x4b1   : > { %v11415_v39 = vadd.f32 %v3981_v52, %v11224_v60  ;;  %v4784_v1 = vpop.f32.mrf.mxu2  ;;  %v8551_v60 = vld [vmem:[%s12530_s2 + $0x150] sm:$0xff] }
 0x4b2   : > { %v11423_v16 = vadd.f32 %v4784_v1, %v4696_v7  ;;  %v4608_v37 = vpop.f32.mrf.mxu0  ;;  %5022 = vmatpush.bf16.msra.mxu1 %v8551_v60  ;;  %v12912_v1 = vld [vmem:[#allocation4_spill] sm:$0xff] }
 0x4b3   : > { %v4609_v31 = vadd.f32 %v4608_v37, %v11230_v30  ;;  %5112 = vmatpush.bf16.msra.mxu2 %v8558_v43  ;;  %v8550_v30 = vld [vmem:[%s12530_s2 + $0x148] sm:$0xff]  ;;  %v12915_v37 = vld [vmem:[#allocation6_spill] sm:$0xff] }
 0x4b4   : > { %v4697_v25 = vpop.f32.mrf.mxu1 }
 0x4b5   : > { %v4698_v54 = vadd.f32 %v4697_v25, %v4609_v31 }
 0x4b6   : > { %5023 = vmatpush.bf16.msra.mxu1 %v8550_v30 }
 0x4b7   : > { %5113 = vmatpush.bf16.msra.mxu2 %v8557_v5 }
 0x4b8   : > { %v3983_v47 = vpop.f32.mrf.mxu3 }
 0x4b9   : > { %v11439_v7 = vadd.f32 %v3983_v47, %v11234_v53  ;;  %v4786_v26 = vpop.f32.mrf.mxu2  ;;  %v8549_v53 = vld [vmem:[%s12530_s2 + $0x140] sm:$0xff] }
 0x4ba   : > { %v11447_v63 = vadd.f32 %v4786_v26, %v4698_v54  ;;  %v4611_v55 = vpop.f32.mrf.mxu0  ;;  %5024 = vmatpush.bf16.msra.mxu1 %v8549_v53 }
 0x4bb   : > { %v4612_v46 = vadd.f32 %v4611_v55, %v11254_v2  ;;  %v8568_v2 = vld [vmem:[%s12530_s2 + $0x1d8] sm:$0xff] }
 0x4bc   : > { %v4700_v42 = vpop.f32.mrf.mxu1  ;;  %5199 = vmatpush.bf16.msrb.mxu3 %v8568_v2 }
 0x4bd   : > { %v4701_v52 = vadd.f32 %v4700_v42, %v4612_v46  ;;  %4650 = vmatmul.bf16.gmra.mxu0 %v12912_v1  ;;  %4877 = vmatmul.bf16.gmra.mxu3 %v12913_v22  ;;  %v12916_v1 = vld [vmem:[#allocation5_spill] sm:$0xff] }
 0x4be   : > { %4828 = vmatmul.bf16.gmra.mxu2 %v12914_v13  ;;  %v12918_v22 = vld [vmem:[#allocation13_spill] sm:$0xff] }
 0x4bf   : > { %4739 = vmatmul.bf16.gmra.mxu1 %v12915_v37 }
 0x4c0   : > { %v3986_v31 = vpop.f32.mrf.mxu3 }
 0x4c1   : > { %v11461_v25 = vadd.f32 %v3986_v31, %v11256_v17  ;;  %v4789_v60 = vpop.f32.mrf.mxu2 }
 0x4c2   : > { %v11463_v54 = vadd.f32 %v4789_v60, %v4701_v52  ;;  %v4613_v4 = vpop.f32.mrf.mxu0  ;;  %v12917_v52 = vld [vmem:[#allocation45_spill] sm:$0xff] }
 0x4c3   : > { %v4614_v43 = vadd.f32 %v4613_v4, %v11262_v21  ;;  %v12919_v21 = vld [vmem:[#allocation7_spill] sm:$0xff] }
 0x4c4   : > { %v4702_v30 = vpop.f32.mrf.mxu1 }
 0x4c5   : > { %v4703_v47 = vadd.f32 %v4702_v30, %v4614_v43 }
 0x4c8   : > { %v3988_v26 = vpop.f32.mrf.mxu3 }
 0x4c9   : > { %v11467_v27 = vadd.f32 %v3988_v26, %v11266_v58  ;;  %v4791_v5 = vpop.f32.mrf.mxu2 }
 0x4ca   : > { %v11469_v55 = vadd.f32 %v4791_v5, %v4703_v47  ;;  %v4616_v46 = vpop.f32.mrf.mxu0 }
 0x4cb   : > { %v4617_v42 = vadd.f32 %v4616_v46, %v11274_v11 }
 0x4cc   : > { %v4705_v17 = vpop.f32.mrf.mxu1 }
 0x4cd   : > { %v4706_v53 = vadd.f32 %v4705_v17, %v4617_v42  ;;  %4655 = vmatmul.bf16.gmra.mxu0 %v12916_v1  ;;  %4882 = vmatmul.bf16.gmra.mxu3 %v12917_v52  ;;  %v12920_v17 = vld [vmem:[#allocation48_spill] sm:$0xff]  ;;  %v12922_v1 = vld [vmem:[#allocation50_spill] sm:$0xff] }
 0x4ce   : > { %4833 = vmatmul.bf16.gmra.mxu2 %v12918_v22 }
 0x4cf   : > { %4744 = vmatmul.bf16.gmra.mxu1 %v12919_v21 }
 0x4d0   : > { %v3991_v13 = vpop.f32.mrf.mxu3 }
 0x4d1   : > { %v11477_v58 = vadd.f32 %v3991_v13, %v11276_v59  ;;  %v4794_v37 = vpop.f32.mrf.mxu2 }
 0x4d2   : > { %v11479_v2 = vadd.f32 %v4794_v37, %v4706_v53  ;;  %v4618_v31 = vpop.f32.mrf.mxu0  ;;  %v12921_v53 = vld [vmem:[#allocation49_spill] sm:$0xff] }
 0x4d3   : > { %v4619_v11 = vadd.f32 %v4618_v31, %v11280_v32  ;;  %v12923_v32 = vld [vmem:[#allocation51_spill] sm:$0xff] }
 0x4d4   : > { %v4707_v60 = vpop.f32.mrf.mxu1 }
 0x4d5   : > { %v4708_v4 = vadd.f32 %v4707_v60, %v4619_v11 }
 0x4d8   : > { %v3993_v43 = vpop.f32.mrf.mxu3 }
 0x4d9   : > { %v11483_v30 = vadd.f32 %v3993_v43, %v11282_v0  ;;  %v4796_v47 = vpop.f32.mrf.mxu2  ;;  %v8567_v0 = vld [vmem:[%s12530_s2 + $0x1d0] sm:$0xff] }
 0x4da   : > { %v11485_v26 = vadd.f32 %v4796_v47, %v4708_v4  ;;  %v4621_v5 = vpop.f32.mrf.mxu0  ;;  %5200 = vmatpush.bf16.msrb.mxu3 %v8567_v0 }
 0x4db   : > { %v4622_v46 = vadd.f32 %v4621_v5, %v11302_v61 }
 0x4dc   : > { %v4710_v59 = vpop.f32.mrf.mxu1 }
 0x4dd   : > { %v4711_v42 = vadd.f32 %v4710_v59, %v4622_v46  ;;  %4887 = vmatmul.bf16.gmra.mxu3 %v12920_v17  ;;  %4936 = vmatmul.bf16.vlgmr.msra.gmra.mxu0 %v12921_v53  ;;  %v12924_v17 = vld [vmem:[#allocation52_spill] sm:$0xff]  ;;  %v12926_v53 = vld [vmem:[#allocation54_spill] sm:$0xff] }
 0x4de   : > { %5114 = vmatmul.bf16.vlgmr.msra.gmra.mxu2 %v12922_v1 }
 0x4df   : > { %5025 = vmatmul.bf16.vlgmr.msra.gmra.mxu1 %v12923_v32 }
 0x4e0   : > { %v4848_v52 = vpop.f32.mrf.mxu3 }
 0x4e1   : > { %v4799_v22 = vpop.f32.mrf.mxu2  ;;  %v11496_v21 = vadd.f32 %v4848_v52, %v11304_v18 }
 0x4e2   : > { %v11498_v61 = vadd.f32 %v4799_v22, %v4711_v42  ;;  %v4623_v13 = vpop.f32.mrf.mxu0  ;;  %v12925_v42 = vld [vmem:[#allocation53_spill] sm:$0xff] }
 0x4e3   : > { %v4624_v37 = vadd.f32 %v4623_v13, %v11308_v45  ;;  %v12927_v45 = vld [vmem:[#allocation55_spill] sm:$0xff] }
 0x4e4   : > { %v4712_v31 = vpop.f32.mrf.mxu1 }
 0x4e5   : > { %v4713_v11 = vadd.f32 %v4712_v31, %v4624_v37 }
 0x4e8   : > { %v4850_v60 = vpop.f32.mrf.mxu3 }
 0x4e9   : > { %v4801_v4 = vpop.f32.mrf.mxu2  ;;  %v11502_v43 = vadd.f32 %v4850_v60, %v11310_v20 }
 0x4ea   : > { %v11504_v47 = vadd.f32 %v4801_v4, %v4713_v11  ;;  %v4626_v5 = vpop.f32.mrf.mxu0 }
 0x4eb   : > { %v4627_v46 = vadd.f32 %v4626_v5, %v11318_v56 }
 0x4ec   : > { %v4715_v59 = vpop.f32.mrf.mxu1 }
 0x4ed   : > { %v4716_v18 = vadd.f32 %v4715_v59, %v4627_v46  ;;  %4892 = vmatmul.bf16.gmra.mxu3 %v12924_v17  ;;  %4941 = vmatmul.bf16.gmra.mxu0 %v12925_v42  ;;  %v12928_v59 = vld [vmem:[#allocation56_spill] sm:$0xff]  ;;  %v12930_v17 = vld [vmem:[#allocation58_spill] sm:$0xff] }
 0x4ee   : > { %5119 = vmatmul.bf16.gmra.mxu2 %v12926_v53 }
 0x4ef   : > { %5030 = vmatmul.bf16.gmra.mxu1 %v12927_v45 }
 0x4f0   : > { %v4853_v1 = vpop.f32.mrf.mxu3 }
 0x4f1   : > { %v4804_v32 = vpop.f32.mrf.mxu2  ;;  %v11512_v20 = vadd.f32 %v4853_v1, %v11320_v50 }
 0x4f2   : > { %v11514_v0 = vadd.f32 %v4804_v32, %v4716_v18  ;;  %v4628_v52 = vpop.f32.mrf.mxu0  ;;  %v12929_v18 = vld [vmem:[#allocation57_spill] sm:$0xff] }
 0x4f3   : > { %v4629_v56 = vadd.f32 %v4628_v52, %v11324_v38  ;;  %v12931_v38 = vld [vmem:[#allocation59_spill] sm:$0xff] }
 0x4f4   : > { %v4717_v22 = vpop.f32.mrf.mxu1 }
 0x4f5   : > { %v4718_v13 = vadd.f32 %v4717_v22, %v4629_v56 }
 0x4f8   : > { %v4855_v37 = vpop.f32.mrf.mxu3 }
 0x4f9   : > { %v4806_v31 = vpop.f32.mrf.mxu2  ;;  %v11518_v11 = vadd.f32 %v4855_v37, %v11326_v35  ;;  %v8566_v35 = vld [vmem:[%s12530_s2 + $0x1c8] sm:$0xff] }
 0x4fa   : > { %v11520_v60 = vadd.f32 %v4806_v31, %v4718_v13  ;;  %v4631_v4 = vpop.f32.mrf.mxu0  ;;  %5201 = vmatpush.bf16.msrb.mxu3 %v8566_v35 }
 0x4fb   : > { %v4632_v5 = vadd.f32 %v4631_v4, %v11346_v44 }
 0x4fc   : > { %v4720_v46 = vpop.f32.mrf.mxu1 }
 0x4fd   : > { %v4721_v50 = vadd.f32 %v4720_v46, %v4632_v5  ;;  %4897 = vmatmul.bf16.gmra.mxu3 %v12928_v59  ;;  %4946 = vmatmul.bf16.gmra.mxu0 %v12929_v18  ;;  %v12932_v59 = vld [vmem:[#allocation60_spill] sm:$0xff]  ;;  %v12934_v18 = vld [vmem:[#allocation62_spill] sm:$0xff] }
 0x4fe   : > { %5124 = vmatmul.bf16.gmra.mxu2 %v12930_v17 }
 0x4ff   : > { %5035 = vmatmul.bf16.gmra.mxu1 %v12931_v38 }
 0x500   : > { %v4858_v42 = vpop.f32.mrf.mxu3 }
 0x501   : > { %v4809_v53 = vpop.f32.mrf.mxu2  ;;  %v11531_v45 = vadd.f32 %v4858_v42, %v11348_v57 }
 0x502   : > { %v11533_v44 = vadd.f32 %v4809_v53, %v4721_v50  ;;  %v4633_v1 = vpop.f32.mrf.mxu0  ;;  %v12933_v50 = vld [vmem:[#allocation61_spill] sm:$0xff] }
 0x503   : > { %v4634_v32 = vadd.f32 %v4633_v1, %v11352_v15  ;;  %v12935_v15 = vld [vmem:[#allocation63_spill] sm:$0xff] }
 0x504   : > { %v4722_v52 = vpop.f32.mrf.mxu1 }
 0x505   : > { %v4723_v56 = vadd.f32 %v4722_v52, %v4634_v32 }
 0x508   : > { %v4860_v22 = vpop.f32.mrf.mxu3 }
 0x509   : > { %v4811_v13 = vpop.f32.mrf.mxu2  ;;  %v11537_v37 = vadd.f32 %v4860_v22, %v11354_v12 }
 0x50a   : > { %v11539_v31 = vadd.f32 %v4811_v13, %v4723_v56  ;;  %v4636_v4 = vpop.f32.mrf.mxu0 }
 0x50b   : > { %v4637_v5 = vadd.f32 %v4636_v4, %v11362_v33 }
 0x50c   : > { %v4725_v46 = vpop.f32.mrf.mxu1 }
 0x50d   : > { %v4726_v57 = vadd.f32 %v4725_v46, %v4637_v5  ;;  %4902 = vmatmul.bf16.gmra.mxu3 %v12932_v59  ;;  %4951 = vmatmul.bf16.gmra.mxu0 %v12933_v50  ;;  %v12936_v46 = vld [vmem:[#allocation64_spill] sm:$0xff]  ;;  %v12938_v59 = vld [vmem:[#allocation66_spill] sm:$0xff] }
 0x50e   : > { %5129 = vmatmul.bf16.gmra.mxu2 %v12934_v18 }
 0x50f   : > { %5040 = vmatmul.bf16.gmra.mxu1 %v12935_v15 }
 0x510   : > { %v4863_v17 = vpop.f32.mrf.mxu3 }
 0x511   : > { %v4814_v38 = vpop.f32.mrf.mxu2  ;;  %v11547_v12 = vadd.f32 %v4863_v17, %v11364_v14 }
 0x512   : > { %v11549_v35 = vadd.f32 %v4814_v38, %v4726_v57  ;;  %v4638_v42 = vpop.f32.mrf.mxu0  ;;  %v12937_v57 = vld [vmem:[#allocation65_spill] sm:$0xff] }
 0x513   : > { %v4639_v33 = vadd.f32 %v4638_v42, %v11368_v40  ;;  %v12939_v40 = vld [vmem:[#allocation67_spill] sm:$0xff] }
 0x514   : > { %v4727_v53 = vpop.f32.mrf.mxu1 }
 0x515   : > { %v4728_v1 = vadd.f32 %v4727_v53, %v4639_v33 }
 0x518   : > { %v4865_v32 = vpop.f32.mrf.mxu3 }
 0x519   : > { %v4816_v52 = vpop.f32.mrf.mxu2  ;;  %v11553_v56 = vadd.f32 %v4865_v32, %v11370_v41  ;;  %v8565_v41 = vld [vmem:[%s12530_s2 + $0x1c0] sm:$0xff] }
 0x51a   : > { %v11555_v22 = vadd.f32 %v4816_v52, %v4728_v1  ;;  %v4641_v13 = vpop.f32.mrf.mxu0  ;;  %5202 = vmatpush.bf16.msrb.mxu3 %v8565_v41 }
 0x51b   : > { %v4642_v4 = vadd.f32 %v4641_v13, %v11390_v6 }
 0x51c   : > { %v4730_v5 = vpop.f32.mrf.mxu1 }
 0x51d   : > { %v4731_v14 = vadd.f32 %v4730_v5, %v4642_v4  ;;  %4907 = vmatmul.bf16.gmra.mxu3 %v12936_v46  ;;  %4956 = vmatmul.bf16.gmra.mxu0 %v12937_v57  ;;  %v12940_v46 = vld [vmem:[#allocation68_spill] sm:$0xff]  ;;  %v12942_v57 = vld [vmem:[#allocation70_spill] sm:$0xff] }
 0x51e   : > { %5134 = vmatmul.bf16.gmra.mxu2 %v12938_v59 }
 0x51f   : > { %5045 = vmatmul.bf16.gmra.mxu1 %v12939_v40 }
 0x520   : > { %v4868_v50 = vpop.f32.mrf.mxu3 }
 0x521   : > { %v4819_v18 = vpop.f32.mrf.mxu2  ;;  %v11566_v15 = vadd.f32 %v4868_v50, %v11392_v19 }
 0x522   : > { %v11568_v6 = vadd.f32 %v4819_v18, %v4731_v14  ;;  %v4643_v17 = vpop.f32.mrf.mxu0  ;;  %v12941_v14 = vld [vmem:[#allocation69_spill] sm:$0xff] }
 0x523   : > { %v4644_v38 = vadd.f32 %v4643_v17, %v11396_v23  ;;  %v12943_v23 = vld [vmem:[#allocation71_spill] sm:$0xff] }
 0x524   : > { %v4732_v42 = vpop.f32.mrf.mxu1 }
 0x525   : > { %v4733_v33 = vadd.f32 %v4732_v42, %v4644_v38 }
 0x528   : > { %v4870_v53 = vpop.f32.mrf.mxu3 }
 0x529   : > { %v4821_v1 = vpop.f32.mrf.mxu2  ;;  %v11572_v32 = vadd.f32 %v4870_v53, %v11398_v36 }
 0x52a   : > { %v11574_v52 = vadd.f32 %v4821_v1, %v4733_v33  ;;  %v4646_v13 = vpop.f32.mrf.mxu0 }
 0x52b   : > { %v4647_v4 = vadd.f32 %v4646_v13, %v11415_v39 }
 0x52c   : > { %v4735_v5 = vpop.f32.mrf.mxu1 }
 0x52d   : > { %v4736_v19 = vadd.f32 %v4735_v5, %v4647_v4  ;;  %4912 = vmatmul.bf16.gmra.mxu3 %v12940_v46  ;;  %4961 = vmatmul.bf16.gmra.mxu0 %v12941_v14  ;;  %v12946_v46 = vld [vmem:[#allocation74_spill] sm:$0xff]  ;;  %v12947_v14 = vld [vmem:[#allocation75_spill] sm:$0xff] }
 0x52e   : > { %5139 = vmatmul.bf16.gmra.mxu2 %v12942_v57  ;;  %v8588_v57 = vld [vmem:[%s12530_s2 + $0x278] sm:$0xff] }
 0x52f   : > { %5050 = vmatmul.bf16.gmra.mxu1 %v12943_v23 }
 0x530   : > { %v4873_v59 = vpop.f32.mrf.mxu3  ;;  %5373 = vmatpush.bf16.msrb.mxu1 %v8588_v57 }
 0x531   : > { %v4824_v40 = vpop.f32.mrf.mxu2  ;;  %v11582_v36 = vadd.f32 %v4873_v59, %v11423_v16  ;;  %v8596_v16 = vld [vmem:[%s12530_s2 + $0x2b8] sm:$0xff] }
 0x532   : > { %v11584_v41 = vadd.f32 %v4824_v40, %v4736_v19  ;;  %v4648_v50 = vpop.f32.mrf.mxu0  ;;  %v12944_v19 = vld [vmem:[#allocation72_spill] sm:$0xff]  ;;  %5462 = vmatpush.bf16.msrb.mxu2 %v8596_v16 }
 0x533   : > { %v4649_v39 = vadd.f32 %v4648_v50, %v11439_v7  ;;  %v12945_v7 = vld [vmem:[#allocation73_spill] sm:$0xff] }
 0x534   : > { %v4737_v18 = vpop.f32.mrf.mxu1 }
 0x535   : > { %v4738_v17 = vadd.f32 %v4737_v18, %v4649_v39 }
 0x538   : > { %v4875_v38 = vpop.f32.mrf.mxu3 }
 0x539   : > { %v4826_v42 = vpop.f32.mrf.mxu2  ;;  %v11588_v33 = vadd.f32 %v4875_v38, %v11447_v63  ;;  %v8580_v63 = vld [vmem:[%s12530_s2 + $0x238] sm:$0xff] }
 0x53a   : > { %v11590_v53 = vadd.f32 %v4826_v42, %v4738_v17  ;;  %v4651_v1 = vpop.f32.mrf.mxu0  ;;  %5284 = vmatpush.bf16.msrb.mxu0 %v8580_v63 }
 0x53b   : > { %v4652_v13 = vadd.f32 %v4651_v1, %v11461_v25  ;;  %v8604_v25 = vld [vmem:[%s12530_s2 + $0x2f8] sm:$0xff] }
 0x53c   : > { %v4740_v4 = vpop.f32.mrf.mxu1  ;;  %5551 = vmatpush.bf16.msra.mxu3 %v8604_v25 }
 0x53d   : > { %v4741_v5 = vadd.f32 %v4740_v4, %v4652_v13  ;;  %4917 = vmatmul.bf16.gmra.mxu3 %v12944_v19  ;;  %4966 = vmatmul.bf16.gmra.mxu0 %v12945_v7 }
 0x53e   : > { %5144 = vmatmul.bf16.gmra.mxu2 %v12946_v46  ;;  %v12948_v46 = vld [vmem:[#allocation76_spill] sm:$0xff] }
 0x53f   : > { %5055 = vmatmul.bf16.gmra.mxu1 %v12947_v14  ;;  %v12950_v14 = vld [vmem:[#allocation78_spill] sm:$0xff] }
 0x540   : > { %v4878_v23 = vpop.f32.mrf.mxu3 }
 0x541   : > { %v4829_v59 = vpop.f32.mrf.mxu2  ;;  %v11610_v40 = vadd.f32 %v4878_v23, %v11463_v54 }
 0x542   : > { %v11612_v50 = vadd.f32 %v4829_v59, %v4741_v5  ;;  %v4653_v39 = vpop.f32.mrf.mxu0  ;;  %v12949_v5 = vld [vmem:[#allocation77_spill] sm:$0xff] }
 0x543   : > { %v4654_v18 = vadd.f32 %v4653_v39, %v11467_v27  ;;  %v12951_v27 = vld [vmem:[#allocation79_spill] sm:$0xff] }
 0x544   : > { %v4742_v17 = vpop.f32.mrf.mxu1 }
 0x545   : > { %v4743_v38 = vadd.f32 %v4742_v17, %v4654_v18 }
 0x548   : > { %v4880_v42 = vpop.f32.mrf.mxu3 }
 0x549   : > { %v4831_v1 = vpop.f32.mrf.mxu2  ;;  %v11616_v13 = vadd.f32 %v4880_v42, %v11469_v55 }
 0x54a   : > { %v11618_v4 = vadd.f32 %v4831_v1, %v4743_v38  ;;  %v4656_v16 = vpop.f32.mrf.mxu0 }
 0x54b   : > { %v4657_v19 = vadd.f32 %v4656_v16, %v11477_v58 }
 0x54c   : > { %v4745_v54 = vpop.f32.mrf.mxu1 }
 0x54d   : > { %v4746_v7 = vadd.f32 %v4745_v54, %v4657_v19  ;;  %4922 = vmatmul.bf16.gmra.mxu3 %v12948_v46  ;;  %4971 = vmatmul.bf16.gmra.mxu0 %v12949_v5  ;;  %v12954_v46 = vld [vmem:[#allocation82_spill] sm:$0xff]  ;;  %v12955_v5 = vld [vmem:[#allocation83_spill] sm:$0xff] }
 0x54e   : > { %5149 = vmatmul.bf16.gmra.mxu2 %v12950_v14  ;;  %v8587_v14 = vld [vmem:[%s12530_s2 + $0x270] sm:$0xff] }
 0x54f   : > { %5060 = vmatmul.bf16.gmra.mxu1 %v12951_v27 }
 0x550   : > { %v4883_v63 = vpop.f32.mrf.mxu3  ;;  %5374 = vmatpush.bf16.msrb.mxu1 %v8587_v14 }
 0x551   : > { %v4834_v25 = vpop.f32.mrf.mxu2  ;;  %v11626_v55 = vadd.f32 %v4883_v63, %v11479_v2  ;;  %v8595_v2 = vld [vmem:[%s12530_s2 + $0x2b0] sm:$0xff] }
 0x552   : > { %v11628_v57 = vadd.f32 %v4834_v25, %v4746_v7  ;;  %v4658_v23 = vpop.f32.mrf.mxu0  ;;  %v12952_v7 = vld [vmem:[#allocation80_spill] sm:$0xff]  ;;  %5463 = vmatpush.bf16.msrb.mxu2 %v8595_v2 }
 0x553   : > { %v4659_v58 = vadd.f32 %v4658_v23, %v11483_v30  ;;  %v12953_v30 = vld [vmem:[#allocation81_spill] sm:$0xff] }
 0x554   : > { %v4747_v59 = vpop.f32.mrf.mxu1 }
 0x555   : > { %v4748_v39 = vadd.f32 %v4747_v59, %v4659_v58 }
 0x558   : > { %v4885_v18 = vpop.f32.mrf.mxu3 }
 0x559   : > { %v4836_v17 = vpop.f32.mrf.mxu2  ;;  %v11632_v38 = vadd.f32 %v4885_v18, %v11485_v26  ;;  %v8579_v26 = vld [vmem:[%s12530_s2 + $0x230] sm:$0xff] }
 0x55a   : > { %v11634_v42 = vadd.f32 %v4836_v17, %v4748_v39  ;;  %v4937_v1 = vpop.f32.mrf.mxu0  ;;  %5285 = vmatpush.bf16.msrb.mxu0 %v8579_v26 }
 0x55b   : > { %v4938_v16 = vadd.f32 %v4937_v1, %v11496_v21  ;;  %v8603_v21 = vld [vmem:[%s12530_s2 + $0x2f0] sm:$0xff] }
 0x55c   : > { %v5026_v19 = vpop.f32.mrf.mxu1  ;;  %5552 = vmatpush.bf16.msra.mxu3 %v8603_v21 }
 0x55d   : > { %v5027_v54 = vadd.f32 %v5026_v19, %v4938_v16  ;;  %4976 = vmatmul.bf16.gmra.mxu0 %v12952_v7  ;;  %5203 = vmatmul.bf16.vlgmr.msrb.gmra.mxu3 %v12953_v30 }
 0x55e   : > { %5154 = vmatmul.bf16.gmra.mxu2 %v12954_v46  ;;  %v12956_v46 = vld [vmem:[#allocation84_spill] sm:$0xff] }
 0x55f   : > { %5065 = vmatmul.bf16.gmra.mxu1 %v12955_v5  ;;  %v12958_v5 = vld [vmem:[#allocation86_spill] sm:$0xff] }
 0x560   : > { %v4888_v27 = vpop.f32.mrf.mxu3 }
 0x561   : > { %v11654_v63 = vadd.f32 %v4888_v27, %v11498_v61  ;;  %v5115_v25 = vpop.f32.mrf.mxu2 }
 0x562   : > { %v11656_v23 = vadd.f32 %v5115_v25, %v5027_v54  ;;  %v4939_v58 = vpop.f32.mrf.mxu0  ;;  %v12957_v54 = vld [vmem:[#allocation85_spill] sm:$0xff] }
 0x563   : > { %v4940_v59 = vadd.f32 %v4939_v58, %v11502_v43  ;;  %v12959_v43 = vld [vmem:[#allocation87_spill] sm:$0xff] }
 0x564   : > { %v5028_v39 = vpop.f32.mrf.mxu1 }
 0x565   : > { %v5029_v18 = vadd.f32 %v5028_v39, %v4940_v59 }
 0x568   : > { %v4890_v17 = vpop.f32.mrf.mxu3 }
 0x569   : > { %v11660_v1 = vadd.f32 %v4890_v17, %v11504_v47  ;;  %v5117_v16 = vpop.f32.mrf.mxu2 }
 0x56a   : > { %v11662_v19 = vadd.f32 %v5117_v16, %v5029_v18  ;;  %v4942_v2 = vpop.f32.mrf.mxu0 }
 0x56b   : > { %v4943_v61 = vadd.f32 %v4942_v2, %v11512_v20 }
 0x56c   : > { %v5031_v7 = vpop.f32.mrf.mxu1 }
 0x56d   : > { %v5032_v30 = vadd.f32 %v5031_v7, %v4943_v61  ;;  %4981 = vmatmul.bf16.gmra.mxu0 %v12956_v46  ;;  %5208 = vmatmul.bf16.gmra.mxu3 %v12957_v54  ;;  %v8594_v61 = vld [vmem:[%s12530_s2 + $0x2a8] sm:$0xff]  ;;  %v12962_v46 = vld [vmem:[#allocation90_spill] sm:$0xff] }
 0x56e   : > { %5159 = vmatmul.bf16.gmra.mxu2 %v12958_v5  ;;  %v8578_v54 = vld [vmem:[%s12530_s2 + $0x228] sm:$0xff] }
 0x56f   : > { %5070 = vmatmul.bf16.gmra.mxu1 %v12959_v43  ;;  %v8586_v5 = vld [vmem:[%s12530_s2 + $0x268] sm:$0xff]  ;;  %5464 = vmatpush.bf16.msrb.mxu2 %v8594_v61 }
 0x570   : > { %v4893_v26 = vpop.f32.mrf.mxu3  ;;  %5286 = vmatpush.bf16.msrb.mxu0 %v8578_v54  ;;  %5375 = vmatpush.bf16.msrb.mxu1 %v8586_v5 }
 0x571   : > { %v11670_v47 = vadd.f32 %v4893_v26, %v11514_v0  ;;  %v5120_v21 = vpop.f32.mrf.mxu2 }
 0x572   : > { %v11672_v14 = vadd.f32 %v5120_v21, %v5032_v30  ;;  %v4944_v27 = vpop.f32.mrf.mxu0  ;;  %v12960_v30 = vld [vmem:[#allocation88_spill] sm:$0xff] }
 0x573   : > { %v4945_v20 = vadd.f32 %v4944_v27, %v11518_v11  ;;  %v12961_v11 = vld [vmem:[#allocation89_spill] sm:$0xff] }
 0x574   : > { %v5033_v25 = vpop.f32.mrf.mxu1 }
 0x575   : > { %v5034_v58 = vadd.f32 %v5033_v25, %v4945_v20 }
 0x578   : > { %v4895_v59 = vpop.f32.mrf.mxu3 }
 0x579   : > { %v11676_v39 = vadd.f32 %v4895_v59, %v11520_v60  ;;  %v5122_v18 = vpop.f32.mrf.mxu2  ;;  %v12963_v60 = vld [vmem:[#allocation91_spill] sm:$0xff] }
 0x57a   : > { %v11678_v17 = vadd.f32 %v5122_v18, %v5034_v58  ;;  %v4947_v16 = vpop.f32.mrf.mxu0 }
 0x57b   : > { %v4948_v2 = vadd.f32 %v4947_v16, %v11531_v45  ;;  %v8602_v45 = vld [vmem:[%s12530_s2 + $0x2e8] sm:$0xff] }
 0x57c   : > { %v5036_v0 = vpop.f32.mrf.mxu1  ;;  %5553 = vmatpush.bf16.msra.mxu3 %v8602_v45 }
 0x57d   : > { %v5037_v7 = vadd.f32 %v5036_v0, %v4948_v2  ;;  %4986 = vmatmul.bf16.gmra.mxu0 %v12960_v30  ;;  %5213 = vmatmul.bf16.gmra.mxu3 %v12961_v11 }
 0x57e   : > { %5164 = vmatmul.bf16.gmra.mxu2 %v12962_v46  ;;  %v12964_v46 = vld [vmem:[#allocation92_spill] sm:$0xff] }
 0x57f   : > { %5075 = vmatmul.bf16.gmra.mxu1 %v12963_v60  ;;  %v12966_v60 = vld [vmem:[#allocation94_spill] sm:$0xff] }
 0x580   : > { %v4898_v43 = vpop.f32.mrf.mxu3 }
 0x581   : > { %v11698_v26 = vadd.f32 %v4898_v43, %v11533_v44  ;;  %v5125_v21 = vpop.f32.mrf.mxu2 }
 0x582   : > { %v11700_v27 = vadd.f32 %v5125_v21, %v5037_v7  ;;  %v4949_v20 = vpop.f32.mrf.mxu0  ;;  %v12965_v7 = vld [vmem:[#allocation93_spill] sm:$0xff] }
 0x583   : > { %v4950_v25 = vadd.f32 %v4949_v20, %v11537_v37  ;;  %v12967_v37 = vld [vmem:[#allocation95_spill] sm:$0xff] }
 0x584   : > { %v5038_v58 = vpop.f32.mrf.mxu1 }
 0x585   : > { %v5039_v59 = vadd.f32 %v5038_v58, %v4950_v25 }
 0x588   : > { %v4900_v18 = vpop.f32.mrf.mxu3 }
 0x589   : > { %v11704_v16 = vadd.f32 %v4900_v18, %v11539_v31  ;;  %v5127_v2 = vpop.f32.mrf.mxu2 }
 0x58a   : > { %v11706_v0 = vadd.f32 %v5127_v2, %v5039_v59  ;;  %v4952_v61 = vpop.f32.mrf.mxu0 }
 0x58b   : > { %v4953_v44 = vadd.f32 %v4952_v61, %v11547_v12 }
 0x58c   : > { %v5041_v30 = vpop.f32.mrf.mxu1 }
 0x58d   : > { %v5042_v11 = vadd.f32 %v5041_v30, %v4953_v44  ;;  %4991 = vmatmul.bf16.gmra.mxu0 %v12964_v46  ;;  %5218 = vmatmul.bf16.gmra.mxu3 %v12965_v7  ;;  %v8593_v44 = vld [vmem:[%s12530_s2 + $0x2a0] sm:$0xff]  ;;  %v12970_v46 = vld [vmem:[#allocation98_spill] sm:$0xff] }
 0x58e   : > { %5169 = vmatmul.bf16.gmra.mxu2 %v12966_v60  ;;  %v8577_v7 = vld [vmem:[%s12530_s2 + $0x220] sm:$0xff] }
 0x58f   : > { %5080 = vmatmul.bf16.gmra.mxu1 %v12967_v37  ;;  %v8585_v60 = vld [vmem:[%s12530_s2 + $0x260] sm:$0xff]  ;;  %5465 = vmatpush.bf16.msrb.mxu2 %v8593_v44 }
 0x590   : > { %v4903_v54 = vpop.f32.mrf.mxu3  ;;  %5287 = vmatpush.bf16.msrb.mxu0 %v8577_v7  ;;  %5376 = vmatpush.bf16.msrb.mxu1 %v8585_v60  ;;  %v12975_v7 = vld [vmem:[#allocation103_spill] sm:$0xff] }
 0x591   : > { %v11714_v31 = vadd.f32 %v4903_v54, %v11549_v35  ;;  %v5130_v45 = vpop.f32.mrf.mxu2 }
 0x592   : > { %v11716_v5 = vadd.f32 %v5130_v45, %v5042_v11  ;;  %v4954_v43 = vpop.f32.mrf.mxu0  ;;  %v12968_v11 = vld [vmem:[#allocation96_spill] sm:$0xff] }
 0x593   : > { %v4955_v12 = vadd.f32 %v4954_v43, %v11553_v56  ;;  %v12969_v56 = vld [vmem:[#allocation97_spill] sm:$0xff] }
 0x594   : > { %v5043_v21 = vpop.f32.mrf.mxu1 }
 0x595   : > { %v5044_v20 = vadd.f32 %v5043_v21, %v4955_v12 }
 0x598   : > { %v4905_v25 = vpop.f32.mrf.mxu3 }
 0x599   : > { %v11720_v58 = vadd.f32 %v4905_v25, %v11555_v22  ;;  %v5132_v59 = vpop.f32.mrf.mxu2  ;;  %v12971_v22 = vld [vmem:[#allocation99_spill] sm:$0xff] }
 0x59a   : > { %v11722_v18 = vadd.f32 %v5132_v59, %v5044_v20  ;;  %v4957_v2 = vpop.f32.mrf.mxu0 }
 0x59b   : > { %v4958_v61 = vadd.f32 %v4957_v2, %v11566_v15  ;;  %v8601_v15 = vld [vmem:[%s12530_s2 + $0x2e0] sm:$0xff] }
 0x59c   : > { %v5046_v35 = vpop.f32.mrf.mxu1  ;;  %5554 = vmatpush.bf16.msra.mxu3 %v8601_v15 }
 0x59d   : > { %v5047_v30 = vadd.f32 %v5046_v35, %v4958_v61  ;;  %4996 = vmatmul.bf16.gmra.mxu0 %v12968_v11  ;;  %5223 = vmatmul.bf16.gmra.mxu3 %v12969_v56 }
 0x59e   : > { %5174 = vmatmul.bf16.gmra.mxu2 %v12970_v46  ;;  %v12972_v46 = vld [vmem:[#allocation100_spill] sm:$0xff] }
 0x59f   : > { %5085 = vmatmul.bf16.gmra.mxu1 %v12971_v22  ;;  %v12974_v22 = vld [vmem:[#allocation102_spill] sm:$0xff] }
 0x5a0   : > { %v4908_v37 = vpop.f32.mrf.mxu3 }
 0x5a1   : > { %v11742_v54 = vadd.f32 %v4908_v37, %v11568_v6  ;;  %v5135_v45 = vpop.f32.mrf.mxu2 }
 0x5a2   : > { %v11744_v43 = vadd.f32 %v5135_v45, %v5047_v30  ;;  %v4959_v12 = vpop.f32.mrf.mxu0  ;;  %v12973_v30 = vld [vmem:[#allocation101_spill] sm:$0xff] }
 0x5a3   : > { %v4960_v21 = vadd.f32 %v4959_v12, %v11572_v32  ;;  %v8576_v32 = vld [vmem:[%s12530_s2 + $0x218] sm:$0xff]  ;;  %v8575_v45 = vld [vmem:[%s12530_s2 + $0x210] sm:$0xff] }
 0x5a4   : > { %v5048_v20 = vpop.f32.mrf.mxu1  ;;  %5288 = vmatpush.bf16.msrb.mxu0 %v8576_v32  ;;  %v8591_v12 = vld [vmem:[%s12530_s2 + $0x290] sm:$0xff]  ;;  %v8589_v32 = vld [vmem:[%s12530_s2 + $0x280] sm:$0xff] }
 0x5a5   : > { %v5049_v25 = vadd.f32 %v5048_v20, %v4960_v21 }
 0x5a8   : > { %v4910_v59 = vpop.f32.mrf.mxu3  ;;  %5289 = vmatpush.bf16.msrb.mxu0 %v8575_v45  ;;  %v12977_v45 = vld [vmem:[#allocation105_spill] sm:$0xff] }
 0x5a9   : > { %v11748_v2 = vadd.f32 %v4910_v59, %v11574_v52  ;;  %v5137_v61 = vpop.f32.mrf.mxu2  ;;  %v8592_v52 = vld [vmem:[%s12530_s2 + $0x298] sm:$0xff] }
 0x5aa   : > { %v11750_v35 = vadd.f32 %v5137_v61, %v5049_v25  ;;  %v4962_v44 = vpop.f32.mrf.mxu0  ;;  %5466 = vmatpush.bf16.msrb.mxu2 %v8592_v52 }
 0x5ab   : > { %v4963_v6 = vadd.f32 %v4962_v44, %v11582_v36  ;;  %v8584_v36 = vld [vmem:[%s12530_s2 + $0x258] sm:$0xff]  ;;  %v8574_v44 = vld [vmem:[%s12530_s2 + $0x208] sm:$0xff] }
 0x5ac   : > { %v5051_v11 = vpop.f32.mrf.mxu1  ;;  %5377 = vmatpush.bf16.msrb.mxu1 %v8584_v36  ;;  %5290 = vmatpush.bf16.msrb.mxu0 %v8574_v44 }
 0x5ad   : > { %v5052_v56 = vadd.f32 %v5051_v11, %v4963_v6  ;;  %5001 = vmatmul.bf16.gmra.mxu0 %v12972_v46  ;;  %5228 = vmatmul.bf16.gmra.mxu3 %v12973_v30  ;;  %v8590_v6 = vld [vmem:[%s12530_s2 + $0x288] sm:$0xff]  ;;  %v8573_v30 = vld [vmem:[%s12530_s2 + $0x200] sm:$0xff] }
 0x5ae   : > { %5179 = vmatmul.bf16.gmra.mxu2 %v12974_v22 }
 0x5af   : > { %5090 = vmatmul.bf16.gmra.mxu1 %v12975_v7  ;;  %5467 = vmatpush.bf16.msrb.mxu2 %v8591_v12  ;;  %v12978_v12 = vld [vmem:[#allocation106_spill] sm:$0xff] }
 0x5b0   : > { %v4913_v15 = vpop.f32.mrf.mxu3  ;;  %5291 = vmatpush.bf16.msrb.mxu0 %v8573_v30 }
 0x5b1   : > { %v11767_v60 = vadd.f32 %v4913_v15, %v11584_v41  ;;  %v5140_v37 = vpop.f32.mrf.mxu2  ;;  %v8583_v41 = vld [vmem:[%s12530_s2 + $0x250] sm:$0xff] }
 0x5b2   : > { %v11775_v21 = vadd.f32 %v5140_v37, %v5052_v56  ;;  %v4964_v20 = vpop.f32.mrf.mxu0  ;;  %5378 = vmatpush.bf16.msrb.mxu1 %v8583_v41  ;;  %v12976_v37 = vld [vmem:[#allocation104_spill] sm:$0xff] }
 0x5b3   : > { %v4965_v25 = vadd.f32 %v4964_v20, %v11588_v33  ;;  %5468 = vmatpush.bf16.msrb.mxu2 %v8590_v6  ;;  %v8582_v33 = vld [vmem:[%s12530_s2 + $0x248] sm:$0xff]  ;;  %v12979_v20 = vld [vmem:[#allocation107_spill] sm:$0xff] }
 0x5b4   : > { %v5053_v59 = vpop.f32.mrf.mxu1 }
 0x5b5   : > { %v5054_v61 = vadd.f32 %v5053_v59, %v4965_v25 }
 0x5b6   : > { %5379 = vmatpush.bf16.msrb.mxu1 %v8582_v33 }
 0x5b7   : > { %5469 = vmatpush.bf16.msrb.mxu2 %v8589_v32 }
 0x5b8   : > { %v4915_v11 = vpop.f32.mrf.mxu3 }
 0x5b9   : > { %v11791_v56 = vadd.f32 %v4915_v11, %v11590_v53  ;;  %v5142_v46 = vpop.f32.mrf.mxu2  ;;  %v8581_v53 = vld [vmem:[%s12530_s2 + $0x240] sm:$0xff] }
 0x5ba   : > { %v11799_v52 = vadd.f32 %v5142_v46, %v5054_v61  ;;  %v4967_v22 = vpop.f32.mrf.mxu0  ;;  %5380 = vmatpush.bf16.msrb.mxu1 %v8581_v53 }
 0x5bb   : > { %v4968_v7 = vadd.f32 %v4967_v22, %v11610_v40  ;;  %v8600_v40 = vld [vmem:[%s12530_s2 + $0x2d8] sm:$0xff] }
 0x5bc   : > { %v5056_v36 = vpop.f32.mrf.mxu1  ;;  %5555 = vmatpush.bf16.msra.mxu3 %v8600_v40 }
 0x5bd   : > { %v5057_v15 = vadd.f32 %v5056_v36, %v4968_v7  ;;  %5006 = vmatmul.bf16.gmra.mxu0 %v12976_v37  ;;  %5233 = vmatmul.bf16.gmra.mxu3 %v12977_v45  ;;  %v12980_v37 = vld [vmem:[#allocation108_spill] sm:$0xff]  ;;  %v12982_v45 = vld [vmem:[#allocation110_spill] sm:$0xff] }
 0x5be   : > { %5184 = vmatmul.bf16.gmra.mxu2 %v12978_v12 }
 0x5bf   : > { %5095 = vmatmul.bf16.gmra.mxu1 %v12979_v20 }
 0x5c0   : > { %v4918_v25 = vpop.f32.mrf.mxu3 }
 0x5c1   : > { %v11813_v59 = vadd.f32 %v4918_v25, %v11612_v50  ;;  %v5145_v41 = vpop.f32.mrf.mxu2 }
 0x5c2   : > { %v11815_v61 = vadd.f32 %v5145_v41, %v5057_v15  ;;  %v4969_v44 = vpop.f32.mrf.mxu0  ;;  %v12981_v15 = vld [vmem:[#allocation109_spill] sm:$0xff] }
 0x5c3   : > { %v4970_v6 = vadd.f32 %v4969_v44, %v11616_v13  ;;  %v12983_v13 = vld [vmem:[#allocation111_spill] sm:$0xff] }
 0x5c4   : > { %v5058_v33 = vpop.f32.mrf.mxu1 }
 0x5c5   : > { %v5059_v11 = vadd.f32 %v5058_v33, %v4970_v6 }
 0x5c8   : > { %v4920_v46 = vpop.f32.mrf.mxu3 }
 0x5c9   : > { %v11819_v30 = vadd.f32 %v4920_v46, %v11618_v4  ;;  %v5147_v32 = vpop.f32.mrf.mxu2 }
 0x5ca   : > { %v11821_v22 = vadd.f32 %v5147_v32, %v5059_v11  ;;  %v4972_v7 = vpop.f32.mrf.mxu0 }
 0x5cb   : > { %v4973_v36 = vadd.f32 %v4972_v7, %v11626_v55 }
 0x5cc   : > { %v5061_v50 = vpop.f32.mrf.mxu1 }
 0x5cd   : > { %v5062_v53 = vadd.f32 %v5061_v50, %v4973_v36  ;;  %5011 = vmatmul.bf16.gmra.mxu0 %v12980_v37  ;;  %5238 = vmatmul.bf16.gmra.mxu3 %v12981_v15  ;;  %v12984_v50 = vld [vmem:[#allocation112_spill] sm:$0xff]  ;;  %v12986_v37 = vld [vmem:[#allocation114_spill] sm:$0xff] }
 0x5ce   : > { %5189 = vmatmul.bf16.gmra.mxu2 %v12982_v45 }
 0x5cf   : > { %5100 = vmatmul.bf16.gmra.mxu1 %v12983_v13 }
 0x5d0   : > { %v4923_v12 = vpop.f32.mrf.mxu3 }
 0x5d1   : > { %v11829_v4 = vadd.f32 %v4923_v12, %v11628_v57  ;;  %v5150_v20 = vpop.f32.mrf.mxu2 }
 0x5d2   : > { %v11831_v40 = vadd.f32 %v5150_v20, %v5062_v53  ;;  %v4974_v25 = vpop.f32.mrf.mxu0  ;;  %v12985_v53 = vld [vmem:[#allocation113_spill] sm:$0xff] }
 0x5d3   : > { %v4975_v55 = vadd.f32 %v4974_v25, %v11632_v38  ;;  %v12987_v38 = vld [vmem:[#allocation115_spill] sm:$0xff] }
 0x5d4   : > { %v5063_v41 = vpop.f32.mrf.mxu1 }
 0x5d5   : > { %v5064_v44 = vadd.f32 %v5063_v41, %v4975_v55 }
 0x5d8   : > { %v4925_v6 = vpop.f32.mrf.mxu3 }
 0x5d9   : > { %v11835_v33 = vadd.f32 %v4925_v6, %v11634_v42  ;;  %v5152_v11 = vpop.f32.mrf.mxu2  ;;  %v8599_v42 = vld [vmem:[%s12530_s2 + $0x2d0] sm:$0xff] }
 0x5da   : > { %v11837_v46 = vadd.f32 %v5152_v11, %v5064_v44  ;;  %v4977_v32 = vpop.f32.mrf.mxu0  ;;  %5556 = vmatpush.bf16.msra.mxu3 %v8599_v42 }
 0x5db   : > { %v4978_v7 = vadd.f32 %v4977_v32, %v11654_v63 }
 0x5dc   : > { %v5066_v57 = vpop.f32.mrf.mxu1 }
 0x5dd   : > { %v5067_v36 = vadd.f32 %v5066_v57, %v4978_v7  ;;  %5243 = vmatmul.bf16.gmra.mxu3 %v12984_v50  ;;  %5292 = vmatmul.bf16.vlgmr.msrb.gmra.mxu0 %v12985_v53  ;;  %v12988_v50 = vld [vmem:[#allocation116_spill] sm:$0xff]  ;;  %v12990_v53 = vld [vmem:[#allocation118_spill] sm:$0xff] }
 0x5de   : > { %5470 = vmatmul.bf16.vlgmr.msrb.gmra.mxu2 %v12986_v37 }
 0x5df   : > { %5381 = vmatmul.bf16.vlgmr.msrb.gmra.mxu1 %v12987_v38 }
 0x5e0   : > { %v5204_v15 = vpop.f32.mrf.mxu3 }
 0x5e1   : > { %v5155_v45 = vpop.f32.mrf.mxu2  ;;  %v11848_v13 = vadd.f32 %v5204_v15, %v11656_v23 }
 0x5e2   : > { %v11850_v63 = vadd.f32 %v5155_v45, %v5067_v36  ;;  %v4979_v12 = vpop.f32.mrf.mxu0  ;;  %v12989_v36 = vld [vmem:[#allocation117_spill] sm:$0xff] }
 0x5e3   : > { %v4980_v20 = vadd.f32 %v4979_v12, %v11660_v1  ;;  %v12991_v1 = vld [vmem:[#allocation119_spill] sm:$0xff] }
 0x5e4   : > { %v5068_v25 = vpop.f32.mrf.mxu1 }
 0x5e5   : > { %v5069_v55 = vadd.f32 %v5068_v25, %v4980_v20 }
 0x5e8   : > { %v5206_v41 = vpop.f32.mrf.mxu3 }
 0x5e9   : > { %v5157_v44 = vpop.f32.mrf.mxu2  ;;  %v11854_v6 = vadd.f32 %v5206_v41, %v11662_v19 }
 0x5ea   : > { %v11856_v11 = vadd.f32 %v5157_v44, %v5069_v55  ;;  %v4982_v32 = vpop.f32.mrf.mxu0 }
 0x5eb   : > { %v4983_v7 = vadd.f32 %v4982_v32, %v11670_v47 }
 0x5ec   : > { %v5071_v57 = vpop.f32.mrf.mxu1 }
 0x5ed   : > { %v5072_v23 = vadd.f32 %v5071_v57, %v4983_v7  ;;  %5248 = vmatmul.bf16.gmra.mxu3 %v12988_v50  ;;  %5297 = vmatmul.bf16.gmra.mxu0 %v12989_v36  ;;  %v12992_v57 = vld [vmem:[#allocation120_spill] sm:$0xff]  ;;  %v12994_v50 = vld [vmem:[#allocation122_spill] sm:$0xff] }
 0x5ee   : > { %5475 = vmatmul.bf16.gmra.mxu2 %v12990_v53 }
 0x5ef   : > { %5386 = vmatmul.bf16.gmra.mxu1 %v12991_v1 }
 0x5f0   : > { %v5209_v37 = vpop.f32.mrf.mxu3 }
 0x5f1   : > { %v5160_v38 = vpop.f32.mrf.mxu2  ;;  %v11864_v19 = vadd.f32 %v5209_v37, %v11672_v14 }
 0x5f2   : > { %v11866_v42 = vadd.f32 %v5160_v38, %v5072_v23  ;;  %v4984_v15 = vpop.f32.mrf.mxu0  ;;  %v12993_v23 = vld [vmem:[#allocation121_spill] sm:$0xff] }
 0x5f3   : > { %v4985_v47 = vadd.f32 %v4984_v15, %v11676_v39  ;;  %v12995_v39 = vld [vmem:[#allocation123_spill] sm:$0xff] }
 0x5f4   : > { %v5073_v45 = vpop.f32.mrf.mxu1 }
 0x5f5   : > { %v5074_v12 = vadd.f32 %v5073_v45, %v4985_v47 }
 0x5f8   : > { %v5211_v20 = vpop.f32.mrf.mxu3 }
 0x5f9   : > { %v5162_v25 = vpop.f32.mrf.mxu2  ;;  %v11870_v55 = vadd.f32 %v5211_v20, %v11678_v17  ;;  %v8598_v17 = vld [vmem:[%s12530_s2 + $0x2c8] sm:$0xff] }
 0x5fa   : > { %v11872_v41 = vadd.f32 %v5162_v25, %v5074_v12  ;;  %v4987_v44 = vpop.f32.mrf.mxu0  ;;  %5557 = vmatpush.bf16.msra.mxu3 %v8598_v17 }
 0x5fb   : > { %v4988_v32 = vadd.f32 %v4987_v44, %v11698_v26 }
 0x5fc   : > { %v5076_v7 = vpop.f32.mrf.mxu1 }
 0x5fd   : > { %v5077_v14 = vadd.f32 %v5076_v7, %v4988_v32  ;;  %5253 = vmatmul.bf16.gmra.mxu3 %v12992_v57  ;;  %5302 = vmatmul.bf16.gmra.mxu0 %v12993_v23  ;;  %v12996_v57 = vld [vmem:[#allocation124_spill] sm:$0xff]  ;;  %v12998_v23 = vld [vmem:[#allocation126_spill] sm:$0xff] }
 0x5fe   : > { %5480 = vmatmul.bf16.gmra.mxu2 %v12994_v50 }
 0x5ff   : > { %5391 = vmatmul.bf16.gmra.mxu1 %v12995_v39 }
 0x600   : > { %v5214_v36 = vpop.f32.mrf.mxu3 }
 0x601   : > { %v5165_v53 = vpop.f32.mrf.mxu2  ;;  %v11883_v1 = vadd.f32 %v5214_v36, %v11700_v27 }
 0x602   : > { %v11885_v26 = vadd.f32 %v5165_v53, %v5077_v14  ;;  %v4989_v37 = vpop.f32.mrf.mxu0  ;;  %v12997_v14 = vld [vmem:[#allocation125_spill] sm:$0xff] }
 0x603   : > { %v4990_v38 = vadd.f32 %v4989_v37, %v11704_v16  ;;  %v12999_v16 = vld [vmem:[#allocation127_spill] sm:$0xff] }
 0x604   : > { %v5078_v15 = vpop.f32.mrf.mxu1 }
 0x605   : > { %v5079_v47 = vadd.f32 %v5078_v15, %v4990_v38 }
 0x608   : > { %v5216_v45 = vpop.f32.mrf.mxu3 }
 0x609   : > { %v5167_v12 = vpop.f32.mrf.mxu2  ;;  %v11889_v20 = vadd.f32 %v5216_v45, %v11706_v0 }
 0x60a   : > { %v11891_v25 = vadd.f32 %v5167_v12, %v5079_v47  ;;  %v4992_v44 = vpop.f32.mrf.mxu0 }
 0x60b   : > { %v4993_v32 = vadd.f32 %v4992_v44, %v11714_v31 }
 0x60c   : > { %v5081_v7 = vpop.f32.mrf.mxu1 }
 0x60d   : > { %v5082_v27 = vadd.f32 %v5081_v7, %v4993_v32  ;;  %5258 = vmatmul.bf16.gmra.mxu3 %v12996_v57  ;;  %5307 = vmatmul.bf16.gmra.mxu0 %v12997_v14  ;;  %v13000_v7 = vld [vmem:[#allocation128_spill] sm:$0xff]  ;;  %v13002_v57 = vld [vmem:[#allocation130_spill] sm:$0xff] }
 0x60e   : > { %5485 = vmatmul.bf16.gmra.mxu2 %v12998_v23 }
 0x60f   : > { %5396 = vmatmul.bf16.gmra.mxu1 %v12999_v16 }
 0x610   : > { %v5219_v50 = vpop.f32.mrf.mxu3 }
 0x611   : > { %v5170_v39 = vpop.f32.mrf.mxu2  ;;  %v11899_v0 = vadd.f32 %v5219_v50, %v11716_v5 }
 0x612   : > { %v11901_v17 = vadd.f32 %v5170_v39, %v5082_v27  ;;  %v4994_v36 = vpop.f32.mrf.mxu0  ;;  %v13001_v27 = vld [vmem:[#allocation129_spill] sm:$0xff] }
 0x613   : > { %v4995_v31 = vadd.f32 %v4994_v36, %v11720_v58  ;;  %v13003_v58 = vld [vmem:[#allocation131_spill] sm:$0xff] }
 0x614   : > { %v5083_v53 = vpop.f32.mrf.mxu1 }
 0x615   : > { %v5084_v37 = vadd.f32 %v5083_v53, %v4995_v31 }
 0x618   : > { %v5221_v38 = vpop.f32.mrf.mxu3 }
 0x619   : > { %v5172_v15 = vpop.f32.mrf.mxu2  ;;  %v11905_v47 = vadd.f32 %v5221_v38, %v11722_v18  ;;  %v8597_v18 = vld [vmem:[%s12530_s2 + $0x2c0] sm:$0xff] }
 0x61a   : > { %v11907_v45 = vadd.f32 %v5172_v15, %v5084_v37  ;;  %v4997_v12 = vpop.f32.mrf.mxu0  ;;  %5558 = vmatpush.bf16.msra.mxu3 %v8597_v18 }
 0x61b   : > { %v4998_v44 = vadd.f32 %v4997_v12, %v11742_v54 }
 0x61c   : > { %v5086_v32 = vpop.f32.mrf.mxu1 }
 0x61d   : > { %v5087_v5 = vadd.f32 %v5086_v32, %v4998_v44  ;;  %5263 = vmatmul.bf16.gmra.mxu3 %v13000_v7  ;;  %5312 = vmatmul.bf16.gmra.mxu0 %v13001_v27  ;;  %v13004_v7 = vld [vmem:[#allocation132_spill] sm:$0xff]  ;;  %v13006_v27 = vld [vmem:[#allocation134_spill] sm:$0xff] }
 0x61e   : > { %5490 = vmatmul.bf16.gmra.mxu2 %v13002_v57 }
 0x61f   : > { %5401 = vmatmul.bf16.gmra.mxu1 %v13003_v58 }
 0x620   : > { %v5224_v14 = vpop.f32.mrf.mxu3 }
 0x621   : > { %v5175_v23 = vpop.f32.mrf.mxu2  ;;  %v11918_v16 = vadd.f32 %v5224_v14, %v11744_v43 }
 0x622   : > { %v11920_v54 = vadd.f32 %v5175_v23, %v5087_v5  ;;  %v4999_v50 = vpop.f32.mrf.mxu0  ;;  %v13005_v5 = vld [vmem:[#allocation133_spill] sm:$0xff] }
 0x623   : > { %v5000_v39 = vadd.f32 %v4999_v50, %v11748_v2  ;;  %v13007_v2 = vld [vmem:[#allocation135_spill] sm:$0xff] }
 0x624   : > { %v5088_v36 = vpop.f32.mrf.mxu1 }
 0x625   : > { %v5089_v31 = vadd.f32 %v5088_v36, %v5000_v39 }
 0x628   : > { %v5226_v53 = vpop.f32.mrf.mxu3 }
 0x629   : > { %v5177_v37 = vpop.f32.mrf.mxu2  ;;  %v11924_v38 = vadd.f32 %v5226_v53, %v11750_v35 }
 0x62a   : > { %v11926_v15 = vadd.f32 %v5177_v37, %v5089_v31  ;;  %v5002_v12 = vpop.f32.mrf.mxu0 }
 0x62b   : > { %v5003_v44 = vadd.f32 %v5002_v12, %v11767_v60 }
 0x62c   : > { %v5091_v32 = vpop.f32.mrf.mxu1 }
 0x62d   : > { %v5092_v43 = vadd.f32 %v5091_v32, %v5003_v44  ;;  %5268 = vmatmul.bf16.gmra.mxu3 %v13004_v7  ;;  %5317 = vmatmul.bf16.gmra.mxu0 %v13005_v5  ;;  %v13008_v32 = vld [vmem:[#allocation136_spill] sm:$0xff]  ;;  %v13010_v7 = vld [vmem:[#allocation138_spill] sm:$0xff] }
 0x62e   : > { %5495 = vmatmul.bf16.gmra.mxu2 %v13006_v27 }
 0x62f   : > { %5406 = vmatmul.bf16.gmra.mxu1 %v13007_v2 }
 0x630   : > { %v5229_v57 = vpop.f32.mrf.mxu3 }
 0x631   : > { %v5180_v58 = vpop.f32.mrf.mxu2  ;;  %v11934_v35 = vadd.f32 %v5229_v57, %v11775_v21 }
 0x632   : > { %v11936_v18 = vadd.f32 %v5180_v58, %v5092_v43  ;;  %v5004_v14 = vpop.f32.mrf.mxu0  ;;  %v13009_v43 = vld [vmem:[#allocation137_spill] sm:$0xff] }
 0x633   : > { %v5005_v60 = vadd.f32 %v5004_v14, %v11791_v56  ;;  %v13011_v56 = vld [vmem:[#allocation139_spill] sm:$0xff] }
 0x634   : > { %v5093_v23 = vpop.f32.mrf.mxu1 }
 0x635   : > { %v5094_v50 = vadd.f32 %v5093_v23, %v5005_v60 }
 0x638   : > { %v5231_v39 = vpop.f32.mrf.mxu3 }
 0x639   : > { %v5182_v36 = vpop.f32.mrf.mxu2  ;;  %v11940_v31 = vadd.f32 %v5231_v39, %v11799_v52 }
 0x63a   : > { %v11942_v53 = vadd.f32 %v5182_v36, %v5094_v50  ;;  %v5007_v37 = vpop.f32.mrf.mxu0 }
 0x63b   : > { %v5008_v12 = vadd.f32 %v5007_v37, %v11813_v59 }
 0x63c   : > { %v5096_v44 = vpop.f32.mrf.mxu1 }
 0x63d   : > { %v5097_v21 = vadd.f32 %v5096_v44, %v5008_v12  ;;  %5273 = vmatmul.bf16.gmra.mxu3 %v13008_v32  ;;  %5322 = vmatmul.bf16.gmra.mxu0 %v13009_v43  ;;  %v13014_v32 = vld [vmem:[#allocation142_spill] sm:$0xff]  ;;  %v13015_v43 = vld [vmem:[#allocation143_spill] sm:$0xff] }
 0x63e   : > { %5500 = vmatmul.bf16.gmra.mxu2 %v13010_v7 }
 0x63f   : > { %5411 = vmatmul.bf16.gmra.mxu1 %v13011_v56 }
 0x640   : > { %v5234_v5 = vpop.f32.mrf.mxu3 }
 0x641   : > { %v5185_v27 = vpop.f32.mrf.mxu2  ;;  %v11950_v52 = vadd.f32 %v5234_v5, %v11815_v61  ;;  %v5915_v61 = vld [vmem:[%s12533_s5 + $0xf8] sm:$0xff] }
 0x642   : > { %v11952_v2 = vadd.f32 %v5185_v27, %v5097_v21  ;;  %v5009_v57 = vpop.f32.mrf.mxu0  ;;  %5916 = vmatpush.msra.mxu0 %v5915_v61  ;;  %v13012_v21 = vld [vmem:[#allocation140_spill] sm:$0xff] }
 0x643   : > { %v5010_v59 = vadd.f32 %v5009_v57, %v11819_v30  ;;  %v5899_v30 = vld [vmem:[%s12533_s5 + $0x78] sm:$0xff] }
 0x644   : > { %v5098_v58 = vpop.f32.mrf.mxu1  ;;  %5981 = vmatpush.msra.mxu1 %v5899_v30 }
 0x645   : > { %v5099_v14 = vadd.f32 %v5098_v58, %v5010_v59 }
 0x648   : > { %v5236_v60 = vpop.f32.mrf.mxu3 }
 0x649   : > { %v5187_v23 = vpop.f32.mrf.mxu2  ;;  %v11956_v50 = vadd.f32 %v5236_v60, %v11821_v22  ;;  %v13013_v22 = vld [vmem:[#allocation141_spill] sm:$0xff] }
 0x64a   : > { %v11958_v39 = vadd.f32 %v5187_v23, %v5099_v14  ;;  %v5012_v36 = vpop.f32.mrf.mxu0 }
 0x64b   : > { %v5013_v37 = vadd.f32 %v5012_v36, %v11829_v4 }
 0x64c   : > { %v5101_v12 = vpop.f32.mrf.mxu1 }
 0x64d   : > { %v5102_v44 = vadd.f32 %v5101_v12, %v5013_v37  ;;  %5278 = vmatmul.bf16.gmra.mxu3 %v13012_v21  ;;  %5327 = vmatmul.bf16.gmra.mxu0 %v13013_v22  ;;  %v13018_v21 = vld [vmem:[#allocation146_spill] sm:$0xff]  ;;  %v13019_v22 = vld [vmem:[#allocation147_spill] sm:$0xff] }
 0x64e   : > { %5505 = vmatmul.bf16.gmra.mxu2 %v13014_v32 }
 0x64f   : > { %5416 = vmatmul.bf16.gmra.mxu1 %v13015_v43 }
 0x650   : > { %v5239_v4 = vpop.f32.mrf.mxu3 }
 0x651   : > { %v5190_v7 = vpop.f32.mrf.mxu2  ;;  %v11972_v56 = vadd.f32 %v5239_v4, %v11831_v40  ;;  %v5914_v40 = vld [vmem:[%s12533_s5 + $0xf0] sm:$0xff] }
 0x652   : > { %v11974_v5 = vadd.f32 %v5190_v7, %v5102_v44  ;;  %v5014_v27 = vpop.f32.mrf.mxu0  ;;  %5917 = vmatpush.msra.mxu0 %v5914_v40  ;;  %v13016_v44 = vld [vmem:[#allocation144_spill] sm:$0xff] }
 0x653   : > { %v5015_v57 = vadd.f32 %v5014_v27, %v11835_v33  ;;  %v5898_v33 = vld [vmem:[%s12533_s5 + $0x70] sm:$0xff]  ;;  %v5913_v40 = vld [vmem:[%s12533_s5 + $0xe8] sm:$0xff] }
 0x654   : > { %v5103_v59 = vpop.f32.mrf.mxu1  ;;  %5982 = vmatpush.msra.mxu1 %v5898_v33  ;;  %5918 = vmatpush.msra.mxu0 %v5913_v40  ;;  %v5912_v40 = vld [vmem:[%s12533_s5 + $0xe0] sm:$0xff] }
 0x655   : > { %v5104_v58 = vadd.f32 %v5103_v59, %v5015_v57 }
 0x656   : > { %5919 = vmatpush.msra.mxu0 %v5912_v40  ;;  %v5911_v40 = vld [vmem:[%s12533_s5 + $0xd8] sm:$0xff] }
 0x658   : > { %v5241_v14 = vpop.f32.mrf.mxu3  ;;  %5920 = vmatpush.msra.mxu0 %v5911_v40  ;;  %v13035_v40 = vld [vmem:[#allocation163_spill] sm:$0xff] }
 0x659   : > { %v5192_v60 = vpop.f32.mrf.mxu2  ;;  %v11978_v23 = vadd.f32 %v5241_v14, %v11837_v46  ;;  %v13017_v46 = vld [vmem:[#allocation145_spill] sm:$0xff] }
 0x65a   : > { %v11980_v36 = vadd.f32 %v5192_v60, %v5104_v58  ;;  %v5293_v37 = vpop.f32.mrf.mxu0 }
 0x65b   : > { %v5294_v12 = vadd.f32 %v5293_v37, %v11848_v13 }
 0x65c   : > { %v5382_v61 = vpop.f32.mrf.mxu1 }
 0x65d   : > { %v5383_v30 = vadd.f32 %v5382_v61, %v5294_v12  ;;  %5332 = vmatmul.bf16.gmra.mxu0 %v13016_v44  ;;  %5559 = vmatmul.bf16.vlgmr.msra.gmra.mxu3 %v13017_v46  ;;  %v13022_v44 = vld [vmem:[#allocation150_spill] sm:$0xff]  ;;  %v13023_v46 = vld [vmem:[#allocation151_spill] sm:$0xff] }
 0x65e   : > { %5510 = vmatmul.bf16.gmra.mxu2 %v13018_v21 }
 0x65f   : > { %5421 = vmatmul.bf16.gmra.mxu1 %v13019_v22 }
 0x660   : > { %v5244_v13 = vpop.f32.mrf.mxu3 }
 0x661   : > { %v11994_v32 = vadd.f32 %v5244_v13, %v11850_v63  ;;  %v5471_v43 = vpop.f32.mrf.mxu2 }
 0x662   : > { %v11996_v4 = vadd.f32 %v5471_v43, %v5383_v30  ;;  %v5295_v7 = vpop.f32.mrf.mxu0  ;;  %v13021_v30 = vld [vmem:[#allocation149_spill] sm:$0xff] }
 0x663   : > { %v5296_v27 = vadd.f32 %v5295_v7, %v11854_v6  ;;  %v5897_v6 = vld [vmem:[%s12533_s5 + $0x68] sm:$0xff] }
 0x664   : > { %v5384_v57 = vpop.f32.mrf.mxu1  ;;  %5983 = vmatpush.msra.mxu1 %v5897_v6 }
 0x665   : > { %v5385_v59 = vadd.f32 %v5384_v57, %v5296_v27 }
 0x668   : > { %v5246_v58 = vpop.f32.mrf.mxu3 }
 0x669   : > { %v12000_v14 = vadd.f32 %v5246_v58, %v11856_v11  ;;  %v5473_v60 = vpop.f32.mrf.mxu2  ;;  %v13020_v11 = vld [vmem:[#allocation148_spill] sm:$0xff] }
 0x66a   : > { %v12002_v37 = vadd.f32 %v5473_v60, %v5385_v59  ;;  %v5298_v12 = vpop.f32.mrf.mxu0 }
 0x66b   : > { %v5299_v61 = vadd.f32 %v5298_v12, %v11864_v19 }
 0x66c   : > { %v5387_v63 = vpop.f32.mrf.mxu1 }
 0x66d   : > { %v5388_v33 = vadd.f32 %v5387_v63, %v5299_v61  ;;  %5337 = vmatmul.bf16.gmra.mxu0 %v13020_v11  ;;  %5564 = vmatmul.bf16.gmra.mxu3 %v13021_v30  ;;  %v13026_v11 = vld [vmem:[#allocation154_spill] sm:$0xff]  ;;  %v13027_v30 = vld [vmem:[#allocation155_spill] sm:$0xff] }
 0x66e   : > { %5515 = vmatmul.bf16.gmra.mxu2 %v13022_v44 }
 0x66f   : > { %5426 = vmatmul.bf16.gmra.mxu1 %v13023_v46 }
 0x670   : > { %v5249_v19 = vpop.f32.mrf.mxu3 }
 0x671   : > { %v12016_v21 = vadd.f32 %v5249_v19, %v11866_v42  ;;  %v5476_v22 = vpop.f32.mrf.mxu2 }
 0x672   : > { %v12018_v13 = vadd.f32 %v5476_v22, %v5388_v33  ;;  %v5300_v43 = vpop.f32.mrf.mxu0  ;;  %v13025_v33 = vld [vmem:[#allocation153_spill] sm:$0xff] }
 0x673   : > { %v5301_v7 = vadd.f32 %v5300_v43, %v11870_v55  ;;  %v5896_v55 = vld [vmem:[%s12533_s5 + $0x60] sm:$0xff] }
 0x674   : > { %v5389_v27 = vpop.f32.mrf.mxu1  ;;  %5984 = vmatpush.msra.mxu1 %v5896_v55  ;;  %v13028_v55 = vld [vmem:[#allocation156_spill] sm:$0xff] }
 0x675   : > { %v5390_v57 = vadd.f32 %v5389_v27, %v5301_v7 }
 0x678   : > { %v5251_v59 = vpop.f32.mrf.mxu3 }
 0x679   : > { %v12022_v58 = vadd.f32 %v5251_v59, %v11872_v41  ;;  %v5478_v60 = vpop.f32.mrf.mxu2  ;;  %v13024_v41 = vld [vmem:[#allocation152_spill] sm:$0xff] }
 0x67a   : > { %v12024_v12 = vadd.f32 %v5478_v60, %v5390_v57  ;;  %v5303_v61 = vpop.f32.mrf.mxu0 }
 0x67b   : > { %v5304_v63 = vadd.f32 %v5303_v61, %v11883_v1 }
 0x67c   : > { %v5392_v42 = vpop.f32.mrf.mxu1 }
 0x67d   : > { %v5393_v6 = vadd.f32 %v5392_v42, %v5304_v63  ;;  %5342 = vmatmul.bf16.gmra.mxu0 %v13024_v41  ;;  %5569 = vmatmul.bf16.gmra.mxu3 %v13025_v33  ;;  %v13030_v41 = vld [vmem:[#allocation158_spill] sm:$0xff] }
 0x67e   : > { %5520 = vmatmul.bf16.gmra.mxu2 %v13026_v11 }
 0x67f   : > { %5431 = vmatmul.bf16.gmra.mxu1 %v13027_v30 }
 0x680   : > { %v5254_v1 = vpop.f32.mrf.mxu3 }
 0x681   : > { %v12038_v44 = vadd.f32 %v5254_v1, %v11885_v26  ;;  %v5481_v46 = vpop.f32.mrf.mxu2 }
 0x682   : > { %v12040_v19 = vadd.f32 %v5481_v46, %v5393_v6  ;;  %v5305_v22 = vpop.f32.mrf.mxu0  ;;  %v13029_v6 = vld [vmem:[#allocation157_spill] sm:$0xff] }
 0x683   : > { %v5306_v43 = vadd.f32 %v5305_v22, %v11889_v20  ;;  %v5895_v20 = vld [vmem:[%s12533_s5 + $0x58] sm:$0xff] }
 0x684   : > { %v5394_v7 = vpop.f32.mrf.mxu1  ;;  %5985 = vmatpush.msra.mxu1 %v5895_v20 }
 0x685   : > { %v5395_v27 = vadd.f32 %v5394_v7, %v5306_v43 }
 0x688   : > { %v5256_v57 = vpop.f32.mrf.mxu3 }
 0x689   : > { %v12044_v59 = vadd.f32 %v5256_v57, %v11891_v25  ;;  %v5483_v60 = vpop.f32.mrf.mxu2 }
 0x68a   : > { %v12046_v61 = vadd.f32 %v5483_v60, %v5395_v27  ;;  %v5308_v63 = vpop.f32.mrf.mxu0 }
 0x68b   : > { %v5309_v42 = vadd.f32 %v5308_v63, %v11899_v0  ;;  %v13031_v0 = vld [vmem:[#allocation159_spill] sm:$0xff] }
 0x68c   : > { %v5397_v26 = vpop.f32.mrf.mxu1 }
 0x68d   : > { %v5398_v25 = vadd.f32 %v5397_v26, %v5309_v42  ;;  %5347 = vmatmul.bf16.gmra.mxu0 %v13028_v55  ;;  %5574 = vmatmul.bf16.gmra.mxu3 %v13029_v6  ;;  %v13032_v42 = vld [vmem:[#allocation160_spill] sm:$0xff]  ;;  %v13033_v26 = vld [vmem:[#allocation161_spill] sm:$0xff]  ;;  %v8849_v55 = vmov 0  }
 0x68e   : > { %5525 = vmatmul.bf16.gmra.mxu2 %v13030_v41  ;;  %8753 = vset.pattern.permute.xlu0 %v8849_v55  ;;  %v5676_v6 = vld [vmem:[%s12093_s19] sm:$0xff] }
 0x68f   : > { %5436 = vmatmul.bf16.gmra.mxu1 %v13031_v0  ;;  %8754 = vset.pattern.permute.xlu1 %v8849_v55  ;;  %vm5692_vm0 = vcmp.gt.f32.partialorder %v5676_v6, 0.5  ;;  %v13041_v6 = vld [vmem:[#allocation169_spill] sm:$0xff] }
 0x690   : > { %v5259_v33 = vpop.f32.mrf.mxu3  ;;  %8755 = vset.pattern.permute.xlu2 %v8849_v55  ;;  %v5708_v0 = vsel %vm5692_vm0, 1, %v8849_v55 }
 0x691   : > { %v12060_v11 = vadd.f32 %v5259_v33, %v11901_v17  ;;  %v5486_v30 = vpop.f32.mrf.mxu2  ;;  %v5910_v17 = vld [vmem:[%s12533_s5 + $0xd0] sm:$0xff]  ;;  %5725 = vperm.xlu0 %8753, %v5708_v0   ;;  %v5909_v33 = vld [vmem:[%s12533_s5 + $0xc8] sm:$0xff] }
 0x692   : > { %v12062_v1 = vadd.f32 %v5486_v30, %v5398_v25  ;;  %v5310_v46 = vpop.f32.mrf.mxu0  ;;  %5921 = vmatpush.msra.mxu0 %v5910_v17  ;;  %v5893_v30 = vld [vmem:[%s12533_s5 + $0x48] sm:$0xff]  ;;  %v5678_v0 = vld [vmem:[%s12093_s19 + $0x10] sm:$0xff] }
 0x693   : > { %v5311_v22 = vadd.f32 %v5310_v46, %v11905_v47  ;;  %v5894_v47 = vld [vmem:[%s12533_s5 + $0x50] sm:$0xff]  ;;  %v13036_v46 = vld [vmem:[#allocation164_spill] sm:$0xff]  ;;  %vm5694_vm3 = vcmp.gt.f32.partialorder %v5678_v0, 0.5 }
 0x694   : > { %v5399_v43 = vpop.f32.mrf.mxu1  ;;  %5986 = vmatpush.msra.mxu1 %v5894_v47  ;;  %5922 = vmatpush.msra.mxu0 %v5909_v33  ;;  %v5682_v47 = vld [vmem:[%s12093_s19 + $0x30] sm:$0xff]  ;;  %v5685_v33 = vld [vmem:[%s12093_s19 + $0x48] sm:$0xff] }
 0x695   : > { %v5400_v7 = vadd.f32 %v5399_v43, %v5311_v22  ;;  %v13037_v22 = vld [vmem:[#allocation165_spill] sm:$0xff]  ;;  %v13039_v43 = vld [vmem:[#allocation167_spill] sm:$0xff]  ;;  %vm5698_vm2 = vcmp.gt.f32.partialorder %v5682_v47, 0.5  ;;  %vm5701_vm4 = vcmp.gt.f32.partialorder %v5685_v33, 0.5 }
 0x696   : > { %5987 = vmatpush.msra.mxu1 %v5893_v30  ;;  %v5890_v0 = vld [vmem:[%s12533_s5 + $0x30] sm:$0xff]  ;;  %v5689_v33 = vld [vmem:[%s12093_s19 + $0x68] sm:$0xff] }
 0x697   : > { %vm5705_vm10 = vcmp.gt.f32.partialorder %v5689_v33, 0.5 }
 0x698   : > { %v5261_v27 = vpop.f32.mrf.mxu3 }
 0x699   : > { %v12068_v57 = vadd.f32 %v5261_v27, %v11907_v45  ;;  %v5488_v60 = vpop.f32.mrf.mxu2  ;;  %v13034_v45 = vld [vmem:[#allocation162_spill] sm:$0xff] }
 0x69a   : > { %v12070_v63 = vadd.f32 %v5488_v60, %v5400_v7  ;;  %v5677_v7 = vld [vmem:[%s12093_s19 + $0x8] sm:$0xff] }
 0x69b   : > { %vm5693_vm1 = vcmp.gt.f32.partialorder %v5677_v7, 0.5  ;;  %v5688_v7 = vld [vmem:[%s12093_s19 + $0x60] sm:$0xff] }
 0x69c   : > { %v5709_v17 = vsel %vm5693_vm1, 1, %v8849_v55  ;;  %vm5704_vm6 = vcmp.gt.f32.partialorder %v5688_v7, 0.5 }
 0x69d   : > { %5352 = vmatmul.bf16.gmra.mxu0 %v13032_v42  ;;  %5579 = vmatmul.bf16.gmra.mxu3 %v13033_v26 }
 0x69e   : > { %5530 = vmatmul.bf16.gmra.mxu2 %v13034_v45  ;;  %5728 = vperm.xlu0 %8753, %v5709_v17   ;;  %v5714_v45 = vsel %vm5698_vm2, 1, %v8849_v55 }
 0x69f   : > { %5441 = vmatmul.bf16.gmra.mxu1 %v13035_v40  ;;  %v5908_v40 = vld [vmem:[%s12533_s5 + $0xc0] sm:$0xff] }
 0x6a0   : > { %v5264_v20 = vpop.f32.mrf.mxu3  ;;  %5923 = vmatpush.msra.mxu0 %v5908_v40  ;;  %v5691_v40 = vld [vmem:[%s12093_s19 + $0x78] sm:$0xff] }
 0x6a1   : > { %v12085_v25 = vadd.f32 %v5264_v20, %v11920_v54  ;;  %v13040_v20 = vld [vmem:[#allocation168_spill] sm:$0xff]  ;;  %vm5707_vm8 = vcmp.gt.f32.partialorder %v5691_v40, 0.5 }
 0x6a6   : > { %5743 = vperm.xlu0 %8753, %v5714_v45   ;;  %v5891_v45 = vld [vmem:[%s12533_s5 + $0x38] sm:$0xff] }
 0x6a8   : > { %v5266_v41 = vpop.f32.mrf.mxu3 }
 0x6a9   : > { %v12100_v54 = vadd.f32 %v5266_v41, %v11926_v15  ;;  %v13038_v15 = vld [vmem:[#allocation166_spill] sm:$0xff]  ;;  %v13043_v41 = vld [vmem:[#allocation171_spill] sm:$0xff] }
 0x6ad   : > { %5357 = vmatmul.bf16.gmra.mxu0 %v13036_v46  ;;  %5584 = vmatmul.bf16.gmra.mxu3 %v13037_v22  ;;  %v5710_v22 = vsel %vm5694_vm3, 1, %v8849_v55 }
 0x6ae   : > { %5535 = vmatmul.bf16.gmra.mxu2 %v13038_v15  ;;  %v5717_v15 = vsel %vm5701_vm4, 1, %v8849_v55  ;;  %5731 = vperm.xlu1 %8754, %v5710_v22   ;;  %v5721_v22 = vsel %vm5705_vm10, 1, %v8849_v55 }
 0x6af   : > { %5446 = vmatmul.bf16.gmra.mxu1 %v13039_v43  ;;  %5752 = vperm.xlu0 %8753, %v5717_v15   ;;  %v5679_v43 = vld [vmem:[%s12093_s19 + $0x18] sm:$0xff]  ;;  %v5680_v15 = vld [vmem:[%s12093_s19 + $0x20] sm:$0xff] }
 0x6b0   : > { %v5269_v27 = vpop.f32.mrf.mxu3  ;;  %vm5695_vm5 = vcmp.gt.f32.partialorder %v5679_v43, 0.5  ;;  %v12185_v43 = vpop.f32.mrf.mxu0  ;;  %vm5696_vm11 = vcmp.gt.f32.partialorder %v5680_v15, 0.5 }
 0x6b1   : > { %v12115_v60 = vadd.f32 %v5269_v27, %v11936_v18  ;;  %v5892_v18 = vld [vmem:[%s12533_s5 + $0x40] sm:$0xff]  ;;  %v5711_v47 = vsel %vm5695_vm5, 1, %v8849_v55 }
 0x6b2   : > { %5988 = vmatpush.msra.mxu1 %v5892_v18 }
 0x6b4   : > { %5989 = vmatpush.msra.mxu1 %v5891_v45 }
 0x6b6   : > { %5734 = vperm.xlu1 %8754, %v5711_v47   ;;  %5990 = vmatpush.msra.mxu1 %v5890_v0  ;;  %v5889_v47 = vld [vmem:[%s12533_s5 + $0x28] sm:$0xff]  ;;  %v5687_v0 = vld [vmem:[%s12093_s19 + $0x58] sm:$0xff] }
 0x6b7   : > { %vm5703_vm14 = vcmp.gt.f32.partialorder %v5687_v0, 0.5  ;;  %v5314_v0 = vadd.f32 %v12185_v43, %v11918_v16 }
 0x6b8   : > { %v5271_v42 = vpop.f32.mrf.mxu3  ;;  %5991 = vmatpush.msra.mxu1 %v5889_v47 }
 0x6b9   : > { %v12120_v26 = vadd.f32 %v5271_v42, %v11942_v53  ;;  %v13042_v53 = vld [vmem:[#allocation170_spill] sm:$0xff] }
 0x6ba   : > { %v5907_v42 = vld [vmem:[%s12533_s5 + $0xb8] sm:$0xff] }
 0x6bb   : > { %5924 = vmatpush.msra.mxu0 %v5907_v42  ;;  %v5681_v42 = vld [vmem:[%s12093_s19 + $0x28] sm:$0xff] }
 0x6bc   : > { %vm5697_vm12 = vcmp.gt.f32.partialorder %v5681_v42, 0.5 }
 0x6bd   : > { %5362 = vmatmul.bf16.gmra.mxu0 %v13040_v20  ;;  %5589 = vmatmul.bf16.gmra.mxu3 %v13041_v6  ;;  %v5713_v40 = vsel %vm5697_vm12, 1, %v8849_v55 }
 0x6be   : > { %5540 = vmatmul.bf16.gmra.mxu2 %v13042_v53  ;;  %v5723_v53 = vsel %vm5707_vm8, 1, %v8849_v55 }
 0x6bf   : > { %5451 = vmatmul.bf16.gmra.mxu1 %v13043_v41  ;;  %v5906_v41 = vld [vmem:[%s12533_s5 + $0xb0] sm:$0xff] }
 0x6c0   : > { %v5274_v30 = vpop.f32.mrf.mxu3  ;;  %5925 = vmatpush.msra.mxu0 %v5906_v41 }
 0x6c1   : > { %v12136_v46 = vadd.f32 %v5274_v30, %v11952_v2  ;;  %v5720_v2 = vsel %vm5704_vm6, 1, %v8849_v55 }
 0x6c2   : > { %5761 = vperm.xlu0 %8753, %v5720_v2   ;;  %v12197_v2 = vpop.f32.mrf.mxu1 }
 0x6c8   : > { %v5276_v27 = vpop.f32.mrf.mxu3 }
 0x6c9   : > { %v12143_v17 = vadd.f32 %v5276_v27, %v11958_v39  ;;  %v5683_v39 = vld [vmem:[%s12093_s19 + $0x38] sm:$0xff] }
 0x6ca   : > { %vm5699_vm7 = vcmp.gt.f32.partialorder %v5683_v39, 0.5  ;;  %5770 = vperm.xlu0 %8753, %v5723_v53   ;;  %v5684_v53 = vld [vmem:[%s12093_s19 + $0x40] sm:$0xff] }
 0x6cb   : > { %v5715_v6 = vsel %vm5699_vm7, 1, %v8849_v55  ;;  %vm5700_vm13 = vcmp.gt.f32.partialorder %v5684_v53, 0.5 }
 0x6cc   : > { %5746 = vperm.xlu1 %8754, %v5715_v6   ;;  %v5404_v6 = vpop.f32.mrf.mxu1 }
 0x6cd   : > { %5367 = vmatmul.bf16.gmra.mxu0 %v11077_v9  ;;  %5594 = vmatmul.bf16.gmra.mxu3 %v11079_v28  ;;  %v6101_v9 = vld [vmem:[%s12535_s7 + $0x18] sm:$0xff]  ;;  %v5686_v28 = vld [vmem:[%s12093_s19 + $0x50] sm:$0xff] }
 0x6ce   : > { %5545 = vmatmul.bf16.gmra.mxu2 %v11083_v10  ;;  %vm5702_vm9 = vcmp.gt.f32.partialorder %v5686_v28, 0.5 }
 0x6cf   : > { %5456 = vmatmul.bf16.gmra.mxu1 %v11085_v49  ;;  %6167 = vmatpush.msra.mxu2 %v6101_v9 }
 0x6d0   : > { %v5279_v18 = vpop.f32.mrf.mxu3 }
 0x6d1   : > { %v12160_v20 = vadd.f32 %v5279_v18, %v11974_v5  ;;  %v5718_v5 = vsel %vm5702_vm9, 1, %v8849_v55  ;;  %v5315_v18 = vpop.f32.mrf.mxu0 }
 0x6d4   : > { %5755 = vperm.xlu1 %8754, %v5718_v5   ;;  %v5888_v5 = vld [vmem:[%s12533_s5 + $0x20] sm:$0xff] }
 0x6d5   : > { %5992 = vmatpush.msra.mxu1 %v5888_v5 }
 0x6d8   : > { %v5281_v10 = vpop.f32.mrf.mxu3 }
 0x6d9   : > { %v12169_v49 = vadd.f32 %v5281_v10, %v11980_v36  ;;  %v5318_v41 = vpop.f32.mrf.mxu0 }
 0x6db   : > { %13044 = vst [vmem:[#allocation8_spill] sm:$0xff] %v12169_v49 }
 0x6dc   : > { %5764 = vperm.xlu1 %8754, %v5721_v22   ;;  %v5719_v22 = vsel %vm5703_vm14, 1, %v8849_v55 }
 0x6dd   : > { %5599 = vmatmul.bf16.gmra.mxu3 %v11103_v3  ;;  %v5712_v3 = vsel %vm5696_vm11, 1, %v8849_v55 }
 0x6de   : > { %5737 = vperm.xlu2 %8755, %v5712_v3   ;;  %v5690_v3 = vld [vmem:[%s12093_s19 + $0x70] sm:$0xff] }
 0x6df   : > { %vm5706_vm15 = vcmp.gt.f32.partialorder %v5690_v3, 0.5  ;;  %v5403_v3 = vadd.f32 %v12197_v2, %v5314_v0 }
 0x6e0   : > { %v5560_v30 = vpop.f32.mrf.mxu3 }
 0x6e1   : > { %v12181_v36 = vadd.f32 %v5560_v30, %v11996_v4  ;;  %v5905_v4 = vld [vmem:[%s12533_s5 + $0xa8] sm:$0xff] }
 0x6e2   : > { %5926 = vmatpush.msra.mxu0 %v5905_v4 }
 0x6e6   : > { %5740 = vperm.xlu2 %8755, %v5713_v40  }
 0x6e8   : > { %v5562_v7 = vpop.f32.mrf.mxu3 }
 0x6e9   : > { %v12188_v27 = vadd.f32 %v5562_v7, %v12002_v37  ;;  %v5491_v37 = vpop.f32.mrf.mxu2  ;;  %v5320_v7 = vpop.f32.mrf.mxu0 }
 0x6ea   : > { %v5492_v16 = vadd.f32 %v5491_v37, %v5403_v3 }
 0x6ed   : > { %5604 = vmatmul.bf16.gmra.mxu3 %v11126_v34  ;;  %v5716_v34 = vsel %vm5700_vm13, 1, %v8849_v55 }
 0x6ee   : > { %5749 = vperm.xlu2 %8755, %v5716_v34  }
 0x6f0   : > { %v5565_v45 = vpop.f32.mrf.mxu3 }
 0x6f1   : > { %v12202_v39 = vadd.f32 %v5565_v45, %v12018_v13  ;;  %v5493_v9 = vpop.f32.mrf.mxu2  ;;  %v5904_v13 = vld [vmem:[%s12533_s5 + $0xa0] sm:$0xff]  ;;  %v5887_v45 = vld [vmem:[%s12533_s5 + $0x18] sm:$0xff]  ;;  %v5323_v53 = vpop.f32.mrf.mxu0 }
 0x6f2   : > { %5927 = vmatpush.msra.mxu0 %v5904_v13  ;;  %5993 = vmatpush.msra.mxu1 %v5887_v45 }
 0x6f6   : > { %5758 = vperm.xlu2 %8755, %v5719_v22   ;;  %v5886_v22 = vld [vmem:[%s12533_s5 + $0x10] sm:$0xff] }
 0x6f7   : > { %5994 = vmatpush.msra.mxu1 %v5886_v22 }
 0x6f8   : > { %v5567_v28 = vpop.f32.mrf.mxu3 }
 0x6f9   : > { %v12207_v10 = vadd.f32 %v5567_v28, %v12024_v12  ;;  %v5407_v12 = vpop.f32.mrf.mxu1  ;;  %v5496_v15 = vpop.f32.mrf.mxu2 }
 0x6fd   : > { %5609 = vmatmul.bf16.gmra.mxu3 %v11146_v48  ;;  %v5722_v48 = vsel %vm5706_vm15, 1, %v8849_v55  ;;  %v6100_v55 = vld [vmem:[%s12535_s7 + $0x10] sm:$0xff] }
 0x6fe   : > { %5767 = vperm.xlu2 %8755, %v5722_v48   ;;  %6168 = vmatpush.msra.mxu2 %v6100_v55  ;;  %v5316_v48 = vadd.f32 %v5315_v18, %v11924_v38  ;;  %v5885_v38 = vld [vmem:[%s12533_s5 + $0x8] sm:$0xff] }
 0x6ff   : > { %5995 = vmatpush.msra.mxu1 %v5885_v38 }
 0x700   : > { %v5570_v33 = vpop.f32.mrf.mxu3 }
 0x701   : > { %v12219_v30 = vadd.f32 %v5570_v33, %v12040_v19  ;;  %v5409_v42 = vpop.f32.mrf.mxu1  ;;  %v5903_v19 = vld [vmem:[%s12533_s5 + $0x98] sm:$0xff]  ;;  %v5498_v40 = vpop.f32.mrf.mxu2 }
 0x702   : > { %5928 = vmatpush.msra.mxu0 %v5903_v19 }
 0x708   : > { %v5572_v4 = vpop.f32.mrf.mxu3 }
 0x709   : > { %v12224_v47 = vadd.f32 %v5572_v4, %v12046_v61  ;;  %v5412_v34 = vpop.f32.mrf.mxu1  ;;  %v5501_v13 = vpop.f32.mrf.mxu2 }
 0x70d   : > { %5614 = vmatmul.bf16.gmra.mxu3 %v11169_v62  ;;  %v5325_v62 = vpop.f32.mrf.mxu0 }
 0x710   : > { %v5575_v61 = vpop.f32.mrf.mxu3 }
 0x711   : > { %v12235_v28 = vadd.f32 %v5575_v61, %v12062_v1  ;;  %v5902_v1 = vld [vmem:[%s12533_s5 + $0x90] sm:$0xff]  ;;  %v5414_v4 = vpop.f32.mrf.mxu1  ;;  %v5503_v43 = vpop.f32.mrf.mxu2  ;;  %v5405_v61 = vadd.f32 %v5404_v6, %v5316_v48 }
 0x712   : > { %5929 = vmatpush.msra.mxu0 %v5902_v1  ;;  %v5319_v1 = vadd.f32 %v5318_v41, %v11934_v35  ;;  %v5321_v35 = vadd.f32 %v5320_v7, %v11940_v31  ;;  %v5884_v31 = vld [vmem:[%s12533_s5] sm:$0xff] }
 0x713   : > { %v5494_v55 = vadd.f32 %v5493_v9, %v5405_v61  ;;  %v5324_v61 = vadd.f32 %v5323_v53, %v11950_v52  ;;  %5996 = vmatpush.msra.mxu1 %v5884_v31  ;;  %v5326_v52 = vadd.f32 %v5325_v62, %v11956_v50 }
 0x714   : > { %v5408_v37 = vadd.f32 %v5407_v12, %v5319_v1  ;;  %v5410_v3 = vadd.f32 %v5409_v42, %v5321_v35 }
 0x715   : > { %v5328_v45 = vpop.f32.mrf.mxu0 }
 0x716   : > { %v5497_v6 = vadd.f32 %v5496_v15, %v5408_v37  ;;  %v5413_v15 = vadd.f32 %v5412_v34, %v5324_v61  ;;  %v5329_v35 = vadd.f32 %v5328_v45, %v11972_v56 }
 0x718   : > { %v5577_v5 = vpop.f32.mrf.mxu3  ;;  %v5502_v42 = vadd.f32 %v5501_v13, %v5413_v15 }
 0x719   : > { %v12243_v33 = vadd.f32 %v5577_v5, %v12070_v63  ;;  %v5417_v5 = vpop.f32.mrf.mxu1  ;;  %v5506_v2 = vpop.f32.mrf.mxu2 }
 0x71d   : > { %5619 = vmatmul.bf16.gmra.mxu3 %v11189_v8  ;;  %v5901_v8 = vld [vmem:[%s12533_s5 + $0x88] sm:$0xff]  ;;  %v5330_v18 = vpop.f32.mrf.mxu0 }
 0x71e   : > { %5930 = vmatpush.msra.mxu0 %v5901_v8  ;;  %v5415_v8 = vadd.f32 %v5414_v4, %v5326_v52  ;;  %v5331_v50 = vadd.f32 %v5330_v18, %v11978_v23  ;;  %v12298_v18 = vld [vmem:[%s12532_s4] ss:$0 sm:$0xff]  ;;  %v5726_v52 = vpop.permute.xlu0 %5725 }
 0x71f   : > { %vm5772_vm0 = vcmp.eq.s32.totalorder %v5726_v52, 1 }
 0x720   : > { %v5580_v63 = vpop.f32.mrf.mxu3  ;;  %v5504_v37 = vadd.f32 %v5503_v43, %v5415_v8  ;;  %v6099_v43 = vld [vmem:[%s12535_s7 + $0x8] sm:$0xff] }
 0x721   : > { %v12254_v19 = vadd.f32 %v5580_v63, %v5492_v16  ;;  %v5419_v41 = vpop.f32.mrf.mxu1  ;;  %v5508_v0 = vpop.f32.mrf.mxu2  ;;  %v5499_v16 = vadd.f32 %v5498_v40, %v5410_v3  ;;  %6169 = vmatpush.msra.mxu2 %v6099_v43 }
 0x722   : > { %v5420_v56 = vadd.f32 %v5419_v41, %v5331_v50 }
 0x724   : > { %v5509_v61 = vadd.f32 %v5508_v0, %v5420_v56 }
 0x725   : > { %v5333_v63 = vpop.f32.mrf.mxu0 }
 0x728   : > { %v5582_v49 = vpop.f32.mrf.mxu3 }
 0x729   : > { %v12257_v22 = vadd.f32 %v5582_v49, %v5494_v55  ;;  %v5422_v12 = vpop.f32.mrf.mxu1  ;;  %v5511_v7 = vpop.f32.mrf.mxu2 }
 0x72d   : > { %5624 = vmatmul.bf16.gmra.mxu3 %v11212_v24  ;;  %v5900_v24 = vld [vmem:[%s12533_s5 + $0x80] sm:$0xff]  ;;  %v5335_v1 = vpop.f32.mrf.mxu0 }
 0x72e   : > { %5931 = vmatpush.msra.mxu0 %v5900_v24  ;;  %v5336_v41 = vadd.f32 %v5335_v1, %v12000_v14 }
 0x730   : > { %v5585_v9 = vpop.f32.mrf.mxu3 }
 0x731   : > { %v12267_v49 = vadd.f32 %v5585_v9, %v5497_v6  ;;  %v5424_v38 = vpop.f32.mrf.mxu1  ;;  %v5513_v6 = vpop.f32.mrf.mxu2 }
 0x735   : > { %v5338_v34 = vpop.f32.mrf.mxu0 }
 0x736   : > { %v5339_v14 = vadd.f32 %v5338_v34, %v12016_v21 }
 0x738   : > { %v5587_v48 = vpop.f32.mrf.mxu3 }
 0x739   : > { %v12270_v55 = vadd.f32 %v5587_v48, %v5499_v16  ;;  %v5418_v16 = vadd.f32 %v5417_v5, %v5329_v35  ;;  %v5427_v13 = vpop.f32.mrf.mxu1  ;;  %v5516_v4 = vpop.f32.mrf.mxu2  ;;  %v5334_v5 = vadd.f32 %v5333_v63, %v11994_v32  ;;  %v5644_v32 = vadd.f32 %v12298_v18, %v12181_v36 }
 0x73a   : > { %v5645_v36 = vadd.f32 %v12298_v18, %v12188_v27  ;;  %v5646_v27 = vadd.f32 %v12298_v18, %v12202_v39  ;;  %v5647_v39 = vadd.f32 %v12298_v18, %v12207_v10  ;;  %v5648_v10 = vadd.f32 %v12298_v18, %v12219_v30 }
 0x73b   : > { %v5423_v15 = vadd.f32 %v5422_v12, %v5334_v5  ;;  %v5425_v12 = vadd.f32 %v5424_v38, %v5336_v41  ;;  %v5649_v30 = vadd.f32 %v12298_v18, %v12224_v47  ;;  %v5650_v47 = vadd.f32 %v12298_v18, %v12235_v28 }
 0x73d   : > { %5629 = vmatmul.bf16.gmra.mxu3 %v11232_v51  ;;  %v5507_v51 = vadd.f32 %v5506_v2, %v5418_v16  ;;  %v5340_v45 = vpop.f32.mrf.mxu0  ;;  %v5512_v23 = vadd.f32 %v5511_v7, %v5423_v15 }
 0x740   : > { %v5590_v40 = vpop.f32.mrf.mxu3 }
 0x741   : > { %v12280_v53 = vadd.f32 %v5590_v40, %v5502_v42  ;;  %v5429_v2 = vpop.f32.mrf.mxu1  ;;  %v5518_v31 = vpop.f32.mrf.mxu2 }
 0x745   : > { %v5343_v42 = vpop.f32.mrf.mxu0 }
 0x748   : > { %v5592_v9 = vpop.f32.mrf.mxu3 }
 0x749   : > { %v12283_v3 = vadd.f32 %v5592_v9, %v5504_v37  ;;  %v5432_v8 = vpop.f32.mrf.mxu1  ;;  %v5521_v9 = vpop.f32.mrf.mxu2 }
 0x74d   : > { %5634 = vmatmul.bf16.gmra.mxu3 %v11264_v29  ;;  %v5345_v56 = vpop.f32.mrf.mxu0 }
 0x750   : > { %v5595_v48 = vpop.f32.mrf.mxu3 }
 0x751   : > { %v12287_v62 = vadd.f32 %v5595_v48, %v5507_v51  ;;  %v5514_v51 = vadd.f32 %v5513_v6, %v5425_v12  ;;  %v5434_v6 = vpop.f32.mrf.mxu1  ;;  %v5523_v52 = vpop.f32.mrf.mxu2 }
 0x758   : > { %v5597_v24 = vpop.f32.mrf.mxu3 }
 0x759   : > { %v12293_v29 = vadd.f32 %v5597_v24, %v5509_v61  ;;  %v5729_v61 = vpop.permute.xlu0 %5728  ;;  %v5428_v24 = vadd.f32 %v5427_v13, %v5339_v14  ;;  %v5344_v14 = vadd.f32 %v5343_v42, %v12038_v44 }
 0x75a   : > { %vm5773_vm1 = vcmp.eq.s32.totalorder %v5729_v61, 1 }
 0x75b   : > { %v5517_v41 = vadd.f32 %v5516_v4, %v5428_v24 }
 0x760   : > { %v5600_v40 = vpop.f32.mrf.mxu3 }
 0x761   : > { %v5601_v0 = vadd.f32 %v5600_v40, %v5512_v23 }
 0x763   : > { %v5660_v63 = vadd.f32 %v12298_v18, %v5601_v0 }
 0x765   : > { %v5788_v7 = vsel %vm5772_vm0, %v5644_v32, %v5660_v63  ;;  %v5804_v37 = vsel %vm5772_vm0, %v5660_v63, %v5644_v32  ;;  %v5341_v32 = vadd.f32 %v5340_v45, %v12022_v58  ;;  %v5732_v63 = vpop.permute.xlu1 %5731  ;;  %vm6106_vm0 = vcmask 261120  }
 0x766   : > { %v5820_v35 = vmax.f32 %v5788_v7, 0.0  ;;  %v5852_v16 = vmax.f32 %v5804_v37, 0.0  ;;  %vm5774_vm2 = vcmp.eq.s32.totalorder %v5732_v63, 1  ;;  %v5348_v7 = vpop.f32.mrf.mxu0 }
 0x767   : > { %v5430_v37 = vadd.f32 %v5429_v2, %v5341_v32 }
 0x768   : > { %v5836_v48 = vmin.f32 %v5820_v35, 1.0  ;;  %v5868_v50 = vmin.f32 %v5852_v16, 1.0  ;;  %v5602_v43 = vpop.f32.mrf.mxu3 }
 0x769   : > { %v5603_v1 = vadd.f32 %v5602_v43, %v5514_v51 }
 0x76a   : > { %5932 = vmatmul.f32.vlgmr.msra.gmra.mxu0 %v5868_v50  ;;  %5997 = vmatmul.f32.vlgmr.msra.gmra.mxu1 %v5836_v48  ;;  %v5519_v48 = vadd.f32 %v5518_v31, %v5430_v37  ;;  %v5437_v50 = vpop.f32.mrf.mxu1 }
 0x76b   : > { %v5661_v38 = vadd.f32 %v12298_v18, %v5603_v1 }
 0x76d   : > { %v5805_v5 = vsel %vm5773_vm1, %v5661_v38, %v5645_v36  ;;  %v5789_v15 = vsel %vm5773_vm1, %v5645_v36, %v5661_v38  ;;  %v5526_v36 = vpop.f32.mrf.mxu2  ;;  %v5735_v61 = vpop.permute.xlu1 %5734  ;;  %v5433_v38 = vadd.f32 %v5432_v8, %v5344_v14 }
 0x76e   : > { %v5853_v23 = vmax.f32 %v5805_v5, 0.0  ;;  %v5821_v40 = vmax.f32 %v5789_v15, 0.0  ;;  %vm5775_vm3 = vcmp.eq.s32.totalorder %v5735_v61, 1  ;;  %v5350_v5 = vpop.f32.mrf.mxu0 }
 0x770   : > { %v5605_v21 = vpop.f32.mrf.mxu3  ;;  %v5869_v34 = vmin.f32 %v5853_v23, 1.0  ;;  %v5837_v0 = vmin.f32 %v5821_v40, 1.0  ;;  %v5522_v40 = vadd.f32 %v5521_v9, %v5433_v38 }
 0x771   : > { %v5606_v12 = vadd.f32 %v5605_v21, %v5517_v41  ;;  %v5346_v21 = vadd.f32 %v5345_v56, %v12044_v59 }
 0x772   : > { %5935 = vmatmul.f32.gmra.mxu0 %v5869_v34  ;;  %6000 = vmatmul.f32.gmra.mxu1 %v5837_v0  ;;  %v5738_v34 = vpop.permute.xlu2 %5737  ;;  %v5439_v32 = vpop.f32.mrf.mxu1 }
 0x773   : > { %v5662_v13 = vadd.f32 %v12298_v18, %v5606_v12  ;;  %vm5776_vm4 = vcmp.eq.s32.totalorder %v5738_v34, 1  ;;  %v5435_v12 = vadd.f32 %v5434_v6, %v5346_v21 }
 0x775   : > { %v5806_v35 = vsel %vm5774_vm2, %v5662_v13, %v5646_v27  ;;  %v5790_v4 = vsel %vm5774_vm2, %v5646_v27, %v5662_v13  ;;  %v5528_v63 = vpop.f32.mrf.mxu2 }
 0x776   : > { %v5854_v16 = vmax.f32 %v5806_v35, 0.0  ;;  %v5822_v51 = vmax.f32 %v5790_v4, 0.0  ;;  %v5524_v35 = vadd.f32 %v5523_v52, %v5435_v12  ;;  %v5353_v4 = vpop.f32.mrf.mxu0 }
 0x778   : > { %v5607_v43 = vpop.f32.mrf.mxu3  ;;  %v5870_v58 = vmin.f32 %v5854_v16, 1.0  ;;  %v5838_v45 = vmin.f32 %v5822_v51, 1.0  ;;  %v5349_v51 = vadd.f32 %v5348_v7, %v12060_v11 }
 0x779   : > { %v5608_v1 = vadd.f32 %v5607_v43, %v5519_v48 }
 0x77a   : > { %5938 = vmatmul.f32.gmra.mxu0 %v5870_v58  ;;  %6003 = vmatmul.f32.gmra.mxu1 %v5838_v45  ;;  %v5741_v43 = vpop.permute.xlu2 %5740  ;;  %v5442_v58 = vpop.f32.mrf.mxu1  ;;  %v5438_v45 = vadd.f32 %v5437_v50, %v5349_v51 }
 0x77b   : > { %v5663_v2 = vadd.f32 %v12298_v18, %v5608_v1  ;;  %vm5777_vm5 = vcmp.eq.s32.totalorder %v5741_v43, 1 }
 0x77d   : > { %v5807_v24 = vsel %vm5775_vm3, %v5663_v2, %v5647_v39  ;;  %v5791_v31 = vsel %vm5775_vm3, %v5647_v39, %v5663_v2  ;;  %v5531_v1 = vpop.f32.mrf.mxu2  ;;  %v5527_v2 = vadd.f32 %v5526_v36, %v5438_v45  ;;  %vm6644_vm3 = vcmask 7168  }
 0x77e   : > { %v5855_v15 = vmax.f32 %v5807_v24, 0.0  ;;  %v5823_v23 = vmax.f32 %v5791_v31, 0.0  ;;  %v5351_v24 = vadd.f32 %v5350_v5, %v12068_v57 }
 0x780   : > { %v5610_v41 = vpop.f32.mrf.mxu3  ;;  %v5871_v44 = vmin.f32 %v5855_v15, 1.0  ;;  %v5839_v42 = vmin.f32 %v5823_v23, 1.0  ;;  %v5355_v15 = vpop.f32.mrf.mxu0  ;;  %v5440_v36 = vadd.f32 %v5439_v32, %v5351_v24 }
 0x781   : > { %v5611_v0 = vadd.f32 %v5610_v41, %v5522_v40  ;;  %v5744_v23 = vpop.permute.xlu0 %5743  ;;  %v6098_v40 = vld [vmem:[%s12535_s7] sm:$0xff] }
 0x782   : > { %5941 = vmatmul.f32.gmra.mxu0 %v5871_v44  ;;  %6006 = vmatmul.f32.gmra.mxu1 %v5839_v42  ;;  %vm5778_vm6 = vcmp.eq.s32.totalorder %v5744_v23, 1  ;;  %v5444_v57 = vpop.f32.mrf.mxu1  ;;  %v5529_v21 = vadd.f32 %v5528_v63, %v5440_v36  ;;  %v5750_v45 = vpop.permute.xlu2 %5749 }
 0x783   : > { %v5664_v8 = vadd.f32 %v12298_v18, %v5611_v0  ;;  %6170 = vmatpush.msra.mxu2 %v6098_v40  ;;  %vm5780_vm8 = vcmp.eq.s32.totalorder %v5750_v45, 1 }
 0x785   : > { %v5808_v27 = vsel %vm5776_vm4, %v5664_v8, %v5648_v10  ;;  %v5792_v9 = vsel %vm5776_vm4, %v5648_v10, %v5664_v8  ;;  %v5533_v34 = vpop.f32.mrf.mxu2  ;;  %v5354_v8 = vadd.f32 %v5353_v4, %v12085_v25 }
 0x786   : > { %v5856_v13 = vmax.f32 %v5808_v27, 0.0  ;;  %v5824_v37 = vmax.f32 %v5792_v9, 0.0  ;;  %v5651_v27 = vadd.f32 %v12298_v18, %v12243_v33  ;;  %v5747_v9 = vpop.permute.xlu1 %5746  ;;  %v5652_v33 = vadd.f32 %v12298_v18, %v12254_v19 }
 0x787   : > { %vm5779_vm7 = vcmp.eq.s32.totalorder %v5747_v9, 1  ;;  %v5653_v19 = vadd.f32 %v12298_v18, %v12257_v22  ;;  %v5654_v22 = vadd.f32 %v12298_v18, %v12267_v49  ;;  %v5655_v49 = vadd.f32 %v12298_v18, %v12270_v55 }
 0x788   : > { %v5612_v59 = vpop.f32.mrf.mxu3  ;;  %v5872_v56 = vmin.f32 %v5856_v13, 1.0  ;;  %v5840_v16 = vmin.f32 %v5824_v37, 1.0  ;;  %v5358_v13 = vpop.f32.mrf.mxu0  ;;  %v5443_v37 = vadd.f32 %v5442_v58, %v5354_v8  ;;  %v5656_v55 = vadd.f32 %v12298_v18, %v12280_v53 }
 0x789   : > { %v5613_v48 = vadd.f32 %v5612_v59, %v5524_v35  ;;  %v5359_v24 = vadd.f32 %v5358_v13, %v12115_v60 }
 0x78a   : > { %5944 = vmatmul.f32.gmra.mxu0 %v5872_v56  ;;  %6009 = vmatmul.f32.gmra.mxu1 %v5840_v16  ;;  %v5532_v16 = vadd.f32 %v5531_v1, %v5443_v37  ;;  %v5447_v51 = vpop.f32.mrf.mxu1 }
 0x78b   : > { %v5665_v6 = vadd.f32 %v12298_v18, %v5613_v48  ;;  %v5448_v40 = vadd.f32 %v5447_v51, %v5359_v24 }
 0x78d   : > { %v5809_v14 = vsel %vm5777_vm5, %v5665_v6, %v5649_v30  ;;  %v5793_v52 = vsel %vm5777_vm5, %v5649_v30, %v5665_v6  ;;  %v5356_v30 = vadd.f32 %v5355_v15, %v12100_v54  ;;  %v5536_v6 = vpop.f32.mrf.mxu2 }
 0x78e   : > { %v5857_v39 = vmax.f32 %v5809_v14, 0.0  ;;  %v5825_v61 = vmax.f32 %v5793_v52, 0.0 }
 0x78f   : > { %v5445_v14 = vadd.f32 %v5444_v57, %v5356_v30 }
 0x790   : > { %v5615_v38 = vpop.f32.mrf.mxu3  ;;  %v5873_v11 = vmin.f32 %v5857_v39, 1.0  ;;  %v5841_v7 = vmin.f32 %v5825_v61, 1.0  ;;  %v5360_v39 = vpop.f32.mrf.mxu0 }
 0x791   : > { %v5616_v31 = vadd.f32 %v5615_v38, %v5527_v2  ;;  %v5534_v38 = vadd.f32 %v5533_v34, %v5445_v14 }
 0x792   : > { %5947 = vmatmul.f32.gmra.mxu0 %v5873_v11  ;;  %6012 = vmatmul.f32.gmra.mxu1 %v5841_v7  ;;  %v5449_v15 = vpop.f32.mrf.mxu1 }
 0x793   : > { %v5666_v50 = vadd.f32 %v12298_v18, %v5616_v31 }
 0x795   : > { %v5810_v41 = vsel %vm5778_vm6, %v5666_v50, %v5650_v47  ;;  %v5794_v44 = vsel %vm5778_vm6, %v5650_v47, %v5666_v50  ;;  %v5753_v47 = vpop.permute.xlu0 %5752  ;;  %v5538_v50 = vpop.f32.mrf.mxu2 }
 0x796   : > { %v5858_v5 = vmax.f32 %v5810_v41, 0.0  ;;  %v5826_v42 = vmax.f32 %v5794_v44, 0.0  ;;  %vm5781_vm9 = vcmp.eq.s32.totalorder %v5753_v47, 1 }
 0x798   : > { %v5617_v0 = vpop.f32.mrf.mxu3  ;;  %v5874_v10 = vmin.f32 %v5858_v5, 1.0  ;;  %v5842_v28 = vmin.f32 %v5826_v42, 1.0  ;;  %v5537_v5 = vadd.f32 %v5536_v6, %v5448_v40  ;;  %v5363_v42 = vpop.f32.mrf.mxu0 }
 0x799   : > { %v5618_v12 = vadd.f32 %v5617_v0, %v5529_v21  ;;  %v5361_v0 = vadd.f32 %v5360_v39, %v12120_v26 }
 0x79a   : > { %5950 = vmatmul.f32.gmra.mxu0 %v5874_v10  ;;  %6015 = vmatmul.f32.gmra.mxu1 %v5842_v28  ;;  %v5756_v28 = vpop.permute.xlu1 %5755 }
 0x79b   : > { %v5667_v32 = vadd.f32 %v12298_v18, %v5618_v12  ;;  %v5452_v12 = vpop.f32.mrf.mxu1  ;;  %vm5782_vm10 = vcmp.eq.s32.totalorder %v5756_v28, 1 }
 0x79d   : > { %v5811_v35 = vsel %vm5779_vm7, %v5667_v32, %v5651_v27  ;;  %v5795_v63 = vsel %vm5779_vm7, %v5651_v27, %v5667_v32  ;;  %v5450_v27 = vadd.f32 %v5449_v15, %v5361_v0  ;;  %v5541_v13 = vpop.f32.mrf.mxu2 }
 0x79e   : > { %v5859_v59 = vmax.f32 %v5811_v35, 0.0  ;;  %v5827_v56 = vmax.f32 %v5795_v63, 0.0 }
 0x79f   : > { %v5539_v63 = vadd.f32 %v5538_v50, %v5450_v27 }
 0x7a0   : > { %v5620_v48 = vpop.f32.mrf.mxu3  ;;  %v5875_v25 = vmin.f32 %v5859_v59, 1.0  ;;  %v5843_v4 = vmin.f32 %v5827_v56, 1.0 }
 0x7a1   : > { %v5621_v43 = vadd.f32 %v5620_v48, %v5532_v16  ;;  %v5364_v16 = vadd.f32 %v5363_v42, %v12136_v46  ;;  %v5365_v48 = vpop.f32.mrf.mxu0 }
 0x7a2   : > { %5953 = vmatmul.f32.gmra.mxu0 %v5875_v25  ;;  %6018 = vmatmul.f32.gmra.mxu1 %v5843_v4  ;;  %v5759_v25 = vpop.permute.xlu2 %5758 }
 0x7a3   : > { %v5668_v58 = vadd.f32 %v12298_v18, %v5621_v43  ;;  %vm5783_vm11 = vcmp.eq.s32.totalorder %v5759_v25, 1  ;;  %v5453_v30 = vadd.f32 %v5452_v12, %v5364_v16  ;;  %v13045_v12 = vld [vmem:[#allocation8_spill] sm:$0xff] }
 0x7a5   : > { %v5812_v52 = vsel %vm5780_vm8, %v5668_v58, %v5652_v33  ;;  %v5796_v1 = vsel %vm5780_vm8, %v5652_v33, %v5668_v58  ;;  %v5454_v33 = vpop.f32.mrf.mxu1  ;;  %v5542_v14 = vadd.f32 %v5541_v13, %v5453_v30 }
 0x7a6   : > { %v5860_v61 = vmax.f32 %v5812_v52, 0.0  ;;  %v5828_v2 = vmax.f32 %v5796_v1, 0.0  ;;  %v5543_v52 = vpop.f32.mrf.mxu2 }
 0x7a8   : > { %v5622_v11 = vpop.f32.mrf.mxu3  ;;  %v5876_v54 = vmin.f32 %v5860_v61, 1.0  ;;  %v5844_v7 = vmin.f32 %v5828_v2, 1.0  ;;  %v5366_v61 = vadd.f32 %v5365_v48, %v12143_v17 }
 0x7a9   : > { %v5623_v31 = vadd.f32 %v5622_v11, %v5534_v38  ;;  %v5762_v38 = vpop.permute.xlu0 %5761 }
 0x7aa   : > { %5956 = vmatmul.f32.gmra.mxu0 %v5876_v54  ;;  %6021 = vmatmul.f32.gmra.mxu1 %v5844_v7  ;;  %v5368_v54 = vpop.f32.mrf.mxu0  ;;  %vm5784_vm12 = vcmp.eq.s32.totalorder %v5762_v38, 1  ;;  %v5455_v7 = vadd.f32 %v5454_v33, %v5366_v61 }
 0x7ab   : > { %v5669_v23 = vadd.f32 %v12298_v18, %v5623_v31 }
 0x7ac   : > { %v5544_v47 = vadd.f32 %v5543_v52, %v5455_v7 }
 0x7ad   : > { %v5813_v36 = vsel %vm5781_vm9, %v5669_v23, %v5653_v19  ;;  %v5797_v41 = vsel %vm5781_vm9, %v5653_v19, %v5669_v23  ;;  %v5457_v23 = vpop.f32.mrf.mxu1 }
 0x7ae   : > { %v5861_v44 = vmax.f32 %v5813_v36, 0.0  ;;  %v5829_v57 = vmax.f32 %v5797_v41, 0.0  ;;  %v5369_v36 = vadd.f32 %v5368_v54, %v12160_v20  ;;  %v5765_v41 = vpop.permute.xlu1 %5764  ;;  %v5546_v53 = vpop.f32.mrf.mxu2 }
 0x7af   : > { %vm5785_vm13 = vcmp.eq.s32.totalorder %v5765_v41, 1 }
 0x7b0   : > { %v5625_v60 = vpop.f32.mrf.mxu3  ;;  %v5877_v21 = vmin.f32 %v5861_v44, 1.0  ;;  %v5845_v34 = vmin.f32 %v5829_v57, 1.0  ;;  %v5657_v57 = vadd.f32 %v12298_v18, %v12283_v3  ;;  %v5458_v42 = vadd.f32 %v5457_v23, %v5369_v36 }
 0x7b1   : > { %v5626_v10 = vadd.f32 %v5625_v60, %v5537_v5  ;;  %v5658_v3 = vadd.f32 %v12298_v18, %v12287_v62  ;;  %v5659_v62 = vadd.f32 %v12298_v18, %v12293_v29 }
 0x7b2   : > { %5959 = vmatmul.f32.gmra.mxu0 %v5877_v21  ;;  %6024 = vmatmul.f32.gmra.mxu1 %v5845_v34  ;;  %v5370_v34 = vpop.f32.mrf.mxu0 }
 0x7b3   : > { %v5670_v8 = vadd.f32 %v12298_v18, %v5626_v10  ;;  %v5371_v27 = vadd.f32 %v5370_v34, %v13045_v12 }
 0x7b5   : > { %v5814_v9 = vsel %vm5782_vm10, %v5670_v8, %v5654_v22  ;;  %v5798_v32 = vsel %vm5782_vm10, %v5654_v22, %v5670_v8  ;;  %v5547_v22 = vadd.f32 %v5546_v53, %v5458_v42  ;;  %v5459_v13 = vpop.f32.mrf.mxu1 }
 0x7b6   : > { %v5862_v37 = vmax.f32 %v5814_v9, 0.0  ;;  %v5830_v35 = vmax.f32 %v5798_v32, 0.0  ;;  %v5768_v9 = vpop.permute.xlu2 %5767 }
 0x7b7   : > { %vm5786_vm14 = vcmp.eq.s32.totalorder %v5768_v9, 1 }
 0x7b8   : > { %v5627_v59 = vpop.f32.mrf.mxu3  ;;  %v5878_v26 = vmin.f32 %v5862_v37, 1.0  ;;  %v5846_v56 = vmin.f32 %v5830_v35, 1.0  ;;  %v5548_v35 = vpop.f32.mrf.mxu2 }
 0x7b9   : > { %v5628_v51 = vadd.f32 %v5627_v59, %v5539_v63  ;;  %v5460_v63 = vadd.f32 %v5459_v13, %v5371_v27 }
 0x7ba   : > { %5962 = vmatmul.f32.gmra.mxu0 %v5878_v26  ;;  %6027 = vmatmul.f32.gmra.mxu1 %v5846_v56 }
 0x7bb   : > { %v5671_v4 = vadd.f32 %v12298_v18, %v5628_v51  ;;  %v5549_v51 = vadd.f32 %v5548_v35, %v5460_v63 }
 0x7bd   : > { %v5815_v43 = vsel %vm5783_vm11, %v5671_v4, %v5655_v49  ;;  %v5799_v6 = vsel %vm5783_vm11, %v5655_v49, %v5671_v4  ;;  %v5771_v4 = vpop.permute.xlu0 %5770 }
 0x7be   : > { %v5863_v45 = vmax.f32 %v5815_v43, 0.0  ;;  %v5831_v58 = vmax.f32 %v5799_v6, 0.0  ;;  %vm5787_vm15 = vcmp.eq.s32.totalorder %v5771_v4, 1 }
 0x7c0   : > { %v5630_v46 = vpop.f32.mrf.mxu3  ;;  %v5879_v1 = vmin.f32 %v5863_v45, 1.0  ;;  %v5847_v39 = vmin.f32 %v5831_v58, 1.0 }
 0x7c1   : > { %v5631_v2 = vadd.f32 %v5630_v46, %v5542_v14  ;;  %v12369_v46 = vld [vmem:[%s12534_s6] ss:$0 sm:$0xff] }
 0x7c2   : > { %5965 = vmatmul.f32.gmra.mxu0 %v5879_v1  ;;  %6030 = vmatmul.f32.gmra.mxu1 %v5847_v39 }
 0x7c3   : > { %v5672_v11 = vadd.f32 %v12298_v18, %v5631_v2 }
 0x7c5   : > { %v5816_v24 = vsel %vm5784_vm12, %v5672_v11, %v5656_v55  ;;  %v5800_v31 = vsel %vm5784_vm12, %v5656_v55, %v5672_v11 }
 0x7c6   : > { %v5864_v15 = vmax.f32 %v5816_v24, 0.0  ;;  %v5832_v19 = vmax.f32 %v5800_v31, 0.0 }
 0x7c8   : > { %v5632_v50 = vpop.f32.mrf.mxu3  ;;  %v5880_v17 = vmin.f32 %v5864_v15, 1.0  ;;  %v5848_v40 = vmin.f32 %v5832_v19, 1.0 }
 0x7c9   : > { %v5633_v44 = vadd.f32 %v5632_v50, %v5544_v47 }
 0x7ca   : > { %5968 = vmatmul.f32.gmra.mxu0 %v5880_v17  ;;  %6033 = vmatmul.f32.gmra.mxu1 %v5848_v40 }
 0x7cb   : > { %v5673_v5 = vadd.f32 %v12298_v18, %v5633_v44 }
 0x7cd   : > { %v5817_v60 = vsel %vm5785_vm13, %v5673_v5, %v5657_v57  ;;  %v5801_v21 = vsel %vm5785_vm13, %v5657_v57, %v5673_v5 }
 0x7ce   : > { %v5865_v0 = vmax.f32 %v5817_v60, 0.0  ;;  %v5833_v10 = vmax.f32 %v5801_v21, 0.0 }
 0x7d0   : > { %v5635_v28 = vpop.f32.mrf.mxu3  ;;  %v5881_v20 = vmin.f32 %v5865_v0, 1.0  ;;  %v5849_v8 = vmin.f32 %v5833_v10, 1.0 }
 0x7d1   : > { %v5636_v32 = vadd.f32 %v5635_v28, %v5547_v22 }
 0x7d2   : > { %5971 = vmatmul.f32.gmra.mxu0 %v5881_v20  ;;  %6036 = vmatmul.f32.gmra.mxu1 %v5849_v8 }
 0x7d3   : > { %v5674_v37 = vadd.f32 %v12298_v18, %v5636_v32 }
 0x7d5   : > { %v5818_v59 = vsel %vm5786_vm14, %v5674_v37, %v5658_v3  ;;  %v5802_v26 = vsel %vm5786_vm14, %v5658_v3, %v5674_v37 }
 0x7d6   : > { %v5866_v56 = vmax.f32 %v5818_v59, 0.0  ;;  %v5834_v16 = vmax.f32 %v5802_v26, 0.0 }
 0x7d8   : > { %v5637_v48 = vpop.f32.mrf.mxu3  ;;  %v5882_v49 = vmin.f32 %v5866_v56, 1.0  ;;  %v5850_v25 = vmin.f32 %v5834_v16, 1.0 }
 0x7d9   : > { %v5638_v30 = vadd.f32 %v5637_v48, %v5549_v51 }
 0x7da   : > { %5974 = vmatmul.f32.gmra.mxu0 %v5882_v49  ;;  %6039 = vmatmul.f32.gmra.mxu1 %v5850_v25 }
 0x7db   : > { %v5675_v43 = vadd.f32 %v12298_v18, %v5638_v30 }
 0x7dd   : > { %v5819_v6 = vsel %vm5787_vm15, %v5675_v43, %v5659_v62  ;;  %v5803_v33 = vsel %vm5787_vm15, %v5659_v62, %v5675_v43 }
 0x7de   : > { %v5867_v45 = vmax.f32 %v5819_v6, 0.0  ;;  %v5835_v58 = vmax.f32 %v5803_v33, 0.0 }
 0x7e0   : > { %v5883_v14 = vmin.f32 %v5867_v45, 1.0  ;;  %v5851_v52 = vmin.f32 %v5835_v58, 1.0 }
 0x7e2   : > { %5977 = vmatmul.f32.gmra.mxu0 %v5883_v14  ;;  %6042 = vmatmul.f32.gmra.mxu1 %v5851_v52 }
 0x7e7   : > { %v5933_v1 = vpop.f32.mrf.mxu0  ;;  %v5998_v39 = vpop.f32.mrf.mxu1 }
 0x7e8   : > { %v5999_v61 = vadd.f32 %v5998_v39, %v5933_v1 }
 0x7ea   : > { %v6050_v29 = vadd.f32 %v12369_v46, %v5999_v61 }
 0x7ec   : > { %v6066_v18 = vmax.f32 %v6050_v29, 0.0 }
 0x7ee   : > { %v6082_v2 = vmin.f32 %v6066_v18, 1.0 }
 0x7ef   : > { %v5936_v55 = vpop.f32.mrf.mxu0  ;;  %v6001_v38 = vpop.f32.mrf.mxu1 }
 0x7f0   : > { %v6002_v11 = vadd.f32 %v6001_v38, %v5936_v55  ;;  %8283 = vmatmul.msk.f32.vlgmr.msra.gmra.mxu2 %vm6106_vm0, %v6082_v2 }
 0x7f2   : > { %v6051_v54 = vadd.f32 %v12369_v46, %v6002_v11 }
 0x7f4   : > { %v6067_v7 = vmax.f32 %v6051_v54, 0.0 }
 0x7f6   : > { %v6083_v24 = vmin.f32 %v6067_v7, 1.0 }
 0x7f7   : > { %v5939_v31 = vpop.f32.mrf.mxu0  ;;  %v6004_v15 = vpop.f32.mrf.mxu1 }
 0x7f8   : > { %v6005_v19 = vadd.f32 %v6004_v15, %v5939_v31  ;;  %8284 = vmatmul.msk.f32.gmra.mxu2 %vm6106_vm0, %v6083_v24 }
 0x7fa   : > { %v6052_v47 = vadd.f32 %v12369_v46, %v6005_v19 }
 0x7fc   : > { %v6068_v23 = vmax.f32 %v6052_v47, 0.0 }
 0x7fe   : > { %v6084_v50 = vmin.f32 %v6068_v23, 1.0 }
 0x7ff   : > { %v5942_v17 = vpop.f32.mrf.mxu0  ;;  %v6007_v40 = vpop.f32.mrf.mxu1 }
 0x800   : > { %v6008_v36 = vadd.f32 %v6007_v40, %v5942_v17  ;;  %8285 = vmatmul.msk.f32.gmra.mxu2 %vm6106_vm0, %v6084_v50 }
 0x802   : > { %v6053_v41 = vadd.f32 %v12369_v46, %v6008_v36 }
 0x804   : > { %v6069_v44 = vmax.f32 %v6053_v41, 0.0 }
 0x806   : > { %v6085_v53 = vmin.f32 %v6069_v44, 1.0 }
 0x807   : > { %v5945_v57 = vpop.f32.mrf.mxu0  ;;  %v6010_v5 = vpop.f32.mrf.mxu1 }
 0x808   : > { %v6011_v42 = vadd.f32 %v6010_v5, %v5945_v57  ;;  %8286 = vmatmul.msk.f32.gmra.mxu2 %vm6106_vm0, %v6085_v53 }
 0x80a   : > { %v6054_v60 = vadd.f32 %v12369_v46, %v6011_v42 }
 0x80c   : > { %v6070_v21 = vmax.f32 %v6054_v60, 0.0 }
 0x80e   : > { %v6086_v34 = vmin.f32 %v6070_v21, 1.0 }
 0x80f   : > { %v5948_v0 = vpop.f32.mrf.mxu0  ;;  %v6013_v10 = vpop.f32.mrf.mxu1 }
 0x810   : > { %v6014_v22 = vadd.f32 %v6013_v10, %v5948_v0  ;;  %8287 = vmatmul.msk.f32.gmra.mxu2 %vm6106_vm0, %v6086_v34 }
 0x812   : > { %v6055_v28 = vadd.f32 %v12369_v46, %v6014_v22 }
 0x814   : > { %v6071_v20 = vmax.f32 %v6055_v28, 0.0  ;;  %v12406_v28 = vld [vmem:[%s12536_s8] ss:$0 sm:$0xff] }
 0x816   : > { %v6087_v8 = vmin.f32 %v6071_v20, 1.0 }
 0x817   : > { %v5951_v12 = vpop.f32.mrf.mxu0  ;;  %v6016_v27 = vpop.f32.mrf.mxu1 }
 0x818   : > { %v6017_v9 = vadd.f32 %v6016_v27, %v5951_v12  ;;  %8288 = vmatmul.msk.f32.gmra.mxu2 %vm6106_vm0, %v6087_v8  ;;  %v12412_v27 = vld [vmem:[%s12537_s9] ss:$0 sm:$0xff] }
 0x81a   : > { %v6056_v32 = vadd.f32 %v12369_v46, %v6017_v9 }
 0x81c   : > { %v6072_v13 = vmax.f32 %v6056_v32, 0.0 }
 0x81e   : > { %v6088_v3 = vmin.f32 %v6072_v13, 1.0 }
 0x81f   : > { %v5954_v37 = vpop.f32.mrf.mxu0  ;;  %v6019_v35 = vpop.f32.mrf.mxu1 }
 0x820   : > { %v6020_v63 = vadd.f32 %v6019_v35, %v5954_v37  ;;  %8289 = vmatmul.msk.f32.gmra.mxu2 %vm6106_vm0, %v6088_v3 }
 0x822   : > { %v6057_v59 = vadd.f32 %v12369_v46, %v6020_v63 }
 0x824   : > { %v6073_v26 = vmax.f32 %v6057_v59, 0.0 }
 0x826   : > { %v6089_v56 = vmin.f32 %v6073_v26, 1.0 }
 0x827   : > { %v5957_v16 = vpop.f32.mrf.mxu0  ;;  %v6022_v51 = vpop.f32.mrf.mxu1 }
 0x828   : > { %v6023_v48 = vadd.f32 %v6022_v51, %v5957_v16  ;;  %8290 = vmatmul.msk.f32.gmra.mxu2 %vm6106_vm0, %v6089_v56 }
 0x82a   : > { %v6058_v49 = vadd.f32 %v12369_v46, %v6023_v48 }
 0x82c   : > { %v6074_v25 = vmax.f32 %v6058_v49, 0.0 }
 0x82e   : > { %v6090_v4 = vmin.f32 %v6074_v25, 1.0 }
 0x82f   : > { %v5960_v30 = vpop.f32.mrf.mxu0  ;;  %v6025_v62 = vpop.f32.mrf.mxu1 }
 0x830   : > { %v6026_v43 = vadd.f32 %v6025_v62, %v5960_v30  ;;  %8291 = vmatmul.msk.f32.gmra.mxu2 %vm6106_vm0, %v6090_v4 }
 0x832   : > { %v6059_v6 = vadd.f32 %v12369_v46, %v6026_v43 }
 0x834   : > { %v6075_v33 = vmax.f32 %v6059_v6, 0.0 }
 0x836   : > { %v6091_v45 = vmin.f32 %v6075_v33, 1.0 }
 0x837   : > { %v5963_v58 = vpop.f32.mrf.mxu0  ;;  %v6028_v14 = vpop.f32.mrf.mxu1 }
 0x838   : > { %v6029_v52 = vadd.f32 %v6028_v14, %v5963_v58  ;;  %8292 = vmatmul.msk.f32.gmra.mxu2 %vm6106_vm0, %v6091_v45 }
 0x83a   : > { %v6060_v1 = vadd.f32 %v12369_v46, %v6029_v52 }
 0x83c   : > { %v6076_v39 = vmax.f32 %v6060_v1, 0.0 }
 0x83e   : > { %v6092_v61 = vmin.f32 %v6076_v39, 1.0 }
 0x83f   : > { %v5966_v29 = vpop.f32.mrf.mxu0  ;;  %v6031_v18 = vpop.f32.mrf.mxu1 }
 0x840   : > { %v6032_v2 = vadd.f32 %v6031_v18, %v5966_v29  ;;  %8293 = vmatmul.msk.f32.gmra.mxu2 %vm6106_vm0, %v6092_v61 }
 0x842   : > { %v6061_v55 = vadd.f32 %v12369_v46, %v6032_v2 }
 0x844   : > { %v6077_v38 = vmax.f32 %v6061_v55, 0.0 }
 0x846   : > { %v6093_v11 = vmin.f32 %v6077_v38, 1.0 }
 0x847   : > { %v5969_v54 = vpop.f32.mrf.mxu0  ;;  %v6034_v7 = vpop.f32.mrf.mxu1 }
 0x848   : > { %v6035_v24 = vadd.f32 %v6034_v7, %v5969_v54  ;;  %8294 = vmatmul.msk.f32.gmra.mxu2 %vm6106_vm0, %v6093_v11 }
 0x84a   : > { %v6062_v31 = vadd.f32 %v12369_v46, %v6035_v24 }
 0x84c   : > { %v6078_v15 = vmax.f32 %v6062_v31, 0.0 }
 0x84e   : > { %v6094_v19 = vmin.f32 %v6078_v15, 1.0 }
 0x84f   : > { %v5972_v47 = vpop.f32.mrf.mxu0  ;;  %v6037_v23 = vpop.f32.mrf.mxu1 }
 0x850   : > { %v6038_v50 = vadd.f32 %v6037_v23, %v5972_v47  ;;  %8295 = vmatmul.msk.f32.gmra.mxu2 %vm6106_vm0, %v6094_v19 }
 0x852   : > { %v6063_v17 = vadd.f32 %v12369_v46, %v6038_v50 }
 0x854   : > { %v6079_v40 = vmax.f32 %v6063_v17, 0.0 }
 0x856   : > { %v6095_v36 = vmin.f32 %v6079_v40, 1.0 }
 0x857   : > { %v5975_v41 = vpop.f32.mrf.mxu0  ;;  %v6040_v44 = vpop.f32.mrf.mxu1 }
 0x858   : > { %v6041_v53 = vadd.f32 %v6040_v44, %v5975_v41  ;;  %8296 = vmatmul.msk.f32.gmra.mxu2 %vm6106_vm0, %v6095_v36 }
 0x85a   : > { %v6064_v57 = vadd.f32 %v12369_v46, %v6041_v53 }
 0x85c   : > { %v6080_v5 = vmax.f32 %v6064_v57, 0.0 }
 0x85e   : > { %v6096_v42 = vmin.f32 %v6080_v5, 1.0 }
 0x85f   : > { %v5978_v60 = vpop.f32.mrf.mxu0  ;;  %v6043_v21 = vpop.f32.mrf.mxu1 }
 0x860   : > { %v6044_v34 = vadd.f32 %v6043_v21, %v5978_v60  ;;  %8297 = vmatmul.msk.f32.gmra.mxu2 %vm6106_vm0, %v6096_v42 }
 0x862   : > { %v6065_v0 = vadd.f32 %v12369_v46, %v6044_v34 }
 0x864   : > { %v6081_v10 = vmax.f32 %v6065_v0, 0.0 }
 0x866   : > { %v6097_v22 = vmin.f32 %v6081_v10, 1.0 }
 0x868   : > { %8298 = vmatmul.msk.f32.gmra.mxu2 %vm6106_vm0, %v6097_v22 }
 0x873   : > { %v6172_v20 = vpop.f32.mrf.mxu2 }
 0x874   : > { %v6173_v8 = vadd.f32 %v12406_v28, %v6172_v20 }
 0x876   : > { %v6220_v12 = vmax.f32 %v6173_v8, 0.0 }
 0x878   : > { %v6236_v9 = vmin.f32 %v6220_v12, 1.0 }
 0x87a   : > { %v6256_v46 = vmul.f32 %v12412_v27, %v6236_v9 }
 0x87b   : > { %v6175_v32 = vpop.f32.mrf.mxu2 }
 0x87c   : > { %v6176_v13 = vadd.f32 %v12406_v28, %v6175_v32  ;;  %v6272_v3 = vsel %vm6106_vm0, %v6256_v46, 0.0 }
 0x87d   : > { %6273 = vadd.xlane.f32.xlu1 %v6272_v3 }
 0x87e   : > { %v6221_v37 = vmax.f32 %v6176_v13, 0.0 }
 0x880   : > { %v6237_v35 = vmin.f32 %v6221_v37, 1.0 }
 0x882   : > { %v6257_v63 = vmul.f32 %v12412_v27, %v6237_v35 }
 0x883   : > { %v6178_v59 = vpop.f32.mrf.mxu2 }
 0x884   : > { %v6179_v26 = vadd.f32 %v12406_v28, %v6178_v59  ;;  %v6275_v56 = vsel %vm6106_vm0, %v6257_v63, 0.0 }
 0x885   : > { %6276 = vadd.xlane.f32.xlu2 %v6275_v56 }
 0x886   : > { %v6222_v16 = vmax.f32 %v6179_v26, 0.0 }
 0x888   : > { %v6238_v51 = vmin.f32 %v6222_v16, 1.0 }
 0x88a   : > { %v6258_v48 = vmul.f32 %v12412_v27, %v6238_v51 }
 0x88b   : > { %v6181_v49 = vpop.f32.mrf.mxu2 }
 0x88c   : > { %v6182_v25 = vadd.f32 %v12406_v28, %v6181_v49  ;;  %v6278_v4 = vsel %vm6106_vm0, %v6258_v48, 0.0 }
 0x88d   : > { %6279 = vadd.xlane.f32.xlu0 %v6278_v4 }
 0x88e   : > { %v6223_v30 = vmax.f32 %v6182_v25, 0.0 }
 0x890   : > { %v6239_v62 = vmin.f32 %v6223_v30, 1.0 }
 0x892   : > { %v6259_v43 = vmul.f32 %v12412_v27, %v6239_v62 }
 0x893   : > { %v6184_v6 = vpop.f32.mrf.mxu2 }
 0x894   : > { %v6185_v33 = vadd.f32 %v12406_v28, %v6184_v6  ;;  %v6281_v45 = vsel %vm6106_vm0, %v6259_v43, 0.0 }
 0x895   : > { %6282 = vadd.xlane.f32.xlu2 %v6281_v45 }
 0x896   : > { %v6224_v58 = vmax.f32 %v6185_v33, 0.0 }
 0x898   : > { %v6240_v14 = vmin.f32 %v6224_v58, 1.0 }
 0x89a   : > { %v6260_v52 = vmul.f32 %v12412_v27, %v6240_v14 }
 0x89b   : > { %v6187_v1 = vpop.f32.mrf.mxu2 }
 0x89c   : > { %v6188_v39 = vadd.f32 %v12406_v28, %v6187_v1  ;;  %v6284_v61 = vsel %vm6106_vm0, %v6260_v52, 0.0 }
 0x89d   : > { %6285 = vadd.xlane.f32.xlu1 %v6284_v61 }
 0x89e   : > { %v6225_v29 = vmax.f32 %v6188_v39, 0.0  ;;  %v12459_v39 = vld [vmem:[#allocation2] ss:$0 sm:$0xff] }
 0x8a0   : > { %v6241_v18 = vmin.f32 %v6225_v29, 1.0 }
 0x8a2   : > { %v6261_v2 = vmul.f32 %v12412_v27, %v6241_v18 }
 0x8a3   : > { %v6190_v55 = vpop.f32.mrf.mxu2 }
 0x8a4   : > { %v6191_v38 = vadd.f32 %v12406_v28, %v6190_v55  ;;  %v6287_v11 = vsel %vm6106_vm0, %v6261_v2, 0.0 }
 0x8a5   : > { %6288 = vadd.xlane.f32.xlu2 %v6287_v11 }
 0x8a6   : > { %v6226_v54 = vmax.f32 %v6191_v38, 0.0 }
 0x8a8   : > { %v6242_v7 = vmin.f32 %v6226_v54, 1.0 }
 0x8aa   : > { %v6262_v24 = vmul.f32 %v12412_v27, %v6242_v7 }
 0x8ab   : > { %v6193_v31 = vpop.f32.mrf.mxu2 }
 0x8ac   : > { %v6194_v15 = vadd.f32 %v12406_v28, %v6193_v31  ;;  %v6290_v19 = vsel %vm6106_vm0, %v6262_v24, 0.0 }
 0x8ad   : > { %6291 = vadd.xlane.f32.xlu0 %v6290_v19 }
 0x8ae   : > { %v6227_v47 = vmax.f32 %v6194_v15, 0.0 }
 0x8b0   : > { %v6243_v23 = vmin.f32 %v6227_v47, 1.0 }
 0x8b2   : > { %v6263_v50 = vmul.f32 %v12412_v27, %v6243_v23 }
 0x8b3   : > { %v6196_v17 = vpop.f32.mrf.mxu2 }
 0x8b4   : > { %v6197_v40 = vadd.f32 %v12406_v28, %v6196_v17  ;;  %v6293_v36 = vsel %vm6106_vm0, %v6263_v50, 0.0 }
 0x8b5   : > { %6294 = vadd.xlane.f32.xlu1 %v6293_v36 }
 0x8b6   : > { %v6228_v41 = vmax.f32 %v6197_v40, 0.0 }
 0x8b8   : > { %v6244_v44 = vmin.f32 %v6228_v41, 1.0 }
 0x8ba   : > { %v6264_v53 = vmul.f32 %v12412_v27, %v6244_v44 }
 0x8bb   : > { %v6199_v57 = vpop.f32.mrf.mxu2 }
 0x8bc   : > { %v6200_v5 = vadd.f32 %v12406_v28, %v6199_v57  ;;  %v6296_v42 = vsel %vm6106_vm0, %v6264_v53, 0.0 }
 0x8bd   : > { %6297 = vadd.xlane.f32.xlu2 %v6296_v42 }
 0x8be   : > { %v6229_v60 = vmax.f32 %v6200_v5, 0.0 }
 0x8c0   : > { %v6245_v21 = vmin.f32 %v6229_v60, 1.0 }
 0x8c2   : > { %v6265_v34 = vmul.f32 %v12412_v27, %v6245_v21 }
 0x8c3   : > { %v6202_v0 = vpop.f32.mrf.mxu2 }
 0x8c4   : > { %v6203_v10 = vadd.f32 %v12406_v28, %v6202_v0  ;;  %v6299_v22 = vsel %vm6106_vm0, %v6265_v34, 0.0 }
 0x8c5   : > { %6300 = vadd.xlane.f32.xlu0 %v6299_v22 }
 0x8c6   : > { %v6230_v20 = vmax.f32 %v6203_v10, 0.0 }
 0x8c8   : > { %v6246_v8 = vmin.f32 %v6230_v20, 1.0 }
 0x8ca   : > { %v6266_v12 = vmul.f32 %v12412_v27, %v6246_v8 }
 0x8cb   : > { %v6205_v9 = vpop.f32.mrf.mxu2 }
 0x8cc   : > { %v6206_v46 = vadd.f32 %v12406_v28, %v6205_v9  ;;  %v6302_v32 = vsel %vm6106_vm0, %v6266_v12, 0.0 }
 0x8cd   : > { %6303 = vadd.xlane.f32.xlu1 %v6302_v32 }
 0x8ce   : > { %v6231_v13 = vmax.f32 %v6206_v46, 0.0 }
 0x8d0   : > { %v6247_v3 = vmin.f32 %v6231_v13, 1.0 }
 0x8d2   : > { %v6267_v37 = vmul.f32 %v12412_v27, %v6247_v3 }
 0x8d3   : > { %v6208_v35 = vpop.f32.mrf.mxu2 }
 0x8d4   : > { %v6209_v63 = vadd.f32 %v12406_v28, %v6208_v35  ;;  %v6305_v59 = vsel %vm6106_vm0, %v6267_v37, 0.0 }
 0x8d5   : > { %6306 = vadd.xlane.f32.xlu2 %v6305_v59 }
 0x8d6   : > { %v6232_v26 = vmax.f32 %v6209_v63, 0.0 }
 0x8d8   : > { %v6248_v56 = vmin.f32 %v6232_v26, 1.0 }
 0x8da   : > { %v6268_v16 = vmul.f32 %v12412_v27, %v6248_v56 }
 0x8db   : > { %v6211_v51 = vpop.f32.mrf.mxu2 }
 0x8dc   : > { %v6212_v48 = vadd.f32 %v12406_v28, %v6211_v51  ;;  %v6308_v49 = vsel %vm6106_vm0, %v6268_v16, 0.0 }
 0x8dd   : > { %6309 = vadd.xlane.f32.xlu0 %v6308_v49 }
 0x8de   : > { %v6233_v25 = vmax.f32 %v6212_v48, 0.0 }
 0x8e0   : > { %v6249_v4 = vmin.f32 %v6233_v25, 1.0 }
 0x8e2   : > { %v6269_v30 = vmul.f32 %v12412_v27, %v6249_v4 }
 0x8e3   : > { %v6214_v62 = vpop.f32.mrf.mxu2 }
 0x8e4   : > { %v6215_v43 = vadd.f32 %v12406_v28, %v6214_v62  ;;  %v6311_v6 = vsel %vm6106_vm0, %v6269_v30, 0.0 }
 0x8e5   : > { %6312 = vadd.xlane.f32.xlu1 %v6311_v6 }
 0x8e6   : > { %v6234_v33 = vmax.f32 %v6215_v43, 0.0 }
 0x8e8   : > { %v6250_v45 = vmin.f32 %v6234_v33, 1.0 }
 0x8ea   : > { %v6270_v58 = vmul.f32 %v12412_v27, %v6250_v45 }
 0x8eb   : > { %v6217_v14 = vpop.f32.mrf.mxu2 }
 0x8ec   : > { %v6218_v52 = vadd.f32 %v12406_v28, %v6217_v14  ;;  %v6314_v1 = vsel %vm6106_vm0, %v6270_v58, 0.0 }
 0x8ed   : > { %6315 = vadd.xlane.f32.xlu2 %v6314_v1 }
 0x8ee   : > { %v6235_v61 = vmax.f32 %v6218_v52, 0.0 }
 0x8f0   : > { %v6251_v29 = vmin.f32 %v6235_v61, 1.0  ;;  %v6274_v18 = vpop.xlane.xlu1 %6273 }
 0x8f1   : > { %v6324_v2 = vadd.f32 %v12459_v39, %v6274_v18 }
 0x8f2   : > { %v6271_v55 = vmul.f32 %v12412_v27, %v6251_v29 }
 0x8f3   : > { %v8299_v38 = vmul.f32 -1.442695, %v6324_v2 }
 0x8f4   : > { %v6317_v11 = vsel %vm6106_vm0, %v6271_v55, 0.0 }
 0x8f5   : > { %8761 = vpow2.f32 %v8299_v38  ;;  %6318 = vadd.xlane.f32.xlu0 %v6317_v11 }
 0x8f8   : > { %v6277_v54 = vpop.xlane.xlu2 %6276 }
 0x8f9   : > { %v6325_v28 = vadd.f32 %v12459_v39, %v6277_v54 }
 0x8fb   : > { %v8762_v7 = vpop.eup %8761  ;;  %v8300_v24 = vmul.f32 -1.442695, %v6325_v28 }
 0x8fc   : > { %v6388_v31 = vadd.f32 1.0, %v8762_v7 }
 0x8fd   : > { %8763 = vpow2.f32 %v8300_v24 }
 0x8fe   : > { %8765 = vrcp.f32 %v6388_v31  ;;  %v6415_v36 = vand.u32 2147483648, %v6388_v31  ;;  %v6413_v53 = vand.u32 2147483647, %v6388_v31  ;;  %vm6409_vm2 = vweird.f32 %v6388_v31 }
 0x900   : > { %v6280_v15 = vpop.xlane.xlu0 %6279  ;;  %v6416_v34 = vor.u32 1.1754944e-38, %v6415_v36  ;;  %vm6414_vm5 = vcmp.eq.f32.partialorder %v6413_v53, 8.507059e+37 }
 0x901   : > { %v6326_v19 = vadd.f32 %v12459_v39, %v6280_v15 }
 0x903   : > { %v8764_v47 = vpop.eup %8763  ;;  %v8301_v23 = vmul.f32 -1.442695, %v6326_v19 }
 0x904   : > { %v8766_v50 = vpop.eup %8765  ;;  %v6389_v27 = vadd.f32 1.0, %v8764_v47 }
 0x905   : > { %v6405_v17 = vmul.f32 %v8766_v50, %v6388_v31  ;;  %8767 = vpow2.f32 %v8301_v23  ;;  %vm6410_vm1 = vweird.f32 %v8766_v50 }
 0x906   : > { %8769 = vrcp.f32 %v6389_v27  ;;  %vm6411_vm4 = vmor %vm6409_vm2, %vm6410_vm1  ;;  %v6430_v12 = vand.u32 2147483648, %v6389_v27  ;;  %v6428_v32 = vand.u32 2147483647, %v6389_v27  ;;  %vm6424_vm7 = vweird.f32 %v6389_v27 }
 0x907   : > { %v6406_v40 = vsub.f32 1.0, %v6405_v17 }
 0x908   : > { %v6283_v41 = vpop.xlane.xlu2 %6282  ;;  %v6431_v59 = vor.u32 1.1754944e-38, %v6430_v12  ;;  %vm6429_vm9 = vcmp.eq.f32.partialorder %v6428_v32, 8.507059e+37 }
 0x909   : > { %v6407_v44 = vmul.f32 %v8766_v50, %v6406_v40  ;;  %v6327_v57 = vadd.f32 %v12459_v39, %v6283_v41 }
 0x90b   : > { %v8768_v5 = vpop.eup %8767  ;;  %v6408_v42 = vadd.f32 %v8766_v50, %v6407_v44  ;;  %v8302_v60 = vmul.f32 -1.442695, %v6327_v57 }
 0x90c   : > { %v8770_v21 = vpop.eup %8769  ;;  %v6390_v0 = vadd.f32 1.0, %v8768_v5 }
 0x90d   : > { %v6412_v10 = vsel %vm6411_vm4, %v8766_v50, %v6408_v42  ;;  %v6420_v22 = vmul.f32 %v8770_v21, %v6389_v27  ;;  %8771 = vpow2.f32 %v8302_v60  ;;  %vm6425_vm6 = vweird.f32 %v8770_v21 }
 0x90e   : > { %v6417_v20 = vsel %vm6414_vm5, %v6416_v34, %v6412_v10  ;;  %8773 = vrcp.f32 %v6390_v0  ;;  %vm6426_vm8 = vmor %vm6424_vm7, %vm6425_vm6  ;;  %v6445_v49 = vand.u32 2147483648, %v6390_v0  ;;  %v6443_v30 = vand.u32 2147483647, %v6390_v0 }
 0x90f   : > { %6645 = vst.msk [vmem:[%s12472_s29] sm:$0xff] %vm6644_vm3, %v6417_v20  ;;  %v6421_v8 = vsub.f32 1.0, %v6420_v22  ;;  %vm6439_vm11 = vweird.f32 %v6390_v0 }
 0x910   : > { %v6286_v9 = vpop.xlane.xlu1 %6285  ;;  %v6446_v58 = vor.u32 1.1754944e-38, %v6445_v49  ;;  %vm6444_vm13 = vcmp.eq.f32.partialorder %v6443_v30, 8.507059e+37 }
 0x911   : > { %v6422_v46 = vmul.f32 %v8770_v21, %v6421_v8  ;;  %v6328_v13 = vadd.f32 %v12459_v39, %v6286_v9 }
 0x913   : > { %v8772_v3 = vpop.eup %8771  ;;  %v6423_v37 = vadd.f32 %v8770_v21, %v6422_v46  ;;  %v8303_v35 = vmul.f32 -1.442695, %v6328_v13 }
 0x914   : > { %v8774_v63 = vpop.eup %8773  ;;  %v6391_v26 = vadd.f32 1.0, %v8772_v3 }
 0x915   : > { %v6427_v56 = vsel %vm6426_vm8, %v8770_v21, %v6423_v37  ;;  %v6435_v16 = vmul.f32 %v8774_v63, %v6390_v0  ;;  %8775 = vpow2.f32 %v8303_v35  ;;  %vm6440_vm10 = vweird.f32 %v8774_v63 }
 0x916   : > { %v6432_v51 = vsel %vm6429_vm9, %v6431_v59, %v6427_v56  ;;  %8777 = vrcp.f32 %v6391_v26  ;;  %vm6441_vm12 = vmor %vm6439_vm11, %vm6440_vm10  ;;  %v6460_v18 = vand.u32 2147483648, %v6391_v26  ;;  %v6458_v38 = vand.u32 2147483647, %v6391_v26 }
 0x917   : > { %6646 = vst.msk [vmem:[%s12472_s29 + $0x8] sm:$0xff] %vm6644_vm3, %v6432_v51  ;;  %v6436_v48 = vsub.f32 1.0, %v6435_v16  ;;  %vm6454_vm15 = vweird.f32 %v6391_v26 }
 0x918   : > { %v6289_v25 = vpop.xlane.xlu2 %6288  ;;  %v6461_v31 = vor.u32 1.1754944e-38, %v6460_v18  ;;  %vm6459_vm1 = vcmp.eq.f32.partialorder %v6458_v38, 8.507059e+37 }
 0x919   : > { %v6437_v4 = vmul.f32 %v8774_v63, %v6436_v48  ;;  %v6329_v62 = vadd.f32 %v12459_v39, %v6289_v25 }
 0x91b   : > { %v8776_v43 = vpop.eup %8775  ;;  %v6438_v6 = vadd.f32 %v8774_v63, %v6437_v4  ;;  %v8304_v33 = vmul.f32 -1.442695, %v6329_v62 }
 0x91c   : > { %v8778_v45 = vpop.eup %8777  ;;  %v6392_v14 = vadd.f32 1.0, %v8776_v43 }
 0x91d   : > { %v6442_v52 = vsel %vm6441_vm12, %v8774_v63, %v6438_v6  ;;  %v6450_v1 = vmul.f32 %v8778_v45, %v6391_v26  ;;  %8779 = vpow2.f32 %v8304_v33  ;;  %vm6455_vm14 = vweird.f32 %v8778_v45 }
 0x91e   : > { %v6447_v61 = vsel %vm6444_vm13, %v6446_v58, %v6442_v52  ;;  %8781 = vrcp.f32 %v6392_v14  ;;  %vm6456_vm0 = vmor %vm6454_vm15, %vm6455_vm14  ;;  %v6475_v27 = vand.u32 2147483648, %v6392_v14  ;;  %v6473_v36 = vand.u32 2147483647, %v6392_v14 }
 0x91f   : > { %6647 = vst.msk [vmem:[%s12472_s29 + $0x10] sm:$0xff] %vm6644_vm3, %v6447_v61  ;;  %v6451_v29 = vsub.f32 1.0, %v6450_v1  ;;  %vm6469_vm4 = vweird.f32 %v6392_v14 }
 0x920   : > { %v6292_v2 = vpop.xlane.xlu0 %6291  ;;  %v6476_v42 = vor.u32 1.1754944e-38, %v6475_v27  ;;  %vm6474_vm6 = vcmp.eq.f32.partialorder %v6473_v36, 8.507059e+37 }
 0x921   : > { %v6452_v55 = vmul.f32 %v8778_v45, %v6451_v29  ;;  %v6330_v11 = vadd.f32 %v12459_v39, %v6292_v2 }
 0x923   : > { %v8780_v54 = vpop.eup %8779  ;;  %v6453_v28 = vadd.f32 %v8778_v45, %v6452_v55  ;;  %v8305_v7 = vmul.f32 -1.442695, %v6330_v11 }
 0x924   : > { %v8782_v24 = vpop.eup %8781  ;;  %v6393_v15 = vadd.f32 1.0, %v8780_v54 }
 0x925   : > { %v6457_v19 = vsel %vm6456_vm0, %v8778_v45, %v6453_v28  ;;  %v6465_v47 = vmul.f32 %v8782_v24, %v6392_v14  ;;  %8783 = vpow2.f32 %v8305_v7  ;;  %vm6470_vm2 = vweird.f32 %v8782_v24 }
 0x926   : > { %v6462_v23 = vsel %vm6459_vm1, %v6461_v31, %v6457_v19  ;;  %8785 = vrcp.f32 %v6393_v15  ;;  %vm6471_vm5 = vmor %vm6469_vm4, %vm6470_vm2  ;;  %v6490_v22 = vand.u32 2147483648, %v6393_v15  ;;  %v6488_v12 = vand.u32 2147483647, %v6393_v15 }
 0x927   : > { %6648 = vst.msk [vmem:[%s12472_s29 + $0x18] sm:$0xff] %vm6644_vm3, %v6462_v23  ;;  %v6466_v50 = vsub.f32 1.0, %v6465_v47  ;;  %vm6484_vm8 = vweird.f32 %v6393_v15 }
 0x928   : > { %v6295_v17 = vpop.xlane.xlu1 %6294  ;;  %v6491_v37 = vor.u32 1.1754944e-38, %v6490_v22  ;;  %vm6489_vm10 = vcmp.eq.f32.partialorder %v6488_v12, 8.507059e+37 }
 0x929   : > { %v6467_v40 = vmul.f32 %v8782_v24, %v6466_v50  ;;  %v6331_v41 = vadd.f32 %v12459_v39, %v6295_v17 }
 0x92b   : > { %v8784_v44 = vpop.eup %8783  ;;  %v6468_v53 = vadd.f32 %v8782_v24, %v6467_v40  ;;  %v8306_v57 = vmul.f32 -1.442695, %v6331_v41 }
 0x92c   : > { %v8786_v5 = vpop.eup %8785  ;;  %v6394_v60 = vadd.f32 1.0, %v8784_v44 }
 0x92d   : > { %v6472_v21 = vsel %vm6471_vm5, %v8782_v24, %v6468_v53  ;;  %v6480_v34 = vmul.f32 %v8786_v5, %v6393_v15  ;;  %8787 = vpow2.f32 %v8306_v57  ;;  %vm6485_vm7 = vweird.f32 %v8786_v5 }
 0x92e   : > { %v6477_v0 = vsel %vm6474_vm6, %v6476_v42, %v6472_v21  ;;  %8789 = vrcp.f32 %v6394_v60  ;;  %vm6486_vm9 = vmor %vm6484_vm8, %vm6485_vm7  ;;  %v6505_v16 = vand.u32 2147483648, %v6394_v60  ;;  %v6503_v49 = vand.u32 2147483647, %v6394_v60 }
 0x92f   : > { %6649 = vst.msk [vmem:[%s12472_s29 + $0x20] sm:$0xff] %vm6644_vm3, %v6477_v0  ;;  %v6481_v10 = vsub.f32 1.0, %v6480_v34  ;;  %vm6499_vm12 = vweird.f32 %v6394_v60 }
 0x930   : > { %v6298_v20 = vpop.xlane.xlu2 %6297  ;;  %v6506_v6 = vor.u32 1.1754944e-38, %v6505_v16  ;;  %vm6504_vm14 = vcmp.eq.f32.partialorder %v6503_v49, 8.507059e+37 }
 0x931   : > { %v6482_v8 = vmul.f32 %v8786_v5, %v6481_v10  ;;  %v6332_v9 = vadd.f32 %v12459_v39, %v6298_v20 }
 0x933   : > { %v8788_v46 = vpop.eup %8787  ;;  %v6483_v32 = vadd.f32 %v8786_v5, %v6482_v8  ;;  %v8307_v13 = vmul.f32 -1.442695, %v6332_v9 }
 0x934   : > { %v8790_v3 = vpop.eup %8789  ;;  %v6395_v35 = vadd.f32 1.0, %v8788_v46 }
 0x935   : > { %v6487_v63 = vsel %vm6486_vm9, %v8786_v5, %v6483_v32  ;;  %v6495_v59 = vmul.f32 %v8790_v3, %v6394_v60  ;;  %8791 = vpow2.f32 %v8307_v13  ;;  %vm6500_vm11 = vweird.f32 %v8790_v3 }
 0x936   : > { %v6492_v26 = vsel %vm6489_vm10, %v6491_v37, %v6487_v63  ;;  %8793 = vrcp.f32 %v6395_v35  ;;  %vm6501_vm13 = vmor %vm6499_vm12, %vm6500_vm11  ;;  %v6520_v1 = vand.u32 2147483648, %v6395_v35  ;;  %v6518_v18 = vand.u32 2147483647, %v6395_v35 }
 0x937   : > { %6650 = vst.msk [vmem:[%s12472_s29 + $0x28] sm:$0xff] %vm6644_vm3, %v6492_v26  ;;  %v6496_v56 = vsub.f32 1.0, %v6495_v59  ;;  %vm6514_vm0 = vweird.f32 %v6395_v35 }
 0x938   : > { %v6301_v51 = vpop.xlane.xlu0 %6300  ;;  %v6521_v28 = vor.u32 1.1754944e-38, %v6520_v1  ;;  %vm6519_vm2 = vcmp.eq.f32.partialorder %v6518_v18, 8.507059e+37 }
 0x939   : > { %v6497_v48 = vmul.f32 %v8790_v3, %v6496_v56  ;;  %v6333_v25 = vadd.f32 %v12459_v39, %v6301_v51 }
 0x93b   : > { %v8792_v4 = vpop.eup %8791  ;;  %v6498_v30 = vadd.f32 %v8790_v3, %v6497_v48  ;;  %v8308_v62 = vmul.f32 -1.442695, %v6333_v25 }
 0x93c   : > { %v8794_v43 = vpop.eup %8793  ;;  %v6396_v33 = vadd.f32 1.0, %v8792_v4 }
 0x93d   : > { %v6502_v45 = vsel %vm6501_vm13, %v8790_v3, %v6498_v30  ;;  %v6510_v58 = vmul.f32 %v8794_v43, %v6395_v35  ;;  %8795 = vpow2.f32 %v8308_v62  ;;  %vm6515_vm15 = vweird.f32 %v8794_v43 }
 0x93e   : > { %v6507_v14 = vsel %vm6504_vm14, %v6506_v6, %v6502_v45  ;;  %8797 = vrcp.f32 %v6396_v33  ;;  %vm6516_vm1 = vmor %vm6514_vm0, %vm6515_vm15  ;;  %v6535_v47 = vand.u32 2147483648, %v6396_v33  ;;  %v6533_v27 = vand.u32 2147483647, %v6396_v33 }
 0x93f   : > { %6651 = vst.msk [vmem:[%s12472_s29 + $0x30] sm:$0xff] %vm6644_vm3, %v6507_v14  ;;  %v6511_v52 = vsub.f32 1.0, %v6510_v58  ;;  %vm6529_vm5 = vweird.f32 %v6396_v33 }
 0x940   : > { %v6304_v61 = vpop.xlane.xlu1 %6303  ;;  %v6536_v53 = vor.u32 1.1754944e-38, %v6535_v47  ;;  %vm6534_vm7 = vcmp.eq.f32.partialorder %v6533_v27, 8.507059e+37 }
 0x941   : > { %v6512_v29 = vmul.f32 %v8794_v43, %v6511_v52  ;;  %v6334_v2 = vadd.f32 %v12459_v39, %v6304_v61 }
 0x943   : > { %v8796_v55 = vpop.eup %8795  ;;  %v6513_v38 = vadd.f32 %v8794_v43, %v6512_v29  ;;  %v8309_v11 = vmul.f32 -1.442695, %v6334_v2 }
 0x944   : > { %v8798_v54 = vpop.eup %8797  ;;  %v6397_v7 = vadd.f32 1.0, %v8796_v55 }
 0x945   : > { %v6517_v24 = vsel %vm6516_vm1, %v8794_v43, %v6513_v38  ;;  %v6525_v31 = vmul.f32 %v8798_v54, %v6396_v33  ;;  %8799 = vpow2.f32 %v8309_v11  ;;  %vm6530_vm4 = vweird.f32 %v8798_v54 }
 0x946   : > { %v6522_v15 = vsel %vm6519_vm2, %v6521_v28, %v6517_v24  ;;  %8801 = vrcp.f32 %v6397_v7  ;;  %vm6531_vm6 = vmor %vm6529_vm5, %vm6530_vm4  ;;  %v6550_v34 = vand.u32 2147483648, %v6397_v7  ;;  %v6548_v22 = vand.u32 2147483647, %v6397_v7 }
 0x947   : > { %6652 = vst.msk [vmem:[%s12472_s29 + $0x38] sm:$0xff] %vm6644_vm3, %v6522_v15  ;;  %v6526_v19 = vsub.f32 1.0, %v6525_v31  ;;  %vm6544_vm9 = vweird.f32 %v6397_v7 }
 0x948   : > { %v6307_v23 = vpop.xlane.xlu2 %6306  ;;  %v6551_v32 = vor.u32 1.1754944e-38, %v6550_v34  ;;  %vm6549_vm11 = vcmp.eq.f32.partialorder %v6548_v22, 8.507059e+37 }
 0x949   : > { %v6527_v50 = vmul.f32 %v8798_v54, %v6526_v19  ;;  %v6335_v17 = vadd.f32 %v12459_v39, %v6307_v23 }
 0x94b   : > { %v8800_v40 = vpop.eup %8799  ;;  %v6528_v36 = vadd.f32 %v8798_v54, %v6527_v50  ;;  %v8310_v41 = vmul.f32 -1.442695, %v6335_v17 }
 0x94c   : > { %v8802_v44 = vpop.eup %8801  ;;  %v6398_v57 = vadd.f32 1.0, %v8800_v40 }
 0x94d   : > { %v6532_v5 = vsel %vm6531_vm6, %v8798_v54, %v6528_v36  ;;  %v6540_v42 = vmul.f32 %v8802_v44, %v6397_v7  ;;  %8803 = vpow2.f32 %v8310_v41  ;;  %vm6545_vm8 = vweird.f32 %v8802_v44 }
 0x94e   : > { %v6537_v60 = vsel %vm6534_vm7, %v6536_v53, %v6532_v5  ;;  %8805 = vrcp.f32 %v6398_v57  ;;  %vm6546_vm10 = vmor %vm6544_vm9, %vm6545_vm8  ;;  %v6565_v59 = vand.u32 2147483648, %v6398_v57  ;;  %v6563_v16 = vand.u32 2147483647, %v6398_v57 }
 0x94f   : > { %6653 = vst.msk [vmem:[%s12472_s29 + $0x40] sm:$0xff] %vm6644_vm3, %v6537_v60  ;;  %v6541_v21 = vsub.f32 1.0, %v6540_v42  ;;  %vm6559_vm13 = vweird.f32 %v6398_v57 }
 0x950   : > { %v6310_v0 = vpop.xlane.xlu0 %6309  ;;  %v6566_v30 = vor.u32 1.1754944e-38, %v6565_v59  ;;  %vm6564_vm15 = vcmp.eq.f32.partialorder %v6563_v16, 8.507059e+37 }
 0x951   : > { %v6542_v10 = vmul.f32 %v8802_v44, %v6541_v21  ;;  %v6336_v20 = vadd.f32 %v12459_v39, %v6310_v0 }
 0x953   : > { %v8804_v8 = vpop.eup %8803  ;;  %v6543_v12 = vadd.f32 %v8802_v44, %v6542_v10  ;;  %v8311_v9 = vmul.f32 -1.442695, %v6336_v20 }
 0x954   : > { %v8806_v46 = vpop.eup %8805  ;;  %v6399_v13 = vadd.f32 1.0, %v8804_v8 }
 0x955   : > { %v6547_v3 = vsel %vm6546_vm10, %v8802_v44, %v6543_v12  ;;  %v6555_v37 = vmul.f32 %v8806_v46, %v6398_v57  ;;  %8807 = vpow2.f32 %v8311_v9  ;;  %vm6560_vm12 = vweird.f32 %v8806_v46 }
 0x956   : > { %v6552_v35 = vsel %vm6549_vm11, %v6551_v32, %v6547_v3  ;;  %8809 = vrcp.f32 %v6399_v13  ;;  %vm6561_vm14 = vmor %vm6559_vm13, %vm6560_vm12  ;;  %v6580_v58 = vand.u32 2147483648, %v6399_v13  ;;  %v6578_v1 = vand.u32 2147483647, %v6399_v13 }
 0x957   : > { %6654 = vst.msk [vmem:[%s12472_s29 + $0x48] sm:$0xff] %vm6644_vm3, %v6552_v35  ;;  %v6556_v63 = vsub.f32 1.0, %v6555_v37  ;;  %vm6574_vm1 = vweird.f32 %v6399_v13 }
 0x958   : > { %v6313_v26 = vpop.xlane.xlu1 %6312  ;;  %v6581_v38 = vor.u32 1.1754944e-38, %v6580_v58  ;;  %vm6579_vm4 = vcmp.eq.f32.partialorder %v6578_v1, 8.507059e+37 }
 0x959   : > { %v6557_v56 = vmul.f32 %v8806_v46, %v6556_v63  ;;  %v6337_v51 = vadd.f32 %v12459_v39, %v6313_v26 }
 0x95b   : > { %v8808_v48 = vpop.eup %8807  ;;  %v6558_v49 = vadd.f32 %v8806_v46, %v6557_v56  ;;  %v8312_v25 = vmul.f32 -1.442695, %v6337_v51 }
 0x95c   : > { %v8810_v4 = vpop.eup %8809  ;;  %v6400_v62 = vadd.f32 1.0, %v8808_v48 }
 0x95d   : > { %v6562_v43 = vsel %vm6561_vm14, %v8806_v46, %v6558_v49  ;;  %v6570_v6 = vmul.f32 %v8810_v4, %v6399_v13  ;;  %8811 = vpow2.f32 %v8312_v25  ;;  %vm6575_vm0 = vweird.f32 %v8810_v4 }
 0x95e   : > { %v6567_v33 = vsel %vm6564_vm15, %v6566_v30, %v6562_v43  ;;  %8813 = vrcp.f32 %v6400_v62  ;;  %vm6576_vm2 = vmor %vm6574_vm1, %vm6575_vm0  ;;  %v6595_v31 = vand.u32 2147483648, %v6400_v62  ;;  %v6593_v47 = vand.u32 2147483647, %v6400_v62 }
 0x95f   : > { %6655 = vst.msk [vmem:[%s12472_s29 + $0x50] sm:$0xff] %vm6644_vm3, %v6567_v33  ;;  %v6571_v45 = vsub.f32 1.0, %v6570_v6  ;;  %vm6589_vm6 = vweird.f32 %v6400_v62 }
 0x960   : > { %v6316_v14 = vpop.xlane.xlu2 %6315  ;;  %v6596_v36 = vor.u32 1.1754944e-38, %v6595_v31  ;;  %vm6594_vm8 = vcmp.eq.f32.partialorder %v6593_v47, 8.507059e+37 }
 0x961   : > { %v6572_v52 = vmul.f32 %v8810_v4, %v6571_v45  ;;  %v6338_v61 = vadd.f32 %v12459_v39, %v6316_v14 }
 0x963   : > { %v8812_v29 = vpop.eup %8811  ;;  %v6573_v18 = vadd.f32 %v8810_v4, %v6572_v52  ;;  %v8313_v2 = vmul.f32 -1.442695, %v6338_v61 }
 0x964   : > { %v8814_v55 = vpop.eup %8813  ;;  %v6401_v11 = vadd.f32 1.0, %v8812_v29 }
 0x965   : > { %v6577_v54 = vsel %vm6576_vm2, %v8810_v4, %v6573_v18  ;;  %v6585_v28 = vmul.f32 %v8814_v55, %v6400_v62  ;;  %8815 = vpow2.f32 %v8313_v2  ;;  %vm6590_vm5 = vweird.f32 %v8814_v55 }
 0x966   : > { %v6582_v7 = vsel %vm6579_vm4, %v6581_v38, %v6577_v54  ;;  %8817 = vrcp.f32 %v6401_v11  ;;  %vm6591_vm7 = vmor %vm6589_vm6, %vm6590_vm5  ;;  %v6610_v42 = vand.u32 2147483648, %v6401_v11  ;;  %v6608_v60 = vand.u32 2147483647, %v6401_v11 }
 0x967   : > { %6656 = vst.msk [vmem:[%s12472_s29 + $0x58] sm:$0xff] %vm6644_vm3, %v6582_v7  ;;  %v6586_v24 = vsub.f32 1.0, %v6585_v28  ;;  %vm6604_vm10 = vweird.f32 %v6401_v11 }
 0x968   : > { %v6319_v15 = vpop.xlane.xlu0 %6318  ;;  %v6611_v10 = vor.u32 1.1754944e-38, %v6610_v42  ;;  %vm6609_vm12 = vcmp.eq.f32.partialorder %v6608_v60, 8.507059e+37 }
 0x969   : > { %v6587_v19 = vmul.f32 %v8814_v55, %v6586_v24  ;;  %v6339_v23 = vadd.f32 %v12459_v39, %v6319_v15 }
 0x96b   : > { %v8816_v50 = vpop.eup %8815  ;;  %v6588_v27 = vadd.f32 %v8814_v55, %v6587_v19  ;;  %v8314_v17 = vmul.f32 -1.442695, %v6339_v23 }
 0x96c   : > { %v8818_v40 = vpop.eup %8817  ;;  %v6402_v41 = vadd.f32 1.0, %v8816_v50 }
 0x96d   : > { %v6592_v44 = vsel %vm6591_vm7, %v8814_v55, %v6588_v27  ;;  %v6600_v53 = vmul.f32 %v8818_v40, %v6401_v11  ;;  %8819 = vpow2.f32 %v8314_v17  ;;  %vm6605_vm9 = vweird.f32 %v8818_v40 }
 0x96e   : > { %v6597_v57 = vsel %vm6594_vm8, %v6596_v36, %v6592_v44  ;;  %8821 = vrcp.f32 %v6402_v41  ;;  %vm6606_vm11 = vmor %vm6604_vm10, %vm6605_vm9  ;;  %v6625_v46 = vand.u32 2147483648, %v6402_v41  ;;  %v6623_v13 = vand.u32 2147483647, %v6402_v41 }
 0x96f   : > { %6657 = vst.msk [vmem:[%s12472_s29 + $0x60] sm:$0xff] %vm6644_vm3, %v6597_v57  ;;  %v6601_v5 = vsub.f32 1.0, %v6600_v53  ;;  %vm6619_vm14 = vweird.f32 %v6402_v41 }
 0x970   : > { %v6626_v35 = vor.u32 1.1754944e-38, %v6625_v46  ;;  %vm6624_vm0 = vcmp.eq.f32.partialorder %v6623_v13, 8.507059e+37 }
 0x971   : > { %v6602_v39 = vmul.f32 %v8818_v40, %v6601_v5 }
 0x973   : > { %v8820_v21 = vpop.eup %8819  ;;  %v6603_v34 = vadd.f32 %v8818_v40, %v6602_v39 }
 0x974   : > { %v8822_v0 = vpop.eup %8821  ;;  %v6403_v22 = vadd.f32 1.0, %v8820_v21 }
 0x975   : > { %v6607_v20 = vsel %vm6606_vm11, %v8818_v40, %v6603_v34  ;;  %v6615_v8 = vmul.f32 %v8822_v0, %v6402_v41  ;;  %vm6620_vm13 = vweird.f32 %v8822_v0 }
 0x976   : > { %v6612_v12 = vsel %vm6609_vm12, %v6611_v10, %v6607_v20  ;;  %8823 = vrcp.f32 %v6403_v22  ;;  %vm6621_vm15 = vmor %vm6619_vm14, %vm6620_vm13  ;;  %v6640_v16 = vand.u32 2147483648, %v6403_v22  ;;  %v6638_v48 = vand.u32 2147483647, %v6403_v22 }
 0x977   : > { %6658 = vst.msk [vmem:[%s12472_s29 + $0x68] sm:$0xff] %vm6644_vm3, %v6612_v12  ;;  %v6616_v9 = vsub.f32 1.0, %v6615_v8  ;;  %vm6634_vm2 = vweird.f32 %v6403_v22 }
 0x978   : > { %v6641_v25 = vor.u32 1.1754944e-38, %v6640_v16  ;;  %vm6639_vm5 = vcmp.eq.f32.partialorder %v6638_v48, 8.507059e+37 }
 0x979   : > { %v6617_v32 = vmul.f32 %v8822_v0, %v6616_v9 }
 0x97b   : > { %v6618_v3 = vadd.f32 %v8822_v0, %v6617_v32 }
 0x97c   : > { %v8824_v37 = vpop.eup %8823 }
 0x97d   : > { %v6622_v63 = vsel %vm6621_vm15, %v8822_v0, %v6618_v3  ;;  %v6630_v59 = vmul.f32 %v8824_v37, %v6403_v22  ;;  %vm6635_vm1 = vweird.f32 %v8824_v37 }
 0x97e   : > { %v6627_v26 = vsel %vm6624_vm0, %v6626_v35, %v6622_v63  ;;  %vm6636_vm4 = vmor %vm6634_vm2, %vm6635_vm1 }
 0x97f   : > { %6659 = vst.msk [vmem:[%s12472_s29 + $0x70] sm:$0xff] %vm6644_vm3, %v6627_v26  ;;  %v6631_v56 = vsub.f32 1.0, %v6630_v59 }
 0x981   : > { %v6632_v51 = vmul.f32 %v8824_v37, %v6631_v56 }
 0x983   : > { %v6633_v49 = vadd.f32 %v8824_v37, %v6632_v51 }
 0x985   : > { %v6637_v4 = vsel %vm6636_vm4, %v8824_v37, %v6633_v49 }
 0x986   : > { %v6642_v30 = vsel %vm6639_vm5, %v6641_v25, %v6637_v4 }
 0x987   : > { %6660 = vst.msk [vmem:[%s12472_s29 + $0x78] sm:$0xff] %vm6644_vm3, %v6642_v30 }
 0x988 PF: > { %p20_p9 = scmp.ge.s32.totalorder %s8930_s22, 6   ;;  %s13046_s19 = smov %s8843_s20 }
 0x989   : > { %s13047_s20 = smov %s8939_s25  ;;  %s13048_s21 = smov %s8930_s22 }
 0x98a   :  { %22 = sbr.rel (!%p20_p9) target bundleno = 5 (0x5), region = 125 }

</bundles_post_ra>
